<compile_context>
chip_gen: v6e
topology: v6e:2x2x1
jax: 0.10.0
libtpu: 0.0.40
codegen_flags: <defaults>
</compile_context>

<pallas_src>
import functools

import jax
import jax.numpy as jnp
from jax.experimental import pallas as pl
from jax.experimental.pallas import tpu as pltpu


_COMPUTE_DTYPE = jnp.bfloat16
_VMEM_LIMIT_BYTES = 64 * 1024 * 1024   # safe on v5e/v6e (128 MiB) and v7x (64 MiB)
_DEFAULT_TM = 512                      # ~85% of HBM roofline per measured tiling data


# --------------------------------------------------------------------------
# Pallas kernels: one matmul per spatial tile, activation fused in epilogue.
# --------------------------------------------------------------------------
def _conv_kernel(p_ref, w_ref, o_ref, *, relu):
    """o = p @ w (optionally + ReLU).  p:(tm,K*Cin) bf16, w:(K*Cin,Cout) bf16."""
    acc = jnp.dot(p_ref[...], w_ref[...], preferred_element_type=jnp.float32)
    if relu:
        acc = jnp.maximum(acc, 0.0)
    o_ref[...] = acc.astype(o_ref.dtype)


def _conv_residual_kernel(p_ref, w_ref, r_ref, o_ref):
    """o = relu(p @ w + r)   (residual add + ReLU fused into the epilogue)."""
    acc = jnp.dot(p_ref[...], w_ref[...], preferred_element_type=jnp.float32)
    acc = acc + r_ref[...].astype(jnp.float32)
    o_ref[...] = jnp.maximum(acc, 0.0).astype(o_ref.dtype)


# --------------------------------------------------------------------------
# Pallas wrappers
# --------------------------------------------------------------------------
def _round_up(n, m):
    return ((n + m - 1) // m) * m


def _conv_matmul_pallas(patches, wmat, residual=None, activation=None,
                        tm=_DEFAULT_TM):
    """patches:(N, KC) bf16, wmat:(KC, Cout) bf16, residual:(N, Cout) f32|None.

    Returns (N, Cout) float32.
    """
    N, KC = patches.shape
    Cout = wmat.shape[-1]

    if N <= tm:                       # single tile: shrink to the problem
        tm = _round_up(N, 8)
    n_pad = _round_up(N, tm)
    if n_pad != N:
        patches = jnp.pad(patches, ((0, n_pad - N), (0, 0)))
        if residual is not None:
            residual = jnp.pad(residual, ((0, n_pad - N), (0, 0)))

    grid = (n_pad // tm,)
    p_spec = pl.BlockSpec((tm, KC), lambda i: (i, 0))
    w_spec = pl.BlockSpec((KC, Cout), lambda i: (0, 0))
    o_spec = pl.BlockSpec((tm, Cout), lambda i: (i, 0))
    params = pltpu.CompilerParams(
        dimension_semantics=("parallel",),
        vmem_limit_bytes=_VMEM_LIMIT_BYTES,
    )
    out_shape = jax.ShapeDtypeStruct((n_pad, Cout), jnp.float32)

    if residual is not None:
        r_spec = pl.BlockSpec((tm, Cout), lambda i: (i, 0))
        out = pl.pallas_call(
            _conv_residual_kernel,
            out_shape=out_shape,
            grid=grid,
            in_specs=[p_spec, w_spec, r_spec],
            out_specs=o_spec,
            compiler_params=params,
        )(patches, wmat, residual)
    else:
        out = pl.pallas_call(
            functools.partial(_conv_kernel, relu=(activation == "relu")),
            out_shape=out_shape,
            grid=grid,
            in_specs=[p_spec, w_spec],
            out_specs=o_spec,
            compiler_params=params,
        )(patches, wmat)

    if n_pad != N:
        out = out[:N]
    return out


def conv3d_pallas(x, w, stride=(1, 1, 1), dilation=(1, 1, 1), padding=(0, 0, 0),
                  residual=None, activation=None):
    """3D convolution, no bias, activation / residual fused into the epilogue.

    x:        (B, Z, Y, X, Cin)  float32, channels-last
    w:        (kz, ky, kx, Cin, Cout)  bfloat16
    residual: optional (B, Zo, Yo, Xo, Cout) float32 -> relu(conv + residual)
    activation: None or "relu" (ignored when residual is given: always ReLU)
    """
    B, Z, Y, X, Cin = x.shape
    kz, ky, kx, _, Cout = w.shape
    sz, sy, sx = stride
    dz, dy, dx = dilation
    pz, py, px = padding

    Zo = (Z + 2 * pz - dz * (kz - 1) - 1) // sz + 1
    Yo = (Y + 2 * py - dy * (ky - 1) - 1) // sy + 1
    Xo = (X + 2 * px - dx * (kx - 1) - 1) // sx + 1
    N = B * Zo * Yo * Xo
    K = kz * ky * kx

    xc = x.astype(_COMPUTE_DTYPE)
    if (pz, py, px) != (0, 0, 0):
        xc = jnp.pad(xc, ((0, 0), (pz, pz), (py, py), (px, px), (0, 0)))

    # im2col with the taps folded into the channel (contraction) axis:
    # (N, K*Cin), tap order (iz, iy, ix) lexicographic with Cin fastest,
    # matching w.reshape(K*Cin, Cout).
    taps = []
    for iz in range(kz):
        for iy in range(ky):
            for ix in range(kx):
                taps.append(
                    xc[
                        :,
                        iz * dz: iz * dz + (Zo - 1) * sz + 1: sz,
                        iy * dy: iy * dy + (Yo - 1) * sy + 1: sy,
                        ix * dx: ix * dx + (Xo - 1) * sx + 1: sx,
                        :,
                    ]
                )
    if K == 1:
        patches = taps[0].reshape(N, Cin)
    else:
        patches = jnp.concatenate(taps, axis=-1).reshape(N, K * Cin)

    wmat = w.reshape(K * Cin, Cout).astype(_COMPUTE_DTYPE)

    res_flat = None
    if residual is not None:
        res_flat = residual.reshape(N, Cout).astype(jnp.float32)

    out = _conv_matmul_pallas(patches, wmat, residual=res_flat,
                              activation=activation)
    return out.reshape(B, Zo, Yo, Xo, Cout)


# --------------------------------------------------------------------------
# Model definition (parameters built deterministically in-script)
# --------------------------------------------------------------------------
def _as_triple(s):
    if isinstance(s, (list, tuple)):
        return tuple(int(v) for v in s)
    return (int(s),) * 3


class _ParamFactory:
    def __init__(self, seed=0):
        self._key = jax.random.PRNGKey(seed)
        self._counter = 0

    def conv_weight(self, kz, ky, kx, cin, cout):
        key = jax.random.fold_in(self._key, self._counter)
        self._counter += 1
        fan_in = kz * ky * kx * cin
        scale = (2.0 / fan_in) ** 0.5
        w = scale * jax.random.normal(key, (kz, ky, kx, cin, cout), jnp.float32)
        return w.astype(_COMPUTE_DTYPE)


class BasicBlock3d:
    """Assumed residual block: conv3x3x3 -> ReLU -> conv3x3x3 -> (+identity) -> ReLU."""
    expansion = 1

    def __init__(self, pf, inplanes, planes, stride=(1, 1, 1), dilation=1,
                 downsample=False):
        self.stride = _as_triple(stride)
        self.dilation = _as_triple(dilation)
        self.w1 = pf.conv_weight(3, 3, 3, inplanes, planes)
        self.w2 = pf.conv_weight(3, 3, 3, planes, planes)
        self.w_down = None
        if downsample:
            self.w_down = pf.conv_weight(1, 1, 1, inplanes, planes * self.expansion)

    def __call__(self, x):
        if self.w_down is not None:
            identity = conv3d_pallas(x, self.w_down, stride=self.stride,
                                     dilation=(1, 1, 1), padding=(0, 0, 0),
                                     activation=None)
        else:
            identity = x
        # conv1 + ReLU fused
        out = conv3d_pallas(x, self.w1, stride=self.stride,
                            dilation=self.dilation, padding=self.dilation,
                            activation="relu")
        # conv2 + residual-add + ReLU fused
        out = conv3d_pallas(out, self.w2, stride=(1, 1, 1),
                            dilation=self.dilation, padding=self.dilation,
                            residual=identity)
        return out


class Resnet3dAniso:
    def __init__(self, blocks, n_blocks, stage_filters, strides, dilations=None,
                 in_channels=1, start_filters=16, seed=0):
        pf = _ParamFactory(seed)
        self.inplanes = start_filters
        self.in_channels = in_channels
        if dilations is None:
            dilations = [1 for _ in range(len(stage_filters))]

        # C1: kernel=(3,3,3), stride=1, padding=1, bias=False (no activation).
        self.c1_w = pf.conv_weight(3, 3, 3, in_channels, start_filters)

        self.stages = []
        for i in range(len(n_blocks)):
            self.stages.append(
                self._make_layer(pf, blocks[i], stage_filters[i], n_blocks[i],
                                 strides[i], dilations[i])
            )

    def _make_layer(self, pf, block_cls, planes, n_block, stride=1, dilation=1):
        stride = _as_triple(stride)
        layers = []
        downsample = (stride != (1, 1, 1)
                      or self.inplanes != planes * block_cls.expansion)
        layers.append(block_cls(pf, self.inplanes, planes, stride=stride,
                                dilation=dilation, downsample=downsample))
        self.inplanes = planes * block_cls.expansion
        for _ in range(1, n_block):
            layers.append(block_cls(pf, self.inplanes, planes, dilation=dilation))
        return layers

    def forward(self, x):
        """x: (b, c, z, y, x) -> list of the last 5 pyramid features (b, c, z, y, x)."""
        # NCDHW -> NDHWC
        x = jnp.transpose(x, (0, 2, 3, 4, 1))
        x = conv3d_pallas(x, self.c1_w, stride=(1, 1, 1),
                          dilation=(1, 1, 1), padding=(1, 1, 1), activation=None)
        feats = []
        for stage in self.stages:
            for block in stage:
                x = block(x)
            feats.append(x)
        feats = feats[-5:]
        # NDHWC -> NCDHW
        return [jnp.transpose(f, (0, 4, 1, 2, 3)) for f in feats]


# --------------------------------------------------------------------------
# Main
# --------------------------------------------------------------------------
if __name__ == "__main__":
    model = Resnet3dAniso(
        blocks=[BasicBlock3d] * 5,
        n_blocks=[1, 1, 1, 1, 1],
        stage_filters=[16, 16, 32, 32, 32],
        strides=[1, (1, 2, 2), 2, (1, 2, 2), 1],
        dilations=None,
        in_channels=1,
        start_filters=8,
        seed=0,
    )

    forward = jax.jit(model.forward)

    key = jax.random.PRNGKey(0)
    x = jax.random.normal(key, (2, 1, 8, 16, 16), dtype=jnp.float32)  # (b, c, z, y, x)

    feats = forward(x)
    feats = jax.block_until_ready(feats)

    # light sanity checks on shapes (5 pyramid levels, channels-first outputs)
    assert len(feats) == 5
    assert feats[0].shape == (2, 16, 8, 16, 16)
    assert feats[-1].shape == (2, 32, 4, 2, 2)
    assert all(jnp.isfinite(f).all() for f in feats)

    print("KERNEL_OK")
</pallas_src>

<mosaic_0001>
module attributes {stable_mosaic.version = 11 : i64} {
  func.func @_conv_kernel(%arg0: i32, %arg1: memref<512x27xbf16, #tpu.memory_space<vmem>>, %arg2: memref<27x8xbf16, #tpu.memory_space<vmem>>, %arg3: memref<512x8xf32, #tpu.memory_space<vmem>>) attributes {dimension_semantics = [#tpu.dimension_semantics<parallel>], iteration_bounds = array<i64: 8>, scalar_prefetch = 0 : i64, scratch_operands = 0 : i64, tpu.core_type = #tpu.core_type<tc>, window_params = [{transform_indices = @transform_0, window_bounds = array<i64: 512, 27>}, {pipeline_mode = #tpu.pipeline_mode<synchronous>, transform_indices = @transform_1, window_bounds = array<i64: 27, 8>}, {transform_indices = @transform_2, window_bounds = array<i64: 512, 8>}]} {
    %c0 = arith.constant 0 : index
    %c0_0 = arith.constant 0 : index
    %0 = vector.load %arg1[%c0, %c0_0] : memref<512x27xbf16, #tpu.memory_space<vmem>>, vector<512x27xbf16>
    %c0_1 = arith.constant 0 : index
    %c0_2 = arith.constant 0 : index
    %1 = vector.load %arg2[%c0_1, %c0_2] : memref<27x8xbf16, #tpu.memory_space<vmem>>, vector<27x8xbf16>
    %cst = arith.constant dense<0.000000e+00> : vector<512x8xf32>
    %2 = tpu.matmul %0, %1, %cst {dimension_numbers = #tpu.dot_dimension_numbers<[1], [0], [0], [1], [0, 0, 1, 1], [], []>} : vector<512x27xbf16>, vector<27x8xbf16>, vector<512x8xf32> -> vector<512x8xf32>
    %c0_3 = arith.constant 0 : index
    %c0_4 = arith.constant 0 : index
    %3 = vector.load %arg3[%c0_3, %c0_4] : memref<512x8xf32, #tpu.memory_space<vmem>>, vector<512x8xf32>
    tpu.vector_store %arg3[%c0_3, %c0_4], %2 {strides = array<i32>} : memref<512x8xf32, #tpu.memory_space<vmem>>, vector<512x8xf32>,
    return
  }
  func.func @transform_0(%arg0: i32) -> (i32, i32) {
    %c0_i32 = arith.constant 0 : i32
    %c0_i32_0 = arith.constant 0 : i32
    return %arg0, %c0_i32 : i32, i32
  }
  func.func @transform_1(%arg0: i32) -> (i32, i32) {
    %c0_i32 = arith.constant 0 : i32
    %c0_i32_0 = arith.constant 0 : i32
    %c0_i32_1 = arith.constant 0 : i32
    return %c0_i32, %c0_i32_0 : i32, i32
  }
  func.func @transform_2(%arg0: i32) -> (i32, i32) {
    %c0_i32 = arith.constant 0 : i32
    %c0_i32_0 = arith.constant 0 : i32
    return %arg0, %c0_i32 : i32, i32
  }
}

module attributes {stable_mosaic.version = 11 : i64} {
  func.func @_conv_kernel(%arg0: i32, %arg1: memref<512x216xbf16, #tpu.memory_space<vmem>>, %arg2: memref<216x16xbf16, #tpu.memory_space<vmem>>, %arg3: memref<512x16xf32, #tpu.memory_space<vmem>>) attributes {dimension_semantics = [#tpu.dimension_semantics<parallel>], iteration_bounds = array<i64: 8>, scalar_prefetch = 0 : i64, scratch_operands = 0 : i64, tpu.core_type = #tpu.core_type<tc>, window_params = [{transform_indices = @transform_0, window_bounds = array<i64: 512, 216>}, {pipeline_mode = #tpu.pipeline_mode<synchronous>, transform_indices = @transform_1, window_bounds = array<i64: 216, 16>}, {transform_indices = @transform_2, window_bounds = array<i64: 512, 16>}]} {
    %c0 = arith.constant 0 : index
    %c0_0 = arith.constant 0 : index
    %0 = vector.load %arg1[%c0, %c0_0] : memref<512x216xbf16, #tpu.memory_space<vmem>>, vector<512x216xbf16>
    %c0_1 = arith.constant 0 : index
    %c0_2 = arith.constant 0 : index
    %1 = vector.load %arg2[%c0_1, %c0_2] : memref<216x16xbf16, #tpu.memory_space<vmem>>, vector<216x16xbf16>
    %cst = arith.constant dense<0.000000e+00> : vector<512x16xf32>
    %2 = tpu.matmul %0, %1, %cst {dimension_numbers = #tpu.dot_dimension_numbers<[1], [0], [0], [1], [0, 0, 1, 1], [], []>} : vector<512x216xbf16>, vector<216x16xbf16>, vector<512x16xf32> -> vector<512x16xf32>
    %cst_3 = arith.constant 0.000000e+00 : f32
    %3 = vector.broadcast %cst_3 : f32 to vector<512x16xf32>
    %4 = arith.maximumf %2, %3 : vector<512x16xf32>
    %c0_4 = arith.constant 0 : index
    %c0_5 = arith.constant 0 : index
    %5 = vector.load %arg3[%c0_4, %c0_5] : memref<512x16xf32, #tpu.memory_space<vmem>>, vector<512x16xf32>
    tpu.vector_store %arg3[%c0_4, %c0_5], %4 {strides = array<i32>} : memref<512x16xf32, #tpu.memory_space<vmem>>, vector<512x16xf32>,
    return
  }
  func.func @transform_0(%arg0: i32) -> (i32, i32) {
    %c0_i32 = arith.constant 0 : i32
    %c0_i32_0 = arith.constant 0 : i32
    return %arg0, %c0_i32 : i32, i32
  }
  func.func @transform_1(%arg0: i32) -> (i32, i32) {
    %c0_i32 = arith.constant 0 : i32
    %c0_i32_0 = arith.constant 0 : i32
    %c0_i32_1 = arith.constant 0 : i32
    return %c0_i32, %c0_i32_0 : i32, i32
  }
  func.func @transform_2(%arg0: i32) -> (i32, i32) {
    %c0_i32 = arith.constant 0 : i32
    %c0_i32_0 = arith.constant 0 : i32
    return %arg0, %c0_i32 : i32, i32
  }
}

module attributes {stable_mosaic.version = 11 : i64} {
  func.func @_conv_kernel(%arg0: i32, %arg1: memref<512x8xbf16, #tpu.memory_space<vmem>>, %arg2: memref<8x16xbf16, #tpu.memory_space<vmem>>, %arg3: memref<512x16xf32, #tpu.memory_space<vmem>>) attributes {dimension_semantics = [#tpu.dimension_semantics<parallel>], iteration_bounds = array<i64: 8>, scalar_prefetch = 0 : i64, scratch_operands = 0 : i64, tpu.core_type = #tpu.core_type<tc>, window_params = [{transform_indices = @transform_0, window_bounds = array<i64: 512, 8>}, {pipeline_mode = #tpu.pipeline_mode<synchronous>, transform_indices = @transform_1, window_bounds = array<i64: 8, 16>}, {transform_indices = @transform_2, window_bounds = array<i64: 512, 16>}]} {
    %c0 = arith.constant 0 : index
    %c0_0 = arith.constant 0 : index
    %0 = vector.load %arg1[%c0, %c0_0] : memref<512x8xbf16, #tpu.memory_space<vmem>>, vector<512x8xbf16>
    %c0_1 = arith.constant 0 : index
    %c0_2 = arith.constant 0 : index
    %1 = vector.load %arg2[%c0_1, %c0_2] : memref<8x16xbf16, #tpu.memory_space<vmem>>, vector<8x16xbf16>
    %cst = arith.constant dense<0.000000e+00> : vector<512x16xf32>
    %2 = tpu.matmul %0, %1, %cst {dimension_numbers = #tpu.dot_dimension_numbers<[1], [0], [0], [1], [0, 0, 1, 1], [], []>} : vector<512x8xbf16>, vector<8x16xbf16>, vector<512x16xf32> -> vector<512x16xf32>
    %c0_3 = arith.constant 0 : index
    %c0_4 = arith.constant 0 : index
    %3 = vector.load %arg3[%c0_3, %c0_4] : memref<512x16xf32, #tpu.memory_space<vmem>>, vector<512x16xf32>
    tpu.vector_store %arg3[%c0_3, %c0_4], %2 {strides = array<i32>} : memref<512x16xf32, #tpu.memory_space<vmem>>, vector<512x16xf32>,
    return
  }
  func.func @transform_0(%arg0: i32) -> (i32, i32) {
    %c0_i32 = arith.constant 0 : i32
    %c0_i32_0 = arith.constant 0 : i32
    return %arg0, %c0_i32 : i32, i32
  }
  func.func @transform_1(%arg0: i32) -> (i32, i32) {
    %c0_i32 = arith.constant 0 : i32
    %c0_i32_0 = arith.constant 0 : i32
    %c0_i32_1 = arith.constant 0 : i32
    return %c0_i32, %c0_i32_0 : i32, i32
  }
  func.func @transform_2(%arg0: i32) -> (i32, i32) {
    %c0_i32 = arith.constant 0 : i32
    %c0_i32_0 = arith.constant 0 : i32
    return %arg0, %c0_i32 : i32, i32
  }
}

module attributes {stable_mosaic.version = 11 : i64} {
  func.func @_conv_residual_kernel(%arg0: i32, %arg1: memref<512x432xbf16, #tpu.memory_space<vmem>>, %arg2: memref<432x16xbf16, #tpu.memory_space<vmem>>, %arg3: memref<512x16xf32, #tpu.memory_space<vmem>>, %arg4: memref<512x16xf32, #tpu.memory_space<vmem>>) attributes {dimension_semantics = [#tpu.dimension_semantics<parallel>], iteration_bounds = array<i64: 8>, scalar_prefetch = 0 : i64, scratch_operands = 0 : i64, tpu.core_type = #tpu.core_type<tc>, window_params = [{transform_indices = @transform_0, window_bounds = array<i64: 512, 432>}, {pipeline_mode = #tpu.pipeline_mode<synchronous>, transform_indices = @transform_1, window_bounds = array<i64: 432, 16>}, {transform_indices = @transform_2, window_bounds = array<i64: 512, 16>}, {transform_indices = @transform_3, window_bounds = array<i64: 512, 16>}]} {
    %c0 = arith.constant 0 : index
    %c0_0 = arith.constant 0 : index
    %0 = vector.load %arg1[%c0, %c0_0] : memref<512x432xbf16, #tpu.memory_space<vmem>>, vector<512x432xbf16>
    %c0_1 = arith.constant 0 : index
    %c0_2 = arith.constant 0 : index
    %1 = vector.load %arg2[%c0_1, %c0_2] : memref<432x16xbf16, #tpu.memory_space<vmem>>, vector<432x16xbf16>
    %cst = arith.constant dense<0.000000e+00> : vector<512x16xf32>
    %2 = tpu.matmul %0, %1, %cst {dimension_numbers = #tpu.dot_dimension_numbers<[1], [0], [0], [1], [0, 0, 1, 1], [], []>} : vector<512x432xbf16>, vector<432x16xbf16>, vector<512x16xf32> -> vector<512x16xf32>
    %c0_3 = arith.constant 0 : index
    %c0_4 = arith.constant 0 : index
    %3 = vector.load %arg3[%c0_3, %c0_4] : memref<512x16xf32, #tpu.memory_space<vmem>>, vector<512x16xf32>
    %4 = arith.addf %2, %3 : vector<512x16xf32>
    %cst_5 = arith.constant 0.000000e+00 : f32
    %5 = vector.broadcast %cst_5 : f32 to vector<512x16xf32>
    %6 = arith.maximumf %4, %5 : vector<512x16xf32>
    %c0_6 = arith.constant 0 : index
    %c0_7 = arith.constant 0 : index
    %7 = vector.load %arg4[%c0_6, %c0_7] : memref<512x16xf32, #tpu.memory_space<vmem>>, vector<512x16xf32>
    tpu.vector_store %arg4[%c0_6, %c0_7], %6 {strides = array<i32>} : memref<512x16xf32, #tpu.memory_space<vmem>>, vector<512x16xf32>,
    return
  }
  func.func @transform_0(%arg0: i32) -> (i32, i32) {
    %c0_i32 = arith.constant 0 : i32
    %c0_i32_0 = arith.constant 0 : i32
    return %arg0, %c0_i32 : i32, i32
  }
  func.func @transform_1(%arg0: i32) -> (i32, i32) {
    %c0_i32 = arith.constant 0 : i32
    %c0_i32_0 = arith.constant 0 : i32
    %c0_i32_1 = arith.constant 0 : i32
    return %c0_i32, %c0_i32_0 : i32, i32
  }
  func.func @transform_2(%arg0: i32) -> (i32, i32) {
    %c0_i32 = arith.constant 0 : i32
    %c0_i32_0 = arith.constant 0 : i32
    return %arg0, %c0_i32 : i32, i32
  }
  func.func @transform_3(%arg0: i32) -> (i32, i32) {
    %c0_i32 = arith.constant 0 : i32
    %c0_i32_0 = arith.constant 0 : i32
    return %arg0, %c0_i32 : i32, i32
  }
}

module attributes {stable_mosaic.version = 11 : i64} {
  func.func @_conv_kernel(%arg0: i32, %arg1: memref<512x432xbf16, #tpu.memory_space<vmem>>, %arg2: memref<432x16xbf16, #tpu.memory_space<vmem>>, %arg3: memref<512x16xf32, #tpu.memory_space<vmem>>) attributes {dimension_semantics = [#tpu.dimension_semantics<parallel>], iteration_bounds = array<i64: 2>, scalar_prefetch = 0 : i64, scratch_operands = 0 : i64, tpu.core_type = #tpu.core_type<tc>, window_params = [{transform_indices = @transform_0, window_bounds = array<i64: 512, 432>}, {pipeline_mode = #tpu.pipeline_mode<synchronous>, transform_indices = @transform_1, window_bounds = array<i64: 432, 16>}, {transform_indices = @transform_2, window_bounds = array<i64: 512, 16>}]} {
    %c0 = arith.constant 0 : index
    %c0_0 = arith.constant 0 : index
    %0 = vector.load %arg1[%c0, %c0_0] : memref<512x432xbf16, #tpu.memory_space<vmem>>, vector<512x432xbf16>
    %c0_1 = arith.constant 0 : index
    %c0_2 = arith.constant 0 : index
    %1 = vector.load %arg2[%c0_1, %c0_2] : memref<432x16xbf16, #tpu.memory_space<vmem>>, vector<432x16xbf16>
    %cst = arith.constant dense<0.000000e+00> : vector<512x16xf32>
    %2 = tpu.matmul %0, %1, %cst {dimension_numbers = #tpu.dot_dimension_numbers<[1], [0], [0], [1], [0, 0, 1, 1], [], []>} : vector<512x432xbf16>, vector<432x16xbf16>, vector<512x16xf32> -> vector<512x16xf32>
    %cst_3 = arith.constant 0.000000e+00 : f32
    %3 = vector.broadcast %cst_3 : f32 to vector<512x16xf32>
    %4 = arith.maximumf %2, %3 : vector<512x16xf32>
    %c0_4 = arith.constant 0 : index
    %c0_5 = arith.constant 0 : index
    %5 = vector.load %arg3[%c0_4, %c0_5] : memref<512x16xf32, #tpu.memory_space<vmem>>, vector<512x16xf32>
    tpu.vector_store %arg3[%c0_4, %c0_5], %4 {strides = array<i32>} : memref<512x16xf32, #tpu.memory_space<vmem>>, vector<512x16xf32>,
    return
  }
  func.func @transform_0(%arg0: i32) -> (i32, i32) {
    %c0_i32 = arith.constant 0 : i32
    %c0_i32_0 = arith.constant 0 : i32
    return %arg0, %c0_i32 : i32, i32
  }
  func.func @transform_1(%arg0: i32) -> (i32, i32) {
    %c0_i32 = arith.constant 0 : i32
    %c0_i32_0 = arith.constant 0 : i32
    %c0_i32_1 = arith.constant 0 : i32
    return %c0_i32, %c0_i32_0 : i32, i32
  }
  func.func @transform_2(%arg0: i32) -> (i32, i32) {
    %c0_i32 = arith.constant 0 : i32
    %c0_i32_0 = arith.constant 0 : i32
    return %arg0, %c0_i32 : i32, i32
  }
}

module attributes {stable_mosaic.version = 11 : i64} {
  func.func @_conv_kernel(%arg0: i32, %arg1: memref<512x16xbf16, #tpu.memory_space<vmem>>, %arg2: memref<16x16xbf16, #tpu.memory_space<vmem>>, %arg3: memref<512x16xf32, #tpu.memory_space<vmem>>) attributes {dimension_semantics = [#tpu.dimension_semantics<parallel>], iteration_bounds = array<i64: 2>, scalar_prefetch = 0 : i64, scratch_operands = 0 : i64, tpu.core_type = #tpu.core_type<tc>, window_params = [{transform_indices = @transform_0, window_bounds = array<i64: 512, 16>}, {pipeline_mode = #tpu.pipeline_mode<synchronous>, transform_indices = @transform_1, window_bounds = array<i64: 16, 16>}, {transform_indices = @transform_2, window_bounds = array<i64: 512, 16>}]} {
    %c0 = arith.constant 0 : index
    %c0_0 = arith.constant 0 : index
    %0 = vector.load %arg1[%c0, %c0_0] : memref<512x16xbf16, #tpu.memory_space<vmem>>, vector<512x16xbf16>
    %c0_1 = arith.constant 0 : index
    %c0_2 = arith.constant 0 : index
    %1 = vector.load %arg2[%c0_1, %c0_2] : memref<16x16xbf16, #tpu.memory_space<vmem>>, vector<16x16xbf16>
    %cst = arith.constant dense<0.000000e+00> : vector<512x16xf32>
    %2 = tpu.matmul %0, %1, %cst {dimension_numbers = #tpu.dot_dimension_numbers<[1], [0], [0], [1], [0, 0, 1, 1], [], []>} : vector<512x16xbf16>, vector<16x16xbf16>, vector<512x16xf32> -> vector<512x16xf32>
    %c0_3 = arith.constant 0 : index
    %c0_4 = arith.constant 0 : index
    %3 = vector.load %arg3[%c0_3, %c0_4] : memref<512x16xf32, #tpu.memory_space<vmem>>, vector<512x16xf32>
    tpu.vector_store %arg3[%c0_3, %c0_4], %2 {strides = array<i32>} : memref<512x16xf32, #tpu.memory_space<vmem>>, vector<512x16xf32>,
    return
  }
  func.func @transform_0(%arg0: i32) -> (i32, i32) {
    %c0_i32 = arith.constant 0 : i32
    %c0_i32_0 = arith.constant 0 : i32
    return %arg0, %c0_i32 : i32, i32
  }
  func.func @transform_1(%arg0: i32) -> (i32, i32) {
    %c0_i32 = arith.constant 0 : i32
    %c0_i32_0 = arith.constant 0 : i32
    %c0_i32_1 = arith.constant 0 : i32
    return %c0_i32, %c0_i32_0 : i32, i32
  }
  func.func @transform_2(%arg0: i32) -> (i32, i32) {
    %c0_i32 = arith.constant 0 : i32
    %c0_i32_0 = arith.constant 0 : i32
    return %arg0, %c0_i32 : i32, i32
  }
}

module attributes {stable_mosaic.version = 11 : i64} {
  func.func @_conv_residual_kernel(%arg0: i32, %arg1: memref<512x432xbf16, #tpu.memory_space<vmem>>, %arg2: memref<432x16xbf16, #tpu.memory_space<vmem>>, %arg3: memref<512x16xf32, #tpu.memory_space<vmem>>, %arg4: memref<512x16xf32, #tpu.memory_space<vmem>>) attributes {dimension_semantics = [#tpu.dimension_semantics<parallel>], iteration_bounds = array<i64: 2>, scalar_prefetch = 0 : i64, scratch_operands = 0 : i64, tpu.core_type = #tpu.core_type<tc>, window_params = [{transform_indices = @transform_0, window_bounds = array<i64: 512, 432>}, {pipeline_mode = #tpu.pipeline_mode<synchronous>, transform_indices = @transform_1, window_bounds = array<i64: 432, 16>}, {transform_indices = @transform_2, window_bounds = array<i64: 512, 16>}, {transform_indices = @transform_3, window_bounds = array<i64: 512, 16>}]} {
    %c0 = arith.constant 0 : index
    %c0_0 = arith.constant 0 : index
    %0 = vector.load %arg1[%c0, %c0_0] : memref<512x432xbf16, #tpu.memory_space<vmem>>, vector<512x432xbf16>
    %c0_1 = arith.constant 0 : index
    %c0_2 = arith.constant 0 : index
    %1 = vector.load %arg2[%c0_1, %c0_2] : memref<432x16xbf16, #tpu.memory_space<vmem>>, vector<432x16xbf16>
    %cst = arith.constant dense<0.000000e+00> : vector<512x16xf32>
    %2 = tpu.matmul %0, %1, %cst {dimension_numbers = #tpu.dot_dimension_numbers<[1], [0], [0], [1], [0, 0, 1, 1], [], []>} : vector<512x432xbf16>, vector<432x16xbf16>, vector<512x16xf32> -> vector<512x16xf32>
    %c0_3 = arith.constant 0 : index
    %c0_4 = arith.constant 0 : index
    %3 = vector.load %arg3[%c0_3, %c0_4] : memref<512x16xf32, #tpu.memory_space<vmem>>, vector<512x16xf32>
    %4 = arith.addf %2, %3 : vector<512x16xf32>
    %cst_5 = arith.constant 0.000000e+00 : f32
    %5 = vector.broadcast %cst_5 : f32 to vector<512x16xf32>
    %6 = arith.maximumf %4, %5 : vector<512x16xf32>
    %c0_6 = arith.constant 0 : index
    %c0_7 = arith.constant 0 : index
    %7 = vector.load %arg4[%c0_6, %c0_7] : memref<512x16xf32, #tpu.memory_space<vmem>>, vector<512x16xf32>
    tpu.vector_store %arg4[%c0_6, %c0_7], %6 {strides = array<i32>} : memref<512x16xf32, #tpu.memory_space<vmem>>, vector<512x16xf32>,
    return
  }
  func.func @transform_0(%arg0: i32) -> (i32, i32) {
    %c0_i32 = arith.constant 0 : i32
    %c0_i32_0 = arith.constant 0 : i32
    return %arg0, %c0_i32 : i32, i32
  }
  func.func @transform_1(%arg0: i32) -> (i32, i32) {
    %c0_i32 = arith.constant 0 : i32
    %c0_i32_0 = arith.constant 0 : i32
    %c0_i32_1 = arith.constant 0 : i32
    return %c0_i32, %c0_i32_0 : i32, i32
  }
  func.func @transform_2(%arg0: i32) -> (i32, i32) {
    %c0_i32 = arith.constant 0 : i32
    %c0_i32_0 = arith.constant 0 : i32
    return %arg0, %c0_i32 : i32, i32
  }
  func.func @transform_3(%arg0: i32) -> (i32, i32) {
    %c0_i32 = arith.constant 0 : i32
    %c0_i32_0 = arith.constant 0 : i32
    return %arg0, %c0_i32 : i32, i32
  }
}

module attributes {stable_mosaic.version = 11 : i64} {
  func.func @_conv_kernel(%arg0: i32, %arg1: memref<128x432xbf16, #tpu.memory_space<vmem>>, %arg2: memref<432x32xbf16, #tpu.memory_space<vmem>>, %arg3: memref<128x32xf32, #tpu.memory_space<vmem>>) attributes {dimension_semantics = [#tpu.dimension_semantics<parallel>], iteration_bounds = array<i64: 1>, scalar_prefetch = 0 : i64, scratch_operands = 0 : i64, tpu.core_type = #tpu.core_type<tc>, window_params = [{transform_indices = @transform_0, window_bounds = array<i64: 128, 432>}, {pipeline_mode = #tpu.pipeline_mode<synchronous>, transform_indices = @transform_1, window_bounds = array<i64: 432, 32>}, {transform_indices = @transform_2, window_bounds = array<i64: 128, 32>}]} {
    %c0 = arith.constant 0 : index
    %c0_0 = arith.constant 0 : index
    %0 = vector.load %arg1[%c0, %c0_0] : memref<128x432xbf16, #tpu.memory_space<vmem>>, vector<128x432xbf16>
    %c0_1 = arith.constant 0 : index
    %c0_2 = arith.constant 0 : index
    %1 = vector.load %arg2[%c0_1, %c0_2] : memref<432x32xbf16, #tpu.memory_space<vmem>>, vector<432x32xbf16>
    %cst = arith.constant dense<0.000000e+00> : vector<128x32xf32>
    %2 = tpu.matmul %0, %1, %cst {dimension_numbers = #tpu.dot_dimension_numbers<[1], [0], [0], [1], [0, 0, 1, 1], [], []>} : vector<128x432xbf16>, vector<432x32xbf16>, vector<128x32xf32> -> vector<128x32xf32>
    %cst_3 = arith.constant 0.000000e+00 : f32
    %3 = vector.broadcast %cst_3 : f32 to vector<128x32xf32>
    %4 = arith.maximumf %2, %3 : vector<128x32xf32>
    %c0_4 = arith.constant 0 : index
    %c0_5 = arith.constant 0 : index
    %5 = vector.load %arg3[%c0_4, %c0_5] : memref<128x32xf32, #tpu.memory_space<vmem>>, vector<128x32xf32>
    tpu.vector_store %arg3[%c0_4, %c0_5], %4 {strides = array<i32>} : memref<128x32xf32, #tpu.memory_space<vmem>>, vector<128x32xf32>,
    return
  }
  func.func @transform_0(%arg0: i32) -> (i32, i32) {
    %c0_i32 = arith.constant 0 : i32
    %c0_i32_0 = arith.constant 0 : i32
    return %arg0, %c0_i32 : i32, i32
  }
  func.func @transform_1(%arg0: i32) -> (i32, i32) {
    %c0_i32 = arith.constant 0 : i32
    %c0_i32_0 = arith.constant 0 : i32
    %c0_i32_1 = arith.constant 0 : i32
    return %c0_i32, %c0_i32_0 : i32, i32
  }
  func.func @transform_2(%arg0: i32) -> (i32, i32) {
    %c0_i32 = arith.constant 0 : i32
    %c0_i32_0 = arith.constant 0 : i32
    return %arg0, %c0_i32 : i32, i32
  }
}

module attributes {stable_mosaic.version = 11 : i64} {
  func.func @_conv_kernel(%arg0: i32, %arg1: memref<128x16xbf16, #tpu.memory_space<vmem>>, %arg2: memref<16x32xbf16, #tpu.memory_space<vmem>>, %arg3: memref<128x32xf32, #tpu.memory_space<vmem>>) attributes {dimension_semantics = [#tpu.dimension_semantics<parallel>], iteration_bounds = array<i64: 1>, scalar_prefetch = 0 : i64, scratch_operands = 0 : i64, tpu.core_type = #tpu.core_type<tc>, window_params = [{transform_indices = @transform_0, window_bounds = array<i64: 128, 16>}, {pipeline_mode = #tpu.pipeline_mode<synchronous>, transform_indices = @transform_1, window_bounds = array<i64: 16, 32>}, {transform_indices = @transform_2, window_bounds = array<i64: 128, 32>}]} {
    %c0 = arith.constant 0 : index
    %c0_0 = arith.constant 0 : index
    %0 = vector.load %arg1[%c0, %c0_0] : memref<128x16xbf16, #tpu.memory_space<vmem>>, vector<128x16xbf16>
    %c0_1 = arith.constant 0 : index
    %c0_2 = arith.constant 0 : index
    %1 = vector.load %arg2[%c0_1, %c0_2] : memref<16x32xbf16, #tpu.memory_space<vmem>>, vector<16x32xbf16>
    %cst = arith.constant dense<0.000000e+00> : vector<128x32xf32>
    %2 = tpu.matmul %0, %1, %cst {dimension_numbers = #tpu.dot_dimension_numbers<[1], [0], [0], [1], [0, 0, 1, 1], [], []>} : vector<128x16xbf16>, vector<16x32xbf16>, vector<128x32xf32> -> vector<128x32xf32>
    %c0_3 = arith.constant 0 : index
    %c0_4 = arith.constant 0 : index
    %3 = vector.load %arg3[%c0_3, %c0_4] : memref<128x32xf32, #tpu.memory_space<vmem>>, vector<128x32xf32>
    tpu.vector_store %arg3[%c0_3, %c0_4], %2 {strides = array<i32>} : memref<128x32xf32, #tpu.memory_space<vmem>>, vector<128x32xf32>,
    return
  }
  func.func @transform_0(%arg0: i32) -> (i32, i32) {
    %c0_i32 = arith.constant 0 : i32
    %c0_i32_0 = arith.constant 0 : i32
    return %arg0, %c0_i32 : i32, i32
  }
  func.func @transform_1(%arg0: i32) -> (i32, i32) {
    %c0_i32 = arith.constant 0 : i32
    %c0_i32_0 = arith.constant 0 : i32
    %c0_i32_1 = arith.constant 0 : i32
    return %c0_i32, %c0_i32_0 : i32, i32
  }
  func.func @transform_2(%arg0: i32) -> (i32, i32) {
    %c0_i32 = arith.constant 0 : i32
    %c0_i32_0 = arith.constant 0 : i32
    return %arg0, %c0_i32 : i32, i32
  }
}

module attributes {stable_mosaic.version = 11 : i64} {
  func.func @_conv_residual_kernel(%arg0: i32, %arg1: memref<128x864xbf16, #tpu.memory_space<vmem>>, %arg2: memref<864x32xbf16, #tpu.memory_space<vmem>>, %arg3: memref<128x32xf32, #tpu.memory_space<vmem>>, %arg4: memref<128x32xf32, #tpu.memory_space<vmem>>) attributes {dimension_semantics = [#tpu.dimension_semantics<parallel>], iteration_bounds = array<i64: 1>, scalar_prefetch = 0 : i64, scratch_operands = 0 : i64, tpu.core_type = #tpu.core_type<tc>, window_params = [{transform_indices = @transform_0, window_bounds = array<i64: 128, 864>}, {pipeline_mode = #tpu.pipeline_mode<synchronous>, transform_indices = @transform_1, window_bounds = array<i64: 864, 32>}, {transform_indices = @transform_2, window_bounds = array<i64: 128, 32>}, {transform_indices = @transform_3, window_bounds = array<i64: 128, 32>}]} {
    %c0 = arith.constant 0 : index
    %c0_0 = arith.constant 0 : index
    %0 = vector.load %arg1[%c0, %c0_0] : memref<128x864xbf16, #tpu.memory_space<vmem>>, vector<128x864xbf16>
    %c0_1 = arith.constant 0 : index
    %c0_2 = arith.constant 0 : index
    %1 = vector.load %arg2[%c0_1, %c0_2] : memref<864x32xbf16, #tpu.memory_space<vmem>>, vector<864x32xbf16>
    %cst = arith.constant dense<0.000000e+00> : vector<128x32xf32>
    %2 = tpu.matmul %0, %1, %cst {dimension_numbers = #tpu.dot_dimension_numbers<[1], [0], [0], [1], [0, 0, 1, 1], [], []>} : vector<128x864xbf16>, vector<864x32xbf16>, vector<128x32xf32> -> vector<128x32xf32>
    %c0_3 = arith.constant 0 : index
    %c0_4 = arith.constant 0 : index
    %3 = vector.load %arg3[%c0_3, %c0_4] : memref<128x32xf32, #tpu.memory_space<vmem>>, vector<128x32xf32>
    %4 = arith.addf %2, %3 : vector<128x32xf32>
    %cst_5 = arith.constant 0.000000e+00 : f32
    %5 = vector.broadcast %cst_5 : f32 to vector<128x32xf32>
    %6 = arith.maximumf %4, %5 : vector<128x32xf32>
    %c0_6 = arith.constant 0 : index
    %c0_7 = arith.constant 0 : index
    %7 = vector.load %arg4[%c0_6, %c0_7] : memref<128x32xf32, #tpu.memory_space<vmem>>, vector<128x32xf32>
    tpu.vector_store %arg4[%c0_6, %c0_7], %6 {strides = array<i32>} : memref<128x32xf32, #tpu.memory_space<vmem>>, vector<128x32xf32>,
    return
  }
  func.func @transform_0(%arg0: i32) -> (i32, i32) {
    %c0_i32 = arith.constant 0 : i32
    %c0_i32_0 = arith.constant 0 : i32
    return %arg0, %c0_i32 : i32, i32
  }
  func.func @transform_1(%arg0: i32) -> (i32, i32) {
    %c0_i32 = arith.constant 0 : i32
    %c0_i32_0 = arith.constant 0 : i32
    %c0_i32_1 = arith.constant 0 : i32
    return %c0_i32, %c0_i32_0 : i32, i32
  }
  func.func @transform_2(%arg0: i32) -> (i32, i32) {
    %c0_i32 = arith.constant 0 : i32
    %c0_i32_0 = arith.constant 0 : i32
    return %arg0, %c0_i32 : i32, i32
  }
  func.func @transform_3(%arg0: i32) -> (i32, i32) {
    %c0_i32 = arith.constant 0 : i32
    %c0_i32_0 = arith.constant 0 : i32
    return %arg0, %c0_i32 : i32, i32
  }
}

module attributes {stable_mosaic.version = 11 : i64} {
  func.func @_conv_kernel(%arg0: i32, %arg1: memref<32x864xbf16, #tpu.memory_space<vmem>>, %arg2: memref<864x32xbf16, #tpu.memory_space<vmem>>, %arg3: memref<32x32xf32, #tpu.memory_space<vmem>>) attributes {dimension_semantics = [#tpu.dimension_semantics<parallel>], iteration_bounds = array<i64: 1>, scalar_prefetch = 0 : i64, scratch_operands = 0 : i64, tpu.core_type = #tpu.core_type<tc>, window_params = [{transform_indices = @transform_0, window_bounds = array<i64: 32, 864>}, {pipeline_mode = #tpu.pipeline_mode<synchronous>, transform_indices = @transform_1, window_bounds = array<i64: 864, 32>}, {transform_indices = @transform_2, window_bounds = array<i64: 32, 32>}]} {
    %c0 = arith.constant 0 : index
    %c0_0 = arith.constant 0 : index
    %0 = vector.load %arg1[%c0, %c0_0] : memref<32x864xbf16, #tpu.memory_space<vmem>>, vector<32x864xbf16>
    %c0_1 = arith.constant 0 : index
    %c0_2 = arith.constant 0 : index
    %1 = vector.load %arg2[%c0_1, %c0_2] : memref<864x32xbf16, #tpu.memory_space<vmem>>, vector<864x32xbf16>
    %cst = arith.constant dense<0.000000e+00> : vector<32x32xf32>
    %2 = tpu.matmul %0, %1, %cst {dimension_numbers = #tpu.dot_dimension_numbers<[1], [0], [0], [1], [0, 0, 1, 1], [], []>} : vector<32x864xbf16>, vector<864x32xbf16>, vector<32x32xf32> -> vector<32x32xf32>
    %cst_3 = arith.constant 0.000000e+00 : f32
    %3 = vector.broadcast %cst_3 : f32 to vector<32x32xf32>
    %4 = arith.maximumf %2, %3 : vector<32x32xf32>
    %c0_4 = arith.constant 0 : index
    %c0_5 = arith.constant 0 : index
    %5 = vector.load %arg3[%c0_4, %c0_5] : memref<32x32xf32, #tpu.memory_space<vmem>>, vector<32x32xf32>
    tpu.vector_store %arg3[%c0_4, %c0_5], %4 {strides = array<i32>} : memref<32x32xf32, #tpu.memory_space<vmem>>, vector<32x32xf32>,
    return
  }
  func.func @transform_0(%arg0: i32) -> (i32, i32) {
    %c0_i32 = arith.constant 0 : i32
    %c0_i32_0 = arith.constant 0 : i32
    return %arg0, %c0_i32 : i32, i32
  }
  func.func @transform_1(%arg0: i32) -> (i32, i32) {
    %c0_i32 = arith.constant 0 : i32
    %c0_i32_0 = arith.constant 0 : i32
    %c0_i32_1 = arith.constant 0 : i32
    return %c0_i32, %c0_i32_0 : i32, i32
  }
  func.func @transform_2(%arg0: i32) -> (i32, i32) {
    %c0_i32 = arith.constant 0 : i32
    %c0_i32_0 = arith.constant 0 : i32
    return %arg0, %c0_i32 : i32, i32
  }
}

module attributes {stable_mosaic.version = 11 : i64} {
  func.func @_conv_kernel(%arg0: i32, %arg1: memref<32x32xbf16, #tpu.memory_space<vmem>>, %arg2: memref<32x32xbf16, #tpu.memory_space<vmem>>, %arg3: memref<32x32xf32, #tpu.memory_space<vmem>>) attributes {dimension_semantics = [#tpu.dimension_semantics<parallel>], iteration_bounds = array<i64: 1>, scalar_prefetch = 0 : i64, scratch_operands = 0 : i64, tpu.core_type = #tpu.core_type<tc>, window_params = [{transform_indices = @transform_0, window_bounds = array<i64: 32, 32>}, {pipeline_mode = #tpu.pipeline_mode<synchronous>, transform_indices = @transform_1, window_bounds = array<i64: 32, 32>}, {transform_indices = @transform_2, window_bounds = array<i64: 32, 32>}]} {
    %c0 = arith.constant 0 : index
    %c0_0 = arith.constant 0 : index
    %0 = vector.load %arg1[%c0, %c0_0] : memref<32x32xbf16, #tpu.memory_space<vmem>>, vector<32x32xbf16>
    %c0_1 = arith.constant 0 : index
    %c0_2 = arith.constant 0 : index
    %1 = vector.load %arg2[%c0_1, %c0_2] : memref<32x32xbf16, #tpu.memory_space<vmem>>, vector<32x32xbf16>
    %cst = arith.constant dense<0.000000e+00> : vector<32x32xf32>
    %2 = tpu.matmul %0, %1, %cst {dimension_numbers = #tpu.dot_dimension_numbers<[1], [0], [0], [1], [0, 0, 1, 1], [], []>} : vector<32x32xbf16>, vector<32x32xbf16>, vector<32x32xf32> -> vector<32x32xf32>
    %c0_3 = arith.constant 0 : index
    %c0_4 = arith.constant 0 : index
    %3 = vector.load %arg3[%c0_3, %c0_4] : memref<32x32xf32, #tpu.memory_space<vmem>>, vector<32x32xf32>
    tpu.vector_store %arg3[%c0_3, %c0_4], %2 {strides = array<i32>} : memref<32x32xf32, #tpu.memory_space<vmem>>, vector<32x32xf32>,
    return
  }
  func.func @transform_0(%arg0: i32) -> (i32, i32) {
    %c0_i32 = arith.constant 0 : i32
    %c0_i32_0 = arith.constant 0 : i32
    return %arg0, %c0_i32 : i32, i32
  }
  func.func @transform_1(%arg0: i32) -> (i32, i32) {
    %c0_i32 = arith.constant 0 : i32
    %c0_i32_0 = arith.constant 0 : i32
    %c0_i32_1 = arith.constant 0 : i32
    return %c0_i32, %c0_i32_0 : i32, i32
  }
  func.func @transform_2(%arg0: i32) -> (i32, i32) {
    %c0_i32 = arith.constant 0 : i32
    %c0_i32_0 = arith.constant 0 : i32
    return %arg0, %c0_i32 : i32, i32
  }
}

module attributes {stable_mosaic.version = 11 : i64} {
  func.func @_conv_residual_kernel(%arg0: i32, %arg1: memref<32x864xbf16, #tpu.memory_space<vmem>>, %arg2: memref<864x32xbf16, #tpu.memory_space<vmem>>, %arg3: memref<32x32xf32, #tpu.memory_space<vmem>>, %arg4: memref<32x32xf32, #tpu.memory_space<vmem>>) attributes {dimension_semantics = [#tpu.dimension_semantics<parallel>], iteration_bounds = array<i64: 1>, scalar_prefetch = 0 : i64, scratch_operands = 0 : i64, tpu.core_type = #tpu.core_type<tc>, window_params = [{transform_indices = @transform_0, window_bounds = array<i64: 32, 864>}, {pipeline_mode = #tpu.pipeline_mode<synchronous>, transform_indices = @transform_1, window_bounds = array<i64: 864, 32>}, {transform_indices = @transform_2, window_bounds = array<i64: 32, 32>}, {transform_indices = @transform_3, window_bounds = array<i64: 32, 32>}]} {
    %c0 = arith.constant 0 : index
    %c0_0 = arith.constant 0 : index
    %0 = vector.load %arg1[%c0, %c0_0] : memref<32x864xbf16, #tpu.memory_space<vmem>>, vector<32x864xbf16>
    %c0_1 = arith.constant 0 : index
    %c0_2 = arith.constant 0 : index
    %1 = vector.load %arg2[%c0_1, %c0_2] : memref<864x32xbf16, #tpu.memory_space<vmem>>, vector<864x32xbf16>
    %cst = arith.constant dense<0.000000e+00> : vector<32x32xf32>
    %2 = tpu.matmul %0, %1, %cst {dimension_numbers = #tpu.dot_dimension_numbers<[1], [0], [0], [1], [0, 0, 1, 1], [], []>} : vector<32x864xbf16>, vector<864x32xbf16>, vector<32x32xf32> -> vector<32x32xf32>
    %c0_3 = arith.constant 0 : index
    %c0_4 = arith.constant 0 : index
    %3 = vector.load %arg3[%c0_3, %c0_4] : memref<32x32xf32, #tpu.memory_space<vmem>>, vector<32x32xf32>
    %4 = arith.addf %2, %3 : vector<32x32xf32>
    %cst_5 = arith.constant 0.000000e+00 : f32
    %5 = vector.broadcast %cst_5 : f32 to vector<32x32xf32>
    %6 = arith.maximumf %4, %5 : vector<32x32xf32>
    %c0_6 = arith.constant 0 : index
    %c0_7 = arith.constant 0 : index
    %7 = vector.load %arg4[%c0_6, %c0_7] : memref<32x32xf32, #tpu.memory_space<vmem>>, vector<32x32xf32>
    tpu.vector_store %arg4[%c0_6, %c0_7], %6 {strides = array<i32>} : memref<32x32xf32, #tpu.memory_space<vmem>>, vector<32x32xf32>,
    return
  }
  func.func @transform_0(%arg0: i32) -> (i32, i32) {
    %c0_i32 = arith.constant 0 : i32
    %c0_i32_0 = arith.constant 0 : i32
    return %arg0, %c0_i32 : i32, i32
  }
  func.func @transform_1(%arg0: i32) -> (i32, i32) {
    %c0_i32 = arith.constant 0 : i32
    %c0_i32_0 = arith.constant 0 : i32
    %c0_i32_1 = arith.constant 0 : i32
    return %c0_i32, %c0_i32_0 : i32, i32
  }
  func.func @transform_2(%arg0: i32) -> (i32, i32) {
    %c0_i32 = arith.constant 0 : i32
    %c0_i32_0 = arith.constant 0 : i32
    return %arg0, %c0_i32 : i32, i32
  }
  func.func @transform_3(%arg0: i32) -> (i32, i32) {
    %c0_i32 = arith.constant 0 : i32
    %c0_i32_0 = arith.constant 0 : i32
    return %arg0, %c0_i32 : i32, i32
  }
}

module attributes {stable_mosaic.version = 11 : i64} {
  func.func @_conv_residual_kernel(%arg0: i32, %arg1: memref<32x864xbf16, #tpu.memory_space<vmem>>, %arg2: memref<864x32xbf16, #tpu.memory_space<vmem>>, %arg3: memref<32x32xf32, #tpu.memory_space<vmem>>, %arg4: memref<32x32xf32, #tpu.memory_space<vmem>>) attributes {dimension_semantics = [#tpu.dimension_semantics<parallel>], iteration_bounds = array<i64: 1>, scalar_prefetch = 0 : i64, scratch_operands = 0 : i64, tpu.core_type = #tpu.core_type<tc>, window_params = [{transform_indices = @transform_0, window_bounds = array<i64: 32, 864>}, {pipeline_mode = #tpu.pipeline_mode<synchronous>, transform_indices = @transform_1, window_bounds = array<i64: 864, 32>}, {transform_indices = @transform_2, window_bounds = array<i64: 32, 32>}, {transform_indices = @transform_3, window_bounds = array<i64: 32, 32>}]} {
    %c0 = arith.constant 0 : index
    %c0_0 = arith.constant 0 : index
    %0 = vector.load %arg1[%c0, %c0_0] : memref<32x864xbf16, #tpu.memory_space<vmem>>, vector<32x864xbf16>
    %c0_1 = arith.constant 0 : index
    %c0_2 = arith.constant 0 : index
    %1 = vector.load %arg2[%c0_1, %c0_2] : memref<864x32xbf16, #tpu.memory_space<vmem>>, vector<864x32xbf16>
    %cst = arith.constant dense<0.000000e+00> : vector<32x32xf32>
    %2 = tpu.matmul %0, %1, %cst {dimension_numbers = #tpu.dot_dimension_numbers<[1], [0], [0], [1], [0, 0, 1, 1], [], []>} : vector<32x864xbf16>, vector<864x32xbf16>, vector<32x32xf32> -> vector<32x32xf32>
    %c0_3 = arith.constant 0 : index
    %c0_4 = arith.constant 0 : index
    %3 = vector.load %arg3[%c0_3, %c0_4] : memref<32x32xf32, #tpu.memory_space<vmem>>, vector<32x32xf32>
    %4 = arith.addf %2, %3 : vector<32x32xf32>
    %cst_5 = arith.constant 0.000000e+00 : f32
    %5 = vector.broadcast %cst_5 : f32 to vector<32x32xf32>
    %6 = arith.maximumf %4, %5 : vector<32x32xf32>
    %c0_6 = arith.constant 0 : index
    %c0_7 = arith.constant 0 : index
    %7 = vector.load %arg4[%c0_6, %c0_7] : memref<32x32xf32, #tpu.memory_space<vmem>>, vector<32x32xf32>
    tpu.vector_store %arg4[%c0_6, %c0_7], %6 {strides = array<i32>} : memref<32x32xf32, #tpu.memory_space<vmem>>, vector<32x32xf32>,
    return
  }
  func.func @transform_0(%arg0: i32) -> (i32, i32) {
    %c0_i32 = arith.constant 0 : i32
    %c0_i32_0 = arith.constant 0 : i32
    return %arg0, %c0_i32 : i32, i32
  }
  func.func @transform_1(%arg0: i32) -> (i32, i32) {
    %c0_i32 = arith.constant 0 : i32
    %c0_i32_0 = arith.constant 0 : i32
    %c0_i32_1 = arith.constant 0 : i32
    return %c0_i32, %c0_i32_0 : i32, i32
  }
  func.func @transform_2(%arg0: i32) -> (i32, i32) {
    %c0_i32 = arith.constant 0 : i32
    %c0_i32_0 = arith.constant 0 : i32
    return %arg0, %c0_i32 : i32, i32
  }
  func.func @transform_3(%arg0: i32) -> (i32, i32) {
    %c0_i32 = arith.constant 0 : i32
    %c0_i32_0 = arith.constant 0 : i32
    return %arg0, %c0_i32 : i32, i32
  }
}

</mosaic_0001>

<bundles_post_ra>
// kernel: forward.15
= control target key start
LH: loop header
LB: loop body
LE: loop exit
PB: predicated region body
PF: predicated region fallthrough
CT: control target
= control target key end

     0   :  { %s1151_s9 = smov 0   ;;  %s1374_s0 = inlined_call_operand.vmem [shape: bf16[4096,27], index: 0, kind: input, shape index: {}]   ;;  %s1375_s1 = inlined_call_operand.vmem [shape: bf16[27,8], index: 1, kind: input, shape index: {}]   ;;  %s1376_s2 = inlined_call_operand.vmem [shape: f32[4096,8], index: 2, kind: output, shape index: {}]  }
   0x1 LB: > { %s901_s10 = sadd.s32 4294967295, %s1133_s9   ;;  %p905_p0 = scmp.ge.s32.totalorder %s1133_s9, 1  ;;  %s1133_s9 = sphi %s1151_s9, %s12_s9  }
   0x2   : > { %p113_p1 = scmp.lt.s32.totalorder %s1133_s9, 9 }
   0x4   : > { %p114_p2 = pnand %p905_p0, %p113_p1 }
   0x5   : > { %s906_s13 = sshll.u32 (!%p114_p2), %s901_s10, 6 }
   0x6   : > { %117 = sbr.rel (%p114_p2) target bundleno = 280 (0x118), region = 28  ;;  %p136_p3 = scmp.lt.s32.totalorder (!%p114_p2), %s906_s13, 511 }
   0xb   : > { %v1093_v0 = vld [vmem:[%s1375_s1 + $0x8] sm:$0x3f]   ;;  %vm484_vm0 = vcmask 1044480   ;;  %vm485_vm1 = vcmask 1045504   ;;  %v1135_v1 = vmov 65535   ;;  %v1094_v5 = vld [vmem:[%s1375_s1] sm:$0xff]  }
   0xc   : > { %v486_v2 = vsel %vm484_vm0, 4294967295, %v1135_v1  ;;  %s1378_s13 = smov (!%p136_p3, %s906_s13), 511  ;;  %vm387_vm2 = vcmask 220160   ;;  %vm780_vm3 = vcmask 64512  }
   0xd   : > { %v487_v3 = vsel %vm485_vm1, %v486_v2, 0  ;;  %s907_s16 = sshll.u32 %s1378_s13, 2  ;;  %s909_s20 = sshll.u32 %s1378_s13, 3 }
   0xe   : > { %v489_v4 = vand.u32 %v1093_v0, %v487_v3  ;;  %s1171_s19 = scalar_lea.vmem %s1374_s0, %s907_s16  ;;  %s1241_s23 = scalar_lea.vmem %s1376_s2, %s909_s20 }
   0xf   : > { %v1095_v6 = vld [vmem:[%s1171_s19] sm:$0xff]   ;;  %v1097_v8 = vld [vmem:[%s1171_s19 + $0x8] sm:$0xff]   ;;  %v1099_v10 = vld [vmem:[%s1171_s19 + $0x10] sm:$0xff]  }
  0x10   : > { %1012 = vmatprep.subr.bf16.mxu0 %v489_v4  ;;  %1080 = vmatprep.subr.bf16.mxu1 %v489_v4  ;;  %v1096_v7 = vld [vmem:[%s1171_s19 + $0x80] sm:$0xff]   ;;  %v1098_v9 = vld [vmem:[%s1171_s19 + $0x88] sm:$0xff]   ;;  %v1100_v11 = vld [vmem:[%s1171_s19 + $0x90] sm:$0xff]  }
  0x11   : > { %1013 = vmatpush3.bf16.msra.mxu0 %v489_v4  ;;  %1082 = vmatpush3.bf16.msra.mxu1 %v489_v4  ;;  %v1101_v12 = vld [vmem:[%s1171_s19 + $0x18] sm:$0xff]   ;;  %v1103_v14 = vld [vmem:[%s1171_s19 + $0x20] sm:$0xff]   ;;  %v1105_v16 = vld [vmem:[%s1171_s19 + $0x28] sm:$0xff]  }
  0x12   : > { %1014 = vmatprep.subr.bf16.mxu0 %v1094_v5  ;;  %1081 = vmatprep.subr.bf16.mxu1 %v1094_v5  ;;  %v1102_v13 = vld [vmem:[%s1171_s19 + $0x98] sm:$0xff]   ;;  %v1104_v15 = vld [vmem:[%s1171_s19 + $0xa0] sm:$0xff]   ;;  %v1106_v17 = vld [vmem:[%s1171_s19 + $0xa8] sm:$0xff]  }
  0x13   : > { %1016 = vmatprep.mubr.msk.bf16.mxu0 %vm387_vm2, %v1095_v6  ;;  %1048 = vmatprep.mubr.msk.bf16.mxu1 %vm387_vm2, %v1096_v7  ;;  %v1107_v18 = vld [vmem:[%s1171_s19 + $0x30] sm:$0xff]   ;;  %v1109_v20 = vld [vmem:[%s1171_s19 + $0x38] sm:$0xff]   ;;  %v1111_v22 = vld [vmem:[%s1171_s19 + $0x40] sm:$0xff]  }
  0x14   : > { %v1108_v19 = vld [vmem:[%s1171_s19 + $0xb0] sm:$0xff]   ;;  %v1110_v21 = vld [vmem:[%s1171_s19 + $0xb8] sm:$0xff]   ;;  %v1112_v23 = vld [vmem:[%s1171_s19 + $0xc0] sm:$0xff]  }
  0x15   : > { %1015 = vmatpush3.bf16.msra.mxu0 %v1094_v5  ;;  %1083 = vmatpush3.bf16.msra.mxu1 %v1094_v5  ;;  %v1113_v24 = vld [vmem:[%s1171_s19 + $0x48] sm:$0xff]   ;;  %v1115_v26 = vld [vmem:[%s1171_s19 + $0x50] sm:$0xff]   ;;  %v1117_v28 = vld [vmem:[%s1171_s19 + $0x58] sm:$0xff]  }
  0x16   : > { %v1114_v25 = vld [vmem:[%s1171_s19 + $0xc8] sm:$0xff]   ;;  %v1116_v27 = vld [vmem:[%s1171_s19 + $0xd0] sm:$0xff]   ;;  %v1118_v29 = vld [vmem:[%s1171_s19 + $0xd8] sm:$0xff]  }
  0x17   : > { %v1119_v30 = vld [vmem:[%s1171_s19 + $0x60] sm:$0xff]   ;;  %v1121_v32 = vld [vmem:[%s1171_s19 + $0x68] sm:$0xff]   ;;  %v1123_v34 = vld [vmem:[%s1171_s19 + $0x70] sm:$0xff]  }
  0x18   : > { %1017 = vmatmul.mubr.msk.bf16.vlgmr.msra.gmra.mxu0 %vm387_vm2, %v1097_v8  ;;  %1049 = vmatmul.mubr.msk.bf16.vlgmr.msra.gmra.mxu1 %vm387_vm2, %v1098_v9  ;;  %v1120_v31 = vld [vmem:[%s1171_s19 + $0xe0] sm:$0xff]   ;;  %v1122_v33 = vld [vmem:[%s1171_s19 + $0xe8] sm:$0xff]   ;;  %v1124_v35 = vld [vmem:[%s1171_s19 + $0xf0] sm:$0xff]  }
  0x19   : > { %1020 = vmatprep.mubr.msk.bf16.mxu0 %vm387_vm2, %v1099_v10  ;;  %1052 = vmatprep.mubr.msk.bf16.mxu1 %vm387_vm2, %v1100_v11  ;;  %v1125_v36 = vld [vmem:[%s1171_s19 + $0x78] sm:$0xff]  }
  0x1a   : > { %v1126_v37 = vld [vmem:[%s1171_s19 + $0xf8] sm:$0xff]  }
  0x20   : > { %1021 = vmatmul.mubr.msk.bf16.gmra.mxu0 %vm387_vm2, %v1101_v12  ;;  %1053 = vmatmul.mubr.msk.bf16.gmra.mxu1 %vm387_vm2, %v1102_v13 }
  0x21   : > { %1024 = vmatprep.mubr.msk.bf16.mxu0 %vm387_vm2, %v1103_v14  ;;  %1056 = vmatprep.mubr.msk.bf16.mxu1 %vm387_vm2, %v1104_v15 }
  0x28   : > { %1025 = vmatmul.mubr.msk.bf16.gmra.mxu0 %vm387_vm2, %v1105_v16  ;;  %1057 = vmatmul.mubr.msk.bf16.gmra.mxu1 %vm387_vm2, %v1106_v17 }
  0x29   : > { %1028 = vmatprep.mubr.msk.bf16.mxu0 %vm387_vm2, %v1107_v18  ;;  %1060 = vmatprep.mubr.msk.bf16.mxu1 %vm387_vm2, %v1108_v19 }
  0x30   : > { %1029 = vmatmul.mubr.msk.bf16.gmra.mxu0 %vm387_vm2, %v1109_v20  ;;  %1061 = vmatmul.mubr.msk.bf16.gmra.mxu1 %vm387_vm2, %v1110_v21 }
  0x31   : > { %1032 = vmatprep.mubr.msk.bf16.mxu0 %vm387_vm2, %v1111_v22  ;;  %1064 = vmatprep.mubr.msk.bf16.mxu1 %vm387_vm2, %v1112_v23 }
  0x38   : > { %1033 = vmatmul.mubr.msk.bf16.gmra.mxu0 %vm387_vm2, %v1113_v24  ;;  %1065 = vmatmul.mubr.msk.bf16.gmra.mxu1 %vm387_vm2, %v1114_v25 }
  0x39   : > { %1036 = vmatprep.mubr.msk.bf16.mxu0 %vm387_vm2, %v1115_v26  ;;  %1068 = vmatprep.mubr.msk.bf16.mxu1 %vm387_vm2, %v1116_v27 }
  0x40   : > { %1037 = vmatmul.mubr.msk.bf16.gmra.mxu0 %vm387_vm2, %v1117_v28  ;;  %1069 = vmatmul.mubr.msk.bf16.gmra.mxu1 %vm387_vm2, %v1118_v29 }
  0x41   : > { %1040 = vmatprep.mubr.msk.bf16.mxu0 %vm387_vm2, %v1119_v30  ;;  %1072 = vmatprep.mubr.msk.bf16.mxu1 %vm387_vm2, %v1120_v31 }
  0x48   : > { %1041 = vmatmul.mubr.msk.bf16.gmra.mxu0 %vm387_vm2, %v1121_v32  ;;  %1073 = vmatmul.mubr.msk.bf16.gmra.mxu1 %vm387_vm2, %v1122_v33 }
  0x49   : > { %1044 = vmatprep.mubr.msk.bf16.mxu0 %vm387_vm2, %v1123_v34  ;;  %1076 = vmatprep.mubr.msk.bf16.mxu1 %vm387_vm2, %v1124_v35 }
  0x50   : > { %1045 = vmatmul.mubr.msk.bf16.gmra.mxu0 %vm387_vm2, %v1125_v36  ;;  %1077 = vmatmul.mubr.msk.bf16.gmra.mxu1 %vm387_vm2, %v1126_v37 }
  0xd8   : > { %v1018_v38 = vpop.f32.mrf.mxu0  ;;  %v1050_v39 = vpop.f32.mrf.mxu1 }
  0xd9   : > { %783 = vst.msk [vmem:[%s1241_s23 + $0x10] sm:$0xff] %vm780_vm3, %v1018_v38  ;;  %815 = vst.msk [vmem:[%s1241_s23 + $0x110] sm:$0xff] %vm780_vm3, %v1050_v39 }
  0xda   : > { %v525_v40 = vpop.f32.mrf.mxu0  ;;  %v653_v41 = vpop.f32.mrf.mxu1 }
  0xdb   : > { %781 = vst.msk [vmem:[%s1241_s23] sm:$0xff] %vm780_vm3, %v525_v40  ;;  %813 = vst.msk [vmem:[%s1241_s23 + $0x100] sm:$0xff] %vm780_vm3, %v653_v41 }
  0xdc   : > { %v1019_v42 = vpop.f32.mrf.mxu0  ;;  %v1051_v43 = vpop.f32.mrf.mxu1 }
  0xdd   : > { %784 = vst.msk [vmem:[%s1241_s23 + $0x18] sm:$0xff] %vm780_vm3, %v1019_v42  ;;  %816 = vst.msk [vmem:[%s1241_s23 + $0x118] sm:$0xff] %vm780_vm3, %v1051_v43 }
  0xde   : > { %v528_v44 = vpop.f32.mrf.mxu0  ;;  %v656_v45 = vpop.f32.mrf.mxu1 }
  0xdf   : > { %782 = vst.msk [vmem:[%s1241_s23 + $0x8] sm:$0xff] %vm780_vm3, %v528_v44  ;;  %814 = vst.msk [vmem:[%s1241_s23 + $0x108] sm:$0xff] %vm780_vm3, %v656_v45 }
  0xe0   : > { %v1022_v46 = vpop.f32.mrf.mxu0  ;;  %v1054_v47 = vpop.f32.mrf.mxu1 }
  0xe1   : > { %787 = vst.msk [vmem:[%s1241_s23 + $0x30] sm:$0xff] %vm780_vm3, %v1022_v46  ;;  %819 = vst.msk [vmem:[%s1241_s23 + $0x130] sm:$0xff] %vm780_vm3, %v1054_v47 }
  0xe2   : > { %v541_v48 = vpop.f32.mrf.mxu0  ;;  %v669_v49 = vpop.f32.mrf.mxu1 }
  0xe3   : > { %785 = vst.msk [vmem:[%s1241_s23 + $0x20] sm:$0xff] %vm780_vm3, %v541_v48  ;;  %817 = vst.msk [vmem:[%s1241_s23 + $0x120] sm:$0xff] %vm780_vm3, %v669_v49 }
  0xe4   : > { %v1023_v50 = vpop.f32.mrf.mxu0  ;;  %v1055_v51 = vpop.f32.mrf.mxu1 }
  0xe5   : > { %788 = vst.msk [vmem:[%s1241_s23 + $0x38] sm:$0xff] %vm780_vm3, %v1023_v50  ;;  %820 = vst.msk [vmem:[%s1241_s23 + $0x138] sm:$0xff] %vm780_vm3, %v1055_v51 }
  0xe6   : > { %v544_v52 = vpop.f32.mrf.mxu0  ;;  %v672_v53 = vpop.f32.mrf.mxu1 }
  0xe7   : > { %786 = vst.msk [vmem:[%s1241_s23 + $0x28] sm:$0xff] %vm780_vm3, %v544_v52  ;;  %818 = vst.msk [vmem:[%s1241_s23 + $0x128] sm:$0xff] %vm780_vm3, %v672_v53 }
  0xe8   : > { %v1026_v54 = vpop.f32.mrf.mxu0  ;;  %v1058_v55 = vpop.f32.mrf.mxu1 }
  0xe9   : > { %791 = vst.msk [vmem:[%s1241_s23 + $0x50] sm:$0xff] %vm780_vm3, %v1026_v54  ;;  %823 = vst.msk [vmem:[%s1241_s23 + $0x150] sm:$0xff] %vm780_vm3, %v1058_v55 }
  0xea   : > { %v557_v56 = vpop.f32.mrf.mxu0  ;;  %v685_v57 = vpop.f32.mrf.mxu1 }
  0xeb   : > { %789 = vst.msk [vmem:[%s1241_s23 + $0x40] sm:$0xff] %vm780_vm3, %v557_v56  ;;  %821 = vst.msk [vmem:[%s1241_s23 + $0x140] sm:$0xff] %vm780_vm3, %v685_v57 }
  0xec   : > { %v1027_v58 = vpop.f32.mrf.mxu0  ;;  %v1059_v59 = vpop.f32.mrf.mxu1 }
  0xed   : > { %792 = vst.msk [vmem:[%s1241_s23 + $0x58] sm:$0xff] %vm780_vm3, %v1027_v58  ;;  %824 = vst.msk [vmem:[%s1241_s23 + $0x158] sm:$0xff] %vm780_vm3, %v1059_v59 }
  0xee   : > { %v560_v60 = vpop.f32.mrf.mxu0  ;;  %v688_v61 = vpop.f32.mrf.mxu1 }
  0xef   : > { %790 = vst.msk [vmem:[%s1241_s23 + $0x48] sm:$0xff] %vm780_vm3, %v560_v60  ;;  %822 = vst.msk [vmem:[%s1241_s23 + $0x148] sm:$0xff] %vm780_vm3, %v688_v61 }
  0xf0   : > { %v1030_v62 = vpop.f32.mrf.mxu0  ;;  %v1062_v63 = vpop.f32.mrf.mxu1 }
  0xf1   : > { %795 = vst.msk [vmem:[%s1241_s23 + $0x70] sm:$0xff] %vm780_vm3, %v1030_v62  ;;  %827 = vst.msk [vmem:[%s1241_s23 + $0x170] sm:$0xff] %vm780_vm3, %v1062_v63 }
  0xf2   : > { %v573_v0 = vpop.f32.mrf.mxu0  ;;  %v701_v1 = vpop.f32.mrf.mxu1 }
  0xf3   : > { %793 = vst.msk [vmem:[%s1241_s23 + $0x60] sm:$0xff] %vm780_vm3, %v573_v0  ;;  %825 = vst.msk [vmem:[%s1241_s23 + $0x160] sm:$0xff] %vm780_vm3, %v701_v1 }
  0xf4   : > { %v1031_v2 = vpop.f32.mrf.mxu0  ;;  %v1063_v3 = vpop.f32.mrf.mxu1 }
  0xf5   : > { %796 = vst.msk [vmem:[%s1241_s23 + $0x78] sm:$0xff] %vm780_vm3, %v1031_v2  ;;  %828 = vst.msk [vmem:[%s1241_s23 + $0x178] sm:$0xff] %vm780_vm3, %v1063_v3 }
  0xf6   : > { %v576_v4 = vpop.f32.mrf.mxu0  ;;  %v704_v5 = vpop.f32.mrf.mxu1 }
  0xf7   : > { %794 = vst.msk [vmem:[%s1241_s23 + $0x68] sm:$0xff] %vm780_vm3, %v576_v4  ;;  %826 = vst.msk [vmem:[%s1241_s23 + $0x168] sm:$0xff] %vm780_vm3, %v704_v5 }
  0xf8   : > { %v1034_v6 = vpop.f32.mrf.mxu0  ;;  %v1066_v7 = vpop.f32.mrf.mxu1 }
  0xf9   : > { %799 = vst.msk [vmem:[%s1241_s23 + $0x90] sm:$0xff] %vm780_vm3, %v1034_v6  ;;  %831 = vst.msk [vmem:[%s1241_s23 + $0x190] sm:$0xff] %vm780_vm3, %v1066_v7 }
  0xfa   : > { %v589_v8 = vpop.f32.mrf.mxu0  ;;  %v717_v9 = vpop.f32.mrf.mxu1 }
  0xfb   : > { %797 = vst.msk [vmem:[%s1241_s23 + $0x80] sm:$0xff] %vm780_vm3, %v589_v8  ;;  %829 = vst.msk [vmem:[%s1241_s23 + $0x180] sm:$0xff] %vm780_vm3, %v717_v9 }
  0xfc   : > { %v1035_v10 = vpop.f32.mrf.mxu0  ;;  %v1067_v11 = vpop.f32.mrf.mxu1 }
  0xfd   : > { %800 = vst.msk [vmem:[%s1241_s23 + $0x98] sm:$0xff] %vm780_vm3, %v1035_v10  ;;  %832 = vst.msk [vmem:[%s1241_s23 + $0x198] sm:$0xff] %vm780_vm3, %v1067_v11 }
  0xfe   : > { %v592_v12 = vpop.f32.mrf.mxu0  ;;  %v720_v13 = vpop.f32.mrf.mxu1 }
  0xff   : > { %798 = vst.msk [vmem:[%s1241_s23 + $0x88] sm:$0xff] %vm780_vm3, %v592_v12  ;;  %830 = vst.msk [vmem:[%s1241_s23 + $0x188] sm:$0xff] %vm780_vm3, %v720_v13 }
 0x100   : > { %v1038_v14 = vpop.f32.mrf.mxu0  ;;  %v1070_v15 = vpop.f32.mrf.mxu1 }
 0x101   : > { %803 = vst.msk [vmem:[%s1241_s23 + $0xb0] sm:$0xff] %vm780_vm3, %v1038_v14  ;;  %835 = vst.msk [vmem:[%s1241_s23 + $0x1b0] sm:$0xff] %vm780_vm3, %v1070_v15 }
 0x102   : > { %v605_v16 = vpop.f32.mrf.mxu0  ;;  %v733_v17 = vpop.f32.mrf.mxu1 }
 0x103   : > { %801 = vst.msk [vmem:[%s1241_s23 + $0xa0] sm:$0xff] %vm780_vm3, %v605_v16  ;;  %833 = vst.msk [vmem:[%s1241_s23 + $0x1a0] sm:$0xff] %vm780_vm3, %v733_v17 }
 0x104   : > { %v1039_v18 = vpop.f32.mrf.mxu0  ;;  %v1071_v19 = vpop.f32.mrf.mxu1 }
 0x105   : > { %804 = vst.msk [vmem:[%s1241_s23 + $0xb8] sm:$0xff] %vm780_vm3, %v1039_v18  ;;  %836 = vst.msk [vmem:[%s1241_s23 + $0x1b8] sm:$0xff] %vm780_vm3, %v1071_v19 }
 0x106   : > { %v608_v20 = vpop.f32.mrf.mxu0  ;;  %v736_v21 = vpop.f32.mrf.mxu1 }
 0x107   : > { %802 = vst.msk [vmem:[%s1241_s23 + $0xa8] sm:$0xff] %vm780_vm3, %v608_v20  ;;  %834 = vst.msk [vmem:[%s1241_s23 + $0x1a8] sm:$0xff] %vm780_vm3, %v736_v21 }
 0x108   : > { %v1042_v22 = vpop.f32.mrf.mxu0  ;;  %v1074_v23 = vpop.f32.mrf.mxu1 }
 0x109   : > { %807 = vst.msk [vmem:[%s1241_s23 + $0xd0] sm:$0xff] %vm780_vm3, %v1042_v22  ;;  %839 = vst.msk [vmem:[%s1241_s23 + $0x1d0] sm:$0xff] %vm780_vm3, %v1074_v23 }
 0x10a   : > { %v621_v24 = vpop.f32.mrf.mxu0  ;;  %v749_v25 = vpop.f32.mrf.mxu1 }
 0x10b   : > { %805 = vst.msk [vmem:[%s1241_s23 + $0xc0] sm:$0xff] %vm780_vm3, %v621_v24  ;;  %837 = vst.msk [vmem:[%s1241_s23 + $0x1c0] sm:$0xff] %vm780_vm3, %v749_v25 }
 0x10c   : > { %v1043_v26 = vpop.f32.mrf.mxu0  ;;  %v1075_v27 = vpop.f32.mrf.mxu1 }
 0x10d   : > { %808 = vst.msk [vmem:[%s1241_s23 + $0xd8] sm:$0xff] %vm780_vm3, %v1043_v26  ;;  %840 = vst.msk [vmem:[%s1241_s23 + $0x1d8] sm:$0xff] %vm780_vm3, %v1075_v27 }
 0x10e   : > { %v624_v28 = vpop.f32.mrf.mxu0  ;;  %v752_v29 = vpop.f32.mrf.mxu1 }
 0x10f   : > { %806 = vst.msk [vmem:[%s1241_s23 + $0xc8] sm:$0xff] %vm780_vm3, %v624_v28  ;;  %838 = vst.msk [vmem:[%s1241_s23 + $0x1c8] sm:$0xff] %vm780_vm3, %v752_v29 }
 0x110   : > { %v1046_v30 = vpop.f32.mrf.mxu0  ;;  %v1078_v31 = vpop.f32.mrf.mxu1 }
 0x111   : > { %811 = vst.msk [vmem:[%s1241_s23 + $0xf0] sm:$0xff] %vm780_vm3, %v1046_v30  ;;  %843 = vst.msk [vmem:[%s1241_s23 + $0x1f0] sm:$0xff] %vm780_vm3, %v1078_v31 }
 0x112   : > { %v637_v32 = vpop.f32.mrf.mxu0  ;;  %v765_v33 = vpop.f32.mrf.mxu1 }
 0x113   : > { %809 = vst.msk [vmem:[%s1241_s23 + $0xe0] sm:$0xff] %vm780_vm3, %v637_v32  ;;  %841 = vst.msk [vmem:[%s1241_s23 + $0x1e0] sm:$0xff] %vm780_vm3, %v765_v33 }
 0x114   : > { %v1047_v34 = vpop.f32.mrf.mxu0  ;;  %v1079_v35 = vpop.f32.mrf.mxu1 }
 0x115   : > { %812 = vst.msk [vmem:[%s1241_s23 + $0xf8] sm:$0xff] %vm780_vm3, %v1047_v34  ;;  %844 = vst.msk [vmem:[%s1241_s23 + $0x1f8] sm:$0xff] %vm780_vm3, %v1079_v35 }
 0x116   : > { %v640_v36 = vpop.f32.mrf.mxu0  ;;  %v768_v37 = vpop.f32.mrf.mxu1 }
 0x117   : > { %810 = vst.msk [vmem:[%s1241_s23 + $0xe8] sm:$0xff] %vm780_vm3, %v640_v36  ;;  %842 = vst.msk [vmem:[%s1241_s23 + $0x1e8] sm:$0xff] %vm780_vm3, %v768_v37 }
 0x118 PF: > { %s12_s9 = sadd.s32 1, %s1133_s9  }
 0x119   : > { %p9_p4 = scmp.ge.s32.totalorder %s12_s9, 10  }
 0x11b   :  { %11 = sbr.rel (!%p9_p4) target bundleno = 1 (0x1), region = 58 }

// kernel: forward.17
= control target key start
LH: loop header
LB: loop body
LE: loop exit
PB: predicated region body
PF: predicated region fallthrough
CT: control target
= control target key end

     0   :  { %s1480_s9 = smov 0   ;;  %s1802_s0 = inlined_call_operand.vmem [shape: bf16[4096,216], index: 0, kind: input, shape index: {}]   ;;  %s1803_s1 = inlined_call_operand.vmem [shape: bf16[216,16], index: 1, kind: input, shape index: {}]   ;;  %s1804_s2 = inlined_call_operand.vmem [shape: f32[4096,16], index: 2, kind: output, shape index: {}]  }
   0x1 LB: > { %s1186_s10 = sadd.s32 4294967295, %s1462_s9   ;;  %p1190_p0 = scmp.ge.s32.totalorder %s1462_s9, 1  ;;  %s1462_s9 = sphi %s1480_s9, %s12_s9  }
   0x2   : > { %p114_p1 = scmp.lt.s32.totalorder %s1462_s9, 9 }
   0x4   : > { %p115_p2 = pnand %p1190_p0, %p114_p1 }
   0x5   : > { %s1191_s15 = sshll.u32 (!%p115_p2), %s1186_s10, 6 }
   0x6   : > { %118 = sbr.rel (%p115_p2) target bundleno = 388 (0x184), region = 28  ;;  %p138_p3 = scmp.lt.s32.totalorder (!%p115_p2), %s1191_s15, 511 }
   0xb   : > { %v1346_v0 = vld [vmem:[%s1803_s1 + $0x38] sm:$0xff]   ;;  %v1464_v1 = vmov 0   ;;  %v1347_v2 = vld [vmem:[%s1803_s1 + $0x30] sm:$0xff]   ;;  %s1806_s15 = smov (!%p138_p3, %s1191_s15), 511  ;;  %v1348_v3 = vld [vmem:[%s1803_s1 + $0x28] sm:$0xff]   ;;  %vm611_vm0 = vcmask 719872  }
   0xc   : > { %712 = vmatprep.subr.bf16.mxu0 %v1464_v1  ;;  %1309 = vmatprep.subr.bf16.mxu1 %v1464_v1  ;;  %s1308_s18 = sshll.u32 %s1806_s15, 3  ;;  %v1349_v4 = vld [vmem:[%s1803_s1 + $0x20] sm:$0xff]   ;;  %v1350_v5 = vld [vmem:[%s1803_s1 + $0x18] sm:$0xff]   ;;  %v1351_v8 = vld [vmem:[%s1803_s1 + $0x10] sm:$0xff]   ;;  %vm708_vm1 = vcmask 1043456   ;;  %vm1065_vm2 = vcmask 130048  }
   0xd   : > { %713 = vmatpush1.bf16.msra.mxu0 %v1346_v0  ;;  %1323 = vmatpush1.bf16.msra.mxu1 %v1346_v0  ;;  %s1516_s23 = scalar_lea.vmem %s1802_s0, %s1308_s18  ;;  %v1352_v9 = vld [vmem:[%s1803_s1 + $0x8] sm:$0xff]   ;;  %v1353_v10 = vld [vmem:[%s1803_s1] sm:$0xff]   ;;  %v1356_v14 = vld [vmem:[%s1803_s1 + $0x58] sm:$0xff]   ;;  %s1669_s21 = scalar_lea.vmem %s1804_s2, %s1308_s18 }
   0xe   : > { %714 = vmatprep.subr.bf16.mxu0 %v1464_v1  ;;  %1310 = vmatprep.subr.bf16.mxu1 %v1464_v1  ;;  %v1362_v6 = vld [vmem:[%s1516_s23 + $0x4] ss:$8 sps:$4 sm:$0xff]   ;;  %v1354_v11 = vld [vmem:[%s1803_s1 + $0x68] ss:$0 sps:$4 sm:$0xff]   ;;  %v1357_v15 = vld [vmem:[%s1803_s1 + $0x50] sm:$0xff]  }
   0xf   : > { %1274 = vmatprep.mubr.msk.bf16.mxu0 %vm611_vm0, %v1362_v6  ;;  %v1365_v7 = vld [vmem:[%s1516_s23 + $0x104] ss:$8 sps:$4 sm:$0xff]   ;;  %v710_v12 = vsel %vm708_vm1, %v1354_v11, 0  ;;  %v1360_v18 = vld [vmem:[%s1516_s23] ss:$8 sps:$4 sm:$0xff]  }
  0x10   : > { %1290 = vmatprep.mubr.msk.bf16.mxu1 %vm611_vm0, %v1365_v7  ;;  %v1355_v13 = vld [vmem:[%s1803_s1 + $0x60] sm:$0xff]   ;;  %v1358_v16 = vld [vmem:[%s1803_s1 + $0x48] sm:$0xff]   ;;  %v1366_v20 = vld [vmem:[%s1516_s23 + $0x14] ss:$8 sps:$4 sm:$0xff]  }
  0x11   : > { %715 = vmatpush1.bf16.msra.mxu0 %v1347_v2  ;;  %1324 = vmatpush1.bf16.msra.mxu1 %v1347_v2  ;;  %v1359_v17 = vld [vmem:[%s1803_s1 + $0x40] sm:$0xff]   ;;  %v1368_v21 = vld [vmem:[%s1516_s23 + $0x114] ss:$8 sps:$4 sm:$0xff]   ;;  %v1370_v22 = vld [vmem:[%s1516_s23 + $0x10] ss:$8 sps:$4 sm:$0xff]  }
  0x12   : > { %716 = vmatprep.subr.bf16.mxu0 %v1464_v1  ;;  %1311 = vmatprep.subr.bf16.mxu1 %v1464_v1  ;;  %v1363_v19 = vld [vmem:[%s1516_s23 + $0x100] ss:$8 sps:$4 sm:$0xff]   ;;  %v1371_v23 = vld [vmem:[%s1516_s23 + $0x110] ss:$8 sps:$4 sm:$0xff]   ;;  %v1372_v24 = vld [vmem:[%s1516_s23 + $0x24] ss:$8 sps:$4 sm:$0xff]  }
  0x13   : > { %v1374_v25 = vld [vmem:[%s1516_s23 + $0x124] ss:$8 sps:$4 sm:$0xff]   ;;  %v1376_v26 = vld [vmem:[%s1516_s23 + $0x20] ss:$8 sps:$4 sm:$0xff]   ;;  %v1378_v28 = vld [vmem:[%s1516_s23 + $0x34] ss:$8 sps:$4 sm:$0xff]  }
  0x14   : > { %v1377_v27 = vld [vmem:[%s1516_s23 + $0x120] ss:$8 sps:$4 sm:$0xff]   ;;  %v1380_v29 = vld [vmem:[%s1516_s23 + $0x134] ss:$8 sps:$4 sm:$0xff]   ;;  %v1382_v30 = vld [vmem:[%s1516_s23 + $0x30] ss:$8 sps:$4 sm:$0xff]  }
  0x15   : > { %717 = vmatpush1.bf16.msra.mxu0 %v1348_v3  ;;  %1325 = vmatpush1.bf16.msra.mxu1 %v1348_v3  ;;  %v1383_v31 = vld [vmem:[%s1516_s23 + $0x130] ss:$8 sps:$4 sm:$0xff]   ;;  %v1384_v32 = vld [vmem:[%s1516_s23 + $0x44] ss:$8 sps:$4 sm:$0xff]   ;;  %v1388_v34 = vld [vmem:[%s1516_s23 + $0x40] ss:$8 sps:$4 sm:$0xff]  }
  0x16   : > { %718 = vmatprep.subr.bf16.mxu0 %v1464_v1  ;;  %1312 = vmatprep.subr.bf16.mxu1 %v1464_v1  ;;  %v1386_v33 = vld [vmem:[%s1516_s23 + $0x144] ss:$8 sps:$4 sm:$0xff]   ;;  %v1389_v35 = vld [vmem:[%s1516_s23 + $0x140] ss:$8 sps:$4 sm:$0xff]   ;;  %v1390_v36 = vld [vmem:[%s1516_s23 + $0x54] ss:$8 sps:$4 sm:$0xff]  }
  0x17   : > { %v1392_v37 = vld [vmem:[%s1516_s23 + $0x154] ss:$8 sps:$4 sm:$0xff]   ;;  %v1394_v38 = vld [vmem:[%s1516_s23 + $0x50] ss:$8 sps:$4 sm:$0xff]   ;;  %v1396_v40 = vld [vmem:[%s1516_s23 + $0x64] ss:$8 sps:$4 sm:$0xff]  }
  0x18   : > { %v1395_v39 = vld [vmem:[%s1516_s23 + $0x150] ss:$8 sps:$4 sm:$0xff]   ;;  %v1398_v41 = vld [vmem:[%s1516_s23 + $0x164] ss:$8 sps:$4 sm:$0xff]   ;;  %v1400_v42 = vld [vmem:[%s1516_s23 + $0x60] ss:$8 sps:$4 sm:$0xff]  }
  0x19   : > { %719 = vmatpush1.bf16.msra.mxu0 %v1349_v4  ;;  %1326 = vmatpush1.bf16.msra.mxu1 %v1349_v4  ;;  %v1401_v43 = vld [vmem:[%s1516_s23 + $0x160] ss:$8 sps:$4 sm:$0xff]   ;;  %v1402_v44 = vld [vmem:[%s1516_s23 + $0x74] ss:$8 sps:$4 sm:$0xff]   ;;  %v1406_v46 = vld [vmem:[%s1516_s23 + $0x70] ss:$8 sps:$4 sm:$0xff]  }
  0x1a   : > { %720 = vmatprep.subr.bf16.mxu0 %v1464_v1  ;;  %1313 = vmatprep.subr.bf16.mxu1 %v1464_v1  ;;  %v1404_v45 = vld [vmem:[%s1516_s23 + $0x174] ss:$8 sps:$4 sm:$0xff]   ;;  %v1407_v47 = vld [vmem:[%s1516_s23 + $0x170] ss:$8 sps:$4 sm:$0xff]   ;;  %v1408_v48 = vld [vmem:[%s1516_s23 + $0x84] ss:$8 sps:$4 sm:$0xff]  }
  0x1b   : > { %v1410_v49 = vld [vmem:[%s1516_s23 + $0x184] ss:$8 sps:$4 sm:$0xff]   ;;  %v1412_v50 = vld [vmem:[%s1516_s23 + $0x80] ss:$8 sps:$4 sm:$0xff]   ;;  %v1414_v52 = vld [vmem:[%s1516_s23 + $0x94] ss:$8 sps:$4 sm:$0xff]  }
  0x1c   : > { %v1413_v51 = vld [vmem:[%s1516_s23 + $0x180] ss:$8 sps:$4 sm:$0xff]   ;;  %v1416_v53 = vld [vmem:[%s1516_s23 + $0x194] ss:$8 sps:$4 sm:$0xff]   ;;  %v1418_v54 = vld [vmem:[%s1516_s23 + $0x90] ss:$8 sps:$4 sm:$0xff]  }
  0x1d   : > { %721 = vmatpush1.bf16.msra.mxu0 %v1350_v5  ;;  %1327 = vmatpush1.bf16.msra.mxu1 %v1350_v5  ;;  %v1419_v55 = vld [vmem:[%s1516_s23 + $0x190] ss:$8 sps:$4 sm:$0xff]   ;;  %v1420_v56 = vld [vmem:[%s1516_s23 + $0xa4] ss:$8 sps:$4 sm:$0xff]   ;;  %v1424_v58 = vld [vmem:[%s1516_s23 + $0xa0] ss:$8 sps:$4 sm:$0xff]  }
  0x1e   : > { %722 = vmatprep.subr.bf16.mxu0 %v1464_v1  ;;  %1314 = vmatprep.subr.bf16.mxu1 %v1464_v1  ;;  %v1422_v57 = vld [vmem:[%s1516_s23 + $0x1a4] ss:$8 sps:$4 sm:$0xff]   ;;  %v1425_v59 = vld [vmem:[%s1516_s23 + $0x1a0] ss:$8 sps:$4 sm:$0xff]   ;;  %v1426_v60 = vld [vmem:[%s1516_s23 + $0xb4] ss:$8 sps:$4 sm:$0xff]  }
  0x1f   : > { %v1428_v61 = vld [vmem:[%s1516_s23 + $0x1b4] ss:$8 sps:$4 sm:$0xff]   ;;  %v1430_v62 = vld [vmem:[%s1516_s23 + $0xb0] ss:$8 sps:$4 sm:$0xff]   ;;  %v1432_v0 = vld [vmem:[%s1516_s23 + $0xc4] ss:$8 sps:$4 sm:$0xff]  }
  0x20   : > { %v1431_v63 = vld [vmem:[%s1516_s23 + $0x1b0] ss:$8 sps:$4 sm:$0xff]   ;;  %v1436_v2 = vld [vmem:[%s1516_s23 + $0xc0] ss:$8 sps:$4 sm:$0xff]   ;;  %v1438_v4 = vld [vmem:[%s1516_s23 + $0xd4] ss:$8 sps:$4 sm:$0xff]  }
  0x21   : > { %723 = vmatpush1.bf16.msra.mxu0 %v1351_v8  ;;  %1328 = vmatpush1.bf16.msra.mxu1 %v1351_v8  ;;  %v1437_v3 = vld [vmem:[%s1516_s23 + $0x1c0] ss:$8 sps:$4 sm:$0xff]   ;;  %v1440_v5 = vld [vmem:[%s1516_s23 + $0x1d4] ss:$8 sps:$4 sm:$0xff]   ;;  %v1442_v6 = vld [vmem:[%s1516_s23 + $0xd0] ss:$8 sps:$4 sm:$0xff]  }
  0x22   : > { %724 = vmatprep.subr.bf16.mxu0 %v1464_v1  ;;  %1315 = vmatprep.subr.bf16.mxu1 %v1464_v1  ;;  %v1443_v7 = vld [vmem:[%s1516_s23 + $0x1d0] ss:$8 sps:$4 sm:$0xff]   ;;  %v1444_v8 = vld [vmem:[%s1516_s23 + $0xe4] ss:$8 sps:$4 sm:$0xff]   ;;  %v1449_v11 = vld [vmem:[%s1516_s23 + $0x1e0] ss:$8 sps:$4 sm:$0xff]  }
  0x25   : > { %725 = vmatpush1.bf16.msra.mxu0 %v1352_v9  ;;  %1329 = vmatpush1.bf16.msra.mxu1 %v1352_v9  ;;  %v1446_v9 = vld [vmem:[%s1516_s23 + $0x1e4] ss:$8 sps:$4 sm:$0xff]  }
  0x26   : > { %726 = vmatprep.subr.bf16.mxu0 %v1464_v1  ;;  %1316 = vmatprep.subr.bf16.mxu1 %v1464_v1 }
  0x29   : > { %727 = vmatpush1.bf16.msra.mxu0 %v1353_v10  ;;  %1330 = vmatpush1.bf16.msra.mxu1 %v1353_v10  ;;  %v1448_v10 = vld [vmem:[%s1516_s23 + $0xe0] ss:$8 sps:$4 sm:$0xff]  }
  0x2a   : > { %732 = vmatprep.subr.bf16.mxu0 %v1464_v1  ;;  %1317 = vmatprep.subr.bf16.mxu1 %v1464_v1 }
  0x2d   : > { %733 = vmatpush2.bf16.msra.mxu0 %v710_v12  ;;  %1331 = vmatpush2.bf16.msra.mxu1 %v710_v12  ;;  %v1450_v12 = vld [vmem:[%s1516_s23 + $0xf4] ss:$8 sps:$4 sm:$0xff]  }
  0x2e   : > { %734 = vmatprep.subr.bf16.mxu0 %v1464_v1  ;;  %1318 = vmatprep.subr.bf16.mxu1 %v1464_v1 }
  0x31   : > { %735 = vmatpush2.bf16.msra.mxu0 %v1355_v13  ;;  %1332 = vmatpush2.bf16.msra.mxu1 %v1355_v13  ;;  %v1452_v13 = vld [vmem:[%s1516_s23 + $0x1f4] ss:$8 sps:$4 sm:$0xff]  }
  0x32   : > { %736 = vmatprep.subr.bf16.mxu0 %v1464_v1  ;;  %1319 = vmatprep.subr.bf16.mxu1 %v1464_v1 }
  0x35   : > { %737 = vmatpush2.bf16.msra.mxu0 %v1356_v14  ;;  %1333 = vmatpush2.bf16.msra.mxu1 %v1356_v14  ;;  %v1454_v14 = vld [vmem:[%s1516_s23 + $0xf0] ss:$8 sps:$4 sm:$0xff]  }
  0x36   : > { %738 = vmatprep.subr.bf16.mxu0 %v1464_v1  ;;  %1320 = vmatprep.subr.bf16.mxu1 %v1464_v1 }
  0x39   : > { %739 = vmatpush2.bf16.msra.mxu0 %v1357_v15  ;;  %1334 = vmatpush2.bf16.msra.mxu1 %v1357_v15  ;;  %v1455_v15 = vld [vmem:[%s1516_s23 + $0x1f0] ss:$8 sps:$4 sm:$0xff]  }
  0x3a   : > { %740 = vmatprep.subr.bf16.mxu0 %v1464_v1  ;;  %1321 = vmatprep.subr.bf16.mxu1 %v1464_v1 }
  0x3d   : > { %741 = vmatpush2.bf16.msra.mxu0 %v1358_v16  ;;  %1335 = vmatpush2.bf16.msra.mxu1 %v1358_v16 }
  0x3e   : > { %742 = vmatprep.subr.bf16.mxu0 %v1464_v1  ;;  %1322 = vmatprep.subr.bf16.mxu1 %v1464_v1  ;;  %v1434_v1 = vld [vmem:[%s1516_s23 + $0x1c4] ss:$8 sps:$4 sm:$0xff]  }
  0x41   : > { %743 = vmatpush2.bf16.msra.mxu0 %v1359_v17  ;;  %1336 = vmatpush2.bf16.msra.mxu1 %v1359_v17 }
  0x44   : > { %745 = vmatmul.mubr.bf16.vlgmr.msra.gmra.mxu0 %v1360_v18  ;;  %873 = vmatmul.mubr.bf16.vlgmr.msra.gmra.mxu1 %v1363_v19 }
  0x45   : > { %1275 = vmatprep.mubr.msk.bf16.mxu0 %vm611_vm0, %v1366_v20  ;;  %1291 = vmatprep.mubr.msk.bf16.mxu1 %vm611_vm0, %v1368_v21 }
  0x4c   : > { %753 = vmatmul.mubr.bf16.gmra.mxu0 %v1370_v22  ;;  %881 = vmatmul.mubr.bf16.gmra.mxu1 %v1371_v23 }
  0x4d   : > { %1276 = vmatprep.mubr.msk.bf16.mxu0 %vm611_vm0, %v1372_v24  ;;  %1292 = vmatprep.mubr.msk.bf16.mxu1 %vm611_vm0, %v1374_v25 }
  0x54   : > { %761 = vmatmul.mubr.bf16.gmra.mxu0 %v1376_v26  ;;  %889 = vmatmul.mubr.bf16.gmra.mxu1 %v1377_v27 }
  0x55   : > { %1277 = vmatprep.mubr.msk.bf16.mxu0 %vm611_vm0, %v1378_v28  ;;  %1293 = vmatprep.mubr.msk.bf16.mxu1 %vm611_vm0, %v1380_v29 }
  0x5c   : > { %769 = vmatmul.mubr.bf16.gmra.mxu0 %v1382_v30  ;;  %897 = vmatmul.mubr.bf16.gmra.mxu1 %v1383_v31 }
  0x5d   : > { %1278 = vmatprep.mubr.msk.bf16.mxu0 %vm611_vm0, %v1384_v32  ;;  %1294 = vmatprep.mubr.msk.bf16.mxu1 %vm611_vm0, %v1386_v33 }
  0x64   : > { %777 = vmatmul.mubr.bf16.gmra.mxu0 %v1388_v34  ;;  %905 = vmatmul.mubr.bf16.gmra.mxu1 %v1389_v35 }
  0x65   : > { %1279 = vmatprep.mubr.msk.bf16.mxu0 %vm611_vm0, %v1390_v36  ;;  %1295 = vmatprep.mubr.msk.bf16.mxu1 %vm611_vm0, %v1392_v37 }
  0x6c   : > { %785 = vmatmul.mubr.bf16.gmra.mxu0 %v1394_v38  ;;  %913 = vmatmul.mubr.bf16.gmra.mxu1 %v1395_v39 }
  0x6d   : > { %1280 = vmatprep.mubr.msk.bf16.mxu0 %vm611_vm0, %v1396_v40  ;;  %1296 = vmatprep.mubr.msk.bf16.mxu1 %vm611_vm0, %v1398_v41 }
  0x74   : > { %793 = vmatmul.mubr.bf16.gmra.mxu0 %v1400_v42  ;;  %921 = vmatmul.mubr.bf16.gmra.mxu1 %v1401_v43 }
  0x75   : > { %1281 = vmatprep.mubr.msk.bf16.mxu0 %vm611_vm0, %v1402_v44  ;;  %1297 = vmatprep.mubr.msk.bf16.mxu1 %vm611_vm0, %v1404_v45 }
  0x7c   : > { %801 = vmatmul.mubr.bf16.gmra.mxu0 %v1406_v46  ;;  %929 = vmatmul.mubr.bf16.gmra.mxu1 %v1407_v47 }
  0x7d   : > { %1282 = vmatprep.mubr.msk.bf16.mxu0 %vm611_vm0, %v1408_v48  ;;  %1298 = vmatprep.mubr.msk.bf16.mxu1 %vm611_vm0, %v1410_v49 }
  0x84   : > { %809 = vmatmul.mubr.bf16.gmra.mxu0 %v1412_v50  ;;  %937 = vmatmul.mubr.bf16.gmra.mxu1 %v1413_v51 }
  0x85   : > { %1283 = vmatprep.mubr.msk.bf16.mxu0 %vm611_vm0, %v1414_v52  ;;  %1299 = vmatprep.mubr.msk.bf16.mxu1 %vm611_vm0, %v1416_v53 }
  0x8c   : > { %817 = vmatmul.mubr.bf16.gmra.mxu0 %v1418_v54  ;;  %945 = vmatmul.mubr.bf16.gmra.mxu1 %v1419_v55 }
  0x8d   : > { %1284 = vmatprep.mubr.msk.bf16.mxu0 %vm611_vm0, %v1420_v56  ;;  %1300 = vmatprep.mubr.msk.bf16.mxu1 %vm611_vm0, %v1422_v57 }
  0x94   : > { %825 = vmatmul.mubr.bf16.gmra.mxu0 %v1424_v58  ;;  %953 = vmatmul.mubr.bf16.gmra.mxu1 %v1425_v59 }
  0x95   : > { %1285 = vmatprep.mubr.msk.bf16.mxu0 %vm611_vm0, %v1426_v60  ;;  %1301 = vmatprep.mubr.msk.bf16.mxu1 %vm611_vm0, %v1428_v61 }
  0x9c   : > { %833 = vmatmul.mubr.bf16.gmra.mxu0 %v1430_v62  ;;  %961 = vmatmul.mubr.bf16.gmra.mxu1 %v1431_v63 }
  0x9d   : > { %1286 = vmatprep.mubr.msk.bf16.mxu0 %vm611_vm0, %v1432_v0  ;;  %1302 = vmatprep.mubr.msk.bf16.mxu1 %vm611_vm0, %v1434_v1 }
  0xa4   : > { %841 = vmatmul.mubr.bf16.gmra.mxu0 %v1436_v2  ;;  %969 = vmatmul.mubr.bf16.gmra.mxu1 %v1437_v3 }
  0xa5   : > { %1287 = vmatprep.mubr.msk.bf16.mxu0 %vm611_vm0, %v1438_v4  ;;  %1303 = vmatprep.mubr.msk.bf16.mxu1 %vm611_vm0, %v1440_v5 }
  0xac   : > { %849 = vmatmul.mubr.bf16.gmra.mxu0 %v1442_v6  ;;  %977 = vmatmul.mubr.bf16.gmra.mxu1 %v1443_v7 }
  0xad   : > { %1288 = vmatprep.mubr.msk.bf16.mxu0 %vm611_vm0, %v1444_v8  ;;  %1304 = vmatprep.mubr.msk.bf16.mxu1 %vm611_vm0, %v1446_v9 }
  0xb4   : > { %857 = vmatmul.mubr.bf16.gmra.mxu0 %v1448_v10  ;;  %985 = vmatmul.mubr.bf16.gmra.mxu1 %v1449_v11 }
  0xb5   : > { %1289 = vmatprep.mubr.msk.bf16.mxu0 %vm611_vm0, %v1450_v12  ;;  %1305 = vmatprep.mubr.msk.bf16.mxu1 %vm611_vm0, %v1452_v13 }
  0xbc   : > { %865 = vmatmul.mubr.bf16.gmra.mxu0 %v1454_v14  ;;  %993 = vmatmul.mubr.bf16.gmra.mxu1 %v1455_v15 }
 0x104   : > { %v746_v16 = vpop.f32.mrf.mxu0  ;;  %v874_v17 = vpop.f32.mrf.mxu1 }
 0x105   : > { %v1001_v18 = vmax.f32 %v746_v16, 0.0  ;;  %v1033_v19 = vmax.f32 %v874_v17, 0.0 }
 0x106   : > { %v748_v20 = vpop.f32.mrf.mxu0  ;;  %v876_v21 = vpop.f32.mrf.mxu1 }
 0x107   : > { %1066 = vst.msk [vmem:[%s1669_s21] sm:$0xff] %vm1065_vm2, %v1001_v18  ;;  %1098 = vst.msk [vmem:[%s1669_s21 + $0x100] sm:$0xff] %vm1065_vm2, %v1033_v19 }
 0x108   : > { %v749_v22 = vpop.f32.mrf.mxu0  ;;  %v877_v23 = vpop.f32.mrf.mxu1 }
 0x109   : > { %v1002_v24 = vmax.f32 %v749_v22, 0.0  ;;  %v1034_v25 = vmax.f32 %v877_v23, 0.0 }
 0x10a   : > { %v751_v26 = vpop.f32.mrf.mxu0  ;;  %v879_v27 = vpop.f32.mrf.mxu1 }
 0x10b   : > { %1067 = vst.msk [vmem:[%s1669_s21 + $0x8] sm:$0xff] %vm1065_vm2, %v1002_v24  ;;  %1099 = vst.msk [vmem:[%s1669_s21 + $0x108] sm:$0xff] %vm1065_vm2, %v1034_v25 }
 0x10c   : > { %v754_v28 = vpop.f32.mrf.mxu0  ;;  %v882_v29 = vpop.f32.mrf.mxu1 }
 0x10d   : > { %v1003_v30 = vmax.f32 %v754_v28, 0.0  ;;  %v1035_v31 = vmax.f32 %v882_v29, 0.0 }
 0x10e   : > { %v756_v32 = vpop.f32.mrf.mxu0  ;;  %v884_v33 = vpop.f32.mrf.mxu1 }
 0x10f   : > { %1068 = vst.msk [vmem:[%s1669_s21 + $0x10] sm:$0xff] %vm1065_vm2, %v1003_v30  ;;  %1100 = vst.msk [vmem:[%s1669_s21 + $0x110] sm:$0xff] %vm1065_vm2, %v1035_v31 }
 0x110   : > { %v757_v34 = vpop.f32.mrf.mxu0  ;;  %v885_v35 = vpop.f32.mrf.mxu1 }
 0x111   : > { %v1004_v36 = vmax.f32 %v757_v34, 0.0  ;;  %v1036_v37 = vmax.f32 %v885_v35, 0.0 }
 0x112   : > { %v759_v38 = vpop.f32.mrf.mxu0  ;;  %v887_v39 = vpop.f32.mrf.mxu1 }
 0x113   : > { %1069 = vst.msk [vmem:[%s1669_s21 + $0x18] sm:$0xff] %vm1065_vm2, %v1004_v36  ;;  %1101 = vst.msk [vmem:[%s1669_s21 + $0x118] sm:$0xff] %vm1065_vm2, %v1036_v37 }
 0x114   : > { %v762_v40 = vpop.f32.mrf.mxu0  ;;  %v890_v41 = vpop.f32.mrf.mxu1 }
 0x115   : > { %v1005_v42 = vmax.f32 %v762_v40, 0.0  ;;  %v1037_v43 = vmax.f32 %v890_v41, 0.0 }
 0x116   : > { %v764_v44 = vpop.f32.mrf.mxu0  ;;  %v892_v45 = vpop.f32.mrf.mxu1 }
 0x117   : > { %1070 = vst.msk [vmem:[%s1669_s21 + $0x20] sm:$0xff] %vm1065_vm2, %v1005_v42  ;;  %1102 = vst.msk [vmem:[%s1669_s21 + $0x120] sm:$0xff] %vm1065_vm2, %v1037_v43 }
 0x118   : > { %v765_v46 = vpop.f32.mrf.mxu0  ;;  %v893_v47 = vpop.f32.mrf.mxu1 }
 0x119   : > { %v1006_v48 = vmax.f32 %v765_v46, 0.0  ;;  %v1038_v49 = vmax.f32 %v893_v47, 0.0 }
 0x11a   : > { %v767_v50 = vpop.f32.mrf.mxu0  ;;  %v895_v51 = vpop.f32.mrf.mxu1 }
 0x11b   : > { %1071 = vst.msk [vmem:[%s1669_s21 + $0x28] sm:$0xff] %vm1065_vm2, %v1006_v48  ;;  %1103 = vst.msk [vmem:[%s1669_s21 + $0x128] sm:$0xff] %vm1065_vm2, %v1038_v49 }
 0x11c   : > { %v770_v52 = vpop.f32.mrf.mxu0  ;;  %v898_v53 = vpop.f32.mrf.mxu1 }
 0x11d   : > { %v1007_v54 = vmax.f32 %v770_v52, 0.0  ;;  %v1039_v55 = vmax.f32 %v898_v53, 0.0 }
 0x11e   : > { %v772_v56 = vpop.f32.mrf.mxu0  ;;  %v900_v57 = vpop.f32.mrf.mxu1 }
 0x11f   : > { %1072 = vst.msk [vmem:[%s1669_s21 + $0x30] sm:$0xff] %vm1065_vm2, %v1007_v54  ;;  %1104 = vst.msk [vmem:[%s1669_s21 + $0x130] sm:$0xff] %vm1065_vm2, %v1039_v55 }
 0x120   : > { %v773_v58 = vpop.f32.mrf.mxu0  ;;  %v901_v59 = vpop.f32.mrf.mxu1 }
 0x121   : > { %v1008_v60 = vmax.f32 %v773_v58, 0.0  ;;  %v1040_v61 = vmax.f32 %v901_v59, 0.0 }
 0x122   : > { %v775_v62 = vpop.f32.mrf.mxu0  ;;  %v903_v63 = vpop.f32.mrf.mxu1 }
 0x123   : > { %1073 = vst.msk [vmem:[%s1669_s21 + $0x38] sm:$0xff] %vm1065_vm2, %v1008_v60  ;;  %1105 = vst.msk [vmem:[%s1669_s21 + $0x138] sm:$0xff] %vm1065_vm2, %v1040_v61 }
 0x124   : > { %v778_v0 = vpop.f32.mrf.mxu0  ;;  %v906_v1 = vpop.f32.mrf.mxu1 }
 0x125   : > { %v1009_v2 = vmax.f32 %v778_v0, 0.0  ;;  %v1041_v3 = vmax.f32 %v906_v1, 0.0 }
 0x126   : > { %v780_v4 = vpop.f32.mrf.mxu0  ;;  %v908_v5 = vpop.f32.mrf.mxu1 }
 0x127   : > { %1074 = vst.msk [vmem:[%s1669_s21 + $0x40] sm:$0xff] %vm1065_vm2, %v1009_v2  ;;  %1106 = vst.msk [vmem:[%s1669_s21 + $0x140] sm:$0xff] %vm1065_vm2, %v1041_v3 }
 0x128   : > { %v781_v6 = vpop.f32.mrf.mxu0  ;;  %v909_v7 = vpop.f32.mrf.mxu1 }
 0x129   : > { %v1010_v8 = vmax.f32 %v781_v6, 0.0  ;;  %v1042_v9 = vmax.f32 %v909_v7, 0.0 }
 0x12a   : > { %v783_v10 = vpop.f32.mrf.mxu0  ;;  %v911_v11 = vpop.f32.mrf.mxu1 }
 0x12b   : > { %1075 = vst.msk [vmem:[%s1669_s21 + $0x48] sm:$0xff] %vm1065_vm2, %v1010_v8  ;;  %1107 = vst.msk [vmem:[%s1669_s21 + $0x148] sm:$0xff] %vm1065_vm2, %v1042_v9 }
 0x12c   : > { %v786_v12 = vpop.f32.mrf.mxu0  ;;  %v914_v13 = vpop.f32.mrf.mxu1 }
 0x12d   : > { %v1011_v14 = vmax.f32 %v786_v12, 0.0  ;;  %v1043_v15 = vmax.f32 %v914_v13, 0.0 }
 0x12e   : > { %v788_v16 = vpop.f32.mrf.mxu0  ;;  %v916_v17 = vpop.f32.mrf.mxu1 }
 0x12f   : > { %1076 = vst.msk [vmem:[%s1669_s21 + $0x50] sm:$0xff] %vm1065_vm2, %v1011_v14  ;;  %1108 = vst.msk [vmem:[%s1669_s21 + $0x150] sm:$0xff] %vm1065_vm2, %v1043_v15 }
 0x130   : > { %v789_v18 = vpop.f32.mrf.mxu0  ;;  %v917_v19 = vpop.f32.mrf.mxu1 }
 0x131   : > { %v1012_v20 = vmax.f32 %v789_v18, 0.0  ;;  %v1044_v21 = vmax.f32 %v917_v19, 0.0 }
 0x132   : > { %v791_v22 = vpop.f32.mrf.mxu0  ;;  %v919_v23 = vpop.f32.mrf.mxu1 }
 0x133   : > { %1077 = vst.msk [vmem:[%s1669_s21 + $0x58] sm:$0xff] %vm1065_vm2, %v1012_v20  ;;  %1109 = vst.msk [vmem:[%s1669_s21 + $0x158] sm:$0xff] %vm1065_vm2, %v1044_v21 }
 0x134   : > { %v794_v24 = vpop.f32.mrf.mxu0  ;;  %v922_v25 = vpop.f32.mrf.mxu1 }
 0x135   : > { %v1013_v26 = vmax.f32 %v794_v24, 0.0  ;;  %v1045_v27 = vmax.f32 %v922_v25, 0.0 }
 0x136   : > { %v796_v28 = vpop.f32.mrf.mxu0  ;;  %v924_v29 = vpop.f32.mrf.mxu1 }
 0x137   : > { %1078 = vst.msk [vmem:[%s1669_s21 + $0x60] sm:$0xff] %vm1065_vm2, %v1013_v26  ;;  %1110 = vst.msk [vmem:[%s1669_s21 + $0x160] sm:$0xff] %vm1065_vm2, %v1045_v27 }
 0x138   : > { %v797_v30 = vpop.f32.mrf.mxu0  ;;  %v925_v31 = vpop.f32.mrf.mxu1 }
 0x139   : > { %v1014_v32 = vmax.f32 %v797_v30, 0.0  ;;  %v1046_v33 = vmax.f32 %v925_v31, 0.0 }
 0x13a   : > { %v799_v34 = vpop.f32.mrf.mxu0  ;;  %v927_v35 = vpop.f32.mrf.mxu1 }
 0x13b   : > { %1079 = vst.msk [vmem:[%s1669_s21 + $0x68] sm:$0xff] %vm1065_vm2, %v1014_v32  ;;  %1111 = vst.msk [vmem:[%s1669_s21 + $0x168] sm:$0xff] %vm1065_vm2, %v1046_v33 }
 0x13c   : > { %v802_v36 = vpop.f32.mrf.mxu0  ;;  %v930_v37 = vpop.f32.mrf.mxu1 }
 0x13d   : > { %v1015_v38 = vmax.f32 %v802_v36, 0.0  ;;  %v1047_v39 = vmax.f32 %v930_v37, 0.0 }
 0x13e   : > { %v804_v40 = vpop.f32.mrf.mxu0  ;;  %v932_v41 = vpop.f32.mrf.mxu1 }
 0x13f   : > { %1080 = vst.msk [vmem:[%s1669_s21 + $0x70] sm:$0xff] %vm1065_vm2, %v1015_v38  ;;  %1112 = vst.msk [vmem:[%s1669_s21 + $0x170] sm:$0xff] %vm1065_vm2, %v1047_v39 }
 0x140   : > { %v805_v42 = vpop.f32.mrf.mxu0  ;;  %v933_v43 = vpop.f32.mrf.mxu1 }
 0x141   : > { %v1016_v44 = vmax.f32 %v805_v42, 0.0  ;;  %v1048_v45 = vmax.f32 %v933_v43, 0.0 }
 0x142   : > { %v807_v46 = vpop.f32.mrf.mxu0  ;;  %v935_v47 = vpop.f32.mrf.mxu1 }
 0x143   : > { %1081 = vst.msk [vmem:[%s1669_s21 + $0x78] sm:$0xff] %vm1065_vm2, %v1016_v44  ;;  %1113 = vst.msk [vmem:[%s1669_s21 + $0x178] sm:$0xff] %vm1065_vm2, %v1048_v45 }
 0x144   : > { %v810_v48 = vpop.f32.mrf.mxu0  ;;  %v938_v49 = vpop.f32.mrf.mxu1 }
 0x145   : > { %v1017_v50 = vmax.f32 %v810_v48, 0.0  ;;  %v1049_v51 = vmax.f32 %v938_v49, 0.0 }
 0x146   : > { %v812_v52 = vpop.f32.mrf.mxu0  ;;  %v940_v53 = vpop.f32.mrf.mxu1 }
 0x147   : > { %1082 = vst.msk [vmem:[%s1669_s21 + $0x80] sm:$0xff] %vm1065_vm2, %v1017_v50  ;;  %1114 = vst.msk [vmem:[%s1669_s21 + $0x180] sm:$0xff] %vm1065_vm2, %v1049_v51 }
 0x148   : > { %v813_v54 = vpop.f32.mrf.mxu0  ;;  %v941_v55 = vpop.f32.mrf.mxu1 }
 0x149   : > { %v1018_v56 = vmax.f32 %v813_v54, 0.0  ;;  %v1050_v57 = vmax.f32 %v941_v55, 0.0 }
 0x14a   : > { %v815_v58 = vpop.f32.mrf.mxu0  ;;  %v943_v59 = vpop.f32.mrf.mxu1 }
 0x14b   : > { %1083 = vst.msk [vmem:[%s1669_s21 + $0x88] sm:$0xff] %vm1065_vm2, %v1018_v56  ;;  %1115 = vst.msk [vmem:[%s1669_s21 + $0x188] sm:$0xff] %vm1065_vm2, %v1050_v57 }
 0x14c   : > { %v818_v60 = vpop.f32.mrf.mxu0  ;;  %v946_v61 = vpop.f32.mrf.mxu1 }
 0x14d   : > { %v1019_v62 = vmax.f32 %v818_v60, 0.0  ;;  %v1051_v63 = vmax.f32 %v946_v61, 0.0 }
 0x14e   : > { %v820_v0 = vpop.f32.mrf.mxu0  ;;  %v948_v1 = vpop.f32.mrf.mxu1 }
 0x14f   : > { %1084 = vst.msk [vmem:[%s1669_s21 + $0x90] sm:$0xff] %vm1065_vm2, %v1019_v62  ;;  %1116 = vst.msk [vmem:[%s1669_s21 + $0x190] sm:$0xff] %vm1065_vm2, %v1051_v63 }
 0x150   : > { %v821_v2 = vpop.f32.mrf.mxu0  ;;  %v949_v3 = vpop.f32.mrf.mxu1 }
 0x151   : > { %v1020_v4 = vmax.f32 %v821_v2, 0.0  ;;  %v1052_v5 = vmax.f32 %v949_v3, 0.0 }
 0x152   : > { %v823_v6 = vpop.f32.mrf.mxu0  ;;  %v951_v7 = vpop.f32.mrf.mxu1 }
 0x153   : > { %1085 = vst.msk [vmem:[%s1669_s21 + $0x98] sm:$0xff] %vm1065_vm2, %v1020_v4  ;;  %1117 = vst.msk [vmem:[%s1669_s21 + $0x198] sm:$0xff] %vm1065_vm2, %v1052_v5 }
 0x154   : > { %v826_v8 = vpop.f32.mrf.mxu0  ;;  %v954_v9 = vpop.f32.mrf.mxu1 }
 0x155   : > { %v1021_v10 = vmax.f32 %v826_v8, 0.0  ;;  %v1053_v11 = vmax.f32 %v954_v9, 0.0 }
 0x156   : > { %v828_v12 = vpop.f32.mrf.mxu0  ;;  %v956_v13 = vpop.f32.mrf.mxu1 }
 0x157   : > { %1086 = vst.msk [vmem:[%s1669_s21 + $0xa0] sm:$0xff] %vm1065_vm2, %v1021_v10  ;;  %1118 = vst.msk [vmem:[%s1669_s21 + $0x1a0] sm:$0xff] %vm1065_vm2, %v1053_v11 }
 0x158   : > { %v829_v14 = vpop.f32.mrf.mxu0  ;;  %v957_v15 = vpop.f32.mrf.mxu1 }
 0x159   : > { %v1022_v16 = vmax.f32 %v829_v14, 0.0  ;;  %v1054_v17 = vmax.f32 %v957_v15, 0.0 }
 0x15a   : > { %v831_v18 = vpop.f32.mrf.mxu0  ;;  %v959_v19 = vpop.f32.mrf.mxu1 }
 0x15b   : > { %1087 = vst.msk [vmem:[%s1669_s21 + $0xa8] sm:$0xff] %vm1065_vm2, %v1022_v16  ;;  %1119 = vst.msk [vmem:[%s1669_s21 + $0x1a8] sm:$0xff] %vm1065_vm2, %v1054_v17 }
 0x15c   : > { %v834_v20 = vpop.f32.mrf.mxu0  ;;  %v962_v21 = vpop.f32.mrf.mxu1 }
 0x15d   : > { %v1023_v22 = vmax.f32 %v834_v20, 0.0  ;;  %v1055_v23 = vmax.f32 %v962_v21, 0.0 }
 0x15e   : > { %v836_v24 = vpop.f32.mrf.mxu0  ;;  %v964_v25 = vpop.f32.mrf.mxu1 }
 0x15f   : > { %1088 = vst.msk [vmem:[%s1669_s21 + $0xb0] sm:$0xff] %vm1065_vm2, %v1023_v22  ;;  %1120 = vst.msk [vmem:[%s1669_s21 + $0x1b0] sm:$0xff] %vm1065_vm2, %v1055_v23 }
 0x160   : > { %v837_v26 = vpop.f32.mrf.mxu0  ;;  %v965_v27 = vpop.f32.mrf.mxu1 }
 0x161   : > { %v1024_v28 = vmax.f32 %v837_v26, 0.0  ;;  %v1056_v29 = vmax.f32 %v965_v27, 0.0 }
 0x162   : > { %v839_v30 = vpop.f32.mrf.mxu0  ;;  %v967_v31 = vpop.f32.mrf.mxu1 }
 0x163   : > { %1089 = vst.msk [vmem:[%s1669_s21 + $0xb8] sm:$0xff] %vm1065_vm2, %v1024_v28  ;;  %1121 = vst.msk [vmem:[%s1669_s21 + $0x1b8] sm:$0xff] %vm1065_vm2, %v1056_v29 }
 0x164   : > { %v842_v32 = vpop.f32.mrf.mxu0  ;;  %v970_v33 = vpop.f32.mrf.mxu1 }
 0x165   : > { %v1025_v34 = vmax.f32 %v842_v32, 0.0  ;;  %v1057_v35 = vmax.f32 %v970_v33, 0.0 }
 0x166   : > { %v844_v36 = vpop.f32.mrf.mxu0  ;;  %v972_v37 = vpop.f32.mrf.mxu1 }
 0x167   : > { %1090 = vst.msk [vmem:[%s1669_s21 + $0xc0] sm:$0xff] %vm1065_vm2, %v1025_v34  ;;  %1122 = vst.msk [vmem:[%s1669_s21 + $0x1c0] sm:$0xff] %vm1065_vm2, %v1057_v35 }
 0x168   : > { %v845_v38 = vpop.f32.mrf.mxu0  ;;  %v973_v39 = vpop.f32.mrf.mxu1 }
 0x169   : > { %v1026_v40 = vmax.f32 %v845_v38, 0.0  ;;  %v1058_v41 = vmax.f32 %v973_v39, 0.0 }
 0x16a   : > { %v847_v42 = vpop.f32.mrf.mxu0  ;;  %v975_v43 = vpop.f32.mrf.mxu1 }
 0x16b   : > { %1091 = vst.msk [vmem:[%s1669_s21 + $0xc8] sm:$0xff] %vm1065_vm2, %v1026_v40  ;;  %1123 = vst.msk [vmem:[%s1669_s21 + $0x1c8] sm:$0xff] %vm1065_vm2, %v1058_v41 }
 0x16c   : > { %v850_v44 = vpop.f32.mrf.mxu0  ;;  %v978_v45 = vpop.f32.mrf.mxu1 }
 0x16d   : > { %v1027_v46 = vmax.f32 %v850_v44, 0.0  ;;  %v1059_v47 = vmax.f32 %v978_v45, 0.0 }
 0x16e   : > { %v852_v48 = vpop.f32.mrf.mxu0  ;;  %v980_v49 = vpop.f32.mrf.mxu1 }
 0x16f   : > { %1092 = vst.msk [vmem:[%s1669_s21 + $0xd0] sm:$0xff] %vm1065_vm2, %v1027_v46  ;;  %1124 = vst.msk [vmem:[%s1669_s21 + $0x1d0] sm:$0xff] %vm1065_vm2, %v1059_v47 }
 0x170   : > { %v853_v50 = vpop.f32.mrf.mxu0  ;;  %v981_v51 = vpop.f32.mrf.mxu1 }
 0x171   : > { %v1028_v52 = vmax.f32 %v853_v50, 0.0  ;;  %v1060_v53 = vmax.f32 %v981_v51, 0.0 }
 0x172   : > { %v855_v54 = vpop.f32.mrf.mxu0  ;;  %v983_v55 = vpop.f32.mrf.mxu1 }
 0x173   : > { %1093 = vst.msk [vmem:[%s1669_s21 + $0xd8] sm:$0xff] %vm1065_vm2, %v1028_v52  ;;  %1125 = vst.msk [vmem:[%s1669_s21 + $0x1d8] sm:$0xff] %vm1065_vm2, %v1060_v53 }
 0x174   : > { %v858_v56 = vpop.f32.mrf.mxu0  ;;  %v986_v57 = vpop.f32.mrf.mxu1 }
 0x175   : > { %v1029_v58 = vmax.f32 %v858_v56, 0.0  ;;  %v1061_v59 = vmax.f32 %v986_v57, 0.0 }
 0x176   : > { %v860_v60 = vpop.f32.mrf.mxu0  ;;  %v988_v61 = vpop.f32.mrf.mxu1 }
 0x177   : > { %1094 = vst.msk [vmem:[%s1669_s21 + $0xe0] sm:$0xff] %vm1065_vm2, %v1029_v58  ;;  %1126 = vst.msk [vmem:[%s1669_s21 + $0x1e0] sm:$0xff] %vm1065_vm2, %v1061_v59 }
 0x178   : > { %v861_v62 = vpop.f32.mrf.mxu0  ;;  %v989_v63 = vpop.f32.mrf.mxu1 }
 0x179   : > { %v1030_v0 = vmax.f32 %v861_v62, 0.0  ;;  %v1062_v1 = vmax.f32 %v989_v63, 0.0 }
 0x17a   : > { %v863_v2 = vpop.f32.mrf.mxu0  ;;  %v991_v3 = vpop.f32.mrf.mxu1 }
 0x17b   : > { %1095 = vst.msk [vmem:[%s1669_s21 + $0xe8] sm:$0xff] %vm1065_vm2, %v1030_v0  ;;  %1127 = vst.msk [vmem:[%s1669_s21 + $0x1e8] sm:$0xff] %vm1065_vm2, %v1062_v1 }
 0x17c   : > { %v866_v4 = vpop.f32.mrf.mxu0  ;;  %v994_v5 = vpop.f32.mrf.mxu1 }
 0x17d   : > { %v1031_v6 = vmax.f32 %v866_v4, 0.0  ;;  %v1063_v7 = vmax.f32 %v994_v5, 0.0 }
 0x17e   : > { %v868_v8 = vpop.f32.mrf.mxu0  ;;  %v996_v9 = vpop.f32.mrf.mxu1 }
 0x17f   : > { %1096 = vst.msk [vmem:[%s1669_s21 + $0xf0] sm:$0xff] %vm1065_vm2, %v1031_v6  ;;  %1128 = vst.msk [vmem:[%s1669_s21 + $0x1f0] sm:$0xff] %vm1065_vm2, %v1063_v7 }
 0x180   : > { %v869_v10 = vpop.f32.mrf.mxu0  ;;  %v997_v11 = vpop.f32.mrf.mxu1 }
 0x181   : > { %v1032_v12 = vmax.f32 %v869_v10, 0.0  ;;  %v1064_v13 = vmax.f32 %v997_v11, 0.0 }
 0x182   : > { %v871_v14 = vpop.f32.mrf.mxu0  ;;  %v999_v15 = vpop.f32.mrf.mxu1 }
 0x183   : > { %1097 = vst.msk [vmem:[%s1669_s21 + $0xf8] sm:$0xff] %vm1065_vm2, %v1032_v12  ;;  %1129 = vst.msk [vmem:[%s1669_s21 + $0x1f8] sm:$0xff] %vm1065_vm2, %v1064_v13 }
 0x184 PF: > { %s12_s9 = sadd.s32 1, %s1462_s9  }
 0x185   : > { %p9_p4 = scmp.ge.s32.totalorder %s12_s9, 10  }
 0x187   :  { %11 = sbr.rel (!%p9_p4) target bundleno = 1 (0x1), region = 58 }

// kernel: forward.16
= control target key start
LH: loop header
LB: loop body
LE: loop exit
PB: predicated region body
PF: predicated region fallthrough
CT: control target
= control target key end

     0   :  { %s1125_s9 = smov 0   ;;  %s1345_s0 = inlined_call_operand.vmem [shape: bf16[4096,8], index: 0, kind: input, shape index: {}]   ;;  %s1346_s1 = inlined_call_operand.vmem [shape: bf16[8,16], index: 1, kind: input, shape index: {}]   ;;  %s1347_s2 = inlined_call_operand.vmem [shape: f32[4096,16], index: 2, kind: output, shape index: {}]  }
   0x1 LB: > { %s884_s10 = sadd.s32 4294967295, %s1108_s9   ;;  %p888_p0 = scmp.ge.s32.totalorder %s1108_s9, 1  ;;  %s1108_s9 = sphi %s1125_s9, %s12_s9  }
   0x2   : > { %p113_p1 = scmp.lt.s32.totalorder %s1108_s9, 9 }
   0x4   : > { %p114_p2 = pnand %p888_p0, %p113_p1 }
   0x5   : > { %s889_s13 = sshll.u32 (!%p114_p2), %s884_s10, 6 }
   0x6   : > { %117 = sbr.rel (%p114_p2) target bundleno = 273 (0x111), region = 28  ;;  %p136_p3 = scmp.lt.s32.totalorder (!%p114_p2), %s889_s13, 511 }
   0xb   : > { %v212_v0 = vld [vmem:[%s1346_s1] sm:$0xf]  ;;  %vm470_vm0 = vcmask 1043456   ;;  %s1349_s13 = smov (!%p136_p3, %s889_s13), 511  ;;  %vm373_vm1 = vcmask 64512   ;;  %vm763_vm2 = vcmask 130048  }
   0xc   : > { %1060 = vmatprep.subr.msk.bf16.mxu0 %vm470_vm0, %v212_v0  ;;  %1061 = vmatprep.subr.msk.bf16.mxu1 %vm470_vm0, %v212_v0  ;;  %v472_v1 = vsel %vm470_vm0, %v212_v0, 0  ;;  %s890_s14 = sshll.u32 %s1349_s13, 2  ;;  %s892_s18 = sshll.u32 %s1349_s13, 3 }
   0xd   : > { %993 = vmatpush3.bf16.msra.mxu0 %v472_v1  ;;  %1059 = vmatpush3.bf16.msra.mxu1 %v472_v1  ;;  %s1142_s17 = scalar_lea.vmem %s1345_s0, %s890_s14  ;;  %s1212_s21 = scalar_lea.vmem %s1347_s2, %s892_s18 }
   0xe   : > { %v1070_v2 = vld [vmem:[%s1142_s17] sm:$0xff]   ;;  %v1072_v4 = vld [vmem:[%s1142_s17 + $0x8] sm:$0xff]   ;;  %v1074_v6 = vld [vmem:[%s1142_s17 + $0x10] sm:$0xff]  }
   0xf   : > { %v1071_v3 = vld [vmem:[%s1142_s17 + $0x80] sm:$0xff]   ;;  %994 = vmatprep.mubr.msk.bf16.mxu0 %vm373_vm1, %v1070_v2  ;;  %v1073_v5 = vld [vmem:[%s1142_s17 + $0x88] sm:$0xff]   ;;  %v1075_v7 = vld [vmem:[%s1142_s17 + $0x90] sm:$0xff]  }
  0x10   : > { %1026 = vmatprep.mubr.msk.bf16.mxu1 %vm373_vm1, %v1071_v3  ;;  %995 = vmatmul.mubr.msk.bf16.vlgmr.msra.gmra.mxu0 %vm373_vm1, %v1072_v4  ;;  %v1076_v8 = vld [vmem:[%s1142_s17 + $0x18] sm:$0xff]   ;;  %v1078_v10 = vld [vmem:[%s1142_s17 + $0x20] sm:$0xff]   ;;  %v1080_v12 = vld [vmem:[%s1142_s17 + $0x28] sm:$0xff]  }
  0x11   : > { %1027 = vmatmul.mubr.msk.bf16.vlgmr.msra.gmra.mxu1 %vm373_vm1, %v1073_v5  ;;  %998 = vmatprep.mubr.msk.bf16.mxu0 %vm373_vm1, %v1074_v6  ;;  %v1077_v9 = vld [vmem:[%s1142_s17 + $0x98] sm:$0xff]   ;;  %v1079_v11 = vld [vmem:[%s1142_s17 + $0xa0] sm:$0xff]   ;;  %v1081_v13 = vld [vmem:[%s1142_s17 + $0xa8] sm:$0xff]  }
  0x12   : > { %1030 = vmatprep.mubr.msk.bf16.mxu1 %vm373_vm1, %v1075_v7  ;;  %v1082_v14 = vld [vmem:[%s1142_s17 + $0x30] sm:$0xff]   ;;  %v1084_v16 = vld [vmem:[%s1142_s17 + $0x38] sm:$0xff]   ;;  %v1086_v18 = vld [vmem:[%s1142_s17 + $0x40] sm:$0xff]  }
  0x13   : > { %v1083_v15 = vld [vmem:[%s1142_s17 + $0xb0] sm:$0xff]   ;;  %v1085_v17 = vld [vmem:[%s1142_s17 + $0xb8] sm:$0xff]   ;;  %v1087_v19 = vld [vmem:[%s1142_s17 + $0xc0] sm:$0xff]  }
  0x14   : > { %v1088_v20 = vld [vmem:[%s1142_s17 + $0x48] sm:$0xff]   ;;  %v1090_v22 = vld [vmem:[%s1142_s17 + $0x50] sm:$0xff]   ;;  %v1092_v24 = vld [vmem:[%s1142_s17 + $0x58] sm:$0xff]  }
  0x15   : > { %v1089_v21 = vld [vmem:[%s1142_s17 + $0xc8] sm:$0xff]   ;;  %v1091_v23 = vld [vmem:[%s1142_s17 + $0xd0] sm:$0xff]   ;;  %v1093_v25 = vld [vmem:[%s1142_s17 + $0xd8] sm:$0xff]  }
  0x16   : > { %v1094_v26 = vld [vmem:[%s1142_s17 + $0x60] sm:$0xff]   ;;  %v1096_v28 = vld [vmem:[%s1142_s17 + $0x68] sm:$0xff]   ;;  %v1098_v30 = vld [vmem:[%s1142_s17 + $0x70] sm:$0xff]  }
  0x17   : > { %v1095_v27 = vld [vmem:[%s1142_s17 + $0xe0] sm:$0xff]   ;;  %v1097_v29 = vld [vmem:[%s1142_s17 + $0xe8] sm:$0xff]   ;;  %v1099_v31 = vld [vmem:[%s1142_s17 + $0xf0] sm:$0xff]  }
  0x18   : > { %999 = vmatmul.mubr.msk.bf16.gmra.mxu0 %vm373_vm1, %v1076_v8  ;;  %v1100_v32 = vld [vmem:[%s1142_s17 + $0x78] sm:$0xff]  }
  0x19   : > { %1031 = vmatmul.mubr.msk.bf16.gmra.mxu1 %vm373_vm1, %v1077_v9  ;;  %1002 = vmatprep.mubr.msk.bf16.mxu0 %vm373_vm1, %v1078_v10  ;;  %v1101_v33 = vld [vmem:[%s1142_s17 + $0xf8] sm:$0xff]  }
  0x1a   : > { %1034 = vmatprep.mubr.msk.bf16.mxu1 %vm373_vm1, %v1079_v11 }
  0x20   : > { %1003 = vmatmul.mubr.msk.bf16.gmra.mxu0 %vm373_vm1, %v1080_v12 }
  0x21   : > { %1035 = vmatmul.mubr.msk.bf16.gmra.mxu1 %vm373_vm1, %v1081_v13  ;;  %1006 = vmatprep.mubr.msk.bf16.mxu0 %vm373_vm1, %v1082_v14 }
  0x22   : > { %1038 = vmatprep.mubr.msk.bf16.mxu1 %vm373_vm1, %v1083_v15 }
  0x28   : > { %1007 = vmatmul.mubr.msk.bf16.gmra.mxu0 %vm373_vm1, %v1084_v16 }
  0x29   : > { %1039 = vmatmul.mubr.msk.bf16.gmra.mxu1 %vm373_vm1, %v1085_v17  ;;  %1010 = vmatprep.mubr.msk.bf16.mxu0 %vm373_vm1, %v1086_v18 }
  0x2a   : > { %1042 = vmatprep.mubr.msk.bf16.mxu1 %vm373_vm1, %v1087_v19 }
  0x30   : > { %1011 = vmatmul.mubr.msk.bf16.gmra.mxu0 %vm373_vm1, %v1088_v20 }
  0x31   : > { %1043 = vmatmul.mubr.msk.bf16.gmra.mxu1 %vm373_vm1, %v1089_v21  ;;  %1014 = vmatprep.mubr.msk.bf16.mxu0 %vm373_vm1, %v1090_v22 }
  0x32   : > { %1046 = vmatprep.mubr.msk.bf16.mxu1 %vm373_vm1, %v1091_v23 }
  0x38   : > { %1015 = vmatmul.mubr.msk.bf16.gmra.mxu0 %vm373_vm1, %v1092_v24 }
  0x39   : > { %1047 = vmatmul.mubr.msk.bf16.gmra.mxu1 %vm373_vm1, %v1093_v25  ;;  %1018 = vmatprep.mubr.msk.bf16.mxu0 %vm373_vm1, %v1094_v26 }
  0x3a   : > { %1050 = vmatprep.mubr.msk.bf16.mxu1 %vm373_vm1, %v1095_v27 }
  0x40   : > { %1019 = vmatmul.mubr.msk.bf16.gmra.mxu0 %vm373_vm1, %v1096_v28 }
  0x41   : > { %1051 = vmatmul.mubr.msk.bf16.gmra.mxu1 %vm373_vm1, %v1097_v29  ;;  %1022 = vmatprep.mubr.msk.bf16.mxu0 %vm373_vm1, %v1098_v30 }
  0x42   : > { %1054 = vmatprep.mubr.msk.bf16.mxu1 %vm373_vm1, %v1099_v31 }
  0x48   : > { %1023 = vmatmul.mubr.msk.bf16.gmra.mxu0 %vm373_vm1, %v1100_v32 }
  0x49   : > { %1055 = vmatmul.mubr.msk.bf16.gmra.mxu1 %vm373_vm1, %v1101_v33 }
  0xd0   : > { %v996_v34 = vpop.f32.mrf.mxu0 }
  0xd1   : > { %766 = vst.msk [vmem:[%s1212_s21 + $0x10] sm:$0xff] %vm763_vm2, %v996_v34  ;;  %v1028_v35 = vpop.f32.mrf.mxu1 }
  0xd2   : > { %798 = vst.msk [vmem:[%s1212_s21 + $0x110] sm:$0xff] %vm763_vm2, %v1028_v35  ;;  %v508_v36 = vpop.f32.mrf.mxu0 }
  0xd3   : > { %764 = vst.msk [vmem:[%s1212_s21] sm:$0xff] %vm763_vm2, %v508_v36  ;;  %v636_v37 = vpop.f32.mrf.mxu1 }
  0xd4   : > { %796 = vst.msk [vmem:[%s1212_s21 + $0x100] sm:$0xff] %vm763_vm2, %v636_v37  ;;  %v997_v38 = vpop.f32.mrf.mxu0 }
  0xd5   : > { %767 = vst.msk [vmem:[%s1212_s21 + $0x18] sm:$0xff] %vm763_vm2, %v997_v38  ;;  %v1029_v39 = vpop.f32.mrf.mxu1 }
  0xd6   : > { %799 = vst.msk [vmem:[%s1212_s21 + $0x118] sm:$0xff] %vm763_vm2, %v1029_v39  ;;  %v511_v40 = vpop.f32.mrf.mxu0 }
  0xd7   : > { %765 = vst.msk [vmem:[%s1212_s21 + $0x8] sm:$0xff] %vm763_vm2, %v511_v40  ;;  %v639_v41 = vpop.f32.mrf.mxu1 }
  0xd8   : > { %797 = vst.msk [vmem:[%s1212_s21 + $0x108] sm:$0xff] %vm763_vm2, %v639_v41  ;;  %v1000_v42 = vpop.f32.mrf.mxu0 }
  0xd9   : > { %770 = vst.msk [vmem:[%s1212_s21 + $0x30] sm:$0xff] %vm763_vm2, %v1000_v42  ;;  %v1032_v43 = vpop.f32.mrf.mxu1 }
  0xda   : > { %802 = vst.msk [vmem:[%s1212_s21 + $0x130] sm:$0xff] %vm763_vm2, %v1032_v43  ;;  %v524_v44 = vpop.f32.mrf.mxu0 }
  0xdb   : > { %768 = vst.msk [vmem:[%s1212_s21 + $0x20] sm:$0xff] %vm763_vm2, %v524_v44  ;;  %v652_v45 = vpop.f32.mrf.mxu1 }
  0xdc   : > { %800 = vst.msk [vmem:[%s1212_s21 + $0x120] sm:$0xff] %vm763_vm2, %v652_v45  ;;  %v1001_v46 = vpop.f32.mrf.mxu0 }
  0xdd   : > { %771 = vst.msk [vmem:[%s1212_s21 + $0x38] sm:$0xff] %vm763_vm2, %v1001_v46  ;;  %v1033_v47 = vpop.f32.mrf.mxu1 }
  0xde   : > { %803 = vst.msk [vmem:[%s1212_s21 + $0x138] sm:$0xff] %vm763_vm2, %v1033_v47  ;;  %v527_v48 = vpop.f32.mrf.mxu0 }
  0xdf   : > { %769 = vst.msk [vmem:[%s1212_s21 + $0x28] sm:$0xff] %vm763_vm2, %v527_v48  ;;  %v655_v49 = vpop.f32.mrf.mxu1 }
  0xe0   : > { %801 = vst.msk [vmem:[%s1212_s21 + $0x128] sm:$0xff] %vm763_vm2, %v655_v49  ;;  %v1004_v50 = vpop.f32.mrf.mxu0 }
  0xe1   : > { %774 = vst.msk [vmem:[%s1212_s21 + $0x50] sm:$0xff] %vm763_vm2, %v1004_v50  ;;  %v1036_v51 = vpop.f32.mrf.mxu1 }
  0xe2   : > { %806 = vst.msk [vmem:[%s1212_s21 + $0x150] sm:$0xff] %vm763_vm2, %v1036_v51  ;;  %v540_v52 = vpop.f32.mrf.mxu0 }
  0xe3   : > { %772 = vst.msk [vmem:[%s1212_s21 + $0x40] sm:$0xff] %vm763_vm2, %v540_v52  ;;  %v668_v53 = vpop.f32.mrf.mxu1 }
  0xe4   : > { %804 = vst.msk [vmem:[%s1212_s21 + $0x140] sm:$0xff] %vm763_vm2, %v668_v53  ;;  %v1005_v54 = vpop.f32.mrf.mxu0 }
  0xe5   : > { %775 = vst.msk [vmem:[%s1212_s21 + $0x58] sm:$0xff] %vm763_vm2, %v1005_v54  ;;  %v1037_v55 = vpop.f32.mrf.mxu1 }
  0xe6   : > { %807 = vst.msk [vmem:[%s1212_s21 + $0x158] sm:$0xff] %vm763_vm2, %v1037_v55  ;;  %v543_v56 = vpop.f32.mrf.mxu0 }
  0xe7   : > { %773 = vst.msk [vmem:[%s1212_s21 + $0x48] sm:$0xff] %vm763_vm2, %v543_v56  ;;  %v671_v57 = vpop.f32.mrf.mxu1 }
  0xe8   : > { %805 = vst.msk [vmem:[%s1212_s21 + $0x148] sm:$0xff] %vm763_vm2, %v671_v57  ;;  %v1008_v58 = vpop.f32.mrf.mxu0 }
  0xe9   : > { %778 = vst.msk [vmem:[%s1212_s21 + $0x70] sm:$0xff] %vm763_vm2, %v1008_v58  ;;  %v1040_v59 = vpop.f32.mrf.mxu1 }
  0xea   : > { %810 = vst.msk [vmem:[%s1212_s21 + $0x170] sm:$0xff] %vm763_vm2, %v1040_v59  ;;  %v556_v60 = vpop.f32.mrf.mxu0 }
  0xeb   : > { %776 = vst.msk [vmem:[%s1212_s21 + $0x60] sm:$0xff] %vm763_vm2, %v556_v60  ;;  %v684_v61 = vpop.f32.mrf.mxu1 }
  0xec   : > { %808 = vst.msk [vmem:[%s1212_s21 + $0x160] sm:$0xff] %vm763_vm2, %v684_v61  ;;  %v1009_v62 = vpop.f32.mrf.mxu0 }
  0xed   : > { %779 = vst.msk [vmem:[%s1212_s21 + $0x78] sm:$0xff] %vm763_vm2, %v1009_v62  ;;  %v1041_v63 = vpop.f32.mrf.mxu1 }
  0xee   : > { %811 = vst.msk [vmem:[%s1212_s21 + $0x178] sm:$0xff] %vm763_vm2, %v1041_v63  ;;  %v559_v0 = vpop.f32.mrf.mxu0 }
  0xef   : > { %777 = vst.msk [vmem:[%s1212_s21 + $0x68] sm:$0xff] %vm763_vm2, %v559_v0  ;;  %v687_v1 = vpop.f32.mrf.mxu1 }
  0xf0   : > { %809 = vst.msk [vmem:[%s1212_s21 + $0x168] sm:$0xff] %vm763_vm2, %v687_v1  ;;  %v1012_v2 = vpop.f32.mrf.mxu0 }
  0xf1   : > { %782 = vst.msk [vmem:[%s1212_s21 + $0x90] sm:$0xff] %vm763_vm2, %v1012_v2  ;;  %v1044_v3 = vpop.f32.mrf.mxu1 }
  0xf2   : > { %814 = vst.msk [vmem:[%s1212_s21 + $0x190] sm:$0xff] %vm763_vm2, %v1044_v3  ;;  %v572_v4 = vpop.f32.mrf.mxu0 }
  0xf3   : > { %780 = vst.msk [vmem:[%s1212_s21 + $0x80] sm:$0xff] %vm763_vm2, %v572_v4  ;;  %v700_v5 = vpop.f32.mrf.mxu1 }
  0xf4   : > { %812 = vst.msk [vmem:[%s1212_s21 + $0x180] sm:$0xff] %vm763_vm2, %v700_v5  ;;  %v1013_v6 = vpop.f32.mrf.mxu0 }
  0xf5   : > { %783 = vst.msk [vmem:[%s1212_s21 + $0x98] sm:$0xff] %vm763_vm2, %v1013_v6  ;;  %v1045_v7 = vpop.f32.mrf.mxu1 }
  0xf6   : > { %815 = vst.msk [vmem:[%s1212_s21 + $0x198] sm:$0xff] %vm763_vm2, %v1045_v7  ;;  %v575_v8 = vpop.f32.mrf.mxu0 }
  0xf7   : > { %781 = vst.msk [vmem:[%s1212_s21 + $0x88] sm:$0xff] %vm763_vm2, %v575_v8  ;;  %v703_v9 = vpop.f32.mrf.mxu1 }
  0xf8   : > { %813 = vst.msk [vmem:[%s1212_s21 + $0x188] sm:$0xff] %vm763_vm2, %v703_v9  ;;  %v1016_v10 = vpop.f32.mrf.mxu0 }
  0xf9   : > { %786 = vst.msk [vmem:[%s1212_s21 + $0xb0] sm:$0xff] %vm763_vm2, %v1016_v10  ;;  %v1048_v11 = vpop.f32.mrf.mxu1 }
  0xfa   : > { %818 = vst.msk [vmem:[%s1212_s21 + $0x1b0] sm:$0xff] %vm763_vm2, %v1048_v11  ;;  %v588_v12 = vpop.f32.mrf.mxu0 }
  0xfb   : > { %784 = vst.msk [vmem:[%s1212_s21 + $0xa0] sm:$0xff] %vm763_vm2, %v588_v12  ;;  %v716_v13 = vpop.f32.mrf.mxu1 }
  0xfc   : > { %816 = vst.msk [vmem:[%s1212_s21 + $0x1a0] sm:$0xff] %vm763_vm2, %v716_v13  ;;  %v1017_v14 = vpop.f32.mrf.mxu0 }
  0xfd   : > { %787 = vst.msk [vmem:[%s1212_s21 + $0xb8] sm:$0xff] %vm763_vm2, %v1017_v14  ;;  %v1049_v15 = vpop.f32.mrf.mxu1 }
  0xfe   : > { %819 = vst.msk [vmem:[%s1212_s21 + $0x1b8] sm:$0xff] %vm763_vm2, %v1049_v15  ;;  %v591_v16 = vpop.f32.mrf.mxu0 }
  0xff   : > { %785 = vst.msk [vmem:[%s1212_s21 + $0xa8] sm:$0xff] %vm763_vm2, %v591_v16  ;;  %v719_v17 = vpop.f32.mrf.mxu1 }
 0x100   : > { %817 = vst.msk [vmem:[%s1212_s21 + $0x1a8] sm:$0xff] %vm763_vm2, %v719_v17  ;;  %v1020_v18 = vpop.f32.mrf.mxu0 }
 0x101   : > { %790 = vst.msk [vmem:[%s1212_s21 + $0xd0] sm:$0xff] %vm763_vm2, %v1020_v18  ;;  %v1052_v19 = vpop.f32.mrf.mxu1 }
 0x102   : > { %822 = vst.msk [vmem:[%s1212_s21 + $0x1d0] sm:$0xff] %vm763_vm2, %v1052_v19  ;;  %v604_v20 = vpop.f32.mrf.mxu0 }
 0x103   : > { %788 = vst.msk [vmem:[%s1212_s21 + $0xc0] sm:$0xff] %vm763_vm2, %v604_v20  ;;  %v732_v21 = vpop.f32.mrf.mxu1 }
 0x104   : > { %820 = vst.msk [vmem:[%s1212_s21 + $0x1c0] sm:$0xff] %vm763_vm2, %v732_v21  ;;  %v1021_v22 = vpop.f32.mrf.mxu0 }
 0x105   : > { %791 = vst.msk [vmem:[%s1212_s21 + $0xd8] sm:$0xff] %vm763_vm2, %v1021_v22  ;;  %v1053_v23 = vpop.f32.mrf.mxu1 }
 0x106   : > { %823 = vst.msk [vmem:[%s1212_s21 + $0x1d8] sm:$0xff] %vm763_vm2, %v1053_v23  ;;  %v607_v24 = vpop.f32.mrf.mxu0 }
 0x107   : > { %789 = vst.msk [vmem:[%s1212_s21 + $0xc8] sm:$0xff] %vm763_vm2, %v607_v24  ;;  %v735_v25 = vpop.f32.mrf.mxu1 }
 0x108   : > { %821 = vst.msk [vmem:[%s1212_s21 + $0x1c8] sm:$0xff] %vm763_vm2, %v735_v25  ;;  %v1024_v26 = vpop.f32.mrf.mxu0 }
 0x109   : > { %794 = vst.msk [vmem:[%s1212_s21 + $0xf0] sm:$0xff] %vm763_vm2, %v1024_v26  ;;  %v1056_v27 = vpop.f32.mrf.mxu1 }
 0x10a   : > { %826 = vst.msk [vmem:[%s1212_s21 + $0x1f0] sm:$0xff] %vm763_vm2, %v1056_v27  ;;  %v620_v28 = vpop.f32.mrf.mxu0 }
 0x10b   : > { %792 = vst.msk [vmem:[%s1212_s21 + $0xe0] sm:$0xff] %vm763_vm2, %v620_v28  ;;  %v748_v29 = vpop.f32.mrf.mxu1 }
 0x10c   : > { %824 = vst.msk [vmem:[%s1212_s21 + $0x1e0] sm:$0xff] %vm763_vm2, %v748_v29  ;;  %v1025_v30 = vpop.f32.mrf.mxu0 }
 0x10d   : > { %795 = vst.msk [vmem:[%s1212_s21 + $0xf8] sm:$0xff] %vm763_vm2, %v1025_v30  ;;  %v1057_v31 = vpop.f32.mrf.mxu1 }
 0x10e   : > { %827 = vst.msk [vmem:[%s1212_s21 + $0x1f8] sm:$0xff] %vm763_vm2, %v1057_v31  ;;  %v623_v32 = vpop.f32.mrf.mxu0 }
 0x10f   : > { %793 = vst.msk [vmem:[%s1212_s21 + $0xe8] sm:$0xff] %vm763_vm2, %v623_v32  ;;  %v751_v33 = vpop.f32.mrf.mxu1 }
 0x110   : > { %825 = vst.msk [vmem:[%s1212_s21 + $0x1e8] sm:$0xff] %vm763_vm2, %v751_v33 }
 0x111 PF: > { %s12_s9 = sadd.s32 1, %s1108_s9  }
 0x112   : > { %p9_p4 = scmp.ge.s32.totalorder %s12_s9, 10  }
 0x114   :  { %11 = sbr.rel (!%p9_p4) target bundleno = 1 (0x1), region = 58 }

// kernel: forward.18
= control target key start
LH: loop header
LB: loop body
LE: loop exit
PB: predicated region body
PF: predicated region fallthrough
CT: control target
= control target key end

     0   :  { %s2536_s12 = smov 0   ;;  %s3059_s0 = inlined_call_operand.vmem [shape: bf16[4096,432], index: 0, kind: input, shape index: {}]   ;;  %s3060_s1 = inlined_call_operand.vmem [shape: bf16[432,16], index: 1, kind: input, shape index: {}]   ;;  %s3061_s2 = inlined_call_operand.vmem [shape: f32[4096,16], index: 2, kind: input, shape index: {}]   ;;  %s3062_s3 = inlined_call_operand.vmem [shape: f32[4096,16], index: 3, kind: output, shape index: {}]  }
   0x1 LB: > { %s2088_s13 = sadd.s32 4294967295, %s2513_s12   ;;  %p2092_p0 = scmp.ge.s32.totalorder %s2513_s12, 1  ;;  %s2513_s12 = sphi %s2536_s12, %s13_s12  }
   0x2   : > { %p150_p1 = scmp.lt.s32.totalorder %s2513_s12, 9 }
   0x4   : > { %p151_p2 = pnand %p2092_p0, %p150_p1 }
   0x5   : > { %s2093_s26 = sshll.u32 (!%p151_p2), %s2088_s13, 6 }
   0x6   : > { %154 = sbr.rel (%p151_p2) target bundleno = 528 (0x210), region = 32  ;;  %p181_p3 = scmp.lt.s32.totalorder (!%p151_p2), %s2093_s26, 511 }
   0xb   : > { %v2299_v0 = vld [vmem:[%s3060_s1 + $0x38] sm:$0xff]   ;;  %v2515_v1 = vmov 0   ;;  %v2300_v2 = vld [vmem:[%s3060_s1 + $0x30] sm:$0xff]   ;;  %v2301_v4 = vld [vmem:[%s3060_s1 + $0x28] sm:$0xff]   ;;  %s3064_s26 = smov (!%p181_p3, %s2093_s26), 511  ;;  %vm1216_vm0 = vcmask 392192  }
   0xc   : > { %1313 = vmatprep.subr.bf16.mxu0 %v2515_v1  ;;  %1602 = vmatprep.subr.bf16.mxu1 %v2515_v1  ;;  %v2304_v3 = vld [vmem:[%s3060_s1 + $0xb8] sm:$0xff]   ;;  %v2306_v5 = vld [vmem:[%s3060_s1 + $0xb0] sm:$0xff]   ;;  %v2302_v6 = vld [vmem:[%s3060_s1 + $0x20] sm:$0xff]   ;;  %s2289_s10 = sshll.u32 %s3064_s26, 4  ;;  %s2097_s23 = sshll.u32 %s3064_s26, 3  ;;  %vm1955_vm1 = vcmask 130048  }
   0xd   : > { %1314 = vmatpush1.bf16.msra.mxu0 %v2299_v0  ;;  %1603 = vmatpush1.bf16.msra.mxu1 %v2304_v3  ;;  %v2308_v7 = vld [vmem:[%s3060_s1 + $0xa8] sm:$0xff]   ;;  %v2303_v8 = vld [vmem:[%s3060_s1 + $0x18] sm:$0xff]   ;;  %v2310_v9 = vld [vmem:[%s3060_s1 + $0xa0] sm:$0xff]   ;;  %s2602_s18 = scalar_lea.vmem %s3059_s0, %s2289_s10  ;;  %s2800_s27 = scalar_lea.vmem %s3061_s2, %s2097_s23 }
   0xe   : > { %1315 = vmatprep.subr.bf16.mxu0 %v2515_v1  ;;  %1604 = vmatprep.subr.bf16.mxu1 %v2515_v1  ;;  %v2305_v10 = vld [vmem:[%s3060_s1 + $0x10] sm:$0xff]   ;;  %v2312_v11 = vld [vmem:[%s3060_s1 + $0x98] sm:$0xff]   ;;  %v2307_v12 = vld [vmem:[%s3060_s1 + $0x8] sm:$0xff]   ;;  %s2820_s30 = scalar_lea.vmem %s3062_s3, %s2097_s23 }
   0xf   : > { %v2314_v13 = vld [vmem:[%s3060_s1 + $0x90] sm:$0xff]   ;;  %v2309_v14 = vld [vmem:[%s3060_s1] sm:$0xff]   ;;  %v2316_v15 = vld [vmem:[%s3060_s1 + $0x88] sm:$0xff]  }
  0x10   : > { %v2327_v16 = vld [vmem:[%s2602_s18 + $0xc] ss:$16 sps:$4 sm:$0xff]   ;;  %v2331_v17 = vld [vmem:[%s2602_s18 + $0x4] ss:$16 sps:$4 sm:$0xff]   ;;  %v2325_v27 = vld [vmem:[%s2602_s18 + $0x8] ss:$16 sps:$4 sm:$0xff]  }
  0x11   : > { %1316 = vmatpush1.bf16.msra.mxu0 %v2300_v2  ;;  %1605 = vmatpush1.bf16.msra.mxu1 %v2306_v5  ;;  %v2311_v18 = vld [vmem:[%s3060_s1 + $0x78] sm:$0xff]   ;;  %v2318_v19 = vld [vmem:[%s3060_s1 + $0x80] sm:$0xff]   ;;  %v2313_v20 = vld [vmem:[%s3060_s1 + $0x70] sm:$0xff]  }
  0x12   : > { %1317 = vmatprep.subr.bf16.mxu0 %v2515_v1  ;;  %1606 = vmatprep.subr.bf16.mxu1 %v2515_v1  ;;  %v2320_v21 = vld [vmem:[%s3060_s1 + $0xd0] sm:$0xff]   ;;  %v2315_v22 = vld [vmem:[%s3060_s1 + $0x68] sm:$0xff]   ;;  %v2317_v24 = vld [vmem:[%s3060_s1 + $0x60] sm:$0xff]  }
  0x13   : > { %2255 = vmatprep.mubr.msk.bf16.mxu1 %vm1216_vm0, %v2327_v16  ;;  %1345 = vmatprep.mubr.bf16.mxu0 %v2331_v17  ;;  %v2322_v23 = vld [vmem:[%s3060_s1 + $0xc8] sm:$0xff]   ;;  %v2324_v25 = vld [vmem:[%s3060_s1 + $0xc0] sm:$0xff]   ;;  %v2319_v26 = vld [vmem:[%s3060_s1 + $0x58] sm:$0xff]  }
  0x14   : > { %v2332_v28 = vld [vmem:[%s2602_s18 + $0x2c] ss:$16 sps:$4 sm:$0xff]   ;;  %v2321_v29 = vld [vmem:[%s3060_s1 + $0x50] sm:$0xff]   ;;  %v2334_v31 = vld [vmem:[%s2602_s18 + $0x28] ss:$16 sps:$4 sm:$0xff]  }
  0x15   : > { %1318 = vmatpush1.bf16.msra.mxu0 %v2301_v4  ;;  %1607 = vmatpush1.bf16.msra.mxu1 %v2308_v7  ;;  %v2323_v30 = vld [vmem:[%s3060_s1 + $0x48] sm:$0xff]   ;;  %v2328_v33 = vld [vmem:[%s3060_s1 + $0x40] sm:$0xff]  }
  0x16   : > { %1319 = vmatprep.subr.bf16.mxu0 %v2515_v1  ;;  %1608 = vmatprep.subr.bf16.mxu1 %v2515_v1  ;;  %v2338_v32 = vld [vmem:[%s2602_s18 + $0x4c] ss:$16 sps:$4 sm:$0xff]   ;;  %v2329_v34 = vld [vmem:[%s2602_s18] ss:$16 sps:$4 sm:$0xff]   ;;  %v2335_v35 = vld [vmem:[%s2602_s18 + $0x24] ss:$16 sps:$4 sm:$0xff]  }
  0x17   : > { %v2340_v36 = vld [vmem:[%s2602_s18 + $0x48] ss:$16 sps:$4 sm:$0xff]   ;;  %v2344_v37 = vld [vmem:[%s2602_s18 + $0x6c] ss:$16 sps:$4 sm:$0xff]   ;;  %v2337_v38 = vld [vmem:[%s2602_s18 + $0x20] ss:$16 sps:$4 sm:$0xff]  }
  0x18   : > { %v2341_v39 = vld [vmem:[%s2602_s18 + $0x44] ss:$16 sps:$4 sm:$0xff]   ;;  %v2346_v40 = vld [vmem:[%s2602_s18 + $0x68] ss:$16 sps:$4 sm:$0xff]   ;;  %v2350_v41 = vld [vmem:[%s2602_s18 + $0x8c] ss:$16 sps:$4 sm:$0xff]  }
  0x19   : > { %1320 = vmatpush1.bf16.msra.mxu0 %v2302_v6  ;;  %1609 = vmatpush1.bf16.msra.mxu1 %v2310_v9  ;;  %v2343_v42 = vld [vmem:[%s2602_s18 + $0x40] ss:$16 sps:$4 sm:$0xff]   ;;  %v2347_v43 = vld [vmem:[%s2602_s18 + $0x64] ss:$16 sps:$4 sm:$0xff]   ;;  %v2352_v44 = vld [vmem:[%s2602_s18 + $0x88] ss:$16 sps:$4 sm:$0xff]  }
  0x1a   : > { %1321 = vmatprep.subr.bf16.mxu0 %v2515_v1  ;;  %1610 = vmatprep.subr.bf16.mxu1 %v2515_v1  ;;  %v2356_v45 = vld [vmem:[%s2602_s18 + $0xac] ss:$16 sps:$4 sm:$0xff]   ;;  %v2349_v46 = vld [vmem:[%s2602_s18 + $0x60] ss:$16 sps:$4 sm:$0xff]   ;;  %v2353_v47 = vld [vmem:[%s2602_s18 + $0x84] ss:$16 sps:$4 sm:$0xff]  }
  0x1b   : > { %v2358_v48 = vld [vmem:[%s2602_s18 + $0xa8] ss:$16 sps:$4 sm:$0xff]   ;;  %v2362_v49 = vld [vmem:[%s2602_s18 + $0xcc] ss:$16 sps:$4 sm:$0xff]   ;;  %v2355_v50 = vld [vmem:[%s2602_s18 + $0x80] ss:$16 sps:$4 sm:$0xff]  }
  0x1c   : > { %v2359_v51 = vld [vmem:[%s2602_s18 + $0xa4] ss:$16 sps:$4 sm:$0xff]   ;;  %v2364_v52 = vld [vmem:[%s2602_s18 + $0xc8] ss:$16 sps:$4 sm:$0xff]   ;;  %v2368_v53 = vld [vmem:[%s2602_s18 + $0xec] ss:$16 sps:$4 sm:$0xff]  }
  0x1d   : > { %1322 = vmatpush1.bf16.msra.mxu0 %v2303_v8  ;;  %1611 = vmatpush1.bf16.msra.mxu1 %v2312_v11  ;;  %v2361_v54 = vld [vmem:[%s2602_s18 + $0xa0] ss:$16 sps:$4 sm:$0xff]   ;;  %v2365_v55 = vld [vmem:[%s2602_s18 + $0xc4] ss:$16 sps:$4 sm:$0xff]   ;;  %v2370_v56 = vld [vmem:[%s2602_s18 + $0xe8] ss:$16 sps:$4 sm:$0xff]  }
  0x1e   : > { %1323 = vmatprep.subr.bf16.mxu0 %v2515_v1  ;;  %1612 = vmatprep.subr.bf16.mxu1 %v2515_v1  ;;  %v2374_v57 = vld [vmem:[%s2602_s18 + $0x10c] ss:$16 sps:$4 sm:$0xff]   ;;  %v2367_v58 = vld [vmem:[%s2602_s18 + $0xc0] ss:$16 sps:$4 sm:$0xff]   ;;  %v2371_v59 = vld [vmem:[%s2602_s18 + $0xe4] ss:$16 sps:$4 sm:$0xff]  }
  0x1f   : > { %v2376_v60 = vld [vmem:[%s2602_s18 + $0x108] ss:$16 sps:$4 sm:$0xff]   ;;  %v2380_v61 = vld [vmem:[%s2602_s18 + $0x12c] ss:$16 sps:$4 sm:$0xff]   ;;  %v2373_v62 = vld [vmem:[%s2602_s18 + $0xe0] ss:$16 sps:$4 sm:$0xff]  }
  0x20   : > { %v2377_v63 = vld [vmem:[%s2602_s18 + $0x104] ss:$16 sps:$4 sm:$0xff]   ;;  %v2382_v0 = vld [vmem:[%s2602_s18 + $0x128] ss:$16 sps:$4 sm:$0xff]   ;;  %v2379_v2 = vld [vmem:[%s2602_s18 + $0x100] ss:$16 sps:$4 sm:$0xff]  }
  0x21   : > { %1324 = vmatpush1.bf16.msra.mxu0 %v2305_v10  ;;  %1613 = vmatpush1.bf16.msra.mxu1 %v2314_v13  ;;  %v2383_v3 = vld [vmem:[%s2602_s18 + $0x124] ss:$16 sps:$4 sm:$0xff]   ;;  %v2388_v4 = vld [vmem:[%s2602_s18 + $0x148] ss:$16 sps:$4 sm:$0xff]   ;;  %v2392_v5 = vld [vmem:[%s2602_s18 + $0x16c] ss:$16 sps:$4 sm:$0xff]  }
  0x22   : > { %1325 = vmatprep.subr.bf16.mxu0 %v2515_v1  ;;  %1614 = vmatprep.subr.bf16.mxu1 %v2515_v1  ;;  %v2385_v6 = vld [vmem:[%s2602_s18 + $0x120] ss:$16 sps:$4 sm:$0xff]   ;;  %v2389_v7 = vld [vmem:[%s2602_s18 + $0x144] ss:$16 sps:$4 sm:$0xff]   ;;  %v2394_v8 = vld [vmem:[%s2602_s18 + $0x168] ss:$16 sps:$4 sm:$0xff]  }
  0x23   : > { %v2398_v9 = vld [vmem:[%s2602_s18 + $0x18c] ss:$16 sps:$4 sm:$0xff]   ;;  %v2391_v10 = vld [vmem:[%s2602_s18 + $0x140] ss:$16 sps:$4 sm:$0xff]   ;;  %v2395_v11 = vld [vmem:[%s2602_s18 + $0x164] ss:$16 sps:$4 sm:$0xff]  }
  0x24   : > { %v2404_v13 = vld [vmem:[%s2602_s18 + $0x1ac] ss:$16 sps:$4 sm:$0xff]   ;;  %v2406_v16 = vld [vmem:[%s2602_s18 + $0x1a8] ss:$16 sps:$4 sm:$0xff]  }
  0x25   : > { %1326 = vmatpush1.bf16.msra.mxu0 %v2307_v12  ;;  %1615 = vmatpush1.bf16.msra.mxu1 %v2316_v15  ;;  %v2400_v12 = vld [vmem:[%s2602_s18 + $0x188] ss:$16 sps:$4 sm:$0xff]   ;;  %v2401_v15 = vld [vmem:[%s2602_s18 + $0x184] ss:$16 sps:$4 sm:$0xff]   ;;  %v2410_v17 = vld [vmem:[%s2602_s18 + $0x1cc] ss:$16 sps:$4 sm:$0xff]  }
  0x26   : > { %1327 = vmatprep.subr.bf16.mxu0 %v2515_v1  ;;  %1616 = vmatprep.subr.bf16.mxu1 %v2515_v1 }
  0x29   : > { %1328 = vmatpush1.bf16.msra.mxu0 %v2309_v14  ;;  %1617 = vmatpush1.bf16.msra.mxu1 %v2318_v19  ;;  %v2397_v14 = vld [vmem:[%s2602_s18 + $0x160] ss:$16 sps:$4 sm:$0xff]   ;;  %v2407_v19 = vld [vmem:[%s2602_s18 + $0x1a4] ss:$16 sps:$4 sm:$0xff]  }
  0x2a   : > { %1329 = vmatprep.subr.bf16.mxu0 %v2515_v1  ;;  %1628 = vmatprep.subr.bf16.mxu1 %v2515_v1 }
  0x2d   : > { %1330 = vmatpush2.bf16.msra.mxu0 %v2311_v18  ;;  %1629 = vmatpush2.bf16.msra.mxu1 %v2320_v21  ;;  %v2403_v18 = vld [vmem:[%s2602_s18 + $0x180] ss:$16 sps:$4 sm:$0xff]   ;;  %v2416_v21 = vld [vmem:[%s2602_s18 + $0x1ec] ss:$16 sps:$4 sm:$0xff]  }
  0x2e   : > { %1331 = vmatprep.subr.bf16.mxu0 %v2515_v1  ;;  %1630 = vmatprep.subr.bf16.mxu1 %v2515_v1 }
  0x31   : > { %1332 = vmatpush2.bf16.msra.mxu0 %v2313_v20  ;;  %1631 = vmatpush2.bf16.msra.mxu1 %v2322_v23  ;;  %v2412_v20 = vld [vmem:[%s2602_s18 + $0x1c8] ss:$16 sps:$4 sm:$0xff]   ;;  %v2413_v23 = vld [vmem:[%s2602_s18 + $0x1c4] ss:$16 sps:$4 sm:$0xff]  }
  0x32   : > { %1333 = vmatprep.subr.bf16.mxu0 %v2515_v1  ;;  %1632 = vmatprep.subr.bf16.mxu1 %v2515_v1 }
  0x35   : > { %1334 = vmatpush2.bf16.msra.mxu0 %v2315_v22  ;;  %1633 = vmatpush2.bf16.msra.mxu1 %v2324_v25  ;;  %v2409_v22 = vld [vmem:[%s2602_s18 + $0x1a0] ss:$16 sps:$4 sm:$0xff]   ;;  %v2422_v25 = vld [vmem:[%s2602_s18 + $0x20c] ss:$16 sps:$4 sm:$0xff]  }
  0x36   : > { %1335 = vmatprep.subr.bf16.mxu0 %v2515_v1 }
  0x38   : > { %1635 = vmatmul.mubr.bf16.vlgmr.msra.gmra.mxu1 %v2325_v27  ;;  %v2419_v27 = vld [vmem:[%s2602_s18 + $0x1e4] ss:$16 sps:$4 sm:$0xff]  }
  0x39   : > { %1336 = vmatpush2.bf16.msra.mxu0 %v2317_v24  ;;  %2256 = vmatprep.mubr.msk.bf16.mxu1 %vm1216_vm0, %v2332_v28  ;;  %v2418_v24 = vld [vmem:[%s2602_s18 + $0x1e8] ss:$16 sps:$4 sm:$0xff]  }
  0x3a   : > { %1337 = vmatprep.subr.bf16.mxu0 %v2515_v1  ;;  %v2424_v28 = vld [vmem:[%s2602_s18 + $0x208] ss:$16 sps:$4 sm:$0xff]  }
  0x3d   : > { %1338 = vmatpush2.bf16.msra.mxu0 %v2319_v26  ;;  %v2415_v26 = vld [vmem:[%s2602_s18 + $0x1c0] ss:$16 sps:$4 sm:$0xff]  }
  0x3e   : > { %1339 = vmatprep.subr.bf16.mxu0 %v2515_v1 }
  0x40   : > { %1643 = vmatmul.mubr.bf16.gmra.mxu1 %v2334_v31  ;;  %v2425_v31 = vld [vmem:[%s2602_s18 + $0x204] ss:$16 sps:$4 sm:$0xff]  }
  0x41   : > { %1340 = vmatpush2.bf16.msra.mxu0 %v2321_v29  ;;  %2257 = vmatprep.mubr.msk.bf16.mxu1 %vm1216_vm0, %v2338_v32  ;;  %v2428_v29 = vld [vmem:[%s2602_s18 + $0x22c] ss:$16 sps:$4 sm:$0xff]   ;;  %v2430_v32 = vld [vmem:[%s2602_s18 + $0x228] ss:$16 sps:$4 sm:$0xff]  }
  0x42   : > { %1341 = vmatprep.subr.bf16.mxu0 %v2515_v1 }
  0x45   : > { %1342 = vmatpush2.bf16.msra.mxu0 %v2323_v30  ;;  %v2421_v30 = vld [vmem:[%s2602_s18 + $0x1e0] ss:$16 sps:$4 sm:$0xff]  }
  0x46   : > { %1343 = vmatprep.subr.bf16.mxu0 %v2515_v1  ;;  %v2386_v1 = vld [vmem:[%s2602_s18 + $0x14c] ss:$16 sps:$4 sm:$0xff]  }
  0x48   : > { %1651 = vmatmul.mubr.bf16.gmra.mxu1 %v2340_v36  ;;  %v2436_v36 = vld [vmem:[%s2602_s18 + $0x248] ss:$16 sps:$4 sm:$0xff]  }
  0x49   : > { %1344 = vmatpush2.bf16.msra.mxu0 %v2328_v33  ;;  %2258 = vmatprep.mubr.msk.bf16.mxu1 %vm1216_vm0, %v2344_v37  ;;  %v2434_v33 = vld [vmem:[%s2602_s18 + $0x24c] ss:$16 sps:$4 sm:$0xff]  }
  0x4a   : > { %v2440_v37 = vld [vmem:[%s2602_s18 + $0x26c] ss:$16 sps:$4 sm:$0xff]  }
  0x4c   : > { %1346 = vmatmul.mubr.bf16.vlgmr.msra.gmra.mxu0 %v2329_v34  ;;  %v2427_v34 = vld [vmem:[%s2602_s18 + $0x200] ss:$16 sps:$4 sm:$0xff]  }
  0x4d   : > { %1353 = vmatprep.mubr.bf16.mxu0 %v2335_v35  ;;  %v2431_v35 = vld [vmem:[%s2602_s18 + $0x224] ss:$16 sps:$4 sm:$0xff]  }
  0x50   : > { %1659 = vmatmul.mubr.bf16.gmra.mxu1 %v2346_v40  ;;  %v2442_v40 = vld [vmem:[%s2602_s18 + $0x268] ss:$16 sps:$4 sm:$0xff]  }
  0x51   : > { %2259 = vmatprep.mubr.msk.bf16.mxu1 %vm1216_vm0, %v2350_v41  ;;  %v2446_v41 = vld [vmem:[%s2602_s18 + $0x28c] ss:$16 sps:$4 sm:$0xff]  }
  0x54   : > { %1354 = vmatmul.mubr.bf16.gmra.mxu0 %v2337_v38  ;;  %v2433_v38 = vld [vmem:[%s2602_s18 + $0x220] ss:$16 sps:$4 sm:$0xff]  }
  0x55   : > { %1361 = vmatprep.mubr.bf16.mxu0 %v2341_v39  ;;  %v2437_v39 = vld [vmem:[%s2602_s18 + $0x244] ss:$16 sps:$4 sm:$0xff]  }
  0x58   : > { %1667 = vmatmul.mubr.bf16.gmra.mxu1 %v2352_v44  ;;  %v2448_v44 = vld [vmem:[%s2602_s18 + $0x288] ss:$16 sps:$4 sm:$0xff]  }
  0x59   : > { %2260 = vmatprep.mubr.msk.bf16.mxu1 %vm1216_vm0, %v2356_v45  ;;  %v2452_v45 = vld [vmem:[%s2602_s18 + $0x2ac] ss:$16 sps:$4 sm:$0xff]  }
  0x5c   : > { %1362 = vmatmul.mubr.bf16.gmra.mxu0 %v2343_v42  ;;  %v2439_v42 = vld [vmem:[%s2602_s18 + $0x240] ss:$16 sps:$4 sm:$0xff]  }
  0x5d   : > { %1369 = vmatprep.mubr.bf16.mxu0 %v2347_v43  ;;  %v2443_v43 = vld [vmem:[%s2602_s18 + $0x264] ss:$16 sps:$4 sm:$0xff]  }
  0x60   : > { %1675 = vmatmul.mubr.bf16.gmra.mxu1 %v2358_v48  ;;  %v2454_v48 = vld [vmem:[%s2602_s18 + $0x2a8] ss:$16 sps:$4 sm:$0xff]  }
  0x61   : > { %2261 = vmatprep.mubr.msk.bf16.mxu1 %vm1216_vm0, %v2362_v49  ;;  %v2458_v49 = vld [vmem:[%s2602_s18 + $0x2cc] ss:$16 sps:$4 sm:$0xff]  }
  0x64   : > { %1370 = vmatmul.mubr.bf16.gmra.mxu0 %v2349_v46  ;;  %v2445_v46 = vld [vmem:[%s2602_s18 + $0x260] ss:$16 sps:$4 sm:$0xff]  }
  0x65   : > { %1377 = vmatprep.mubr.bf16.mxu0 %v2353_v47  ;;  %v2449_v47 = vld [vmem:[%s2602_s18 + $0x284] ss:$16 sps:$4 sm:$0xff]  }
  0x68   : > { %1683 = vmatmul.mubr.bf16.gmra.mxu1 %v2364_v52  ;;  %v2460_v52 = vld [vmem:[%s2602_s18 + $0x2c8] ss:$16 sps:$4 sm:$0xff]  }
  0x69   : > { %2262 = vmatprep.mubr.msk.bf16.mxu1 %vm1216_vm0, %v2368_v53  ;;  %v2464_v53 = vld [vmem:[%s2602_s18 + $0x2ec] ss:$16 sps:$4 sm:$0xff]  }
  0x6c   : > { %1378 = vmatmul.mubr.bf16.gmra.mxu0 %v2355_v50  ;;  %v2451_v50 = vld [vmem:[%s2602_s18 + $0x280] ss:$16 sps:$4 sm:$0xff]  }
  0x6d   : > { %1385 = vmatprep.mubr.bf16.mxu0 %v2359_v51  ;;  %v2455_v51 = vld [vmem:[%s2602_s18 + $0x2a4] ss:$16 sps:$4 sm:$0xff]  }
  0x70   : > { %1691 = vmatmul.mubr.bf16.gmra.mxu1 %v2370_v56  ;;  %v2466_v56 = vld [vmem:[%s2602_s18 + $0x2e8] ss:$16 sps:$4 sm:$0xff]  }
  0x71   : > { %2263 = vmatprep.mubr.msk.bf16.mxu1 %vm1216_vm0, %v2374_v57  ;;  %v2470_v57 = vld [vmem:[%s2602_s18 + $0x30c] ss:$16 sps:$4 sm:$0xff]  }
  0x74   : > { %1386 = vmatmul.mubr.bf16.gmra.mxu0 %v2361_v54  ;;  %v2457_v54 = vld [vmem:[%s2602_s18 + $0x2a0] ss:$16 sps:$4 sm:$0xff]  }
  0x75   : > { %1393 = vmatprep.mubr.bf16.mxu0 %v2365_v55  ;;  %v2461_v55 = vld [vmem:[%s2602_s18 + $0x2c4] ss:$16 sps:$4 sm:$0xff]  }
  0x78   : > { %1699 = vmatmul.mubr.bf16.gmra.mxu1 %v2376_v60  ;;  %v2472_v60 = vld [vmem:[%s2602_s18 + $0x308] ss:$16 sps:$4 sm:$0xff]  }
  0x79   : > { %2264 = vmatprep.mubr.msk.bf16.mxu1 %vm1216_vm0, %v2380_v61  ;;  %v2475_v61 = vld [vmem:[%s2602_s18 + $0x32c] ss:$16 sps:$4 sm:$0xff]  }
  0x7c   : > { %1394 = vmatmul.mubr.bf16.gmra.mxu0 %v2367_v58  ;;  %v2463_v58 = vld [vmem:[%s2602_s18 + $0x2c0] ss:$16 sps:$4 sm:$0xff]  }
  0x7d   : > { %1401 = vmatprep.mubr.bf16.mxu0 %v2371_v59  ;;  %v2467_v59 = vld [vmem:[%s2602_s18 + $0x2e4] ss:$16 sps:$4 sm:$0xff]  }
  0x80   : > { %1707 = vmatmul.mubr.bf16.gmra.mxu1 %v2382_v0  ;;  %v303_v0 = vld [vmem:[%s2602_s18 + $0x338] sm:$0xff] }
  0x81   : > { %2265 = vmatprep.mubr.msk.bf16.mxu1 %vm1216_vm0, %v2386_v1 }
  0x84   : > { %1402 = vmatmul.mubr.bf16.gmra.mxu0 %v2373_v62 }
  0x85   : > { %1409 = vmatprep.mubr.bf16.mxu0 %v2377_v63  ;;  %v301_v63 = vld [vmem:[%s2602_s18 + $0x328] sm:$0xff] }
  0x88   : > { %1715 = vmatmul.mubr.bf16.gmra.mxu1 %v2388_v4 }
  0x89   : > { %2266 = vmatprep.mubr.msk.bf16.mxu1 %vm1216_vm0, %v2392_v5  ;;  %v2202_v5 = vcombine.low %v301_v63, %v303_v0  ;;  %v386_v0 = vld [vmem:[%s2800_s27 + $0x20] sm:$0xff] }
  0x8c   : > { %1410 = vmatmul.mubr.bf16.gmra.mxu0 %v2379_v2  ;;  %v2469_v2 = vld [vmem:[%s2602_s18 + $0x2e0] ss:$16 sps:$4 sm:$0xff]  }
  0x8d   : > { %1417 = vmatprep.mubr.bf16.mxu0 %v2383_v3  ;;  %v2473_v3 = vld [vmem:[%s2602_s18 + $0x304] ss:$16 sps:$4 sm:$0xff]  }
  0x90   : > { %1723 = vmatmul.mubr.bf16.gmra.mxu1 %v2394_v8  ;;  %v296_v8 = vld [vmem:[%s2602_s18 + $0x300] sm:$0xff] }
  0x91   : > { %2267 = vmatprep.mubr.msk.bf16.mxu1 %vm1216_vm0, %v2398_v9  ;;  %v298_v9 = vld [vmem:[%s2602_s18 + $0x310] sm:$0xff] }
  0x94   : > { %1418 = vmatmul.mubr.bf16.gmra.mxu0 %v2385_v6  ;;  %v2479_v6 = vld [vmem:[%s2602_s18 + $0x34c] ss:$16 sps:$4 sm:$0xff]  }
  0x95   : > { %1425 = vmatprep.mubr.bf16.mxu0 %v2389_v7 }
  0x98   : > { %1731 = vmatmul.mubr.bf16.gmra.mxu1 %v2400_v12  ;;  %v307_v12 = vld [vmem:[%s2602_s18 + $0x358] sm:$0xff] }
  0x99   : > { %2268 = vmatprep.mubr.msk.bf16.mxu1 %vm1216_vm0, %v2404_v13 }
  0x9c   : > { %1426 = vmatmul.mubr.bf16.gmra.mxu0 %v2391_v10 }
  0x9d   : > { %1433 = vmatprep.mubr.bf16.mxu0 %v2395_v11  ;;  %v305_v11 = vld [vmem:[%s2602_s18 + $0x348] sm:$0xff] }
  0xa0   : > { %1739 = vmatmul.mubr.bf16.gmra.mxu1 %v2406_v16 }
  0xa1   : > { %2269 = vmatprep.mubr.msk.bf16.mxu1 %vm1216_vm0, %v2410_v17  ;;  %v2206_v17 = vcombine.low %v305_v11, %v307_v12  ;;  %v387_v11 = vld [vmem:[%s2800_s27 + $0x28] sm:$0xff] }
  0xa2   : > { %v317_v12 = vld [vmem:[%s2602_s18 + $0x3a8] sm:$0xff] }
  0xa4   : > { %1434 = vmatmul.mubr.bf16.gmra.mxu0 %v2397_v14  ;;  %v2196_v14 = vcombine.low %v296_v8, %v298_v9  ;;  %v310_v8 = vld [vmem:[%s2602_s18 + $0x370] sm:$0xff] }
  0xa5   : > { %1441 = vmatprep.mubr.bf16.mxu0 %v2401_v15  ;;  %v2477_v15 = vld [vmem:[%s2602_s18 + $0x324] ss:$16 sps:$4 sm:$0xff]  }
  0xa8   : > { %1747 = vmatmul.mubr.bf16.gmra.mxu1 %v2412_v20 }
  0xa9   : > { %2270 = vmatprep.mubr.msk.bf16.mxu1 %vm1216_vm0, %v2416_v21 }
  0xac   : > { %1442 = vmatmul.mubr.bf16.gmra.mxu0 %v2403_v18  ;;  %v382_v18 = vld [vmem:[%s2800_s27] sm:$0xff] }
  0xad   : > { %1449 = vmatprep.mubr.bf16.mxu0 %v2407_v19  ;;  %v2483_v19 = vld [vmem:[%s2602_s18 + $0x36c] ss:$16 sps:$4 sm:$0xff]  }
  0xb0   : > { %1755 = vmatmul.mubr.bf16.gmra.mxu1 %v2418_v24  ;;  %v302_v24 = vld [vmem:[%s2602_s18 + $0x330] sm:$0xff] }
  0xb1   : > { %2271 = vmatprep.mubr.msk.bf16.mxu1 %vm1216_vm0, %v2422_v25 }
  0xb4   : > { %1450 = vmatmul.mubr.bf16.gmra.mxu0 %v2409_v22 }
  0xb5   : > { %1457 = vmatprep.mubr.bf16.mxu0 %v2413_v23  ;;  %v300_v23 = vld [vmem:[%s2602_s18 + $0x320] sm:$0xff] }
  0xb8   : > { %1763 = vmatmul.mubr.bf16.gmra.mxu1 %v2424_v28  ;;  %v309_v28 = vld [vmem:[%s2602_s18 + $0x368] sm:$0xff] }
  0xb9   : > { %2272 = vmatprep.mubr.msk.bf16.mxu1 %vm1216_vm0, %v2428_v29  ;;  %v311_v29 = vld [vmem:[%s2602_s18 + $0x378] sm:$0xff] }
  0xbc   : > { %1458 = vmatmul.mubr.bf16.gmra.mxu0 %v2415_v26 }
  0xbd   : > { %1465 = vmatprep.mubr.bf16.mxu0 %v2419_v27  ;;  %v383_v27 = vld [vmem:[%s2800_s27 + $0x8] sm:$0xff] }
  0xc0   : > { %1771 = vmatmul.mubr.bf16.gmra.mxu1 %v2430_v32 }
  0xc1   : > { %2273 = vmatprep.mubr.msk.bf16.mxu1 %vm1216_vm0, %v2434_v33  ;;  %v2200_v33 = vcombine.low %v300_v23, %v302_v24  ;;  %v388_v24 = vld [vmem:[%s2800_s27 + $0x30] sm:$0xff] }
  0xc4   : > { %1466 = vmatmul.mubr.bf16.gmra.mxu0 %v2421_v30 }
  0xc5   : > { %1473 = vmatprep.mubr.bf16.mxu0 %v2425_v31 }
  0xc8   : > { %1779 = vmatmul.mubr.bf16.gmra.mxu1 %v2436_v36  ;;  %v2481_v36 = vld [vmem:[%s2602_s18 + $0x344] ss:$16 sps:$4 sm:$0xff]  }
  0xc9   : > { %2274 = vmatprep.mubr.msk.bf16.mxu1 %vm1216_vm0, %v2440_v37 }
  0xcc   : > { %1474 = vmatmul.mubr.bf16.gmra.mxu0 %v2427_v34 }
  0xcd   : > { %1481 = vmatprep.mubr.bf16.mxu0 %v2431_v35 }
  0xd0   : > { %1787 = vmatmul.mubr.bf16.gmra.mxu1 %v2442_v40  ;;  %v384_v40 = vld [vmem:[%s2800_s27 + $0x10] sm:$0xff] }
  0xd1   : > { %2275 = vmatprep.mubr.msk.bf16.mxu1 %vm1216_vm0, %v2446_v41  ;;  %v2487_v41 = vld [vmem:[%s2602_s18 + $0x38c] ss:$16 sps:$4 sm:$0xff]  }
  0xd4   : > { %1482 = vmatmul.mubr.bf16.gmra.mxu0 %v2433_v38  ;;  %v2210_v38 = vcombine.low %v309_v28, %v311_v29 }
  0xd5   : > { %1489 = vmatprep.mubr.bf16.mxu0 %v2437_v39 }
  0xd8   : > { %1795 = vmatmul.mubr.bf16.gmra.mxu1 %v2448_v44 }
  0xd9   : > { %2276 = vmatprep.mubr.msk.bf16.mxu1 %vm1216_vm0, %v2452_v45 }
  0xdc   : > { %1490 = vmatmul.mubr.bf16.gmra.mxu0 %v2439_v42 }
  0xdd   : > { %1497 = vmatprep.mubr.bf16.mxu0 %v2443_v43 }
  0xe0   : > { %1803 = vmatmul.mubr.bf16.gmra.mxu1 %v2454_v48  ;;  %v306_v48 = vld [vmem:[%s2602_s18 + $0x350] sm:$0xff] }
  0xe1   : > { %2277 = vmatprep.mubr.msk.bf16.mxu1 %vm1216_vm0, %v2458_v49 }
  0xe4   : > { %1498 = vmatmul.mubr.bf16.gmra.mxu0 %v2445_v46 }
  0xe5   : > { %1505 = vmatprep.mubr.bf16.mxu0 %v2449_v47  ;;  %v304_v47 = vld [vmem:[%s2602_s18 + $0x340] sm:$0xff] }
  0xe8   : > { %1811 = vmatmul.mubr.bf16.gmra.mxu1 %v2460_v52  ;;  %v313_v52 = vld [vmem:[%s2602_s18 + $0x388] sm:$0xff] }
  0xe9   : > { %2278 = vmatprep.mubr.msk.bf16.mxu1 %vm1216_vm0, %v2464_v53  ;;  %v315_v53 = vld [vmem:[%s2602_s18 + $0x398] sm:$0xff] }
  0xec   : > { %1506 = vmatmul.mubr.bf16.gmra.mxu0 %v2451_v50 }
  0xed   : > { %1513 = vmatprep.mubr.bf16.mxu0 %v2455_v51  ;;  %v385_v51 = vld [vmem:[%s2800_s27 + $0x18] sm:$0xff] }
  0xf0   : > { %1819 = vmatmul.mubr.bf16.gmra.mxu1 %v2466_v56 }
  0xf1   : > { %2279 = vmatprep.mubr.msk.bf16.mxu1 %vm1216_vm0, %v2470_v57  ;;  %v2204_v57 = vcombine.low %v304_v47, %v306_v48  ;;  %v2502_v47 = vld [vmem:[%s2602_s18 + $0x3ec] ss:$16 sps:$4 sm:$0xff]  }
  0xf4   : > { %1514 = vmatmul.mubr.bf16.gmra.mxu0 %v2457_v54 }
  0xf5   : > { %1521 = vmatprep.mubr.bf16.mxu0 %v2461_v55 }
  0xf8   : > { %v1636_v62 = vpop.f32.mrf.mxu1  ;;  %1827 = vmatmul.mubr.bf16.gmra.mxu1 %v2472_v60  ;;  %v2485_v60 = vld [vmem:[%s2602_s18 + $0x364] ss:$16 sps:$4 sm:$0xff]  }
  0xf9   : > { %2280 = vmatprep.mubr.msk.bf16.mxu1 %vm1216_vm0, %v2475_v61 }
  0xfa   : > { %v1638_v1 = vpop.f32.mrf.mxu1 }
  0xfb   : > { %v2492_v1 = vld [vmem:[%s2602_s18 + $0x3ac] ss:$16 sps:$4 sm:$0xff]  }
  0xfc   : > { %1522 = vmatmul.mubr.bf16.gmra.mxu0 %v2463_v58  ;;  %v1639_v4 = vpop.f32.mrf.mxu1 }
  0xfd   : > { %1529 = vmatprep.mubr.bf16.mxu0 %v2467_v59 }
  0xfe   : > { %v1641_v7 = vpop.f32.mrf.mxu1 }
  0xff   : > { %v308_v7 = vld [vmem:[%s2602_s18 + $0x360] sm:$0xff] }
 0x100   : > { %v1644_v10 = vpop.f32.mrf.mxu1  ;;  %1835 = vmatmul.mubr.bf16.gmra.mxu1 %v2202_v5 }
 0x101   : > { %2281 = vmatprep.mubr.msk.bf16.mxu1 %vm1216_vm0, %v2479_v6 }
 0x102   : > { %v1646_v13 = vpop.f32.mrf.mxu1 }
 0x103   : > { %v319_v13 = vld [vmem:[%s2602_s18 + $0x3b8] sm:$0xff] }
 0x104   : > { %1530 = vmatmul.mubr.bf16.gmra.mxu0 %v2469_v2  ;;  %v2803_v16 = vpop.f32.mrf.mxu1 }
 0x105   : > { %1537 = vmatprep.mubr.bf16.mxu0 %v2473_v3 }
 0x106   : > { %v1649_v20 = vpop.f32.mrf.mxu1 }
 0x107   : > { %v2491_v20 = vld [vmem:[%s2602_s18 + $0x384] ss:$16 sps:$4 sm:$0xff]  }
 0x108   : > { %v2809_v25 = vpop.f32.mrf.mxu1  ;;  %1843 = vmatmul.mubr.bf16.gmra.mxu1 %v2206_v17  ;;  %v2208_v17 = vcombine.low %v308_v7, %v310_v8 }
 0x109   : > { %2282 = vmatprep.mubr.msk.bf16.mxu1 %vm1216_vm0, %v2483_v19 }
 0x10a   : > { %v1654_v31 = vpop.f32.mrf.mxu1 }
 0x10c   : > { %v1347_v21 = vpop.f32.mrf.mxu0  ;;  %1538 = vmatmul.mubr.bf16.gmra.mxu0 %v2196_v14  ;;  %v2823_v37 = vpop.f32.mrf.mxu1 }
 0x10d   : > { %v1348_v22 = vadd.f32 %v1347_v21, %v382_v18  ;;  %1545 = vmatprep.mubr.bf16.mxu0 %v2477_v15 }
 0x10e   : > { %v1349_v26 = vpop.f32.mrf.mxu0  ;;  %v1657_v43 = vpop.f32.mrf.mxu1 }
 0x10f   : > { %v1637_v30 = vadd.f32 %v1636_v62, %v1348_v22  ;;  %v2214_v62 = vcombine.low %v313_v52, %v315_v53  ;;  %v2218_v22 = vcombine.low %v317_v12, %v319_v13  ;;  %v2497_v26 = vld [vmem:[%s2602_s18 + $0x3cc] ss:$16 sps:$4 sm:$0xff]  }
 0x110   : > { %v1350_v32 = vpop.f32.mrf.mxu0  ;;  %v2831_v49 = vpop.f32.mrf.mxu1  ;;  %1851 = vmatmul.mubr.bf16.gmra.mxu1 %v2210_v38  ;;  %v393_v12 = vld [vmem:[%s2800_s27 + $0x58] sm:$0xff] }
 0x111   : > { %v1891_v34 = vmax.f32 %v1637_v30, 0.0  ;;  %v1351_v35 = vadd.f32 %v1350_v32, %v383_v27  ;;  %2283 = vmatprep.mubr.msk.bf16.mxu1 %vm1216_vm0, %v2487_v41 }
 0x112   : > { %v1352_v39 = vpop.f32.mrf.mxu0  ;;  %v1662_v55 = vpop.f32.mrf.mxu1 }
 0x113   : > { %1956 = vst.msk [vmem:[%s2820_s30] sm:$0xff] %vm1955_vm1, %v1891_v34  ;;  %v1640_v42 = vadd.f32 %v1639_v4, %v1351_v35  ;;  %v321_v34 = vld [vmem:[%s2602_s18 + $0x3c8] sm:$0xff]  ;;  %v323_v35 = vld [vmem:[%s2602_s18 + $0x3d8] sm:$0xff]  ;;  %v2489_v39 = vld [vmem:[%s2602_s18 + $0x380] ss:$16 sps:$4 sm:$0xff]  }
 0x114   : > { %v1355_v44 = vpop.f32.mrf.mxu0  ;;  %1546 = vmatmul.mubr.bf16.gmra.mxu0 %v2200_v33  ;;  %v2840_v61 = vpop.f32.mrf.mxu1  ;;  %v389_v33 = vld [vmem:[%s2800_s27 + $0x38] sm:$0xff]  ;;  %v391_v55 = vld [vmem:[%s2800_s27 + $0x48] sm:$0xff] }
 0x115   : > { %v1892_v45 = vmax.f32 %v1640_v42, 0.0  ;;  %v1356_v46 = vadd.f32 %v1355_v44, %v384_v40  ;;  %1553 = vmatprep.mubr.bf16.mxu0 %v2481_v36  ;;  %v2496_v42 = vld [vmem:[%s2602_s18 + $0x3a4] ss:$16 sps:$4 sm:$0xff]   ;;  %v2222_v44 = vcombine.low %v321_v34, %v323_v35  ;;  %v2504_v34 = vld [vmem:[%s2602_s18 + $0x3e0] ss:$16 sps:$4 sm:$0xff]  }
 0x116   : > { %v1357_v50 = vpop.f32.mrf.mxu0  ;;  %v1665_v3 = vpop.f32.mrf.mxu1 }
 0x117   : > { %1957 = vst.msk [vmem:[%s2820_s30 + $0x8] sm:$0xff] %vm1955_vm1, %v1892_v45  ;;  %v1645_v54 = vadd.f32 %v1644_v10, %v1356_v46  ;;  %v390_v46 = vld [vmem:[%s2800_s27 + $0x40] sm:$0xff] }
 0x118   : > { %v1358_v56 = vpop.f32.mrf.mxu0  ;;  %v2849_v9 = vpop.f32.mrf.mxu1  ;;  %1859 = vmatmul.mubr.bf16.gmra.mxu1 %v2214_v62 }
 0x119   : > { %v1893_v58 = vmax.f32 %v1645_v54, 0.0  ;;  %v1359_v59 = vadd.f32 %v1358_v56, %v385_v51  ;;  %2284 = vmatprep.mubr.msk.bf16.mxu1 %vm1216_vm0, %v2492_v1  ;;  %v325_v56 = vld [vmem:[%s2602_s18 + $0x3e8] sm:$0xff] }
 0x11a   : > { %v1360_v63 = vpop.f32.mrf.mxu0  ;;  %v1670_v15 = vpop.f32.mrf.mxu1 }
 0x11b   : > { %1958 = vst.msk [vmem:[%s2820_s30 + $0x10] sm:$0xff] %vm1955_vm1, %v1893_v58  ;;  %v1648_v2 = vadd.f32 %v2803_v16, %v1359_v59 }
 0x11c   : > { %v1363_v4 = vpop.f32.mrf.mxu0  ;;  %1554 = vmatmul.mubr.bf16.gmra.mxu0 %v2204_v57  ;;  %v1671_v21 = vpop.f32.mrf.mxu1  ;;  %v327_v57 = vld [vmem:[%s2602_s18 + $0x3f8] sm:$0xff] }
 0x11d   : > { %v1894_v5 = vmax.f32 %v1648_v2, 0.0  ;;  %v1364_v6 = vadd.f32 %v1363_v4, %v386_v0  ;;  %1561 = vmatprep.mubr.bf16.mxu0 %v2485_v60  ;;  %v2501_v0 = vld [vmem:[%s2602_s18 + $0x3c4] ss:$16 sps:$4 sm:$0xff]   ;;  %v2226_v2 = vcombine.low %v325_v56, %v327_v57 }
 0x11e   : > { %v1365_v10 = vpop.f32.mrf.mxu0  ;;  %v392_v4 = vld [vmem:[%s2800_s27 + $0x50] sm:$0xff] }
 0x11f   : > { %1959 = vst.msk [vmem:[%s2820_s30 + $0x18] sm:$0xff] %vm1955_vm1, %v1894_v5  ;;  %v1653_v14 = vadd.f32 %v2809_v25, %v1364_v6  ;;  %v1673_v25 = vpop.f32.mrf.mxu1 }
 0x120   : > { %v1366_v16 = vpop.f32.mrf.mxu0  ;;  %1867 = vmatmul.mubr.bf16.gmra.mxu1 %v2218_v22  ;;  %v394_v22 = vld [vmem:[%s2800_s27 + $0x60] sm:$0xff] }
 0x121   : > { %v1895_v18 = vmax.f32 %v1653_v14, 0.0  ;;  %v1367_v19 = vadd.f32 %v1366_v16, %v387_v11  ;;  %v1676_v31 = vpop.f32.mrf.mxu1  ;;  %2285 = vmatprep.mubr.msk.bf16.mxu1 %vm1216_vm0, %v2497_v26  ;;  %v2499_v16 = vld [vmem:[%s2602_s18 + $0x3c0] ss:$16 sps:$4 sm:$0xff]  }
 0x122   : > { %v1368_v23 = vpop.f32.mrf.mxu0 }
 0x123   : > { %1960 = vst.msk [vmem:[%s2820_s30 + $0x20] sm:$0xff] %vm1955_vm1, %v1895_v18  ;;  %v1656_v27 = vadd.f32 %v2823_v37, %v1367_v19  ;;  %v1678_v37 = vpop.f32.mrf.mxu1  ;;  %v2506_v19 = vld [vmem:[%s2602_s18 + $0x3e4] ss:$16 sps:$4 sm:$0xff]  }
 0x124   : > { %v1371_v28 = vpop.f32.mrf.mxu0  ;;  %1562 = vmatmul.mubr.bf16.gmra.mxu0 %v2208_v17 }
 0x125   : > { %v1896_v29 = vmax.f32 %v1656_v27, 0.0  ;;  %v1372_v30 = vadd.f32 %v1371_v28, %v388_v24  ;;  %1569 = vmatprep.mubr.bf16.mxu0 %v2491_v20  ;;  %v1679_v43 = vpop.f32.mrf.mxu1 }
 0x126   : > { %v1373_v32 = vpop.f32.mrf.mxu0 }
 0x127   : > { %1961 = vst.msk [vmem:[%s2820_s30 + $0x28] sm:$0xff] %vm1955_vm1, %v1896_v29  ;;  %v1661_v36 = vadd.f32 %v2831_v49, %v1372_v30  ;;  %v1681_v49 = vpop.f32.mrf.mxu1  ;;  %v395_v30 = vld [vmem:[%s2800_s27 + $0x68] sm:$0xff] }
 0x128   : > { %v1374_v38 = vpop.f32.mrf.mxu0  ;;  %1875 = vmatmul.mubr.bf16.gmra.mxu1 %v2222_v44 }
 0x129   : > { %v1897_v40 = vmax.f32 %v1661_v36, 0.0  ;;  %v1375_v41 = vadd.f32 %v1374_v38, %v389_v33  ;;  %v1684_v53 = vpop.f32.mrf.mxu1  ;;  %2286 = vmatprep.mubr.msk.bf16.mxu1 %vm1216_vm0, %v2502_v47  ;;  %v397_v47 = vld [vmem:[%s2800_s27 + $0x78] sm:$0xff] }
 0x12a   : > { %v1376_v45 = vpop.f32.mrf.mxu0 }
 0x12b   : > { %1962 = vst.msk [vmem:[%s2820_s30 + $0x30] sm:$0xff] %vm1955_vm1, %v1897_v40  ;;  %v1664_v48 = vadd.f32 %v2840_v61, %v1375_v41  ;;  %v1686_v59 = vpop.f32.mrf.mxu1  ;;  %v2494_v61 = vld [vmem:[%s2602_s18 + $0x3a0] ss:$16 sps:$4 sm:$0xff]  }
 0x12c   : > { %v1379_v50 = vpop.f32.mrf.mxu0  ;;  %1570 = vmatmul.mubr.bf16.gmra.mxu0 %v2489_v39  ;;  %v396_v39 = vld [vmem:[%s2800_s27 + $0x70] sm:$0xff] }
 0x12d   : > { %v1898_v51 = vmax.f32 %v1664_v48, 0.0  ;;  %v1380_v52 = vadd.f32 %v1379_v50, %v390_v46  ;;  %1577 = vmatprep.mubr.bf16.mxu0 %v2496_v42  ;;  %v1687_v1 = vpop.f32.mrf.mxu1 }
 0x12e   : > { %v1381_v54 = vpop.f32.mrf.mxu0 }
 0x12f   : > { %1963 = vst.msk [vmem:[%s2820_s30 + $0x38] sm:$0xff] %vm1955_vm1, %v1898_v51  ;;  %v1669_v58 = vadd.f32 %v2849_v9, %v1380_v52  ;;  %v1689_v6 = vpop.f32.mrf.mxu1 }
 0x130   : > { %v1382_v60 = vpop.f32.mrf.mxu0  ;;  %1883 = vmatmul.mubr.bf16.gmra.mxu1 %v2226_v2 }
 0x131   : > { %v1899_v62 = vmax.f32 %v1669_v58, 0.0  ;;  %v1383_v63 = vadd.f32 %v1382_v60, %v391_v55  ;;  %v1692_v10 = vpop.f32.mrf.mxu1  ;;  %v398_v55 = vld [vmem:[%s2800_s27 + $0x80] sm:$0xff] }
 0x132   : > { %v1384_v3 = vpop.f32.mrf.mxu0 }
 0x133   : > { %1964 = vst.msk [vmem:[%s2820_s30 + $0x40] sm:$0xff] %vm1955_vm1, %v1899_v62  ;;  %v1672_v5 = vadd.f32 %v1671_v21, %v1383_v63  ;;  %v1694_v14 = vpop.f32.mrf.mxu1  ;;  %v399_v63 = vld [vmem:[%s2800_s27 + $0x88] sm:$0xff] }
 0x134   : > { %v1387_v7 = vpop.f32.mrf.mxu0  ;;  %1578 = vmatmul.mubr.bf16.gmra.mxu0 %v2494_v61 }
 0x135   : > { %v1900_v8 = vmax.f32 %v1672_v5, 0.0  ;;  %v1388_v9 = vadd.f32 %v1387_v7, %v392_v4  ;;  %1585 = vmatprep.mubr.bf16.mxu0 %v2501_v0  ;;  %v1695_v20 = vpop.f32.mrf.mxu1  ;;  %v400_v7 = vld [vmem:[%s2800_s27 + $0x90] sm:$0xff] }
 0x136   : > { %v1389_v11 = vpop.f32.mrf.mxu0 }
 0x137   : > { %1965 = vst.msk [vmem:[%s2820_s30 + $0x48] sm:$0xff] %vm1955_vm1, %v1900_v8  ;;  %v1677_v13 = vadd.f32 %v1676_v31, %v1388_v9  ;;  %v1697_v24 = vpop.f32.mrf.mxu1 }
 0x138   : > { %v1390_v15 = vpop.f32.mrf.mxu0 }
 0x139   : > { %v1901_v17 = vmax.f32 %v1677_v13, 0.0  ;;  %v1391_v18 = vadd.f32 %v1390_v15, %v393_v12  ;;  %v1700_v28 = vpop.f32.mrf.mxu1  ;;  %v401_v15 = vld [vmem:[%s2800_s27 + $0x98] sm:$0xff] }
 0x13a   : > { %v1392_v21 = vpop.f32.mrf.mxu0 }
 0x13b   : > { %1966 = vst.msk [vmem:[%s2820_s30 + $0x50] sm:$0xff] %vm1955_vm1, %v1901_v17  ;;  %v1680_v23 = vadd.f32 %v1679_v43, %v1391_v18  ;;  %v1702_v32 = vpop.f32.mrf.mxu1 }
 0x13c   : > { %v1395_v26 = vpop.f32.mrf.mxu0  ;;  %1586 = vmatmul.mubr.bf16.gmra.mxu0 %v2499_v16 }
 0x13d   : > { %v1902_v27 = vmax.f32 %v1680_v23, 0.0  ;;  %v1396_v25 = vadd.f32 %v1395_v26, %v394_v22  ;;  %1593 = vmatprep.mubr.bf16.mxu0 %v2506_v19  ;;  %v1703_v37 = vpop.f32.mrf.mxu1  ;;  %v402_v23 = vld [vmem:[%s2800_s27 + $0xa0] sm:$0xff] }
 0x13e   : > { %v1397_v29 = vpop.f32.mrf.mxu0 }
 0x13f   : > { %1967 = vst.msk [vmem:[%s2820_s30 + $0x58] sm:$0xff] %vm1955_vm1, %v1902_v27  ;;  %v1685_v31 = vadd.f32 %v1684_v53, %v1396_v25  ;;  %v1705_v41 = vpop.f32.mrf.mxu1 }
 0x140   : > { %v1398_v33 = vpop.f32.mrf.mxu0 }
 0x141   : > { %v1903_v35 = vmax.f32 %v1685_v31, 0.0  ;;  %v1399_v36 = vadd.f32 %v1398_v33, %v395_v30  ;;  %v1708_v45 = vpop.f32.mrf.mxu1  ;;  %v403_v31 = vld [vmem:[%s2800_s27 + $0xa8] sm:$0xff] }
 0x142   : > { %v1400_v38 = vpop.f32.mrf.mxu0 }
 0x143   : > { %1968 = vst.msk [vmem:[%s2820_s30 + $0x60] sm:$0xff] %vm1955_vm1, %v1903_v35  ;;  %v1688_v40 = vadd.f32 %v1687_v1, %v1399_v36  ;;  %v1710_v49 = vpop.f32.mrf.mxu1 }
 0x144   : > { %v1403_v42 = vpop.f32.mrf.mxu0  ;;  %1594 = vmatmul.mubr.bf16.gmra.mxu0 %v2504_v34 }
 0x145   : > { %v1904_v43 = vmax.f32 %v1688_v40, 0.0  ;;  %v1404_v44 = vadd.f32 %v1403_v42, %v396_v39  ;;  %v1711_v53 = vpop.f32.mrf.mxu1  ;;  %v404_v39 = vld [vmem:[%s2800_s27 + $0xb0] sm:$0xff] }
 0x146   : > { %v1405_v46 = vpop.f32.mrf.mxu0 }
 0x147   : > { %1969 = vst.msk [vmem:[%s2820_s30 + $0x68] sm:$0xff] %vm1955_vm1, %v1904_v43  ;;  %v1693_v48 = vadd.f32 %v1692_v10, %v1404_v44  ;;  %v1713_v57 = vpop.f32.mrf.mxu1 }
 0x148   : > { %v1406_v50 = vpop.f32.mrf.mxu0 }
 0x149   : > { %v1905_v51 = vmax.f32 %v1693_v48, 0.0  ;;  %v1407_v52 = vadd.f32 %v1406_v50, %v397_v47  ;;  %v1716_v61 = vpop.f32.mrf.mxu1  ;;  %v405_v47 = vld [vmem:[%s2800_s27 + $0xb8] sm:$0xff] }
 0x14a   : > { %v1408_v54 = vpop.f32.mrf.mxu0 }
 0x14b   : > { %1970 = vst.msk [vmem:[%s2820_s30 + $0x70] sm:$0xff] %vm1955_vm1, %v1905_v51  ;;  %v1696_v56 = vadd.f32 %v1695_v20, %v1407_v52  ;;  %v1718_v1 = vpop.f32.mrf.mxu1 }
 0x14c   : > { %v1411_v58 = vpop.f32.mrf.mxu0 }
 0x14d   : > { %v1906_v59 = vmax.f32 %v1696_v56, 0.0  ;;  %v1412_v60 = vadd.f32 %v1411_v58, %v398_v55  ;;  %v1719_v5 = vpop.f32.mrf.mxu1  ;;  %v406_v55 = vld [vmem:[%s2800_s27 + $0xc0] sm:$0xff] }
 0x14e   : > { %v1413_v62 = vpop.f32.mrf.mxu0 }
 0x14f   : > { %1971 = vst.msk [vmem:[%s2820_s30 + $0x78] sm:$0xff] %vm1955_vm1, %v1906_v59  ;;  %v1701_v0 = vadd.f32 %v1700_v28, %v1412_v60  ;;  %v1721_v9 = vpop.f32.mrf.mxu1 }
 0x150   : > { %v1414_v2 = vpop.f32.mrf.mxu0 }
 0x151   : > { %v1907_v3 = vmax.f32 %v1701_v0, 0.0  ;;  %v1415_v4 = vadd.f32 %v1414_v2, %v399_v63  ;;  %v1724_v13 = vpop.f32.mrf.mxu1  ;;  %v407_v63 = vld [vmem:[%s2800_s27 + $0xc8] sm:$0xff] }
 0x152   : > { %v1416_v6 = vpop.f32.mrf.mxu0 }
 0x153   : > { %1972 = vst.msk [vmem:[%s2820_s30 + $0x80] sm:$0xff] %vm1955_vm1, %v1907_v3  ;;  %v1704_v8 = vadd.f32 %v1703_v37, %v1415_v4  ;;  %v1726_v17 = vpop.f32.mrf.mxu1 }
 0x154   : > { %v1419_v10 = vpop.f32.mrf.mxu0 }
 0x155   : > { %v1908_v11 = vmax.f32 %v1704_v8, 0.0  ;;  %v1420_v12 = vadd.f32 %v1419_v10, %v400_v7  ;;  %v1727_v21 = vpop.f32.mrf.mxu1  ;;  %v408_v7 = vld [vmem:[%s2800_s27 + $0xd0] sm:$0xff] }
 0x156   : > { %v1421_v14 = vpop.f32.mrf.mxu0 }
 0x157   : > { %1973 = vst.msk [vmem:[%s2820_s30 + $0x88] sm:$0xff] %vm1955_vm1, %v1908_v11  ;;  %v1709_v16 = vadd.f32 %v1708_v45, %v1420_v12  ;;  %v1729_v26 = vpop.f32.mrf.mxu1 }
 0x158   : > { %v1422_v18 = vpop.f32.mrf.mxu0 }
 0x159   : > { %v1909_v19 = vmax.f32 %v1709_v16, 0.0  ;;  %v1423_v20 = vadd.f32 %v1422_v18, %v401_v15  ;;  %v1732_v29 = vpop.f32.mrf.mxu1  ;;  %v409_v15 = vld [vmem:[%s2800_s27 + $0xd8] sm:$0xff] }
 0x15a   : > { %v1424_v22 = vpop.f32.mrf.mxu0 }
 0x15b   : > { %1974 = vst.msk [vmem:[%s2820_s30 + $0x90] sm:$0xff] %vm1955_vm1, %v1909_v19  ;;  %v1712_v24 = vadd.f32 %v1711_v53, %v1423_v20  ;;  %v1734_v33 = vpop.f32.mrf.mxu1 }
 0x15c   : > { %v1427_v27 = vpop.f32.mrf.mxu0 }
 0x15d   : > { %v1910_v25 = vmax.f32 %v1712_v24, 0.0  ;;  %v1428_v28 = vadd.f32 %v1427_v27, %v402_v23  ;;  %v1735_v37 = vpop.f32.mrf.mxu1  ;;  %v410_v23 = vld [vmem:[%s2800_s27 + $0xe0] sm:$0xff] }
 0x15e   : > { %v1429_v30 = vpop.f32.mrf.mxu0 }
 0x15f   : > { %1975 = vst.msk [vmem:[%s2820_s30 + $0x98] sm:$0xff] %vm1955_vm1, %v1910_v25  ;;  %v1717_v32 = vadd.f32 %v1716_v61, %v1428_v28  ;;  %v1737_v41 = vpop.f32.mrf.mxu1 }
 0x160   : > { %v1430_v34 = vpop.f32.mrf.mxu0 }
 0x161   : > { %v1911_v35 = vmax.f32 %v1717_v32, 0.0  ;;  %v1431_v36 = vadd.f32 %v1430_v34, %v403_v31  ;;  %v1740_v45 = vpop.f32.mrf.mxu1  ;;  %v411_v31 = vld [vmem:[%s2800_s27 + $0xe8] sm:$0xff] }
 0x162   : > { %v1432_v38 = vpop.f32.mrf.mxu0 }
 0x163   : > { %1976 = vst.msk [vmem:[%s2820_s30 + $0xa0] sm:$0xff] %vm1955_vm1, %v1911_v35  ;;  %v1720_v40 = vadd.f32 %v1719_v5, %v1431_v36  ;;  %v1742_v49 = vpop.f32.mrf.mxu1 }
 0x164   : > { %v1435_v42 = vpop.f32.mrf.mxu0 }
 0x165   : > { %v1912_v43 = vmax.f32 %v1720_v40, 0.0  ;;  %v1436_v44 = vadd.f32 %v1435_v42, %v404_v39  ;;  %v1743_v53 = vpop.f32.mrf.mxu1  ;;  %v412_v39 = vld [vmem:[%s2800_s27 + $0xf0] sm:$0xff] }
 0x166   : > { %v1437_v46 = vpop.f32.mrf.mxu0 }
 0x167   : > { %1977 = vst.msk [vmem:[%s2820_s30 + $0xa8] sm:$0xff] %vm1955_vm1, %v1912_v43  ;;  %v1725_v48 = vadd.f32 %v1724_v13, %v1436_v44  ;;  %v1745_v57 = vpop.f32.mrf.mxu1 }
 0x168   : > { %v1438_v50 = vpop.f32.mrf.mxu0 }
 0x169   : > { %v1913_v51 = vmax.f32 %v1725_v48, 0.0  ;;  %v1439_v52 = vadd.f32 %v1438_v50, %v405_v47  ;;  %v1748_v61 = vpop.f32.mrf.mxu1  ;;  %v413_v47 = vld [vmem:[%s2800_s27 + $0xf8] sm:$0xff] }
 0x16a   : > { %v1440_v54 = vpop.f32.mrf.mxu0 }
 0x16b   : > { %1978 = vst.msk [vmem:[%s2820_s30 + $0xb0] sm:$0xff] %vm1955_vm1, %v1913_v51  ;;  %v1728_v56 = vadd.f32 %v1727_v21, %v1439_v52  ;;  %v1750_v1 = vpop.f32.mrf.mxu1 }
 0x16c   : > { %v1443_v58 = vpop.f32.mrf.mxu0 }
 0x16d   : > { %v1914_v59 = vmax.f32 %v1728_v56, 0.0  ;;  %v1444_v60 = vadd.f32 %v1443_v58, %v406_v55  ;;  %v1751_v5 = vpop.f32.mrf.mxu1  ;;  %v414_v55 = vld [vmem:[%s2800_s27 + $0x100] sm:$0xff] }
 0x16e   : > { %v1445_v62 = vpop.f32.mrf.mxu0 }
 0x16f   : > { %1979 = vst.msk [vmem:[%s2820_s30 + $0xb8] sm:$0xff] %vm1955_vm1, %v1914_v59  ;;  %v1733_v0 = vadd.f32 %v1732_v29, %v1444_v60  ;;  %v1753_v9 = vpop.f32.mrf.mxu1 }
 0x170   : > { %v1446_v2 = vpop.f32.mrf.mxu0 }
 0x171   : > { %v1915_v3 = vmax.f32 %v1733_v0, 0.0  ;;  %v1447_v4 = vadd.f32 %v1446_v2, %v407_v63  ;;  %v1756_v13 = vpop.f32.mrf.mxu1  ;;  %v415_v63 = vld [vmem:[%s2800_s27 + $0x108] sm:$0xff] }
 0x172   : > { %v1448_v6 = vpop.f32.mrf.mxu0 }
 0x173   : > { %1980 = vst.msk [vmem:[%s2820_s30 + $0xc0] sm:$0xff] %vm1955_vm1, %v1915_v3  ;;  %v1736_v8 = vadd.f32 %v1735_v37, %v1447_v4  ;;  %v1758_v17 = vpop.f32.mrf.mxu1 }
 0x174   : > { %v1451_v10 = vpop.f32.mrf.mxu0 }
 0x175   : > { %v1916_v11 = vmax.f32 %v1736_v8, 0.0  ;;  %v1452_v12 = vadd.f32 %v1451_v10, %v408_v7  ;;  %v1759_v21 = vpop.f32.mrf.mxu1  ;;  %v416_v7 = vld [vmem:[%s2800_s27 + $0x110] sm:$0xff] }
 0x176   : > { %v1453_v14 = vpop.f32.mrf.mxu0 }
 0x177   : > { %1981 = vst.msk [vmem:[%s2820_s30 + $0xc8] sm:$0xff] %vm1955_vm1, %v1916_v11  ;;  %v1741_v16 = vadd.f32 %v1740_v45, %v1452_v12  ;;  %v1761_v26 = vpop.f32.mrf.mxu1 }
 0x178   : > { %v1454_v18 = vpop.f32.mrf.mxu0 }
 0x179   : > { %v1917_v19 = vmax.f32 %v1741_v16, 0.0  ;;  %v1455_v20 = vadd.f32 %v1454_v18, %v409_v15  ;;  %v1764_v29 = vpop.f32.mrf.mxu1  ;;  %v417_v15 = vld [vmem:[%s2800_s27 + $0x118] sm:$0xff] }
 0x17a   : > { %v1456_v22 = vpop.f32.mrf.mxu0 }
 0x17b   : > { %1982 = vst.msk [vmem:[%s2820_s30 + $0xd0] sm:$0xff] %vm1955_vm1, %v1917_v19  ;;  %v1744_v24 = vadd.f32 %v1743_v53, %v1455_v20  ;;  %v1766_v33 = vpop.f32.mrf.mxu1 }
 0x17c   : > { %v1459_v27 = vpop.f32.mrf.mxu0 }
 0x17d   : > { %v1918_v25 = vmax.f32 %v1744_v24, 0.0  ;;  %v1460_v28 = vadd.f32 %v1459_v27, %v410_v23  ;;  %v1767_v37 = vpop.f32.mrf.mxu1  ;;  %v418_v23 = vld [vmem:[%s2800_s27 + $0x120] sm:$0xff] }
 0x17e   : > { %v1461_v30 = vpop.f32.mrf.mxu0 }
 0x17f   : > { %1983 = vst.msk [vmem:[%s2820_s30 + $0xd8] sm:$0xff] %vm1955_vm1, %v1918_v25  ;;  %v1749_v32 = vadd.f32 %v1748_v61, %v1460_v28  ;;  %v1769_v41 = vpop.f32.mrf.mxu1 }
 0x180   : > { %v1462_v34 = vpop.f32.mrf.mxu0 }
 0x181   : > { %v1919_v35 = vmax.f32 %v1749_v32, 0.0  ;;  %v1463_v36 = vadd.f32 %v1462_v34, %v411_v31  ;;  %v1772_v45 = vpop.f32.mrf.mxu1  ;;  %v419_v31 = vld [vmem:[%s2800_s27 + $0x128] sm:$0xff] }
 0x182   : > { %v1464_v38 = vpop.f32.mrf.mxu0 }
 0x183   : > { %1984 = vst.msk [vmem:[%s2820_s30 + $0xe0] sm:$0xff] %vm1955_vm1, %v1919_v35  ;;  %v1752_v40 = vadd.f32 %v1751_v5, %v1463_v36  ;;  %v1774_v49 = vpop.f32.mrf.mxu1 }
 0x184   : > { %v1467_v42 = vpop.f32.mrf.mxu0 }
 0x185   : > { %v1920_v43 = vmax.f32 %v1752_v40, 0.0  ;;  %v1468_v44 = vadd.f32 %v1467_v42, %v412_v39  ;;  %v1775_v53 = vpop.f32.mrf.mxu1  ;;  %v420_v39 = vld [vmem:[%s2800_s27 + $0x130] sm:$0xff] }
 0x186   : > { %v1469_v46 = vpop.f32.mrf.mxu0 }
 0x187   : > { %1985 = vst.msk [vmem:[%s2820_s30 + $0xe8] sm:$0xff] %vm1955_vm1, %v1920_v43  ;;  %v1757_v48 = vadd.f32 %v1756_v13, %v1468_v44  ;;  %v1777_v57 = vpop.f32.mrf.mxu1 }
 0x188   : > { %v1470_v50 = vpop.f32.mrf.mxu0 }
 0x189   : > { %v1921_v51 = vmax.f32 %v1757_v48, 0.0  ;;  %v1471_v52 = vadd.f32 %v1470_v50, %v413_v47  ;;  %v1780_v61 = vpop.f32.mrf.mxu1  ;;  %v421_v47 = vld [vmem:[%s2800_s27 + $0x138] sm:$0xff] }
 0x18a   : > { %v1472_v54 = vpop.f32.mrf.mxu0 }
 0x18b   : > { %1986 = vst.msk [vmem:[%s2820_s30 + $0xf0] sm:$0xff] %vm1955_vm1, %v1921_v51  ;;  %v1760_v56 = vadd.f32 %v1759_v21, %v1471_v52  ;;  %v1782_v1 = vpop.f32.mrf.mxu1 }
 0x18c   : > { %v1475_v58 = vpop.f32.mrf.mxu0 }
 0x18d   : > { %v1922_v59 = vmax.f32 %v1760_v56, 0.0  ;;  %v1476_v60 = vadd.f32 %v1475_v58, %v414_v55  ;;  %v1783_v5 = vpop.f32.mrf.mxu1  ;;  %v422_v55 = vld [vmem:[%s2800_s27 + $0x140] sm:$0xff] }
 0x18e   : > { %v1477_v62 = vpop.f32.mrf.mxu0 }
 0x18f   : > { %1987 = vst.msk [vmem:[%s2820_s30 + $0xf8] sm:$0xff] %vm1955_vm1, %v1922_v59  ;;  %v1765_v0 = vadd.f32 %v1764_v29, %v1476_v60  ;;  %v1785_v9 = vpop.f32.mrf.mxu1 }
 0x190   : > { %v1478_v2 = vpop.f32.mrf.mxu0 }
 0x191   : > { %v1923_v3 = vmax.f32 %v1765_v0, 0.0  ;;  %v1479_v4 = vadd.f32 %v1478_v2, %v415_v63  ;;  %v1788_v13 = vpop.f32.mrf.mxu1  ;;  %v423_v63 = vld [vmem:[%s2800_s27 + $0x148] sm:$0xff] }
 0x192   : > { %v1480_v6 = vpop.f32.mrf.mxu0 }
 0x193   : > { %1988 = vst.msk [vmem:[%s2820_s30 + $0x100] sm:$0xff] %vm1955_vm1, %v1923_v3  ;;  %v1768_v8 = vadd.f32 %v1767_v37, %v1479_v4  ;;  %v1790_v17 = vpop.f32.mrf.mxu1 }
 0x194   : > { %v1483_v10 = vpop.f32.mrf.mxu0 }
 0x195   : > { %v1924_v11 = vmax.f32 %v1768_v8, 0.0  ;;  %v1484_v12 = vadd.f32 %v1483_v10, %v416_v7  ;;  %v1791_v21 = vpop.f32.mrf.mxu1  ;;  %v424_v7 = vld [vmem:[%s2800_s27 + $0x150] sm:$0xff] }
 0x196   : > { %v1485_v14 = vpop.f32.mrf.mxu0 }
 0x197   : > { %1989 = vst.msk [vmem:[%s2820_s30 + $0x108] sm:$0xff] %vm1955_vm1, %v1924_v11  ;;  %v1773_v16 = vadd.f32 %v1772_v45, %v1484_v12  ;;  %v1793_v26 = vpop.f32.mrf.mxu1 }
 0x198   : > { %v1486_v18 = vpop.f32.mrf.mxu0 }
 0x199   : > { %v1925_v19 = vmax.f32 %v1773_v16, 0.0  ;;  %v1487_v20 = vadd.f32 %v1486_v18, %v417_v15  ;;  %v1796_v29 = vpop.f32.mrf.mxu1  ;;  %v425_v15 = vld [vmem:[%s2800_s27 + $0x158] sm:$0xff] }
 0x19a   : > { %v1488_v22 = vpop.f32.mrf.mxu0 }
 0x19b   : > { %1990 = vst.msk [vmem:[%s2820_s30 + $0x110] sm:$0xff] %vm1955_vm1, %v1925_v19  ;;  %v1776_v24 = vadd.f32 %v1775_v53, %v1487_v20  ;;  %v1798_v33 = vpop.f32.mrf.mxu1 }
 0x19c   : > { %v1491_v27 = vpop.f32.mrf.mxu0 }
 0x19d   : > { %v1926_v25 = vmax.f32 %v1776_v24, 0.0  ;;  %v1492_v28 = vadd.f32 %v1491_v27, %v418_v23  ;;  %v1799_v37 = vpop.f32.mrf.mxu1  ;;  %v426_v23 = vld [vmem:[%s2800_s27 + $0x160] sm:$0xff] }
 0x19e   : > { %v1493_v30 = vpop.f32.mrf.mxu0 }
 0x19f   : > { %1991 = vst.msk [vmem:[%s2820_s30 + $0x118] sm:$0xff] %vm1955_vm1, %v1926_v25  ;;  %v1781_v32 = vadd.f32 %v1780_v61, %v1492_v28  ;;  %v1801_v41 = vpop.f32.mrf.mxu1 }
 0x1a0   : > { %v1494_v34 = vpop.f32.mrf.mxu0 }
 0x1a1   : > { %v1927_v35 = vmax.f32 %v1781_v32, 0.0  ;;  %v1495_v36 = vadd.f32 %v1494_v34, %v419_v31  ;;  %v1804_v45 = vpop.f32.mrf.mxu1  ;;  %v427_v31 = vld [vmem:[%s2800_s27 + $0x168] sm:$0xff] }
 0x1a2   : > { %v1496_v38 = vpop.f32.mrf.mxu0 }
 0x1a3   : > { %1992 = vst.msk [vmem:[%s2820_s30 + $0x120] sm:$0xff] %vm1955_vm1, %v1927_v35  ;;  %v1784_v40 = vadd.f32 %v1783_v5, %v1495_v36  ;;  %v1806_v49 = vpop.f32.mrf.mxu1 }
 0x1a4   : > { %v1499_v42 = vpop.f32.mrf.mxu0 }
 0x1a5   : > { %v1928_v43 = vmax.f32 %v1784_v40, 0.0  ;;  %v1500_v44 = vadd.f32 %v1499_v42, %v420_v39  ;;  %v1807_v53 = vpop.f32.mrf.mxu1  ;;  %v428_v39 = vld [vmem:[%s2800_s27 + $0x170] sm:$0xff] }
 0x1a6   : > { %v1501_v46 = vpop.f32.mrf.mxu0 }
 0x1a7   : > { %1993 = vst.msk [vmem:[%s2820_s30 + $0x128] sm:$0xff] %vm1955_vm1, %v1928_v43  ;;  %v1789_v48 = vadd.f32 %v1788_v13, %v1500_v44  ;;  %v1809_v57 = vpop.f32.mrf.mxu1 }
 0x1a8   : > { %v1502_v50 = vpop.f32.mrf.mxu0 }
 0x1a9   : > { %v1929_v51 = vmax.f32 %v1789_v48, 0.0  ;;  %v1503_v52 = vadd.f32 %v1502_v50, %v421_v47  ;;  %v1812_v61 = vpop.f32.mrf.mxu1  ;;  %v429_v47 = vld [vmem:[%s2800_s27 + $0x178] sm:$0xff] }
 0x1aa   : > { %v1504_v54 = vpop.f32.mrf.mxu0 }
 0x1ab   : > { %1994 = vst.msk [vmem:[%s2820_s30 + $0x130] sm:$0xff] %vm1955_vm1, %v1929_v51  ;;  %v1792_v56 = vadd.f32 %v1791_v21, %v1503_v52  ;;  %v1814_v1 = vpop.f32.mrf.mxu1 }
 0x1ac   : > { %v1507_v58 = vpop.f32.mrf.mxu0 }
 0x1ad   : > { %v1930_v59 = vmax.f32 %v1792_v56, 0.0  ;;  %v1508_v60 = vadd.f32 %v1507_v58, %v422_v55  ;;  %v1815_v5 = vpop.f32.mrf.mxu1  ;;  %v430_v55 = vld [vmem:[%s2800_s27 + $0x180] sm:$0xff] }
 0x1ae   : > { %v1509_v62 = vpop.f32.mrf.mxu0 }
 0x1af   : > { %1995 = vst.msk [vmem:[%s2820_s30 + $0x138] sm:$0xff] %vm1955_vm1, %v1930_v59  ;;  %v1797_v0 = vadd.f32 %v1796_v29, %v1508_v60  ;;  %v1817_v9 = vpop.f32.mrf.mxu1 }
 0x1b0   : > { %v1510_v2 = vpop.f32.mrf.mxu0 }
 0x1b1   : > { %v1931_v3 = vmax.f32 %v1797_v0, 0.0  ;;  %v1511_v4 = vadd.f32 %v1510_v2, %v423_v63  ;;  %v1820_v13 = vpop.f32.mrf.mxu1  ;;  %v431_v63 = vld [vmem:[%s2800_s27 + $0x188] sm:$0xff] }
 0x1b2   : > { %v1512_v6 = vpop.f32.mrf.mxu0 }
 0x1b3   : > { %1996 = vst.msk [vmem:[%s2820_s30 + $0x140] sm:$0xff] %vm1955_vm1, %v1931_v3  ;;  %v1800_v8 = vadd.f32 %v1799_v37, %v1511_v4  ;;  %v1822_v17 = vpop.f32.mrf.mxu1 }
 0x1b4   : > { %v1515_v10 = vpop.f32.mrf.mxu0 }
 0x1b5   : > { %v1932_v11 = vmax.f32 %v1800_v8, 0.0  ;;  %v1516_v12 = vadd.f32 %v1515_v10, %v424_v7  ;;  %v1823_v21 = vpop.f32.mrf.mxu1  ;;  %v432_v7 = vld [vmem:[%s2800_s27 + $0x190] sm:$0xff] }
 0x1b6   : > { %v1517_v14 = vpop.f32.mrf.mxu0 }
 0x1b7   : > { %1997 = vst.msk [vmem:[%s2820_s30 + $0x148] sm:$0xff] %vm1955_vm1, %v1932_v11  ;;  %v1805_v16 = vadd.f32 %v1804_v45, %v1516_v12  ;;  %v1825_v26 = vpop.f32.mrf.mxu1 }
 0x1b8   : > { %v1518_v18 = vpop.f32.mrf.mxu0 }
 0x1b9   : > { %v1933_v19 = vmax.f32 %v1805_v16, 0.0  ;;  %v1519_v20 = vadd.f32 %v1518_v18, %v425_v15  ;;  %v1828_v29 = vpop.f32.mrf.mxu1  ;;  %v433_v15 = vld [vmem:[%s2800_s27 + $0x198] sm:$0xff] }
 0x1ba   : > { %v1520_v22 = vpop.f32.mrf.mxu0 }
 0x1bb   : > { %1998 = vst.msk [vmem:[%s2820_s30 + $0x150] sm:$0xff] %vm1955_vm1, %v1933_v19  ;;  %v1808_v24 = vadd.f32 %v1807_v53, %v1519_v20  ;;  %v1830_v33 = vpop.f32.mrf.mxu1 }
 0x1bc   : > { %v1523_v27 = vpop.f32.mrf.mxu0 }
 0x1bd   : > { %v1934_v25 = vmax.f32 %v1808_v24, 0.0  ;;  %v1524_v28 = vadd.f32 %v1523_v27, %v426_v23  ;;  %v1831_v37 = vpop.f32.mrf.mxu1  ;;  %v434_v23 = vld [vmem:[%s2800_s27 + $0x1a0] sm:$0xff] }
 0x1be   : > { %v1525_v30 = vpop.f32.mrf.mxu0 }
 0x1bf   : > { %1999 = vst.msk [vmem:[%s2820_s30 + $0x158] sm:$0xff] %vm1955_vm1, %v1934_v25  ;;  %v1813_v32 = vadd.f32 %v1812_v61, %v1524_v28  ;;  %v1833_v41 = vpop.f32.mrf.mxu1 }
 0x1c0   : > { %v1526_v34 = vpop.f32.mrf.mxu0 }
 0x1c1   : > { %v1935_v35 = vmax.f32 %v1813_v32, 0.0  ;;  %v1527_v36 = vadd.f32 %v1526_v34, %v427_v31  ;;  %v1836_v45 = vpop.f32.mrf.mxu1  ;;  %v435_v31 = vld [vmem:[%s2800_s27 + $0x1a8] sm:$0xff] }
 0x1c2   : > { %v1528_v38 = vpop.f32.mrf.mxu0 }
 0x1c3   : > { %2000 = vst.msk [vmem:[%s2820_s30 + $0x160] sm:$0xff] %vm1955_vm1, %v1935_v35  ;;  %v1816_v40 = vadd.f32 %v1815_v5, %v1527_v36  ;;  %v1838_v49 = vpop.f32.mrf.mxu1 }
 0x1c4   : > { %v1531_v42 = vpop.f32.mrf.mxu0 }
 0x1c5   : > { %v1936_v43 = vmax.f32 %v1816_v40, 0.0  ;;  %v1532_v44 = vadd.f32 %v1531_v42, %v428_v39  ;;  %v1839_v53 = vpop.f32.mrf.mxu1  ;;  %v436_v39 = vld [vmem:[%s2800_s27 + $0x1b0] sm:$0xff] }
 0x1c6   : > { %v1533_v46 = vpop.f32.mrf.mxu0 }
 0x1c7   : > { %2001 = vst.msk [vmem:[%s2820_s30 + $0x168] sm:$0xff] %vm1955_vm1, %v1936_v43  ;;  %v1821_v48 = vadd.f32 %v1820_v13, %v1532_v44  ;;  %v1841_v57 = vpop.f32.mrf.mxu1 }
 0x1c8   : > { %v1534_v50 = vpop.f32.mrf.mxu0 }
 0x1c9   : > { %v1937_v51 = vmax.f32 %v1821_v48, 0.0  ;;  %v1535_v52 = vadd.f32 %v1534_v50, %v429_v47  ;;  %v1844_v61 = vpop.f32.mrf.mxu1  ;;  %v437_v47 = vld [vmem:[%s2800_s27 + $0x1b8] sm:$0xff] }
 0x1ca   : > { %v1536_v54 = vpop.f32.mrf.mxu0 }
 0x1cb   : > { %2002 = vst.msk [vmem:[%s2820_s30 + $0x170] sm:$0xff] %vm1955_vm1, %v1937_v51  ;;  %v1824_v56 = vadd.f32 %v1823_v21, %v1535_v52  ;;  %v1846_v1 = vpop.f32.mrf.mxu1 }
 0x1cc   : > { %v1539_v58 = vpop.f32.mrf.mxu0 }
 0x1cd   : > { %v1938_v59 = vmax.f32 %v1824_v56, 0.0  ;;  %v1540_v60 = vadd.f32 %v1539_v58, %v430_v55  ;;  %v1847_v5 = vpop.f32.mrf.mxu1  ;;  %v438_v55 = vld [vmem:[%s2800_s27 + $0x1c0] sm:$0xff] }
 0x1ce   : > { %v1541_v62 = vpop.f32.mrf.mxu0 }
 0x1cf   : > { %2003 = vst.msk [vmem:[%s2820_s30 + $0x178] sm:$0xff] %vm1955_vm1, %v1938_v59  ;;  %v1829_v0 = vadd.f32 %v1828_v29, %v1540_v60  ;;  %v1849_v9 = vpop.f32.mrf.mxu1 }
 0x1d0   : > { %v1542_v2 = vpop.f32.mrf.mxu0 }
 0x1d1   : > { %v1939_v3 = vmax.f32 %v1829_v0, 0.0  ;;  %v1543_v4 = vadd.f32 %v1542_v2, %v431_v63  ;;  %v1852_v13 = vpop.f32.mrf.mxu1  ;;  %v439_v63 = vld [vmem:[%s2800_s27 + $0x1c8] sm:$0xff] }
 0x1d2   : > { %v1544_v6 = vpop.f32.mrf.mxu0 }
 0x1d3   : > { %2004 = vst.msk [vmem:[%s2820_s30 + $0x180] sm:$0xff] %vm1955_vm1, %v1939_v3  ;;  %v1832_v8 = vadd.f32 %v1831_v37, %v1543_v4  ;;  %v1854_v17 = vpop.f32.mrf.mxu1 }
 0x1d4   : > { %v1547_v10 = vpop.f32.mrf.mxu0 }
 0x1d5   : > { %v1940_v11 = vmax.f32 %v1832_v8, 0.0  ;;  %v1548_v12 = vadd.f32 %v1547_v10, %v432_v7  ;;  %v1855_v21 = vpop.f32.mrf.mxu1  ;;  %v440_v7 = vld [vmem:[%s2800_s27 + $0x1d0] sm:$0xff] }
 0x1d6   : > { %v1549_v14 = vpop.f32.mrf.mxu0 }
 0x1d7   : > { %2005 = vst.msk [vmem:[%s2820_s30 + $0x188] sm:$0xff] %vm1955_vm1, %v1940_v11  ;;  %v1837_v16 = vadd.f32 %v1836_v45, %v1548_v12  ;;  %v1857_v26 = vpop.f32.mrf.mxu1 }
 0x1d8   : > { %v1550_v18 = vpop.f32.mrf.mxu0 }
 0x1d9   : > { %v1941_v19 = vmax.f32 %v1837_v16, 0.0  ;;  %v1551_v20 = vadd.f32 %v1550_v18, %v433_v15  ;;  %v1860_v29 = vpop.f32.mrf.mxu1  ;;  %v441_v15 = vld [vmem:[%s2800_s27 + $0x1d8] sm:$0xff] }
 0x1da   : > { %v1552_v22 = vpop.f32.mrf.mxu0 }
 0x1db   : > { %2006 = vst.msk [vmem:[%s2820_s30 + $0x190] sm:$0xff] %vm1955_vm1, %v1941_v19  ;;  %v1840_v24 = vadd.f32 %v1839_v53, %v1551_v20  ;;  %v1862_v33 = vpop.f32.mrf.mxu1 }
 0x1dc   : > { %v1555_v27 = vpop.f32.mrf.mxu0 }
 0x1dd   : > { %v1942_v25 = vmax.f32 %v1840_v24, 0.0  ;;  %v1556_v28 = vadd.f32 %v1555_v27, %v434_v23  ;;  %v1863_v37 = vpop.f32.mrf.mxu1  ;;  %v442_v23 = vld [vmem:[%s2800_s27 + $0x1e0] sm:$0xff] }
 0x1de   : > { %v1557_v30 = vpop.f32.mrf.mxu0 }
 0x1df   : > { %2007 = vst.msk [vmem:[%s2820_s30 + $0x198] sm:$0xff] %vm1955_vm1, %v1942_v25  ;;  %v1845_v32 = vadd.f32 %v1844_v61, %v1556_v28  ;;  %v1865_v41 = vpop.f32.mrf.mxu1  ;;  %v443_v30 = vld [vmem:[%s2800_s27 + $0x1e8] sm:$0xff] }
 0x1e0   : > { %v1558_v34 = vpop.f32.mrf.mxu0 }
 0x1e1   : > { %v1943_v35 = vmax.f32 %v1845_v32, 0.0  ;;  %v1559_v36 = vadd.f32 %v1558_v34, %v435_v31  ;;  %v1868_v45 = vpop.f32.mrf.mxu1 }
 0x1e2   : > { %v1560_v38 = vpop.f32.mrf.mxu0 }
 0x1e3   : > { %2008 = vst.msk [vmem:[%s2820_s30 + $0x1a0] sm:$0xff] %vm1955_vm1, %v1943_v35  ;;  %v1848_v40 = vadd.f32 %v1847_v5, %v1559_v36  ;;  %v1870_v49 = vpop.f32.mrf.mxu1  ;;  %v444_v36 = vld [vmem:[%s2800_s27 + $0x1f0] sm:$0xff] }
 0x1e4   : > { %v1563_v42 = vpop.f32.mrf.mxu0 }
 0x1e5   : > { %v1944_v43 = vmax.f32 %v1848_v40, 0.0  ;;  %v1564_v44 = vadd.f32 %v1563_v42, %v436_v39  ;;  %v1871_v53 = vpop.f32.mrf.mxu1  ;;  %v445_v42 = vld [vmem:[%s2800_s27 + $0x1f8] sm:$0xff] }
 0x1e6   : > { %v1565_v46 = vpop.f32.mrf.mxu0 }
 0x1e7   : > { %2009 = vst.msk [vmem:[%s2820_s30 + $0x1a8] sm:$0xff] %vm1955_vm1, %v1944_v43  ;;  %v1853_v48 = vadd.f32 %v1852_v13, %v1564_v44  ;;  %v1873_v57 = vpop.f32.mrf.mxu1 }
 0x1e8   : > { %v1566_v50 = vpop.f32.mrf.mxu0 }
 0x1e9   : > { %v1945_v51 = vmax.f32 %v1853_v48, 0.0  ;;  %v1567_v52 = vadd.f32 %v1566_v50, %v437_v47  ;;  %v1876_v61 = vpop.f32.mrf.mxu1 }
 0x1ea   : > { %v1568_v54 = vpop.f32.mrf.mxu0 }
 0x1eb   : > { %2010 = vst.msk [vmem:[%s2820_s30 + $0x1b0] sm:$0xff] %vm1955_vm1, %v1945_v51  ;;  %v1856_v56 = vadd.f32 %v1855_v21, %v1567_v52  ;;  %v1878_v1 = vpop.f32.mrf.mxu1 }
 0x1ec   : > { %v1571_v58 = vpop.f32.mrf.mxu0 }
 0x1ed   : > { %v1946_v59 = vmax.f32 %v1856_v56, 0.0  ;;  %v1572_v60 = vadd.f32 %v1571_v58, %v438_v55  ;;  %v1879_v5 = vpop.f32.mrf.mxu1 }
 0x1ee   : > { %v1573_v62 = vpop.f32.mrf.mxu0 }
 0x1ef   : > { %2011 = vst.msk [vmem:[%s2820_s30 + $0x1b8] sm:$0xff] %vm1955_vm1, %v1946_v59  ;;  %v1861_v0 = vadd.f32 %v1860_v29, %v1572_v60  ;;  %v1881_v9 = vpop.f32.mrf.mxu1 }
 0x1f0   : > { %v1574_v2 = vpop.f32.mrf.mxu0 }
 0x1f1   : > { %v1947_v3 = vmax.f32 %v1861_v0, 0.0  ;;  %v1575_v4 = vadd.f32 %v1574_v2, %v439_v63  ;;  %v1884_v13 = vpop.f32.mrf.mxu1 }
 0x1f2   : > { %v1576_v6 = vpop.f32.mrf.mxu0 }
 0x1f3   : > { %2012 = vst.msk [vmem:[%s2820_s30 + $0x1c0] sm:$0xff] %vm1955_vm1, %v1947_v3  ;;  %v1864_v8 = vadd.f32 %v1863_v37, %v1575_v4  ;;  %v1886_v17 = vpop.f32.mrf.mxu1 }
 0x1f4   : > { %v1579_v10 = vpop.f32.mrf.mxu0 }
 0x1f5   : > { %v1948_v11 = vmax.f32 %v1864_v8, 0.0  ;;  %v1580_v12 = vadd.f32 %v1579_v10, %v440_v7  ;;  %v1887_v21 = vpop.f32.mrf.mxu1 }
 0x1f6   : > { %v1581_v14 = vpop.f32.mrf.mxu0 }
 0x1f7   : > { %2013 = vst.msk [vmem:[%s2820_s30 + $0x1c8] sm:$0xff] %vm1955_vm1, %v1948_v11  ;;  %v1869_v16 = vadd.f32 %v1868_v45, %v1580_v12  ;;  %v1889_v26 = vpop.f32.mrf.mxu1 }
 0x1f8   : > { %v1582_v18 = vpop.f32.mrf.mxu0 }
 0x1f9   : > { %v1949_v19 = vmax.f32 %v1869_v16, 0.0  ;;  %v1583_v20 = vadd.f32 %v1582_v18, %v441_v15 }
 0x1fa   : > { %v1584_v22 = vpop.f32.mrf.mxu0 }
 0x1fb   : > { %2014 = vst.msk [vmem:[%s2820_s30 + $0x1d0] sm:$0xff] %vm1955_vm1, %v1949_v19  ;;  %v1872_v24 = vadd.f32 %v1871_v53, %v1583_v20 }
 0x1fc   : > { %v1587_v27 = vpop.f32.mrf.mxu0 }
 0x1fd   : > { %v1950_v25 = vmax.f32 %v1872_v24, 0.0  ;;  %v1588_v28 = vadd.f32 %v1587_v27, %v442_v23 }
 0x1fe   : > { %v1589_v29 = vpop.f32.mrf.mxu0 }
 0x1ff   : > { %2015 = vst.msk [vmem:[%s2820_s30 + $0x1d8] sm:$0xff] %vm1955_vm1, %v1950_v25  ;;  %v1877_v31 = vadd.f32 %v1876_v61, %v1588_v28 }
 0x200   : > { %v1590_v32 = vpop.f32.mrf.mxu0 }
 0x201   : > { %v1951_v33 = vmax.f32 %v1877_v31, 0.0  ;;  %v1591_v34 = vadd.f32 %v1590_v32, %v443_v30 }
 0x202   : > { %v1592_v35 = vpop.f32.mrf.mxu0 }
 0x203   : > { %2016 = vst.msk [vmem:[%s2820_s30 + $0x1e0] sm:$0xff] %vm1955_vm1, %v1951_v33  ;;  %v1880_v37 = vadd.f32 %v1879_v5, %v1591_v34 }
 0x204   : > { %v1595_v38 = vpop.f32.mrf.mxu0 }
 0x205   : > { %v1952_v39 = vmax.f32 %v1880_v37, 0.0  ;;  %v1596_v40 = vadd.f32 %v1595_v38, %v444_v36 }
 0x206   : > { %v1597_v41 = vpop.f32.mrf.mxu0 }
 0x207   : > { %2017 = vst.msk [vmem:[%s2820_s30 + $0x1e8] sm:$0xff] %vm1955_vm1, %v1952_v39  ;;  %v1885_v43 = vadd.f32 %v1884_v13, %v1596_v40 }
 0x208   : > { %v1598_v44 = vpop.f32.mrf.mxu0 }
 0x209   : > { %v1953_v45 = vmax.f32 %v1885_v43, 0.0  ;;  %v1599_v46 = vadd.f32 %v1598_v44, %v445_v42 }
 0x20a   : > { %v1600_v47 = vpop.f32.mrf.mxu0 }
 0x20b   : > { %2018 = vst.msk [vmem:[%s2820_s30 + $0x1f0] sm:$0xff] %vm1955_vm1, %v1953_v45  ;;  %v1888_v48 = vadd.f32 %v1887_v21, %v1599_v46 }
 0x20d   : > { %v1954_v49 = vmax.f32 %v1888_v48, 0.0 }
 0x20f   : > { %2019 = vst.msk [vmem:[%s2820_s30 + $0x1f8] sm:$0xff] %vm1955_vm1, %v1954_v49 }
 0x210 PF: > { %s13_s12 = sadd.s32 1, %s2513_s12  }
 0x211   : > { %p10_p4 = scmp.ge.s32.totalorder %s13_s12, 10  }
 0x213   :  { %12 = sbr.rel (!%p10_p4) target bundleno = 1 (0x1), region = 65 }

// kernel: forward.20
= control target key start
LH: loop header
LB: loop body
LE: loop exit
PB: predicated region body
PF: predicated region fallthrough
CT: control target
= control target key end

     0   :  { %s2411_s9 = smov 0   ;;  %s2836_s0 = inlined_call_operand.vmem [shape: bf16[1024,432], index: 0, kind: input, shape index: {}]   ;;  %s2837_s1 = inlined_call_operand.vmem [shape: bf16[432,16], index: 1, kind: input, shape index: {}]   ;;  %s2838_s2 = inlined_call_operand.vmem [shape: f32[1024,16], index: 2, kind: output, shape index: {}]  }
   0x1 LB: > { %s1963_s10 = sadd.s32 4294967295, %s2393_s9   ;;  %p1967_p0 = scmp.ge.s32.totalorder %s2393_s9, 1  ;;  %s2393_s9 = sphi %s2411_s9, %s12_s9  }
   0x2   : > { %p114_p1 = scmp.lt.s32.totalorder %s2393_s9, 3 }
   0x4   : > { %p115_p2 = pnand %p1967_p0, %p114_p1 }
   0x5   : > { %s1968_s25 = sshll.u32 (!%p115_p2), %s1963_s10, 6 }
   0x6   : > { %118 = sbr.rel (%p115_p2) target bundleno = 526 (0x20e), region = 28  ;;  %p138_p3 = scmp.lt.s32.totalorder (!%p115_p2), %s1968_s25, 127 }
   0xb   : > { %v2172_v0 = vld [vmem:[%s2837_s1 + $0x38] sm:$0xff]   ;;  %v2395_v1 = vmov 0   ;;  %v2173_v2 = vld [vmem:[%s2837_s1 + $0x30] sm:$0xff]   ;;  %v2174_v4 = vld [vmem:[%s2837_s1 + $0x28] sm:$0xff]   ;;  %s2840_s25 = smov (!%p138_p3, %s1968_s25), 127  ;;  %vm1103_vm0 = vcmask 392192  }
   0xc   : > { %1200 = vmatprep.subr.bf16.mxu0 %v2395_v1  ;;  %1489 = vmatprep.subr.bf16.mxu1 %v2395_v1  ;;  %v2176_v3 = vld [vmem:[%s2837_s1 + $0xb8] sm:$0xff]   ;;  %v2178_v5 = vld [vmem:[%s2837_s1 + $0xb0] sm:$0xff]   ;;  %v2175_v6 = vld [vmem:[%s2837_s1 + $0x20] sm:$0xff]   ;;  %s2162_s8 = sshll.u32 %s2840_s25, 4  ;;  %s1972_s18 = sshll.u32 %s2840_s25, 3  ;;  %vm1842_vm1 = vcmask 130048  }
   0xd   : > { %1201 = vmatpush1.bf16.msra.mxu0 %v2172_v0  ;;  %1490 = vmatpush1.bf16.msra.mxu1 %v2176_v3  ;;  %v2180_v7 = vld [vmem:[%s2837_s1 + $0xa8] sm:$0xff]   ;;  %v2177_v8 = vld [vmem:[%s2837_s1 + $0x18] sm:$0xff]   ;;  %v2182_v9 = vld [vmem:[%s2837_s1 + $0xa0] sm:$0xff]   ;;  %s2477_s14 = scalar_lea.vmem %s2836_s0, %s2162_s8  ;;  %s2676_s21 = scalar_lea.vmem %s2838_s2, %s1972_s18 }
   0xe   : > { %1202 = vmatprep.subr.bf16.mxu0 %v2395_v1  ;;  %1491 = vmatprep.subr.bf16.mxu1 %v2395_v1  ;;  %v2179_v10 = vld [vmem:[%s2837_s1 + $0x10] sm:$0xff]   ;;  %v2184_v11 = vld [vmem:[%s2837_s1 + $0x98] sm:$0xff]   ;;  %v2181_v12 = vld [vmem:[%s2837_s1 + $0x8] sm:$0xff]  }
   0xf   : > { %v2186_v13 = vld [vmem:[%s2837_s1 + $0x90] sm:$0xff]   ;;  %v2183_v14 = vld [vmem:[%s2837_s1] sm:$0xff]   ;;  %v2188_v15 = vld [vmem:[%s2837_s1 + $0x88] sm:$0xff]  }
  0x10   : > { %v2200_v16 = vld [vmem:[%s2477_s14 + $0xc] ss:$16 sps:$4 sm:$0xff]   ;;  %v2204_v17 = vld [vmem:[%s2477_s14 + $0x4] ss:$16 sps:$4 sm:$0xff]   ;;  %v2198_v26 = vld [vmem:[%s2477_s14 + $0x8] ss:$16 sps:$4 sm:$0xff]  }
  0x11   : > { %1203 = vmatpush1.bf16.msra.mxu0 %v2173_v2  ;;  %1492 = vmatpush1.bf16.msra.mxu1 %v2178_v5  ;;  %v2185_v18 = vld [vmem:[%s2837_s1 + $0x78] sm:$0xff]   ;;  %v2190_v19 = vld [vmem:[%s2837_s1 + $0x80] sm:$0xff]   ;;  %v2187_v20 = vld [vmem:[%s2837_s1 + $0x70] sm:$0xff]  }
  0x12   : > { %1204 = vmatprep.subr.bf16.mxu0 %v2395_v1  ;;  %1493 = vmatprep.subr.bf16.mxu1 %v2395_v1  ;;  %v2192_v21 = vld [vmem:[%s2837_s1 + $0xd0] sm:$0xff]   ;;  %v2189_v22 = vld [vmem:[%s2837_s1 + $0x68] sm:$0xff]   ;;  %v2191_v24 = vld [vmem:[%s2837_s1 + $0x60] sm:$0xff]  }
  0x13   : > { %2128 = vmatprep.mubr.msk.bf16.mxu1 %vm1103_vm0, %v2200_v16  ;;  %1232 = vmatprep.mubr.bf16.mxu0 %v2204_v17  ;;  %v2194_v23 = vld [vmem:[%s2837_s1 + $0xc8] sm:$0xff]   ;;  %v2196_v25 = vld [vmem:[%s2837_s1 + $0xc0] sm:$0xff]   ;;  %v2193_v27 = vld [vmem:[%s2837_s1 + $0x58] sm:$0xff]  }
  0x14   : > { %v2205_v28 = vld [vmem:[%s2477_s14 + $0x2c] ss:$16 sps:$4 sm:$0xff]   ;;  %v2195_v29 = vld [vmem:[%s2837_s1 + $0x50] sm:$0xff]   ;;  %v2207_v30 = vld [vmem:[%s2477_s14 + $0x28] ss:$16 sps:$4 sm:$0xff]  }
  0x15   : > { %1205 = vmatpush1.bf16.msra.mxu0 %v2174_v4  ;;  %1494 = vmatpush1.bf16.msra.mxu1 %v2180_v7  ;;  %v2197_v31 = vld [vmem:[%s2837_s1 + $0x48] sm:$0xff]   ;;  %v2201_v33 = vld [vmem:[%s2837_s1 + $0x40] sm:$0xff]  }
  0x16   : > { %1206 = vmatprep.subr.bf16.mxu0 %v2395_v1  ;;  %1495 = vmatprep.subr.bf16.mxu1 %v2395_v1  ;;  %v2211_v32 = vld [vmem:[%s2477_s14 + $0x4c] ss:$16 sps:$4 sm:$0xff]   ;;  %v2202_v34 = vld [vmem:[%s2477_s14] ss:$16 sps:$4 sm:$0xff]   ;;  %v2213_v35 = vld [vmem:[%s2477_s14 + $0x48] ss:$16 sps:$4 sm:$0xff]  }
  0x17   : > { %v2208_v36 = vld [vmem:[%s2477_s14 + $0x24] ss:$16 sps:$4 sm:$0xff]   ;;  %v2217_v37 = vld [vmem:[%s2477_s14 + $0x6c] ss:$16 sps:$4 sm:$0xff]   ;;  %v2210_v38 = vld [vmem:[%s2477_s14 + $0x20] ss:$16 sps:$4 sm:$0xff]  }
  0x18   : > { %v2219_v39 = vld [vmem:[%s2477_s14 + $0x68] ss:$16 sps:$4 sm:$0xff]   ;;  %v2214_v40 = vld [vmem:[%s2477_s14 + $0x44] ss:$16 sps:$4 sm:$0xff]   ;;  %v2223_v41 = vld [vmem:[%s2477_s14 + $0x8c] ss:$16 sps:$4 sm:$0xff]  }
  0x19   : > { %1207 = vmatpush1.bf16.msra.mxu0 %v2175_v6  ;;  %1496 = vmatpush1.bf16.msra.mxu1 %v2182_v9  ;;  %v2216_v42 = vld [vmem:[%s2477_s14 + $0x40] ss:$16 sps:$4 sm:$0xff]   ;;  %v2220_v43 = vld [vmem:[%s2477_s14 + $0x64] ss:$16 sps:$4 sm:$0xff]   ;;  %v2225_v44 = vld [vmem:[%s2477_s14 + $0x88] ss:$16 sps:$4 sm:$0xff]  }
  0x1a   : > { %1208 = vmatprep.subr.bf16.mxu0 %v2395_v1  ;;  %1497 = vmatprep.subr.bf16.mxu1 %v2395_v1  ;;  %v2229_v45 = vld [vmem:[%s2477_s14 + $0xac] ss:$16 sps:$4 sm:$0xff]   ;;  %v2222_v46 = vld [vmem:[%s2477_s14 + $0x60] ss:$16 sps:$4 sm:$0xff]   ;;  %v2231_v47 = vld [vmem:[%s2477_s14 + $0xa8] ss:$16 sps:$4 sm:$0xff]  }
  0x1b   : > { %v2226_v48 = vld [vmem:[%s2477_s14 + $0x84] ss:$16 sps:$4 sm:$0xff]   ;;  %v2235_v49 = vld [vmem:[%s2477_s14 + $0xcc] ss:$16 sps:$4 sm:$0xff]   ;;  %v2228_v50 = vld [vmem:[%s2477_s14 + $0x80] ss:$16 sps:$4 sm:$0xff]  }
  0x1c   : > { %v2237_v51 = vld [vmem:[%s2477_s14 + $0xc8] ss:$16 sps:$4 sm:$0xff]   ;;  %v2232_v52 = vld [vmem:[%s2477_s14 + $0xa4] ss:$16 sps:$4 sm:$0xff]   ;;  %v2241_v53 = vld [vmem:[%s2477_s14 + $0xec] ss:$16 sps:$4 sm:$0xff]  }
  0x1d   : > { %1209 = vmatpush1.bf16.msra.mxu0 %v2177_v8  ;;  %1498 = vmatpush1.bf16.msra.mxu1 %v2184_v11  ;;  %v2234_v54 = vld [vmem:[%s2477_s14 + $0xa0] ss:$16 sps:$4 sm:$0xff]   ;;  %v2243_v55 = vld [vmem:[%s2477_s14 + $0xe8] ss:$16 sps:$4 sm:$0xff]   ;;  %v2238_v56 = vld [vmem:[%s2477_s14 + $0xc4] ss:$16 sps:$4 sm:$0xff]  }
  0x1e   : > { %1210 = vmatprep.subr.bf16.mxu0 %v2395_v1  ;;  %1499 = vmatprep.subr.bf16.mxu1 %v2395_v1  ;;  %v2247_v57 = vld [vmem:[%s2477_s14 + $0x10c] ss:$16 sps:$4 sm:$0xff]   ;;  %v2240_v58 = vld [vmem:[%s2477_s14 + $0xc0] ss:$16 sps:$4 sm:$0xff]   ;;  %v2249_v59 = vld [vmem:[%s2477_s14 + $0x108] ss:$16 sps:$4 sm:$0xff]  }
  0x1f   : > { %v2244_v60 = vld [vmem:[%s2477_s14 + $0xe4] ss:$16 sps:$4 sm:$0xff]   ;;  %v2253_v61 = vld [vmem:[%s2477_s14 + $0x12c] ss:$16 sps:$4 sm:$0xff]   ;;  %v2246_v62 = vld [vmem:[%s2477_s14 + $0xe0] ss:$16 sps:$4 sm:$0xff]  }
  0x20   : > { %v2255_v63 = vld [vmem:[%s2477_s14 + $0x128] ss:$16 sps:$4 sm:$0xff]   ;;  %v2250_v0 = vld [vmem:[%s2477_s14 + $0x104] ss:$16 sps:$4 sm:$0xff]   ;;  %v2252_v2 = vld [vmem:[%s2477_s14 + $0x100] ss:$16 sps:$4 sm:$0xff]  }
  0x21   : > { %1211 = vmatpush1.bf16.msra.mxu0 %v2179_v10  ;;  %1500 = vmatpush1.bf16.msra.mxu1 %v2186_v13  ;;  %v2261_v3 = vld [vmem:[%s2477_s14 + $0x148] ss:$16 sps:$4 sm:$0xff]   ;;  %v2256_v4 = vld [vmem:[%s2477_s14 + $0x124] ss:$16 sps:$4 sm:$0xff]   ;;  %v2265_v5 = vld [vmem:[%s2477_s14 + $0x16c] ss:$16 sps:$4 sm:$0xff]  }
  0x22   : > { %1212 = vmatprep.subr.bf16.mxu0 %v2395_v1  ;;  %1501 = vmatprep.subr.bf16.mxu1 %v2395_v1  ;;  %v2258_v6 = vld [vmem:[%s2477_s14 + $0x120] ss:$16 sps:$4 sm:$0xff]   ;;  %v2267_v7 = vld [vmem:[%s2477_s14 + $0x168] ss:$16 sps:$4 sm:$0xff]   ;;  %v2262_v8 = vld [vmem:[%s2477_s14 + $0x144] ss:$16 sps:$4 sm:$0xff]  }
  0x23   : > { %v2271_v9 = vld [vmem:[%s2477_s14 + $0x18c] ss:$16 sps:$4 sm:$0xff]   ;;  %v2264_v10 = vld [vmem:[%s2477_s14 + $0x140] ss:$16 sps:$4 sm:$0xff]   ;;  %v2273_v11 = vld [vmem:[%s2477_s14 + $0x188] ss:$16 sps:$4 sm:$0xff]  }
  0x24   : > { %v2277_v13 = vld [vmem:[%s2477_s14 + $0x1ac] ss:$16 sps:$4 sm:$0xff]   ;;  %v2274_v16 = vld [vmem:[%s2477_s14 + $0x184] ss:$16 sps:$4 sm:$0xff]  }
  0x25   : > { %1213 = vmatpush1.bf16.msra.mxu0 %v2181_v12  ;;  %1502 = vmatpush1.bf16.msra.mxu1 %v2188_v15  ;;  %v2268_v12 = vld [vmem:[%s2477_s14 + $0x164] ss:$16 sps:$4 sm:$0xff]   ;;  %v2279_v15 = vld [vmem:[%s2477_s14 + $0x1a8] ss:$16 sps:$4 sm:$0xff]   ;;  %v2283_v17 = vld [vmem:[%s2477_s14 + $0x1cc] ss:$16 sps:$4 sm:$0xff]  }
  0x26   : > { %1214 = vmatprep.subr.bf16.mxu0 %v2395_v1  ;;  %1503 = vmatprep.subr.bf16.mxu1 %v2395_v1 }
  0x29   : > { %1215 = vmatpush1.bf16.msra.mxu0 %v2183_v14  ;;  %1504 = vmatpush1.bf16.msra.mxu1 %v2190_v19  ;;  %v2270_v14 = vld [vmem:[%s2477_s14 + $0x160] ss:$16 sps:$4 sm:$0xff]   ;;  %v2285_v19 = vld [vmem:[%s2477_s14 + $0x1c8] ss:$16 sps:$4 sm:$0xff]  }
  0x2a   : > { %1216 = vmatprep.subr.bf16.mxu0 %v2395_v1  ;;  %1515 = vmatprep.subr.bf16.mxu1 %v2395_v1 }
  0x2d   : > { %1217 = vmatpush2.bf16.msra.mxu0 %v2185_v18  ;;  %1516 = vmatpush2.bf16.msra.mxu1 %v2192_v21  ;;  %v2276_v18 = vld [vmem:[%s2477_s14 + $0x180] ss:$16 sps:$4 sm:$0xff]   ;;  %v2289_v21 = vld [vmem:[%s2477_s14 + $0x1ec] ss:$16 sps:$4 sm:$0xff]  }
  0x2e   : > { %1218 = vmatprep.subr.bf16.mxu0 %v2395_v1  ;;  %1517 = vmatprep.subr.bf16.mxu1 %v2395_v1 }
  0x31   : > { %1219 = vmatpush2.bf16.msra.mxu0 %v2187_v20  ;;  %1518 = vmatpush2.bf16.msra.mxu1 %v2194_v23  ;;  %v2280_v20 = vld [vmem:[%s2477_s14 + $0x1a4] ss:$16 sps:$4 sm:$0xff]   ;;  %v2291_v23 = vld [vmem:[%s2477_s14 + $0x1e8] ss:$16 sps:$4 sm:$0xff]  }
  0x32   : > { %1220 = vmatprep.subr.bf16.mxu0 %v2395_v1  ;;  %1519 = vmatprep.subr.bf16.mxu1 %v2395_v1 }
  0x35   : > { %1221 = vmatpush2.bf16.msra.mxu0 %v2189_v22  ;;  %1520 = vmatpush2.bf16.msra.mxu1 %v2196_v25  ;;  %v2282_v22 = vld [vmem:[%s2477_s14 + $0x1a0] ss:$16 sps:$4 sm:$0xff]   ;;  %v2295_v25 = vld [vmem:[%s2477_s14 + $0x20c] ss:$16 sps:$4 sm:$0xff]  }
  0x36   : > { %1222 = vmatprep.subr.bf16.mxu0 %v2395_v1 }
  0x38   : > { %1522 = vmatmul.mubr.bf16.vlgmr.msra.gmra.mxu1 %v2198_v26  ;;  %v2288_v26 = vld [vmem:[%s2477_s14 + $0x1c0] ss:$16 sps:$4 sm:$0xff]  }
  0x39   : > { %1223 = vmatpush2.bf16.msra.mxu0 %v2191_v24  ;;  %2129 = vmatprep.mubr.msk.bf16.mxu1 %vm1103_vm0, %v2205_v28  ;;  %v2286_v24 = vld [vmem:[%s2477_s14 + $0x1c4] ss:$16 sps:$4 sm:$0xff]  }
  0x3a   : > { %1224 = vmatprep.subr.bf16.mxu0 %v2395_v1  ;;  %v2292_v28 = vld [vmem:[%s2477_s14 + $0x1e4] ss:$16 sps:$4 sm:$0xff]  }
  0x3d   : > { %1225 = vmatpush2.bf16.msra.mxu0 %v2193_v27  ;;  %v2297_v27 = vld [vmem:[%s2477_s14 + $0x208] ss:$16 sps:$4 sm:$0xff]  }
  0x3e   : > { %1226 = vmatprep.subr.bf16.mxu0 %v2395_v1 }
  0x40   : > { %1530 = vmatmul.mubr.bf16.gmra.mxu1 %v2207_v30  ;;  %v2294_v30 = vld [vmem:[%s2477_s14 + $0x1e0] ss:$16 sps:$4 sm:$0xff]  }
  0x41   : > { %1227 = vmatpush2.bf16.msra.mxu0 %v2195_v29  ;;  %2130 = vmatprep.mubr.msk.bf16.mxu1 %vm1103_vm0, %v2211_v32  ;;  %v2301_v29 = vld [vmem:[%s2477_s14 + $0x22c] ss:$16 sps:$4 sm:$0xff]   ;;  %v2298_v32 = vld [vmem:[%s2477_s14 + $0x204] ss:$16 sps:$4 sm:$0xff]  }
  0x42   : > { %1228 = vmatprep.subr.bf16.mxu0 %v2395_v1 }
  0x45   : > { %1229 = vmatpush2.bf16.msra.mxu0 %v2197_v31  ;;  %v2303_v31 = vld [vmem:[%s2477_s14 + $0x228] ss:$16 sps:$4 sm:$0xff]  }
  0x46   : > { %1230 = vmatprep.subr.bf16.mxu0 %v2395_v1  ;;  %v2259_v1 = vld [vmem:[%s2477_s14 + $0x14c] ss:$16 sps:$4 sm:$0xff]  }
  0x48   : > { %1538 = vmatmul.mubr.bf16.gmra.mxu1 %v2213_v35  ;;  %v2309_v35 = vld [vmem:[%s2477_s14 + $0x248] ss:$16 sps:$4 sm:$0xff]  }
  0x49   : > { %1231 = vmatpush2.bf16.msra.mxu0 %v2201_v33  ;;  %2131 = vmatprep.mubr.msk.bf16.mxu1 %vm1103_vm0, %v2217_v37  ;;  %v2307_v33 = vld [vmem:[%s2477_s14 + $0x24c] ss:$16 sps:$4 sm:$0xff]  }
  0x4a   : > { %v2313_v37 = vld [vmem:[%s2477_s14 + $0x26c] ss:$16 sps:$4 sm:$0xff]  }
  0x4c   : > { %1233 = vmatmul.mubr.bf16.vlgmr.msra.gmra.mxu0 %v2202_v34  ;;  %v2300_v34 = vld [vmem:[%s2477_s14 + $0x200] ss:$16 sps:$4 sm:$0xff]  }
  0x4d   : > { %1240 = vmatprep.mubr.bf16.mxu0 %v2208_v36  ;;  %v2304_v36 = vld [vmem:[%s2477_s14 + $0x224] ss:$16 sps:$4 sm:$0xff]  }
  0x50   : > { %1546 = vmatmul.mubr.bf16.gmra.mxu1 %v2219_v39  ;;  %v2315_v39 = vld [vmem:[%s2477_s14 + $0x268] ss:$16 sps:$4 sm:$0xff]  }
  0x51   : > { %2132 = vmatprep.mubr.msk.bf16.mxu1 %vm1103_vm0, %v2223_v41  ;;  %v2319_v41 = vld [vmem:[%s2477_s14 + $0x28c] ss:$16 sps:$4 sm:$0xff]  }
  0x54   : > { %1241 = vmatmul.mubr.bf16.gmra.mxu0 %v2210_v38  ;;  %v2306_v38 = vld [vmem:[%s2477_s14 + $0x220] ss:$16 sps:$4 sm:$0xff]  }
  0x55   : > { %1248 = vmatprep.mubr.bf16.mxu0 %v2214_v40  ;;  %v2310_v40 = vld [vmem:[%s2477_s14 + $0x244] ss:$16 sps:$4 sm:$0xff]  }
  0x58   : > { %1554 = vmatmul.mubr.bf16.gmra.mxu1 %v2225_v44  ;;  %v2316_v44 = vld [vmem:[%s2477_s14 + $0x264] ss:$16 sps:$4 sm:$0xff]  }
  0x59   : > { %2133 = vmatprep.mubr.msk.bf16.mxu1 %vm1103_vm0, %v2229_v45  ;;  %v2325_v45 = vld [vmem:[%s2477_s14 + $0x2ac] ss:$16 sps:$4 sm:$0xff]  }
  0x5c   : > { %1249 = vmatmul.mubr.bf16.gmra.mxu0 %v2216_v42  ;;  %v2312_v42 = vld [vmem:[%s2477_s14 + $0x240] ss:$16 sps:$4 sm:$0xff]  }
  0x5d   : > { %1256 = vmatprep.mubr.bf16.mxu0 %v2220_v43  ;;  %v2321_v43 = vld [vmem:[%s2477_s14 + $0x288] ss:$16 sps:$4 sm:$0xff]  }
  0x60   : > { %1562 = vmatmul.mubr.bf16.gmra.mxu1 %v2231_v47  ;;  %v2327_v47 = vld [vmem:[%s2477_s14 + $0x2a8] ss:$16 sps:$4 sm:$0xff]  }
  0x61   : > { %2134 = vmatprep.mubr.msk.bf16.mxu1 %vm1103_vm0, %v2235_v49  ;;  %v2331_v49 = vld [vmem:[%s2477_s14 + $0x2cc] ss:$16 sps:$4 sm:$0xff]  }
  0x64   : > { %1257 = vmatmul.mubr.bf16.gmra.mxu0 %v2222_v46  ;;  %v2318_v46 = vld [vmem:[%s2477_s14 + $0x260] ss:$16 sps:$4 sm:$0xff]  }
  0x65   : > { %1264 = vmatprep.mubr.bf16.mxu0 %v2226_v48  ;;  %v2322_v48 = vld [vmem:[%s2477_s14 + $0x284] ss:$16 sps:$4 sm:$0xff]  }
  0x68   : > { %1570 = vmatmul.mubr.bf16.gmra.mxu1 %v2237_v51  ;;  %v2333_v51 = vld [vmem:[%s2477_s14 + $0x2c8] ss:$16 sps:$4 sm:$0xff]  }
  0x69   : > { %2135 = vmatprep.mubr.msk.bf16.mxu1 %vm1103_vm0, %v2241_v53  ;;  %v2337_v53 = vld [vmem:[%s2477_s14 + $0x2ec] ss:$16 sps:$4 sm:$0xff]  }
  0x6c   : > { %1265 = vmatmul.mubr.bf16.gmra.mxu0 %v2228_v50  ;;  %v2324_v50 = vld [vmem:[%s2477_s14 + $0x280] ss:$16 sps:$4 sm:$0xff]  }
  0x6d   : > { %1272 = vmatprep.mubr.bf16.mxu0 %v2232_v52  ;;  %v2328_v52 = vld [vmem:[%s2477_s14 + $0x2a4] ss:$16 sps:$4 sm:$0xff]  }
  0x70   : > { %1578 = vmatmul.mubr.bf16.gmra.mxu1 %v2243_v55  ;;  %v2339_v55 = vld [vmem:[%s2477_s14 + $0x2e8] ss:$16 sps:$4 sm:$0xff]  }
  0x71   : > { %2136 = vmatprep.mubr.msk.bf16.mxu1 %vm1103_vm0, %v2247_v57  ;;  %v2343_v57 = vld [vmem:[%s2477_s14 + $0x30c] ss:$16 sps:$4 sm:$0xff]  }
  0x74   : > { %1273 = vmatmul.mubr.bf16.gmra.mxu0 %v2234_v54  ;;  %v2330_v54 = vld [vmem:[%s2477_s14 + $0x2a0] ss:$16 sps:$4 sm:$0xff]  }
  0x75   : > { %1280 = vmatprep.mubr.bf16.mxu0 %v2238_v56  ;;  %v2334_v56 = vld [vmem:[%s2477_s14 + $0x2c4] ss:$16 sps:$4 sm:$0xff]  }
  0x78   : > { %1586 = vmatmul.mubr.bf16.gmra.mxu1 %v2249_v59  ;;  %v2345_v59 = vld [vmem:[%s2477_s14 + $0x308] ss:$16 sps:$4 sm:$0xff]  }
  0x79   : > { %2137 = vmatprep.mubr.msk.bf16.mxu1 %vm1103_vm0, %v2253_v61  ;;  %v2348_v61 = vld [vmem:[%s2477_s14 + $0x32c] ss:$16 sps:$4 sm:$0xff]  }
  0x7c   : > { %1281 = vmatmul.mubr.bf16.gmra.mxu0 %v2240_v58  ;;  %v2336_v58 = vld [vmem:[%s2477_s14 + $0x2c0] ss:$16 sps:$4 sm:$0xff]  }
  0x7d   : > { %1288 = vmatprep.mubr.bf16.mxu0 %v2244_v60  ;;  %v2340_v60 = vld [vmem:[%s2477_s14 + $0x2e4] ss:$16 sps:$4 sm:$0xff]  }
  0x80   : > { %1594 = vmatmul.mubr.bf16.gmra.mxu1 %v2255_v63 }
  0x81   : > { %2138 = vmatprep.mubr.msk.bf16.mxu1 %vm1103_vm0, %v2259_v1 }
  0x84   : > { %1289 = vmatmul.mubr.bf16.gmra.mxu0 %v2246_v62 }
  0x85   : > { %1296 = vmatprep.mubr.bf16.mxu0 %v2250_v0  ;;  %v2342_v0 = vld [vmem:[%s2477_s14 + $0x2e0] ss:$16 sps:$4 sm:$0xff]  }
  0x88   : > { %1602 = vmatmul.mubr.bf16.gmra.mxu1 %v2261_v3  ;;  %v2346_v3 = vld [vmem:[%s2477_s14 + $0x304] ss:$16 sps:$4 sm:$0xff]  }
  0x89   : > { %2139 = vmatprep.mubr.msk.bf16.mxu1 %vm1103_vm0, %v2265_v5 }
  0x8c   : > { %1297 = vmatmul.mubr.bf16.gmra.mxu0 %v2252_v2  ;;  %v2350_v2 = vld [vmem:[%s2477_s14 + $0x328] ss:$16 sps:$4 sm:$0xff]  }
  0x8d   : > { %1304 = vmatprep.mubr.bf16.mxu0 %v2256_v4  ;;  %v2353_v4 = vld [vmem:[%s2477_s14 + $0x34c] ss:$16 sps:$4 sm:$0xff]  }
  0x90   : > { %1610 = vmatmul.mubr.bf16.gmra.mxu1 %v2267_v7  ;;  %v247_v7 = vld [vmem:[%s2477_s14 + $0x300] sm:$0xff] }
  0x91   : > { %2140 = vmatprep.mubr.msk.bf16.mxu1 %vm1103_vm0, %v2271_v9 }
  0x94   : > { %1305 = vmatmul.mubr.bf16.gmra.mxu0 %v2258_v6 }
  0x95   : > { %1312 = vmatprep.mubr.bf16.mxu0 %v2262_v8  ;;  %v249_v8 = vld [vmem:[%s2477_s14 + $0x310] sm:$0xff] }
  0x98   : > { %1618 = vmatmul.mubr.bf16.gmra.mxu1 %v2273_v11 }
  0x99   : > { %2141 = vmatprep.mubr.msk.bf16.mxu1 %vm1103_vm0, %v2277_v13  ;;  %v2351_v13 = vld [vmem:[%s2477_s14 + $0x324] ss:$16 sps:$4 sm:$0xff]  }
  0x9c   : > { %1313 = vmatmul.mubr.bf16.gmra.mxu0 %v2264_v10  ;;  %v2069_v10 = vcombine.low %v247_v7, %v249_v8 }
  0x9d   : > { %1320 = vmatprep.mubr.bf16.mxu0 %v2268_v12  ;;  %v2355_v12 = vld [vmem:[%s2477_s14 + $0x348] ss:$16 sps:$4 sm:$0xff]  }
  0xa0   : > { %1626 = vmatmul.mubr.bf16.gmra.mxu1 %v2279_v15 }
  0xa1   : > { %2142 = vmatprep.mubr.msk.bf16.mxu1 %vm1103_vm0, %v2283_v17 }
  0xa4   : > { %1321 = vmatmul.mubr.bf16.gmra.mxu0 %v2270_v14  ;;  %v2358_v14 = vld [vmem:[%s2477_s14 + $0x36c] ss:$16 sps:$4 sm:$0xff]  }
  0xa5   : > { %1328 = vmatprep.mubr.bf16.mxu0 %v2274_v16 }
  0xa8   : > { %1634 = vmatmul.mubr.bf16.gmra.mxu1 %v2285_v19  ;;  %v251_v19 = vld [vmem:[%s2477_s14 + $0x320] sm:$0xff] }
  0xa9   : > { %2143 = vmatprep.mubr.msk.bf16.mxu1 %vm1103_vm0, %v2289_v21 }
  0xac   : > { %1329 = vmatmul.mubr.bf16.gmra.mxu0 %v2276_v18 }
  0xad   : > { %1336 = vmatprep.mubr.bf16.mxu0 %v2280_v20  ;;  %v253_v20 = vld [vmem:[%s2477_s14 + $0x330] sm:$0xff] }
  0xb0   : > { %1642 = vmatmul.mubr.bf16.gmra.mxu1 %v2291_v23 }
  0xb1   : > { %2144 = vmatprep.mubr.msk.bf16.mxu1 %vm1103_vm0, %v2295_v25  ;;  %v2073_v25 = vcombine.low %v251_v19, %v253_v20 }
  0xb4   : > { %1337 = vmatmul.mubr.bf16.gmra.mxu0 %v2282_v22 }
  0xb5   : > { %1344 = vmatprep.mubr.bf16.mxu0 %v2286_v24 }
  0xb8   : > { %1650 = vmatmul.mubr.bf16.gmra.mxu1 %v2297_v27  ;;  %v2360_v27 = vld [vmem:[%s2477_s14 + $0x368] ss:$16 sps:$4 sm:$0xff]  }
  0xb9   : > { %2145 = vmatprep.mubr.msk.bf16.mxu1 %vm1103_vm0, %v2301_v29  ;;  %v2356_v29 = vld [vmem:[%s2477_s14 + $0x344] ss:$16 sps:$4 sm:$0xff]  }
  0xbc   : > { %1345 = vmatmul.mubr.bf16.gmra.mxu0 %v2288_v26 }
  0xbd   : > { %1352 = vmatprep.mubr.bf16.mxu0 %v2292_v28 }
  0xc0   : > { %1658 = vmatmul.mubr.bf16.gmra.mxu1 %v2303_v31 }
  0xc1   : > { %2146 = vmatprep.mubr.msk.bf16.mxu1 %vm1103_vm0, %v2307_v33 }
  0xc4   : > { %1353 = vmatmul.mubr.bf16.gmra.mxu0 %v2294_v30  ;;  %v2363_v30 = vld [vmem:[%s2477_s14 + $0x38c] ss:$16 sps:$4 sm:$0xff]  }
  0xc5   : > { %1360 = vmatprep.mubr.bf16.mxu0 %v2298_v32 }
  0xc8   : > { %1666 = vmatmul.mubr.bf16.gmra.mxu1 %v2309_v35 }
  0xc9   : > { %2147 = vmatprep.mubr.msk.bf16.mxu1 %vm1103_vm0, %v2313_v37  ;;  %v255_v37 = vld [vmem:[%s2477_s14 + $0x340] sm:$0xff] }
  0xcc   : > { %1361 = vmatmul.mubr.bf16.gmra.mxu0 %v2300_v34 }
  0xcd   : > { %1368 = vmatprep.mubr.bf16.mxu0 %v2304_v36 }
  0xd0   : > { %1674 = vmatmul.mubr.bf16.gmra.mxu1 %v2315_v39 }
  0xd1   : > { %2148 = vmatprep.mubr.msk.bf16.mxu1 %vm1103_vm0, %v2319_v41 }
  0xd4   : > { %1369 = vmatmul.mubr.bf16.gmra.mxu0 %v2306_v38  ;;  %v257_v38 = vld [vmem:[%s2477_s14 + $0x350] sm:$0xff] }
  0xd5   : > { %1376 = vmatprep.mubr.bf16.mxu0 %v2310_v40 }
  0xd8   : > { %1682 = vmatmul.mubr.bf16.gmra.mxu1 %v2321_v43  ;;  %v2077_v43 = vcombine.low %v255_v37, %v257_v38 }
  0xd9   : > { %2149 = vmatprep.mubr.msk.bf16.mxu1 %vm1103_vm0, %v2325_v45  ;;  %v2365_v45 = vld [vmem:[%s2477_s14 + $0x388] ss:$16 sps:$4 sm:$0xff]  }
  0xdc   : > { %1377 = vmatmul.mubr.bf16.gmra.mxu0 %v2312_v42 }
  0xdd   : > { %1384 = vmatprep.mubr.bf16.mxu0 %v2316_v44 }
  0xe0   : > { %1690 = vmatmul.mubr.bf16.gmra.mxu1 %v2327_v47  ;;  %v2361_v47 = vld [vmem:[%s2477_s14 + $0x364] ss:$16 sps:$4 sm:$0xff]  }
  0xe1   : > { %2150 = vmatprep.mubr.msk.bf16.mxu1 %vm1103_vm0, %v2331_v49 }
  0xe4   : > { %1385 = vmatmul.mubr.bf16.gmra.mxu0 %v2318_v46 }
  0xe5   : > { %1392 = vmatprep.mubr.bf16.mxu0 %v2322_v48  ;;  %v2369_v48 = vld [vmem:[%s2477_s14 + $0x3ac] ss:$16 sps:$4 sm:$0xff]  }
  0xe8   : > { %1698 = vmatmul.mubr.bf16.gmra.mxu1 %v2333_v51 }
  0xe9   : > { %2151 = vmatprep.mubr.msk.bf16.mxu1 %vm1103_vm0, %v2337_v53 }
  0xec   : > { %1393 = vmatmul.mubr.bf16.gmra.mxu0 %v2324_v50 }
  0xed   : > { %1400 = vmatprep.mubr.bf16.mxu0 %v2328_v52 }
  0xf0   : > { %1706 = vmatmul.mubr.bf16.gmra.mxu1 %v2339_v55  ;;  %v259_v55 = vld [vmem:[%s2477_s14 + $0x360] sm:$0xff] }
  0xf1   : > { %2152 = vmatprep.mubr.msk.bf16.mxu1 %vm1103_vm0, %v2343_v57 }
  0xf4   : > { %1401 = vmatmul.mubr.bf16.gmra.mxu0 %v2330_v54 }
  0xf5   : > { %1408 = vmatprep.mubr.bf16.mxu0 %v2334_v56  ;;  %v261_v56 = vld [vmem:[%s2477_s14 + $0x370] sm:$0xff] }
  0xf8   : > { %v1523_v62 = vpop.f32.mrf.mxu1  ;;  %1714 = vmatmul.mubr.bf16.gmra.mxu1 %v2345_v59 }
  0xf9   : > { %2153 = vmatprep.mubr.msk.bf16.mxu1 %vm1103_vm0, %v2348_v61  ;;  %v2081_v61 = vcombine.low %v259_v55, %v261_v56 }
  0xfa   : > { %v1525_v63 = vpop.f32.mrf.mxu1 }
  0xfb   : > { %v2371_v63 = vld [vmem:[%s2477_s14 + $0x3a8] ss:$16 sps:$4 sm:$0xff]  }
  0xfc   : > { %1409 = vmatmul.mubr.bf16.gmra.mxu0 %v2336_v58  ;;  %v1526_v1 = vpop.f32.mrf.mxu1 }
  0xfd   : > { %1416 = vmatprep.mubr.bf16.mxu0 %v2340_v60 }
  0xfe   : > { %v1528_v5 = vpop.f32.mrf.mxu1 }
 0x100   : > { %v1531_v6 = vpop.f32.mrf.mxu1  ;;  %1722 = vmatmul.mubr.bf16.gmra.mxu1 %v2350_v2  ;;  %v2375_v2 = vld [vmem:[%s2477_s14 + $0x3cc] ss:$16 sps:$4 sm:$0xff]  }
 0x101   : > { %2154 = vmatprep.mubr.msk.bf16.mxu1 %vm1103_vm0, %v2353_v4 }
 0x102   : > { %v1533_v9 = vpop.f32.mrf.mxu1 }
 0x104   : > { %1417 = vmatmul.mubr.bf16.gmra.mxu0 %v2342_v0  ;;  %v1534_v11 = vpop.f32.mrf.mxu1 }
 0x105   : > { %1424 = vmatprep.mubr.bf16.mxu0 %v2346_v3 }
 0x106   : > { %v1536_v15 = vpop.f32.mrf.mxu1 }
 0x107   : > { %v2377_v15 = vld [vmem:[%s2477_s14 + $0x3c8] ss:$16 sps:$4 sm:$0xff]  }
 0x108   : > { %v1539_v17 = vpop.f32.mrf.mxu1  ;;  %1730 = vmatmul.mubr.bf16.gmra.mxu1 %v2355_v12 }
 0x109   : > { %2155 = vmatprep.mubr.msk.bf16.mxu1 %vm1103_vm0, %v2358_v14 }
 0x10a   : > { %v1541_v22 = vpop.f32.mrf.mxu1 }
 0x10c   : > { %v1234_v16 = vpop.f32.mrf.mxu0  ;;  %1425 = vmatmul.mubr.bf16.gmra.mxu0 %v2069_v10  ;;  %v1542_v26 = vpop.f32.mrf.mxu1 }
 0x10d   : > { %v1524_v18 = vadd.f32 %v1523_v62, %v1234_v16  ;;  %1432 = vmatprep.mubr.bf16.mxu0 %v2351_v13  ;;  %v2366_v13 = vld [vmem:[%s2477_s14 + $0x380] ss:$16 sps:$4 sm:$0xff]  }
 0x10e   : > { %v1236_v21 = vpop.f32.mrf.mxu0  ;;  %v1544_v32 = vpop.f32.mrf.mxu1 }
 0x10f   : > { %v1778_v23 = vmax.f32 %v1524_v18, 0.0  ;;  %v2381_v18 = vld [vmem:[%s2477_s14 + $0x3ec] ss:$16 sps:$4 sm:$0xff]  }
 0x110   : > { %v1237_v24 = vpop.f32.mrf.mxu0  ;;  %v1547_v35 = vpop.f32.mrf.mxu1  ;;  %1738 = vmatmul.mubr.bf16.gmra.mxu1 %v2360_v27 }
 0x111   : > { %1843 = vst.msk [vmem:[%s2676_s21] sm:$0xff] %vm1842_vm1, %v1778_v23  ;;  %v1527_v28 = vadd.f32 %v1526_v1, %v1237_v24  ;;  %2156 = vmatprep.mubr.msk.bf16.mxu1 %vm1103_vm0, %v2363_v30  ;;  %v2368_v1 = vld [vmem:[%s2477_s14 + $0x384] ss:$16 sps:$4 sm:$0xff]  }
 0x112   : > { %v1239_v31 = vpop.f32.mrf.mxu0  ;;  %v1549_v40 = vpop.f32.mrf.mxu1 }
 0x113   : > { %v1779_v33 = vmax.f32 %v1527_v28, 0.0  ;;  %v2383_v31 = vld [vmem:[%s2477_s14 + $0x3e8] ss:$16 sps:$4 sm:$0xff]  }
 0x114   : > { %v1242_v34 = vpop.f32.mrf.mxu0  ;;  %1433 = vmatmul.mubr.bf16.gmra.mxu0 %v2073_v25  ;;  %v1550_v44 = vpop.f32.mrf.mxu1 }
 0x115   : > { %1844 = vst.msk [vmem:[%s2676_s21 + $0x8] sm:$0xff] %vm1842_vm1, %v1779_v33  ;;  %v1532_v36 = vadd.f32 %v1531_v6, %v1242_v34  ;;  %1440 = vmatprep.mubr.bf16.mxu0 %v2356_v29  ;;  %v2372_v29 = vld [vmem:[%s2477_s14 + $0x3a0] ss:$16 sps:$4 sm:$0xff]   ;;  %v2380_v33 = vld [vmem:[%s2477_s14 + $0x3c4] ss:$16 sps:$4 sm:$0xff]  }
 0x116   : > { %v1244_v39 = vpop.f32.mrf.mxu0  ;;  %v1552_v50 = vpop.f32.mrf.mxu1 }
 0x117   : > { %v1780_v41 = vmax.f32 %v1532_v36, 0.0 }
 0x118   : > { %v1245_v42 = vpop.f32.mrf.mxu0  ;;  %v1555_v53 = vpop.f32.mrf.mxu1  ;;  %1746 = vmatmul.mubr.bf16.gmra.mxu1 %v2365_v45 }
 0x119   : > { %1845 = vst.msk [vmem:[%s2676_s21 + $0x10] sm:$0xff] %vm1842_vm1, %v1780_v41  ;;  %v1535_v46 = vadd.f32 %v1534_v11, %v1245_v42  ;;  %2157 = vmatprep.mubr.msk.bf16.mxu1 %vm1103_vm0, %v2369_v48 }
 0x11a   : > { %v1247_v49 = vpop.f32.mrf.mxu0  ;;  %v1557_v58 = vpop.f32.mrf.mxu1 }
 0x11b   : > { %v1781_v51 = vmax.f32 %v1535_v46, 0.0  ;;  %v2384_v58 = vld [vmem:[%s2477_s14 + $0x3e0] ss:$16 sps:$4 sm:$0xff]  }
 0x11c   : > { %v1250_v52 = vpop.f32.mrf.mxu0  ;;  %1441 = vmatmul.mubr.bf16.gmra.mxu0 %v2077_v43  ;;  %v1558_v62 = vpop.f32.mrf.mxu1 }
 0x11d   : > { %1846 = vst.msk [vmem:[%s2676_s21 + $0x18] sm:$0xff] %vm1842_vm1, %v1781_v51  ;;  %v1540_v54 = vadd.f32 %v1539_v17, %v1250_v52  ;;  %1448 = vmatprep.mubr.bf16.mxu0 %v2361_v47  ;;  %v2374_v17 = vld [vmem:[%s2477_s14 + $0x3a4] ss:$16 sps:$4 sm:$0xff]  }
 0x11e   : > { %v1252_v57 = vpop.f32.mrf.mxu0  ;;  %v1560_v4 = vpop.f32.mrf.mxu1  ;;  %v2386_v47 = vld [vmem:[%s2477_s14 + $0x3e4] ss:$16 sps:$4 sm:$0xff]  }
 0x11f   : > { %v1782_v59 = vmax.f32 %v1540_v54, 0.0 }
 0x120   : > { %v1253_v60 = vpop.f32.mrf.mxu0  ;;  %v1563_v7 = vpop.f32.mrf.mxu1  ;;  %1754 = vmatmul.mubr.bf16.gmra.mxu1 %v2371_v63 }
 0x121   : > { %1847 = vst.msk [vmem:[%s2676_s21 + $0x20] sm:$0xff] %vm1842_vm1, %v1782_v59  ;;  %v1543_v0 = vadd.f32 %v1542_v26, %v1253_v60  ;;  %2158 = vmatprep.mubr.msk.bf16.mxu1 %vm1103_vm0, %v2375_v2 }
 0x122   : > { %v1255_v3 = vpop.f32.mrf.mxu0  ;;  %v1565_v10 = vpop.f32.mrf.mxu1 }
 0x123   : > { %v1783_v5 = vmax.f32 %v1543_v0, 0.0 }
 0x124   : > { %v1258_v6 = vpop.f32.mrf.mxu0  ;;  %1449 = vmatmul.mubr.bf16.gmra.mxu0 %v2081_v61  ;;  %v1566_v14 = vpop.f32.mrf.mxu1 }
 0x125   : > { %1848 = vst.msk [vmem:[%s2676_s21 + $0x28] sm:$0xff] %vm1842_vm1, %v1783_v5  ;;  %v1548_v8 = vadd.f32 %v1547_v35, %v1258_v6  ;;  %1456 = vmatprep.mubr.bf16.mxu0 %v2368_v1 }
 0x126   : > { %v1260_v9 = vpop.f32.mrf.mxu0  ;;  %v1568_v20 = vpop.f32.mrf.mxu1 }
 0x127   : > { %v1784_v11 = vmax.f32 %v1548_v8, 0.0 }
 0x128   : > { %v1261_v12 = vpop.f32.mrf.mxu0  ;;  %v1571_v23 = vpop.f32.mrf.mxu1  ;;  %1762 = vmatmul.mubr.bf16.gmra.mxu1 %v2377_v15 }
 0x129   : > { %1849 = vst.msk [vmem:[%s2676_s21 + $0x30] sm:$0xff] %vm1842_vm1, %v1784_v11  ;;  %v1551_v16 = vadd.f32 %v1550_v44, %v1261_v12  ;;  %2159 = vmatprep.mubr.msk.bf16.mxu1 %vm1103_vm0, %v2381_v18  ;;  %v2378_v44 = vld [vmem:[%s2477_s14 + $0x3c0] ss:$16 sps:$4 sm:$0xff]  }
 0x12a   : > { %v1263_v19 = vpop.f32.mrf.mxu0  ;;  %v1573_v26 = vpop.f32.mrf.mxu1 }
 0x12b   : > { %v1785_v21 = vmax.f32 %v1551_v16, 0.0 }
 0x12c   : > { %v1266_v22 = vpop.f32.mrf.mxu0  ;;  %1457 = vmatmul.mubr.bf16.gmra.mxu0 %v2366_v13  ;;  %v1574_v30 = vpop.f32.mrf.mxu1 }
 0x12d   : > { %1850 = vst.msk [vmem:[%s2676_s21 + $0x38] sm:$0xff] %vm1842_vm1, %v1785_v21  ;;  %v1556_v24 = vadd.f32 %v1555_v53, %v1266_v22  ;;  %1464 = vmatprep.mubr.bf16.mxu0 %v2374_v17 }
 0x12e   : > { %v1268_v25 = vpop.f32.mrf.mxu0  ;;  %v1576_v35 = vpop.f32.mrf.mxu1 }
 0x12f   : > { %v1786_v27 = vmax.f32 %v1556_v24, 0.0 }
 0x130   : > { %v1269_v28 = vpop.f32.mrf.mxu0  ;;  %v1579_v38 = vpop.f32.mrf.mxu1  ;;  %1770 = vmatmul.mubr.bf16.gmra.mxu1 %v2383_v31 }
 0x131   : > { %1851 = vst.msk [vmem:[%s2676_s21 + $0x40] sm:$0xff] %vm1842_vm1, %v1786_v27  ;;  %v1559_v32 = vadd.f32 %v1558_v62, %v1269_v28 }
 0x132   : > { %v1271_v34 = vpop.f32.mrf.mxu0  ;;  %v1581_v41 = vpop.f32.mrf.mxu1 }
 0x133   : > { %v1787_v36 = vmax.f32 %v1559_v32, 0.0 }
 0x134   : > { %v1274_v37 = vpop.f32.mrf.mxu0  ;;  %1465 = vmatmul.mubr.bf16.gmra.mxu0 %v2372_v29  ;;  %v1582_v45 = vpop.f32.mrf.mxu1 }
 0x135   : > { %1852 = vst.msk [vmem:[%s2676_s21 + $0x48] sm:$0xff] %vm1842_vm1, %v1787_v36  ;;  %v1564_v39 = vadd.f32 %v1563_v7, %v1274_v37  ;;  %1472 = vmatprep.mubr.bf16.mxu0 %v2380_v33 }
 0x136   : > { %v1276_v40 = vpop.f32.mrf.mxu0  ;;  %v1584_v49 = vpop.f32.mrf.mxu1 }
 0x137   : > { %v1788_v42 = vmax.f32 %v1564_v39, 0.0 }
 0x138   : > { %v1277_v43 = vpop.f32.mrf.mxu0  ;;  %v1587_v52 = vpop.f32.mrf.mxu1 }
 0x139   : > { %1853 = vst.msk [vmem:[%s2676_s21 + $0x50] sm:$0xff] %vm1842_vm1, %v1788_v42  ;;  %v1567_v46 = vadd.f32 %v1566_v14, %v1277_v43 }
 0x13a   : > { %v1279_v48 = vpop.f32.mrf.mxu0  ;;  %v1589_v55 = vpop.f32.mrf.mxu1 }
 0x13b   : > { %v1789_v50 = vmax.f32 %v1567_v46, 0.0 }
 0x13c   : > { %v1282_v51 = vpop.f32.mrf.mxu0  ;;  %1473 = vmatmul.mubr.bf16.gmra.mxu0 %v2378_v44  ;;  %v1590_v59 = vpop.f32.mrf.mxu1 }
 0x13d   : > { %1854 = vst.msk [vmem:[%s2676_s21 + $0x58] sm:$0xff] %vm1842_vm1, %v1789_v50  ;;  %v1572_v53 = vadd.f32 %v1571_v23, %v1282_v51  ;;  %1480 = vmatprep.mubr.bf16.mxu0 %v2386_v47 }
 0x13e   : > { %v1284_v54 = vpop.f32.mrf.mxu0  ;;  %v1592_v62 = vpop.f32.mrf.mxu1 }
 0x13f   : > { %v1790_v56 = vmax.f32 %v1572_v53, 0.0 }
 0x140   : > { %v1285_v57 = vpop.f32.mrf.mxu0  ;;  %v1595_v1 = vpop.f32.mrf.mxu1 }
 0x141   : > { %1855 = vst.msk [vmem:[%s2676_s21 + $0x60] sm:$0xff] %vm1842_vm1, %v1790_v56  ;;  %v1575_v60 = vadd.f32 %v1574_v30, %v1285_v57 }
 0x142   : > { %v1287_v61 = vpop.f32.mrf.mxu0  ;;  %v1597_v4 = vpop.f32.mrf.mxu1 }
 0x143   : > { %v1791_v63 = vmax.f32 %v1575_v60, 0.0 }
 0x144   : > { %v1290_v0 = vpop.f32.mrf.mxu0  ;;  %1481 = vmatmul.mubr.bf16.gmra.mxu0 %v2384_v58  ;;  %v1598_v7 = vpop.f32.mrf.mxu1 }
 0x145   : > { %1856 = vst.msk [vmem:[%s2676_s21 + $0x68] sm:$0xff] %vm1842_vm1, %v1791_v63  ;;  %v1580_v2 = vadd.f32 %v1579_v38, %v1290_v0 }
 0x146   : > { %v1292_v3 = vpop.f32.mrf.mxu0  ;;  %v1600_v10 = vpop.f32.mrf.mxu1 }
 0x147   : > { %v1792_v5 = vmax.f32 %v1580_v2, 0.0 }
 0x148   : > { %v1293_v6 = vpop.f32.mrf.mxu0  ;;  %v1603_v13 = vpop.f32.mrf.mxu1 }
 0x149   : > { %1857 = vst.msk [vmem:[%s2676_s21 + $0x70] sm:$0xff] %vm1842_vm1, %v1792_v5  ;;  %v1583_v8 = vadd.f32 %v1582_v45, %v1293_v6 }
 0x14a   : > { %v1295_v9 = vpop.f32.mrf.mxu0  ;;  %v1605_v16 = vpop.f32.mrf.mxu1 }
 0x14b   : > { %v1793_v11 = vmax.f32 %v1583_v8, 0.0 }
 0x14c   : > { %v1298_v12 = vpop.f32.mrf.mxu0  ;;  %v1606_v19 = vpop.f32.mrf.mxu1 }
 0x14d   : > { %1858 = vst.msk [vmem:[%s2676_s21 + $0x78] sm:$0xff] %vm1842_vm1, %v1793_v11  ;;  %v1588_v14 = vadd.f32 %v1587_v52, %v1298_v12 }
 0x14e   : > { %v1300_v15 = vpop.f32.mrf.mxu0  ;;  %v1608_v22 = vpop.f32.mrf.mxu1 }
 0x14f   : > { %v1794_v17 = vmax.f32 %v1588_v14, 0.0 }
 0x150   : > { %v1301_v18 = vpop.f32.mrf.mxu0  ;;  %v1611_v25 = vpop.f32.mrf.mxu1 }
 0x151   : > { %1859 = vst.msk [vmem:[%s2676_s21 + $0x80] sm:$0xff] %vm1842_vm1, %v1794_v17  ;;  %v1591_v20 = vadd.f32 %v1590_v59, %v1301_v18 }
 0x152   : > { %v1303_v21 = vpop.f32.mrf.mxu0  ;;  %v1613_v28 = vpop.f32.mrf.mxu1 }
 0x153   : > { %v1795_v23 = vmax.f32 %v1591_v20, 0.0 }
 0x154   : > { %v1306_v24 = vpop.f32.mrf.mxu0  ;;  %v1614_v31 = vpop.f32.mrf.mxu1 }
 0x155   : > { %1860 = vst.msk [vmem:[%s2676_s21 + $0x88] sm:$0xff] %vm1842_vm1, %v1795_v23  ;;  %v1596_v26 = vadd.f32 %v1595_v1, %v1306_v24 }
 0x156   : > { %v1308_v27 = vpop.f32.mrf.mxu0  ;;  %v1616_v34 = vpop.f32.mrf.mxu1 }
 0x157   : > { %v1796_v29 = vmax.f32 %v1596_v26, 0.0 }
 0x158   : > { %v1309_v30 = vpop.f32.mrf.mxu0  ;;  %v1619_v37 = vpop.f32.mrf.mxu1 }
 0x159   : > { %1861 = vst.msk [vmem:[%s2676_s21 + $0x90] sm:$0xff] %vm1842_vm1, %v1796_v29  ;;  %v1599_v32 = vadd.f32 %v1598_v7, %v1309_v30 }
 0x15a   : > { %v1311_v33 = vpop.f32.mrf.mxu0  ;;  %v1621_v40 = vpop.f32.mrf.mxu1 }
 0x15b   : > { %v1797_v35 = vmax.f32 %v1599_v32, 0.0 }
 0x15c   : > { %v1314_v36 = vpop.f32.mrf.mxu0  ;;  %v1622_v43 = vpop.f32.mrf.mxu1 }
 0x15d   : > { %1862 = vst.msk [vmem:[%s2676_s21 + $0x98] sm:$0xff] %vm1842_vm1, %v1797_v35  ;;  %v1604_v38 = vadd.f32 %v1603_v13, %v1314_v36 }
 0x15e   : > { %v1316_v39 = vpop.f32.mrf.mxu0  ;;  %v1624_v46 = vpop.f32.mrf.mxu1 }
 0x15f   : > { %v1798_v41 = vmax.f32 %v1604_v38, 0.0 }
 0x160   : > { %v1317_v42 = vpop.f32.mrf.mxu0  ;;  %v1627_v49 = vpop.f32.mrf.mxu1 }
 0x161   : > { %1863 = vst.msk [vmem:[%s2676_s21 + $0xa0] sm:$0xff] %vm1842_vm1, %v1798_v41  ;;  %v1607_v44 = vadd.f32 %v1606_v19, %v1317_v42 }
 0x162   : > { %v1319_v45 = vpop.f32.mrf.mxu0  ;;  %v1629_v52 = vpop.f32.mrf.mxu1 }
 0x163   : > { %v1799_v47 = vmax.f32 %v1607_v44, 0.0 }
 0x164   : > { %v1322_v48 = vpop.f32.mrf.mxu0  ;;  %v1630_v55 = vpop.f32.mrf.mxu1 }
 0x165   : > { %1864 = vst.msk [vmem:[%s2676_s21 + $0xa8] sm:$0xff] %vm1842_vm1, %v1799_v47  ;;  %v1612_v50 = vadd.f32 %v1611_v25, %v1322_v48 }
 0x166   : > { %v1324_v51 = vpop.f32.mrf.mxu0  ;;  %v1632_v58 = vpop.f32.mrf.mxu1 }
 0x167   : > { %v1800_v53 = vmax.f32 %v1612_v50, 0.0 }
 0x168   : > { %v1325_v54 = vpop.f32.mrf.mxu0  ;;  %v1635_v61 = vpop.f32.mrf.mxu1 }
 0x169   : > { %1865 = vst.msk [vmem:[%s2676_s21 + $0xb0] sm:$0xff] %vm1842_vm1, %v1800_v53  ;;  %v1615_v56 = vadd.f32 %v1614_v31, %v1325_v54 }
 0x16a   : > { %v1327_v57 = vpop.f32.mrf.mxu0  ;;  %v1637_v0 = vpop.f32.mrf.mxu1 }
 0x16b   : > { %v1801_v59 = vmax.f32 %v1615_v56, 0.0 }
 0x16c   : > { %v1330_v60 = vpop.f32.mrf.mxu0  ;;  %v1638_v3 = vpop.f32.mrf.mxu1 }
 0x16d   : > { %1866 = vst.msk [vmem:[%s2676_s21 + $0xb8] sm:$0xff] %vm1842_vm1, %v1801_v59  ;;  %v1620_v62 = vadd.f32 %v1619_v37, %v1330_v60 }
 0x16e   : > { %v1332_v63 = vpop.f32.mrf.mxu0  ;;  %v1640_v6 = vpop.f32.mrf.mxu1 }
 0x16f   : > { %v1802_v1 = vmax.f32 %v1620_v62, 0.0 }
 0x170   : > { %v1333_v2 = vpop.f32.mrf.mxu0  ;;  %v1643_v9 = vpop.f32.mrf.mxu1 }
 0x171   : > { %1867 = vst.msk [vmem:[%s2676_s21 + $0xc0] sm:$0xff] %vm1842_vm1, %v1802_v1  ;;  %v1623_v4 = vadd.f32 %v1622_v43, %v1333_v2 }
 0x172   : > { %v1335_v5 = vpop.f32.mrf.mxu0  ;;  %v1645_v12 = vpop.f32.mrf.mxu1 }
 0x173   : > { %v1803_v7 = vmax.f32 %v1623_v4, 0.0 }
 0x174   : > { %v1338_v8 = vpop.f32.mrf.mxu0  ;;  %v1646_v15 = vpop.f32.mrf.mxu1 }
 0x175   : > { %1868 = vst.msk [vmem:[%s2676_s21 + $0xc8] sm:$0xff] %vm1842_vm1, %v1803_v7  ;;  %v1628_v10 = vadd.f32 %v1627_v49, %v1338_v8 }
 0x176   : > { %v1340_v11 = vpop.f32.mrf.mxu0  ;;  %v1648_v18 = vpop.f32.mrf.mxu1 }
 0x177   : > { %v1804_v13 = vmax.f32 %v1628_v10, 0.0 }
 0x178   : > { %v1341_v14 = vpop.f32.mrf.mxu0  ;;  %v1651_v21 = vpop.f32.mrf.mxu1 }
 0x179   : > { %1869 = vst.msk [vmem:[%s2676_s21 + $0xd0] sm:$0xff] %vm1842_vm1, %v1804_v13  ;;  %v1631_v16 = vadd.f32 %v1630_v55, %v1341_v14 }
 0x17a   : > { %v1343_v17 = vpop.f32.mrf.mxu0  ;;  %v1653_v24 = vpop.f32.mrf.mxu1 }
 0x17b   : > { %v1805_v19 = vmax.f32 %v1631_v16, 0.0 }
 0x17c   : > { %v1346_v20 = vpop.f32.mrf.mxu0  ;;  %v1654_v27 = vpop.f32.mrf.mxu1 }
 0x17d   : > { %1870 = vst.msk [vmem:[%s2676_s21 + $0xd8] sm:$0xff] %vm1842_vm1, %v1805_v19  ;;  %v1636_v22 = vadd.f32 %v1635_v61, %v1346_v20 }
 0x17e   : > { %v1348_v23 = vpop.f32.mrf.mxu0  ;;  %v1656_v30 = vpop.f32.mrf.mxu1 }
 0x17f   : > { %v1806_v25 = vmax.f32 %v1636_v22, 0.0 }
 0x180   : > { %v1349_v26 = vpop.f32.mrf.mxu0  ;;  %v1659_v33 = vpop.f32.mrf.mxu1 }
 0x181   : > { %1871 = vst.msk [vmem:[%s2676_s21 + $0xe0] sm:$0xff] %vm1842_vm1, %v1806_v25  ;;  %v1639_v28 = vadd.f32 %v1638_v3, %v1349_v26 }
 0x182   : > { %v1351_v29 = vpop.f32.mrf.mxu0  ;;  %v1661_v36 = vpop.f32.mrf.mxu1 }
 0x183   : > { %v1807_v31 = vmax.f32 %v1639_v28, 0.0 }
 0x184   : > { %v1354_v32 = vpop.f32.mrf.mxu0  ;;  %v1662_v39 = vpop.f32.mrf.mxu1 }
 0x185   : > { %1872 = vst.msk [vmem:[%s2676_s21 + $0xe8] sm:$0xff] %vm1842_vm1, %v1807_v31  ;;  %v1644_v34 = vadd.f32 %v1643_v9, %v1354_v32 }
 0x186   : > { %v1356_v35 = vpop.f32.mrf.mxu0  ;;  %v1664_v42 = vpop.f32.mrf.mxu1 }
 0x187   : > { %v1808_v37 = vmax.f32 %v1644_v34, 0.0 }
 0x188   : > { %v1357_v38 = vpop.f32.mrf.mxu0  ;;  %v1667_v45 = vpop.f32.mrf.mxu1 }
 0x189   : > { %1873 = vst.msk [vmem:[%s2676_s21 + $0xf0] sm:$0xff] %vm1842_vm1, %v1808_v37  ;;  %v1647_v40 = vadd.f32 %v1646_v15, %v1357_v38 }
 0x18a   : > { %v1359_v41 = vpop.f32.mrf.mxu0  ;;  %v1669_v48 = vpop.f32.mrf.mxu1 }
 0x18b   : > { %v1809_v43 = vmax.f32 %v1647_v40, 0.0 }
 0x18c   : > { %v1362_v44 = vpop.f32.mrf.mxu0  ;;  %v1670_v51 = vpop.f32.mrf.mxu1 }
 0x18d   : > { %1874 = vst.msk [vmem:[%s2676_s21 + $0xf8] sm:$0xff] %vm1842_vm1, %v1809_v43  ;;  %v1652_v46 = vadd.f32 %v1651_v21, %v1362_v44 }
 0x18e   : > { %v1364_v47 = vpop.f32.mrf.mxu0  ;;  %v1672_v54 = vpop.f32.mrf.mxu1 }
 0x18f   : > { %v1810_v49 = vmax.f32 %v1652_v46, 0.0 }
 0x190   : > { %v1365_v50 = vpop.f32.mrf.mxu0  ;;  %v1675_v57 = vpop.f32.mrf.mxu1 }
 0x191   : > { %1875 = vst.msk [vmem:[%s2676_s21 + $0x100] sm:$0xff] %vm1842_vm1, %v1810_v49  ;;  %v1655_v52 = vadd.f32 %v1654_v27, %v1365_v50 }
 0x192   : > { %v1367_v53 = vpop.f32.mrf.mxu0  ;;  %v1677_v60 = vpop.f32.mrf.mxu1 }
 0x193   : > { %v1811_v55 = vmax.f32 %v1655_v52, 0.0 }
 0x194   : > { %v1370_v56 = vpop.f32.mrf.mxu0  ;;  %v1678_v63 = vpop.f32.mrf.mxu1 }
 0x195   : > { %1876 = vst.msk [vmem:[%s2676_s21 + $0x108] sm:$0xff] %vm1842_vm1, %v1811_v55  ;;  %v1660_v58 = vadd.f32 %v1659_v33, %v1370_v56 }
 0x196   : > { %v1372_v59 = vpop.f32.mrf.mxu0  ;;  %v1680_v2 = vpop.f32.mrf.mxu1 }
 0x197   : > { %v1812_v61 = vmax.f32 %v1660_v58, 0.0 }
 0x198   : > { %v1373_v62 = vpop.f32.mrf.mxu0  ;;  %v1683_v5 = vpop.f32.mrf.mxu1 }
 0x199   : > { %1877 = vst.msk [vmem:[%s2676_s21 + $0x110] sm:$0xff] %vm1842_vm1, %v1812_v61  ;;  %v1663_v0 = vadd.f32 %v1662_v39, %v1373_v62 }
 0x19a   : > { %v1375_v1 = vpop.f32.mrf.mxu0  ;;  %v1685_v8 = vpop.f32.mrf.mxu1 }
 0x19b   : > { %v1813_v3 = vmax.f32 %v1663_v0, 0.0 }
 0x19c   : > { %v1378_v4 = vpop.f32.mrf.mxu0  ;;  %v1686_v11 = vpop.f32.mrf.mxu1 }
 0x19d   : > { %1878 = vst.msk [vmem:[%s2676_s21 + $0x118] sm:$0xff] %vm1842_vm1, %v1813_v3  ;;  %v1668_v6 = vadd.f32 %v1667_v45, %v1378_v4 }
 0x19e   : > { %v1380_v7 = vpop.f32.mrf.mxu0  ;;  %v1688_v14 = vpop.f32.mrf.mxu1 }
 0x19f   : > { %v1814_v9 = vmax.f32 %v1668_v6, 0.0 }
 0x1a0   : > { %v1381_v10 = vpop.f32.mrf.mxu0  ;;  %v1691_v17 = vpop.f32.mrf.mxu1 }
 0x1a1   : > { %1879 = vst.msk [vmem:[%s2676_s21 + $0x120] sm:$0xff] %vm1842_vm1, %v1814_v9  ;;  %v1671_v12 = vadd.f32 %v1670_v51, %v1381_v10 }
 0x1a2   : > { %v1383_v13 = vpop.f32.mrf.mxu0  ;;  %v1693_v20 = vpop.f32.mrf.mxu1 }
 0x1a3   : > { %v1815_v15 = vmax.f32 %v1671_v12, 0.0 }
 0x1a4   : > { %v1386_v16 = vpop.f32.mrf.mxu0  ;;  %v1694_v23 = vpop.f32.mrf.mxu1 }
 0x1a5   : > { %1880 = vst.msk [vmem:[%s2676_s21 + $0x128] sm:$0xff] %vm1842_vm1, %v1815_v15  ;;  %v1676_v18 = vadd.f32 %v1675_v57, %v1386_v16 }
 0x1a6   : > { %v1388_v19 = vpop.f32.mrf.mxu0  ;;  %v1696_v26 = vpop.f32.mrf.mxu1 }
 0x1a7   : > { %v1816_v21 = vmax.f32 %v1676_v18, 0.0 }
 0x1a8   : > { %v1389_v22 = vpop.f32.mrf.mxu0  ;;  %v1699_v29 = vpop.f32.mrf.mxu1 }
 0x1a9   : > { %1881 = vst.msk [vmem:[%s2676_s21 + $0x130] sm:$0xff] %vm1842_vm1, %v1816_v21  ;;  %v1679_v24 = vadd.f32 %v1678_v63, %v1389_v22 }
 0x1aa   : > { %v1391_v25 = vpop.f32.mrf.mxu0  ;;  %v1701_v32 = vpop.f32.mrf.mxu1 }
 0x1ab   : > { %v1817_v27 = vmax.f32 %v1679_v24, 0.0 }
 0x1ac   : > { %v1394_v28 = vpop.f32.mrf.mxu0  ;;  %v1702_v35 = vpop.f32.mrf.mxu1 }
 0x1ad   : > { %1882 = vst.msk [vmem:[%s2676_s21 + $0x138] sm:$0xff] %vm1842_vm1, %v1817_v27  ;;  %v1684_v30 = vadd.f32 %v1683_v5, %v1394_v28 }
 0x1ae   : > { %v1396_v31 = vpop.f32.mrf.mxu0  ;;  %v1704_v38 = vpop.f32.mrf.mxu1 }
 0x1af   : > { %v1818_v33 = vmax.f32 %v1684_v30, 0.0 }
 0x1b0   : > { %v1397_v34 = vpop.f32.mrf.mxu0  ;;  %v1707_v41 = vpop.f32.mrf.mxu1 }
 0x1b1   : > { %1883 = vst.msk [vmem:[%s2676_s21 + $0x140] sm:$0xff] %vm1842_vm1, %v1818_v33  ;;  %v1687_v36 = vadd.f32 %v1686_v11, %v1397_v34 }
 0x1b2   : > { %v1399_v37 = vpop.f32.mrf.mxu0  ;;  %v1709_v44 = vpop.f32.mrf.mxu1 }
 0x1b3   : > { %v1819_v39 = vmax.f32 %v1687_v36, 0.0 }
 0x1b4   : > { %v1402_v40 = vpop.f32.mrf.mxu0  ;;  %v1710_v47 = vpop.f32.mrf.mxu1 }
 0x1b5   : > { %1884 = vst.msk [vmem:[%s2676_s21 + $0x148] sm:$0xff] %vm1842_vm1, %v1819_v39  ;;  %v1692_v42 = vadd.f32 %v1691_v17, %v1402_v40 }
 0x1b6   : > { %v1404_v43 = vpop.f32.mrf.mxu0  ;;  %v1712_v50 = vpop.f32.mrf.mxu1 }
 0x1b7   : > { %v1820_v45 = vmax.f32 %v1692_v42, 0.0 }
 0x1b8   : > { %v1405_v46 = vpop.f32.mrf.mxu0  ;;  %v1715_v53 = vpop.f32.mrf.mxu1 }
 0x1b9   : > { %1885 = vst.msk [vmem:[%s2676_s21 + $0x150] sm:$0xff] %vm1842_vm1, %v1820_v45  ;;  %v1695_v48 = vadd.f32 %v1694_v23, %v1405_v46 }
 0x1ba   : > { %v1407_v49 = vpop.f32.mrf.mxu0  ;;  %v1717_v56 = vpop.f32.mrf.mxu1 }
 0x1bb   : > { %v1821_v51 = vmax.f32 %v1695_v48, 0.0 }
 0x1bc   : > { %v1410_v52 = vpop.f32.mrf.mxu0  ;;  %v1718_v59 = vpop.f32.mrf.mxu1 }
 0x1bd   : > { %1886 = vst.msk [vmem:[%s2676_s21 + $0x158] sm:$0xff] %vm1842_vm1, %v1821_v51  ;;  %v1700_v54 = vadd.f32 %v1699_v29, %v1410_v52 }
 0x1be   : > { %v1412_v55 = vpop.f32.mrf.mxu0  ;;  %v1720_v62 = vpop.f32.mrf.mxu1 }
 0x1bf   : > { %v1822_v57 = vmax.f32 %v1700_v54, 0.0 }
 0x1c0   : > { %v1413_v58 = vpop.f32.mrf.mxu0  ;;  %v1723_v1 = vpop.f32.mrf.mxu1 }
 0x1c1   : > { %1887 = vst.msk [vmem:[%s2676_s21 + $0x160] sm:$0xff] %vm1842_vm1, %v1822_v57  ;;  %v1703_v60 = vadd.f32 %v1702_v35, %v1413_v58 }
 0x1c2   : > { %v1415_v61 = vpop.f32.mrf.mxu0  ;;  %v1725_v4 = vpop.f32.mrf.mxu1 }
 0x1c3   : > { %v1823_v63 = vmax.f32 %v1703_v60, 0.0 }
 0x1c4   : > { %v1418_v0 = vpop.f32.mrf.mxu0  ;;  %v1726_v7 = vpop.f32.mrf.mxu1 }
 0x1c5   : > { %1888 = vst.msk [vmem:[%s2676_s21 + $0x168] sm:$0xff] %vm1842_vm1, %v1823_v63  ;;  %v1708_v2 = vadd.f32 %v1707_v41, %v1418_v0 }
 0x1c6   : > { %v1420_v3 = vpop.f32.mrf.mxu0  ;;  %v1728_v10 = vpop.f32.mrf.mxu1 }
 0x1c7   : > { %v1824_v5 = vmax.f32 %v1708_v2, 0.0 }
 0x1c8   : > { %v1421_v6 = vpop.f32.mrf.mxu0  ;;  %v1731_v13 = vpop.f32.mrf.mxu1 }
 0x1c9   : > { %1889 = vst.msk [vmem:[%s2676_s21 + $0x170] sm:$0xff] %vm1842_vm1, %v1824_v5  ;;  %v1711_v8 = vadd.f32 %v1710_v47, %v1421_v6 }
 0x1ca   : > { %v1423_v9 = vpop.f32.mrf.mxu0  ;;  %v1733_v16 = vpop.f32.mrf.mxu1 }
 0x1cb   : > { %v1825_v11 = vmax.f32 %v1711_v8, 0.0 }
 0x1cc   : > { %v1426_v12 = vpop.f32.mrf.mxu0  ;;  %v1734_v19 = vpop.f32.mrf.mxu1 }
 0x1cd   : > { %1890 = vst.msk [vmem:[%s2676_s21 + $0x178] sm:$0xff] %vm1842_vm1, %v1825_v11  ;;  %v1716_v14 = vadd.f32 %v1715_v53, %v1426_v12 }
 0x1ce   : > { %v1428_v15 = vpop.f32.mrf.mxu0  ;;  %v1736_v22 = vpop.f32.mrf.mxu1 }
 0x1cf   : > { %v1826_v17 = vmax.f32 %v1716_v14, 0.0 }
 0x1d0   : > { %v1429_v18 = vpop.f32.mrf.mxu0  ;;  %v1739_v25 = vpop.f32.mrf.mxu1 }
 0x1d1   : > { %1891 = vst.msk [vmem:[%s2676_s21 + $0x180] sm:$0xff] %vm1842_vm1, %v1826_v17  ;;  %v1719_v20 = vadd.f32 %v1718_v59, %v1429_v18 }
 0x1d2   : > { %v1431_v21 = vpop.f32.mrf.mxu0  ;;  %v1741_v28 = vpop.f32.mrf.mxu1 }
 0x1d3   : > { %v1827_v23 = vmax.f32 %v1719_v20, 0.0 }
 0x1d4   : > { %v1434_v24 = vpop.f32.mrf.mxu0  ;;  %v1742_v31 = vpop.f32.mrf.mxu1 }
 0x1d5   : > { %1892 = vst.msk [vmem:[%s2676_s21 + $0x188] sm:$0xff] %vm1842_vm1, %v1827_v23  ;;  %v1724_v26 = vadd.f32 %v1723_v1, %v1434_v24 }
 0x1d6   : > { %v1436_v27 = vpop.f32.mrf.mxu0  ;;  %v1744_v34 = vpop.f32.mrf.mxu1 }
 0x1d7   : > { %v1828_v29 = vmax.f32 %v1724_v26, 0.0 }
 0x1d8   : > { %v1437_v30 = vpop.f32.mrf.mxu0  ;;  %v1747_v37 = vpop.f32.mrf.mxu1 }
 0x1d9   : > { %1893 = vst.msk [vmem:[%s2676_s21 + $0x190] sm:$0xff] %vm1842_vm1, %v1828_v29  ;;  %v1727_v32 = vadd.f32 %v1726_v7, %v1437_v30 }
 0x1da   : > { %v1439_v33 = vpop.f32.mrf.mxu0  ;;  %v1749_v40 = vpop.f32.mrf.mxu1 }
 0x1db   : > { %v1829_v35 = vmax.f32 %v1727_v32, 0.0 }
 0x1dc   : > { %v1442_v36 = vpop.f32.mrf.mxu0  ;;  %v1750_v43 = vpop.f32.mrf.mxu1 }
 0x1dd   : > { %1894 = vst.msk [vmem:[%s2676_s21 + $0x198] sm:$0xff] %vm1842_vm1, %v1829_v35  ;;  %v1732_v38 = vadd.f32 %v1731_v13, %v1442_v36 }
 0x1de   : > { %v1444_v39 = vpop.f32.mrf.mxu0  ;;  %v1752_v46 = vpop.f32.mrf.mxu1 }
 0x1df   : > { %v1830_v41 = vmax.f32 %v1732_v38, 0.0 }
 0x1e0   : > { %v1445_v42 = vpop.f32.mrf.mxu0  ;;  %v1755_v49 = vpop.f32.mrf.mxu1 }
 0x1e1   : > { %1895 = vst.msk [vmem:[%s2676_s21 + $0x1a0] sm:$0xff] %vm1842_vm1, %v1830_v41  ;;  %v1735_v44 = vadd.f32 %v1734_v19, %v1445_v42 }
 0x1e2   : > { %v1447_v45 = vpop.f32.mrf.mxu0  ;;  %v1757_v52 = vpop.f32.mrf.mxu1 }
 0x1e3   : > { %v1831_v47 = vmax.f32 %v1735_v44, 0.0 }
 0x1e4   : > { %v1450_v48 = vpop.f32.mrf.mxu0  ;;  %v1758_v55 = vpop.f32.mrf.mxu1 }
 0x1e5   : > { %1896 = vst.msk [vmem:[%s2676_s21 + $0x1a8] sm:$0xff] %vm1842_vm1, %v1831_v47  ;;  %v1740_v50 = vadd.f32 %v1739_v25, %v1450_v48 }
 0x1e6   : > { %v1452_v51 = vpop.f32.mrf.mxu0  ;;  %v1760_v58 = vpop.f32.mrf.mxu1 }
 0x1e7   : > { %v1832_v53 = vmax.f32 %v1740_v50, 0.0 }
 0x1e8   : > { %v1453_v54 = vpop.f32.mrf.mxu0  ;;  %v1763_v61 = vpop.f32.mrf.mxu1 }
 0x1e9   : > { %1897 = vst.msk [vmem:[%s2676_s21 + $0x1b0] sm:$0xff] %vm1842_vm1, %v1832_v53  ;;  %v1743_v56 = vadd.f32 %v1742_v31, %v1453_v54 }
 0x1ea   : > { %v1455_v57 = vpop.f32.mrf.mxu0  ;;  %v1765_v0 = vpop.f32.mrf.mxu1 }
 0x1eb   : > { %v1833_v59 = vmax.f32 %v1743_v56, 0.0 }
 0x1ec   : > { %v1458_v60 = vpop.f32.mrf.mxu0  ;;  %v1766_v3 = vpop.f32.mrf.mxu1 }
 0x1ed   : > { %1898 = vst.msk [vmem:[%s2676_s21 + $0x1b8] sm:$0xff] %vm1842_vm1, %v1833_v59  ;;  %v1748_v62 = vadd.f32 %v1747_v37, %v1458_v60 }
 0x1ee   : > { %v1460_v63 = vpop.f32.mrf.mxu0  ;;  %v1768_v6 = vpop.f32.mrf.mxu1 }
 0x1ef   : > { %v1834_v1 = vmax.f32 %v1748_v62, 0.0 }
 0x1f0   : > { %v1461_v2 = vpop.f32.mrf.mxu0  ;;  %v1771_v9 = vpop.f32.mrf.mxu1 }
 0x1f1   : > { %1899 = vst.msk [vmem:[%s2676_s21 + $0x1c0] sm:$0xff] %vm1842_vm1, %v1834_v1  ;;  %v1751_v4 = vadd.f32 %v1750_v43, %v1461_v2 }
 0x1f2   : > { %v1463_v5 = vpop.f32.mrf.mxu0  ;;  %v1773_v12 = vpop.f32.mrf.mxu1 }
 0x1f3   : > { %v1835_v7 = vmax.f32 %v1751_v4, 0.0 }
 0x1f4   : > { %v1466_v8 = vpop.f32.mrf.mxu0  ;;  %v1774_v15 = vpop.f32.mrf.mxu1 }
 0x1f5   : > { %1900 = vst.msk [vmem:[%s2676_s21 + $0x1c8] sm:$0xff] %vm1842_vm1, %v1835_v7  ;;  %v1756_v10 = vadd.f32 %v1755_v49, %v1466_v8 }
 0x1f6   : > { %v1468_v11 = vpop.f32.mrf.mxu0  ;;  %v1776_v18 = vpop.f32.mrf.mxu1 }
 0x1f7   : > { %v1836_v13 = vmax.f32 %v1756_v10, 0.0 }
 0x1f8   : > { %v1469_v14 = vpop.f32.mrf.mxu0 }
 0x1f9   : > { %1901 = vst.msk [vmem:[%s2676_s21 + $0x1d0] sm:$0xff] %vm1842_vm1, %v1836_v13  ;;  %v1759_v16 = vadd.f32 %v1758_v55, %v1469_v14 }
 0x1fa   : > { %v1471_v17 = vpop.f32.mrf.mxu0 }
 0x1fb   : > { %v1837_v19 = vmax.f32 %v1759_v16, 0.0 }
 0x1fc   : > { %v1474_v20 = vpop.f32.mrf.mxu0 }
 0x1fd   : > { %1902 = vst.msk [vmem:[%s2676_s21 + $0x1d8] sm:$0xff] %vm1842_vm1, %v1837_v19  ;;  %v1764_v21 = vadd.f32 %v1763_v61, %v1474_v20 }
 0x1fe   : > { %v1476_v22 = vpop.f32.mrf.mxu0 }
 0x1ff   : > { %v1838_v23 = vmax.f32 %v1764_v21, 0.0 }
 0x200   : > { %v1477_v24 = vpop.f32.mrf.mxu0 }
 0x201   : > { %1903 = vst.msk [vmem:[%s2676_s21 + $0x1e0] sm:$0xff] %vm1842_vm1, %v1838_v23  ;;  %v1767_v25 = vadd.f32 %v1766_v3, %v1477_v24 }
 0x202   : > { %v1479_v26 = vpop.f32.mrf.mxu0 }
 0x203   : > { %v1839_v27 = vmax.f32 %v1767_v25, 0.0 }
 0x204   : > { %v1482_v28 = vpop.f32.mrf.mxu0 }
 0x205   : > { %1904 = vst.msk [vmem:[%s2676_s21 + $0x1e8] sm:$0xff] %vm1842_vm1, %v1839_v27  ;;  %v1772_v29 = vadd.f32 %v1771_v9, %v1482_v28 }
 0x206   : > { %v1484_v30 = vpop.f32.mrf.mxu0 }
 0x207   : > { %v1840_v31 = vmax.f32 %v1772_v29, 0.0 }
 0x208   : > { %v1485_v32 = vpop.f32.mrf.mxu0 }
 0x209   : > { %1905 = vst.msk [vmem:[%s2676_s21 + $0x1f0] sm:$0xff] %vm1842_vm1, %v1840_v31  ;;  %v1775_v33 = vadd.f32 %v1774_v15, %v1485_v32 }
 0x20a   : > { %v1487_v34 = vpop.f32.mrf.mxu0 }
 0x20b   : > { %v1841_v35 = vmax.f32 %v1775_v33, 0.0 }
 0x20d   : > { %1906 = vst.msk [vmem:[%s2676_s21 + $0x1f8] sm:$0xff] %vm1842_vm1, %v1841_v35 }
 0x20e PF: > { %s12_s9 = sadd.s32 1, %s2393_s9  }
 0x20f   : > { %p9_p4 = scmp.ge.s32.totalorder %s12_s9, 4  }
 0x211   :  { %11 = sbr.rel (!%p9_p4) target bundleno = 1 (0x1), region = 58 }

// kernel: forward.19
= control target key start
LH: loop header
LB: loop body
LE: loop exit
PB: predicated region body
PF: predicated region fallthrough
CT: control target
= control target key end

     0   :  { %s1127_s9 = smov 0   ;;  %s1347_s0 = inlined_call_operand.vmem [shape: bf16[1024,16], index: 0, kind: input, shape index: {}]   ;;  %s1348_s1 = inlined_call_operand.vmem [shape: bf16[16,16], index: 1, kind: input, shape index: {}]   ;;  %s1349_s2 = inlined_call_operand.vmem [shape: f32[1024,16], index: 2, kind: output, shape index: {}]  }
   0x1 LB: > { %s886_s10 = sadd.s32 4294967295, %s1110_s9   ;;  %p890_p0 = scmp.ge.s32.totalorder %s1110_s9, 1  ;;  %s1110_s9 = sphi %s1127_s9, %s12_s9  }
   0x2   : > { %p113_p1 = scmp.lt.s32.totalorder %s1110_s9, 3 }
   0x4   : > { %p114_p2 = pnand %p890_p0, %p113_p1 }
   0x5   : > { %s891_s13 = sshll.u32 (!%p114_p2), %s886_s10, 6 }
   0x6   : > { %117 = sbr.rel (%p114_p2) target bundleno = 273 (0x111), region = 28  ;;  %p136_p3 = scmp.lt.s32.totalorder (!%p114_p2), %s891_s13, 127 }
   0xb   : > { %v1071_v0 = vld [vmem:[%s1348_s1] sm:$0xff]   ;;  %s1351_s13 = smov (!%p136_p3, %s891_s13), 127  ;;  %vm380_vm0 = vcmask 130048  }
   0xc   : > { %995 = vmatprep.subr.bf16.mxu0 %v1071_v0  ;;  %1061 = vmatprep.subr.bf16.mxu1 %v1071_v0  ;;  %s892_s14 = sshll.u32 %s1351_s13, 2  ;;  %s894_s18 = sshll.u32 %s1351_s13, 3 }
   0xd   : > { %996 = vmatpush3.bf16.msra.mxu0 %v1071_v0  ;;  %1062 = vmatpush3.bf16.msra.mxu1 %v1071_v0  ;;  %s1144_s17 = scalar_lea.vmem %s1347_s0, %s892_s14  ;;  %s1214_s21 = scalar_lea.vmem %s1349_s2, %s894_s18 }
   0xe   : > { %v1072_v1 = vld [vmem:[%s1144_s17] sm:$0xff]   ;;  %v1074_v3 = vld [vmem:[%s1144_s17 + $0x8] sm:$0xff]   ;;  %v1076_v5 = vld [vmem:[%s1144_s17 + $0x10] sm:$0xff]  }
   0xf   : > { %v1073_v2 = vld [vmem:[%s1144_s17 + $0x80] sm:$0xff]   ;;  %997 = vmatprep.mubr.msk.bf16.mxu0 %vm380_vm0, %v1072_v1  ;;  %v1075_v4 = vld [vmem:[%s1144_s17 + $0x88] sm:$0xff]   ;;  %v1077_v6 = vld [vmem:[%s1144_s17 + $0x90] sm:$0xff]  }
  0x10   : > { %1029 = vmatprep.mubr.msk.bf16.mxu1 %vm380_vm0, %v1073_v2  ;;  %998 = vmatmul.mubr.msk.bf16.vlgmr.msra.gmra.mxu0 %vm380_vm0, %v1074_v3  ;;  %v1078_v7 = vld [vmem:[%s1144_s17 + $0x18] sm:$0xff]   ;;  %v1080_v9 = vld [vmem:[%s1144_s17 + $0x20] sm:$0xff]   ;;  %v1082_v11 = vld [vmem:[%s1144_s17 + $0x28] sm:$0xff]  }
  0x11   : > { %1030 = vmatmul.mubr.msk.bf16.vlgmr.msra.gmra.mxu1 %vm380_vm0, %v1075_v4  ;;  %1001 = vmatprep.mubr.msk.bf16.mxu0 %vm380_vm0, %v1076_v5  ;;  %v1079_v8 = vld [vmem:[%s1144_s17 + $0x98] sm:$0xff]   ;;  %v1081_v10 = vld [vmem:[%s1144_s17 + $0xa0] sm:$0xff]   ;;  %v1083_v12 = vld [vmem:[%s1144_s17 + $0xa8] sm:$0xff]  }
  0x12   : > { %1033 = vmatprep.mubr.msk.bf16.mxu1 %vm380_vm0, %v1077_v6  ;;  %v1084_v13 = vld [vmem:[%s1144_s17 + $0x30] sm:$0xff]   ;;  %v1086_v15 = vld [vmem:[%s1144_s17 + $0x38] sm:$0xff]   ;;  %v1088_v17 = vld [vmem:[%s1144_s17 + $0x40] sm:$0xff]  }
  0x13   : > { %v1085_v14 = vld [vmem:[%s1144_s17 + $0xb0] sm:$0xff]   ;;  %v1087_v16 = vld [vmem:[%s1144_s17 + $0xb8] sm:$0xff]   ;;  %v1089_v18 = vld [vmem:[%s1144_s17 + $0xc0] sm:$0xff]  }
  0x14   : > { %v1090_v19 = vld [vmem:[%s1144_s17 + $0x48] sm:$0xff]   ;;  %v1092_v21 = vld [vmem:[%s1144_s17 + $0x50] sm:$0xff]   ;;  %v1094_v23 = vld [vmem:[%s1144_s17 + $0x58] sm:$0xff]  }
  0x15   : > { %v1091_v20 = vld [vmem:[%s1144_s17 + $0xc8] sm:$0xff]   ;;  %v1093_v22 = vld [vmem:[%s1144_s17 + $0xd0] sm:$0xff]   ;;  %v1095_v24 = vld [vmem:[%s1144_s17 + $0xd8] sm:$0xff]  }
  0x16   : > { %v1096_v25 = vld [vmem:[%s1144_s17 + $0x60] sm:$0xff]   ;;  %v1098_v27 = vld [vmem:[%s1144_s17 + $0x68] sm:$0xff]   ;;  %v1100_v29 = vld [vmem:[%s1144_s17 + $0x70] sm:$0xff]  }
  0x17   : > { %v1097_v26 = vld [vmem:[%s1144_s17 + $0xe0] sm:$0xff]   ;;  %v1099_v28 = vld [vmem:[%s1144_s17 + $0xe8] sm:$0xff]   ;;  %v1101_v30 = vld [vmem:[%s1144_s17 + $0xf0] sm:$0xff]  }
  0x18   : > { %1002 = vmatmul.mubr.msk.bf16.gmra.mxu0 %vm380_vm0, %v1078_v7  ;;  %v1102_v31 = vld [vmem:[%s1144_s17 + $0x78] sm:$0xff]  }
  0x19   : > { %1034 = vmatmul.mubr.msk.bf16.gmra.mxu1 %vm380_vm0, %v1079_v8  ;;  %1005 = vmatprep.mubr.msk.bf16.mxu0 %vm380_vm0, %v1080_v9  ;;  %v1103_v32 = vld [vmem:[%s1144_s17 + $0xf8] sm:$0xff]  }
  0x1a   : > { %1037 = vmatprep.mubr.msk.bf16.mxu1 %vm380_vm0, %v1081_v10 }
  0x20   : > { %1006 = vmatmul.mubr.msk.bf16.gmra.mxu0 %vm380_vm0, %v1082_v11 }
  0x21   : > { %1038 = vmatmul.mubr.msk.bf16.gmra.mxu1 %vm380_vm0, %v1083_v12  ;;  %1009 = vmatprep.mubr.msk.bf16.mxu0 %vm380_vm0, %v1084_v13 }
  0x22   : > { %1041 = vmatprep.mubr.msk.bf16.mxu1 %vm380_vm0, %v1085_v14 }
  0x28   : > { %1010 = vmatmul.mubr.msk.bf16.gmra.mxu0 %vm380_vm0, %v1086_v15 }
  0x29   : > { %1042 = vmatmul.mubr.msk.bf16.gmra.mxu1 %vm380_vm0, %v1087_v16  ;;  %1013 = vmatprep.mubr.msk.bf16.mxu0 %vm380_vm0, %v1088_v17 }
  0x2a   : > { %1045 = vmatprep.mubr.msk.bf16.mxu1 %vm380_vm0, %v1089_v18 }
  0x30   : > { %1014 = vmatmul.mubr.msk.bf16.gmra.mxu0 %vm380_vm0, %v1090_v19 }
  0x31   : > { %1046 = vmatmul.mubr.msk.bf16.gmra.mxu1 %vm380_vm0, %v1091_v20  ;;  %1017 = vmatprep.mubr.msk.bf16.mxu0 %vm380_vm0, %v1092_v21 }
  0x32   : > { %1049 = vmatprep.mubr.msk.bf16.mxu1 %vm380_vm0, %v1093_v22 }
  0x38   : > { %1018 = vmatmul.mubr.msk.bf16.gmra.mxu0 %vm380_vm0, %v1094_v23 }
  0x39   : > { %1050 = vmatmul.mubr.msk.bf16.gmra.mxu1 %vm380_vm0, %v1095_v24  ;;  %1021 = vmatprep.mubr.msk.bf16.mxu0 %vm380_vm0, %v1096_v25 }
  0x3a   : > { %1053 = vmatprep.mubr.msk.bf16.mxu1 %vm380_vm0, %v1097_v26 }
  0x40   : > { %1022 = vmatmul.mubr.msk.bf16.gmra.mxu0 %vm380_vm0, %v1098_v27 }
  0x41   : > { %1054 = vmatmul.mubr.msk.bf16.gmra.mxu1 %vm380_vm0, %v1099_v28  ;;  %1025 = vmatprep.mubr.msk.bf16.mxu0 %vm380_vm0, %v1100_v29 }
  0x42   : > { %1057 = vmatprep.mubr.msk.bf16.mxu1 %vm380_vm0, %v1101_v30 }
  0x48   : > { %1026 = vmatmul.mubr.msk.bf16.gmra.mxu0 %vm380_vm0, %v1102_v31 }
  0x49   : > { %1058 = vmatmul.mubr.msk.bf16.gmra.mxu1 %vm380_vm0, %v1103_v32 }
  0xd0   : > { %v999_v33 = vpop.f32.mrf.mxu0 }
  0xd1   : > { %768 = vst.msk [vmem:[%s1214_s21 + $0x10] sm:$0xff] %vm380_vm0, %v999_v33  ;;  %v1031_v34 = vpop.f32.mrf.mxu1 }
  0xd2   : > { %800 = vst.msk [vmem:[%s1214_s21 + $0x110] sm:$0xff] %vm380_vm0, %v1031_v34  ;;  %v511_v35 = vpop.f32.mrf.mxu0 }
  0xd3   : > { %766 = vst.msk [vmem:[%s1214_s21] sm:$0xff] %vm380_vm0, %v511_v35  ;;  %v639_v36 = vpop.f32.mrf.mxu1 }
  0xd4   : > { %798 = vst.msk [vmem:[%s1214_s21 + $0x100] sm:$0xff] %vm380_vm0, %v639_v36  ;;  %v1000_v37 = vpop.f32.mrf.mxu0 }
  0xd5   : > { %769 = vst.msk [vmem:[%s1214_s21 + $0x18] sm:$0xff] %vm380_vm0, %v1000_v37  ;;  %v1032_v38 = vpop.f32.mrf.mxu1 }
  0xd6   : > { %801 = vst.msk [vmem:[%s1214_s21 + $0x118] sm:$0xff] %vm380_vm0, %v1032_v38  ;;  %v514_v39 = vpop.f32.mrf.mxu0 }
  0xd7   : > { %767 = vst.msk [vmem:[%s1214_s21 + $0x8] sm:$0xff] %vm380_vm0, %v514_v39  ;;  %v642_v40 = vpop.f32.mrf.mxu1 }
  0xd8   : > { %799 = vst.msk [vmem:[%s1214_s21 + $0x108] sm:$0xff] %vm380_vm0, %v642_v40  ;;  %v1003_v41 = vpop.f32.mrf.mxu0 }
  0xd9   : > { %772 = vst.msk [vmem:[%s1214_s21 + $0x30] sm:$0xff] %vm380_vm0, %v1003_v41  ;;  %v1035_v42 = vpop.f32.mrf.mxu1 }
  0xda   : > { %804 = vst.msk [vmem:[%s1214_s21 + $0x130] sm:$0xff] %vm380_vm0, %v1035_v42  ;;  %v527_v43 = vpop.f32.mrf.mxu0 }
  0xdb   : > { %770 = vst.msk [vmem:[%s1214_s21 + $0x20] sm:$0xff] %vm380_vm0, %v527_v43  ;;  %v655_v44 = vpop.f32.mrf.mxu1 }
  0xdc   : > { %802 = vst.msk [vmem:[%s1214_s21 + $0x120] sm:$0xff] %vm380_vm0, %v655_v44  ;;  %v1004_v45 = vpop.f32.mrf.mxu0 }
  0xdd   : > { %773 = vst.msk [vmem:[%s1214_s21 + $0x38] sm:$0xff] %vm380_vm0, %v1004_v45  ;;  %v1036_v46 = vpop.f32.mrf.mxu1 }
  0xde   : > { %805 = vst.msk [vmem:[%s1214_s21 + $0x138] sm:$0xff] %vm380_vm0, %v1036_v46  ;;  %v530_v47 = vpop.f32.mrf.mxu0 }
  0xdf   : > { %771 = vst.msk [vmem:[%s1214_s21 + $0x28] sm:$0xff] %vm380_vm0, %v530_v47  ;;  %v658_v48 = vpop.f32.mrf.mxu1 }
  0xe0   : > { %803 = vst.msk [vmem:[%s1214_s21 + $0x128] sm:$0xff] %vm380_vm0, %v658_v48  ;;  %v1007_v49 = vpop.f32.mrf.mxu0 }
  0xe1   : > { %776 = vst.msk [vmem:[%s1214_s21 + $0x50] sm:$0xff] %vm380_vm0, %v1007_v49  ;;  %v1039_v50 = vpop.f32.mrf.mxu1 }
  0xe2   : > { %808 = vst.msk [vmem:[%s1214_s21 + $0x150] sm:$0xff] %vm380_vm0, %v1039_v50  ;;  %v543_v51 = vpop.f32.mrf.mxu0 }
  0xe3   : > { %774 = vst.msk [vmem:[%s1214_s21 + $0x40] sm:$0xff] %vm380_vm0, %v543_v51  ;;  %v671_v52 = vpop.f32.mrf.mxu1 }
  0xe4   : > { %806 = vst.msk [vmem:[%s1214_s21 + $0x140] sm:$0xff] %vm380_vm0, %v671_v52  ;;  %v1008_v53 = vpop.f32.mrf.mxu0 }
  0xe5   : > { %777 = vst.msk [vmem:[%s1214_s21 + $0x58] sm:$0xff] %vm380_vm0, %v1008_v53  ;;  %v1040_v54 = vpop.f32.mrf.mxu1 }
  0xe6   : > { %809 = vst.msk [vmem:[%s1214_s21 + $0x158] sm:$0xff] %vm380_vm0, %v1040_v54  ;;  %v546_v55 = vpop.f32.mrf.mxu0 }
  0xe7   : > { %775 = vst.msk [vmem:[%s1214_s21 + $0x48] sm:$0xff] %vm380_vm0, %v546_v55  ;;  %v674_v56 = vpop.f32.mrf.mxu1 }
  0xe8   : > { %807 = vst.msk [vmem:[%s1214_s21 + $0x148] sm:$0xff] %vm380_vm0, %v674_v56  ;;  %v1011_v57 = vpop.f32.mrf.mxu0 }
  0xe9   : > { %780 = vst.msk [vmem:[%s1214_s21 + $0x70] sm:$0xff] %vm380_vm0, %v1011_v57  ;;  %v1043_v58 = vpop.f32.mrf.mxu1 }
  0xea   : > { %812 = vst.msk [vmem:[%s1214_s21 + $0x170] sm:$0xff] %vm380_vm0, %v1043_v58  ;;  %v559_v59 = vpop.f32.mrf.mxu0 }
  0xeb   : > { %778 = vst.msk [vmem:[%s1214_s21 + $0x60] sm:$0xff] %vm380_vm0, %v559_v59  ;;  %v687_v60 = vpop.f32.mrf.mxu1 }
  0xec   : > { %810 = vst.msk [vmem:[%s1214_s21 + $0x160] sm:$0xff] %vm380_vm0, %v687_v60  ;;  %v1012_v61 = vpop.f32.mrf.mxu0 }
  0xed   : > { %781 = vst.msk [vmem:[%s1214_s21 + $0x78] sm:$0xff] %vm380_vm0, %v1012_v61  ;;  %v1044_v62 = vpop.f32.mrf.mxu1 }
  0xee   : > { %813 = vst.msk [vmem:[%s1214_s21 + $0x178] sm:$0xff] %vm380_vm0, %v1044_v62  ;;  %v562_v63 = vpop.f32.mrf.mxu0 }
  0xef   : > { %779 = vst.msk [vmem:[%s1214_s21 + $0x68] sm:$0xff] %vm380_vm0, %v562_v63  ;;  %v690_v0 = vpop.f32.mrf.mxu1 }
  0xf0   : > { %811 = vst.msk [vmem:[%s1214_s21 + $0x168] sm:$0xff] %vm380_vm0, %v690_v0  ;;  %v1015_v1 = vpop.f32.mrf.mxu0 }
  0xf1   : > { %784 = vst.msk [vmem:[%s1214_s21 + $0x90] sm:$0xff] %vm380_vm0, %v1015_v1  ;;  %v1047_v2 = vpop.f32.mrf.mxu1 }
  0xf2   : > { %816 = vst.msk [vmem:[%s1214_s21 + $0x190] sm:$0xff] %vm380_vm0, %v1047_v2  ;;  %v575_v3 = vpop.f32.mrf.mxu0 }
  0xf3   : > { %782 = vst.msk [vmem:[%s1214_s21 + $0x80] sm:$0xff] %vm380_vm0, %v575_v3  ;;  %v703_v4 = vpop.f32.mrf.mxu1 }
  0xf4   : > { %814 = vst.msk [vmem:[%s1214_s21 + $0x180] sm:$0xff] %vm380_vm0, %v703_v4  ;;  %v1016_v5 = vpop.f32.mrf.mxu0 }
  0xf5   : > { %785 = vst.msk [vmem:[%s1214_s21 + $0x98] sm:$0xff] %vm380_vm0, %v1016_v5  ;;  %v1048_v6 = vpop.f32.mrf.mxu1 }
  0xf6   : > { %817 = vst.msk [vmem:[%s1214_s21 + $0x198] sm:$0xff] %vm380_vm0, %v1048_v6  ;;  %v578_v7 = vpop.f32.mrf.mxu0 }
  0xf7   : > { %783 = vst.msk [vmem:[%s1214_s21 + $0x88] sm:$0xff] %vm380_vm0, %v578_v7  ;;  %v706_v8 = vpop.f32.mrf.mxu1 }
  0xf8   : > { %815 = vst.msk [vmem:[%s1214_s21 + $0x188] sm:$0xff] %vm380_vm0, %v706_v8  ;;  %v1019_v9 = vpop.f32.mrf.mxu0 }
  0xf9   : > { %788 = vst.msk [vmem:[%s1214_s21 + $0xb0] sm:$0xff] %vm380_vm0, %v1019_v9  ;;  %v1051_v10 = vpop.f32.mrf.mxu1 }
  0xfa   : > { %820 = vst.msk [vmem:[%s1214_s21 + $0x1b0] sm:$0xff] %vm380_vm0, %v1051_v10  ;;  %v591_v11 = vpop.f32.mrf.mxu0 }
  0xfb   : > { %786 = vst.msk [vmem:[%s1214_s21 + $0xa0] sm:$0xff] %vm380_vm0, %v591_v11  ;;  %v719_v12 = vpop.f32.mrf.mxu1 }
  0xfc   : > { %818 = vst.msk [vmem:[%s1214_s21 + $0x1a0] sm:$0xff] %vm380_vm0, %v719_v12  ;;  %v1020_v13 = vpop.f32.mrf.mxu0 }
  0xfd   : > { %789 = vst.msk [vmem:[%s1214_s21 + $0xb8] sm:$0xff] %vm380_vm0, %v1020_v13  ;;  %v1052_v14 = vpop.f32.mrf.mxu1 }
  0xfe   : > { %821 = vst.msk [vmem:[%s1214_s21 + $0x1b8] sm:$0xff] %vm380_vm0, %v1052_v14  ;;  %v594_v15 = vpop.f32.mrf.mxu0 }
  0xff   : > { %787 = vst.msk [vmem:[%s1214_s21 + $0xa8] sm:$0xff] %vm380_vm0, %v594_v15  ;;  %v722_v16 = vpop.f32.mrf.mxu1 }
 0x100   : > { %819 = vst.msk [vmem:[%s1214_s21 + $0x1a8] sm:$0xff] %vm380_vm0, %v722_v16  ;;  %v1023_v17 = vpop.f32.mrf.mxu0 }
 0x101   : > { %792 = vst.msk [vmem:[%s1214_s21 + $0xd0] sm:$0xff] %vm380_vm0, %v1023_v17  ;;  %v1055_v18 = vpop.f32.mrf.mxu1 }
 0x102   : > { %824 = vst.msk [vmem:[%s1214_s21 + $0x1d0] sm:$0xff] %vm380_vm0, %v1055_v18  ;;  %v607_v19 = vpop.f32.mrf.mxu0 }
 0x103   : > { %790 = vst.msk [vmem:[%s1214_s21 + $0xc0] sm:$0xff] %vm380_vm0, %v607_v19  ;;  %v735_v20 = vpop.f32.mrf.mxu1 }
 0x104   : > { %822 = vst.msk [vmem:[%s1214_s21 + $0x1c0] sm:$0xff] %vm380_vm0, %v735_v20  ;;  %v1024_v21 = vpop.f32.mrf.mxu0 }
 0x105   : > { %793 = vst.msk [vmem:[%s1214_s21 + $0xd8] sm:$0xff] %vm380_vm0, %v1024_v21  ;;  %v1056_v22 = vpop.f32.mrf.mxu1 }
 0x106   : > { %825 = vst.msk [vmem:[%s1214_s21 + $0x1d8] sm:$0xff] %vm380_vm0, %v1056_v22  ;;  %v610_v23 = vpop.f32.mrf.mxu0 }
 0x107   : > { %791 = vst.msk [vmem:[%s1214_s21 + $0xc8] sm:$0xff] %vm380_vm0, %v610_v23  ;;  %v738_v24 = vpop.f32.mrf.mxu1 }
 0x108   : > { %823 = vst.msk [vmem:[%s1214_s21 + $0x1c8] sm:$0xff] %vm380_vm0, %v738_v24  ;;  %v1027_v25 = vpop.f32.mrf.mxu0 }
 0x109   : > { %796 = vst.msk [vmem:[%s1214_s21 + $0xf0] sm:$0xff] %vm380_vm0, %v1027_v25  ;;  %v1059_v26 = vpop.f32.mrf.mxu1 }
 0x10a   : > { %828 = vst.msk [vmem:[%s1214_s21 + $0x1f0] sm:$0xff] %vm380_vm0, %v1059_v26  ;;  %v623_v27 = vpop.f32.mrf.mxu0 }
 0x10b   : > { %794 = vst.msk [vmem:[%s1214_s21 + $0xe0] sm:$0xff] %vm380_vm0, %v623_v27  ;;  %v751_v28 = vpop.f32.mrf.mxu1 }
 0x10c   : > { %826 = vst.msk [vmem:[%s1214_s21 + $0x1e0] sm:$0xff] %vm380_vm0, %v751_v28  ;;  %v1028_v29 = vpop.f32.mrf.mxu0 }
 0x10d   : > { %797 = vst.msk [vmem:[%s1214_s21 + $0xf8] sm:$0xff] %vm380_vm0, %v1028_v29  ;;  %v1060_v30 = vpop.f32.mrf.mxu1 }
 0x10e   : > { %829 = vst.msk [vmem:[%s1214_s21 + $0x1f8] sm:$0xff] %vm380_vm0, %v1060_v30  ;;  %v626_v31 = vpop.f32.mrf.mxu0 }
 0x10f   : > { %795 = vst.msk [vmem:[%s1214_s21 + $0xe8] sm:$0xff] %vm380_vm0, %v626_v31  ;;  %v754_v32 = vpop.f32.mrf.mxu1 }
 0x110   : > { %827 = vst.msk [vmem:[%s1214_s21 + $0x1e8] sm:$0xff] %vm380_vm0, %v754_v32 }
 0x111 PF: > { %s12_s9 = sadd.s32 1, %s1110_s9  }
 0x112   : > { %p9_p4 = scmp.ge.s32.totalorder %s12_s9, 4  }
 0x114   :  { %11 = sbr.rel (!%p9_p4) target bundleno = 1 (0x1), region = 58 }

// kernel: forward.21
= control target key start
LH: loop header
LB: loop body
LE: loop exit
PB: predicated region body
PF: predicated region fallthrough
CT: control target
= control target key end

     0   :  { %s2536_s12 = smov 0   ;;  %s3059_s0 = inlined_call_operand.vmem [shape: bf16[1024,432], index: 0, kind: input, shape index: {}]   ;;  %s3060_s1 = inlined_call_operand.vmem [shape: bf16[432,16], index: 1, kind: input, shape index: {}]   ;;  %s3061_s2 = inlined_call_operand.vmem [shape: f32[1024,16], index: 2, kind: input, shape index: {}]   ;;  %s3062_s3 = inlined_call_operand.vmem [shape: f32[1024,16], index: 3, kind: output, shape index: {}]  }
   0x1 LB: > { %s2088_s13 = sadd.s32 4294967295, %s2513_s12   ;;  %p2092_p0 = scmp.ge.s32.totalorder %s2513_s12, 1  ;;  %s2513_s12 = sphi %s2536_s12, %s13_s12  }
   0x2   : > { %p150_p1 = scmp.lt.s32.totalorder %s2513_s12, 3 }
   0x4   : > { %p151_p2 = pnand %p2092_p0, %p150_p1 }
   0x5   : > { %s2093_s26 = sshll.u32 (!%p151_p2), %s2088_s13, 6 }
   0x6   : > { %154 = sbr.rel (%p151_p2) target bundleno = 528 (0x210), region = 32  ;;  %p181_p3 = scmp.lt.s32.totalorder (!%p151_p2), %s2093_s26, 127 }
   0xb   : > { %v2299_v0 = vld [vmem:[%s3060_s1 + $0x38] sm:$0xff]   ;;  %v2515_v1 = vmov 0   ;;  %v2300_v2 = vld [vmem:[%s3060_s1 + $0x30] sm:$0xff]   ;;  %v2301_v4 = vld [vmem:[%s3060_s1 + $0x28] sm:$0xff]   ;;  %s3064_s26 = smov (!%p181_p3, %s2093_s26), 127  ;;  %vm1216_vm0 = vcmask 392192  }
   0xc   : > { %1313 = vmatprep.subr.bf16.mxu0 %v2515_v1  ;;  %1602 = vmatprep.subr.bf16.mxu1 %v2515_v1  ;;  %v2304_v3 = vld [vmem:[%s3060_s1 + $0xb8] sm:$0xff]   ;;  %v2306_v5 = vld [vmem:[%s3060_s1 + $0xb0] sm:$0xff]   ;;  %v2302_v6 = vld [vmem:[%s3060_s1 + $0x20] sm:$0xff]   ;;  %s2289_s10 = sshll.u32 %s3064_s26, 4  ;;  %s2097_s23 = sshll.u32 %s3064_s26, 3  ;;  %vm1955_vm1 = vcmask 130048  }
   0xd   : > { %1314 = vmatpush1.bf16.msra.mxu0 %v2299_v0  ;;  %1603 = vmatpush1.bf16.msra.mxu1 %v2304_v3  ;;  %v2308_v7 = vld [vmem:[%s3060_s1 + $0xa8] sm:$0xff]   ;;  %v2303_v8 = vld [vmem:[%s3060_s1 + $0x18] sm:$0xff]   ;;  %v2310_v9 = vld [vmem:[%s3060_s1 + $0xa0] sm:$0xff]   ;;  %s2602_s18 = scalar_lea.vmem %s3059_s0, %s2289_s10  ;;  %s2800_s27 = scalar_lea.vmem %s3061_s2, %s2097_s23 }
   0xe   : > { %1315 = vmatprep.subr.bf16.mxu0 %v2515_v1  ;;  %1604 = vmatprep.subr.bf16.mxu1 %v2515_v1  ;;  %v2305_v10 = vld [vmem:[%s3060_s1 + $0x10] sm:$0xff]   ;;  %v2312_v11 = vld [vmem:[%s3060_s1 + $0x98] sm:$0xff]   ;;  %v2307_v12 = vld [vmem:[%s3060_s1 + $0x8] sm:$0xff]   ;;  %s2820_s30 = scalar_lea.vmem %s3062_s3, %s2097_s23 }
   0xf   : > { %v2314_v13 = vld [vmem:[%s3060_s1 + $0x90] sm:$0xff]   ;;  %v2309_v14 = vld [vmem:[%s3060_s1] sm:$0xff]   ;;  %v2316_v15 = vld [vmem:[%s3060_s1 + $0x88] sm:$0xff]  }
  0x10   : > { %v2327_v16 = vld [vmem:[%s2602_s18 + $0xc] ss:$16 sps:$4 sm:$0xff]   ;;  %v2331_v17 = vld [vmem:[%s2602_s18 + $0x4] ss:$16 sps:$4 sm:$0xff]   ;;  %v2325_v27 = vld [vmem:[%s2602_s18 + $0x8] ss:$16 sps:$4 sm:$0xff]  }
  0x11   : > { %1316 = vmatpush1.bf16.msra.mxu0 %v2300_v2  ;;  %1605 = vmatpush1.bf16.msra.mxu1 %v2306_v5  ;;  %v2311_v18 = vld [vmem:[%s3060_s1 + $0x78] sm:$0xff]   ;;  %v2318_v19 = vld [vmem:[%s3060_s1 + $0x80] sm:$0xff]   ;;  %v2313_v20 = vld [vmem:[%s3060_s1 + $0x70] sm:$0xff]  }
  0x12   : > { %1317 = vmatprep.subr.bf16.mxu0 %v2515_v1  ;;  %1606 = vmatprep.subr.bf16.mxu1 %v2515_v1  ;;  %v2320_v21 = vld [vmem:[%s3060_s1 + $0xd0] sm:$0xff]   ;;  %v2315_v22 = vld [vmem:[%s3060_s1 + $0x68] sm:$0xff]   ;;  %v2317_v24 = vld [vmem:[%s3060_s1 + $0x60] sm:$0xff]  }
  0x13   : > { %2255 = vmatprep.mubr.msk.bf16.mxu1 %vm1216_vm0, %v2327_v16  ;;  %1345 = vmatprep.mubr.bf16.mxu0 %v2331_v17  ;;  %v2322_v23 = vld [vmem:[%s3060_s1 + $0xc8] sm:$0xff]   ;;  %v2324_v25 = vld [vmem:[%s3060_s1 + $0xc0] sm:$0xff]   ;;  %v2319_v26 = vld [vmem:[%s3060_s1 + $0x58] sm:$0xff]  }
  0x14   : > { %v2332_v28 = vld [vmem:[%s2602_s18 + $0x2c] ss:$16 sps:$4 sm:$0xff]   ;;  %v2321_v29 = vld [vmem:[%s3060_s1 + $0x50] sm:$0xff]   ;;  %v2334_v31 = vld [vmem:[%s2602_s18 + $0x28] ss:$16 sps:$4 sm:$0xff]  }
  0x15   : > { %1318 = vmatpush1.bf16.msra.mxu0 %v2301_v4  ;;  %1607 = vmatpush1.bf16.msra.mxu1 %v2308_v7  ;;  %v2323_v30 = vld [vmem:[%s3060_s1 + $0x48] sm:$0xff]   ;;  %v2328_v33 = vld [vmem:[%s3060_s1 + $0x40] sm:$0xff]  }
  0x16   : > { %1319 = vmatprep.subr.bf16.mxu0 %v2515_v1  ;;  %1608 = vmatprep.subr.bf16.mxu1 %v2515_v1  ;;  %v2338_v32 = vld [vmem:[%s2602_s18 + $0x4c] ss:$16 sps:$4 sm:$0xff]   ;;  %v2329_v34 = vld [vmem:[%s2602_s18] ss:$16 sps:$4 sm:$0xff]   ;;  %v2335_v35 = vld [vmem:[%s2602_s18 + $0x24] ss:$16 sps:$4 sm:$0xff]  }
  0x17   : > { %v2340_v36 = vld [vmem:[%s2602_s18 + $0x48] ss:$16 sps:$4 sm:$0xff]   ;;  %v2344_v37 = vld [vmem:[%s2602_s18 + $0x6c] ss:$16 sps:$4 sm:$0xff]   ;;  %v2337_v38 = vld [vmem:[%s2602_s18 + $0x20] ss:$16 sps:$4 sm:$0xff]  }
  0x18   : > { %v2341_v39 = vld [vmem:[%s2602_s18 + $0x44] ss:$16 sps:$4 sm:$0xff]   ;;  %v2346_v40 = vld [vmem:[%s2602_s18 + $0x68] ss:$16 sps:$4 sm:$0xff]   ;;  %v2350_v41 = vld [vmem:[%s2602_s18 + $0x8c] ss:$16 sps:$4 sm:$0xff]  }
  0x19   : > { %1320 = vmatpush1.bf16.msra.mxu0 %v2302_v6  ;;  %1609 = vmatpush1.bf16.msra.mxu1 %v2310_v9  ;;  %v2343_v42 = vld [vmem:[%s2602_s18 + $0x40] ss:$16 sps:$4 sm:$0xff]   ;;  %v2347_v43 = vld [vmem:[%s2602_s18 + $0x64] ss:$16 sps:$4 sm:$0xff]   ;;  %v2352_v44 = vld [vmem:[%s2602_s18 + $0x88] ss:$16 sps:$4 sm:$0xff]  }
  0x1a   : > { %1321 = vmatprep.subr.bf16.mxu0 %v2515_v1  ;;  %1610 = vmatprep.subr.bf16.mxu1 %v2515_v1  ;;  %v2356_v45 = vld [vmem:[%s2602_s18 + $0xac] ss:$16 sps:$4 sm:$0xff]   ;;  %v2349_v46 = vld [vmem:[%s2602_s18 + $0x60] ss:$16 sps:$4 sm:$0xff]   ;;  %v2353_v47 = vld [vmem:[%s2602_s18 + $0x84] ss:$16 sps:$4 sm:$0xff]  }
  0x1b   : > { %v2358_v48 = vld [vmem:[%s2602_s18 + $0xa8] ss:$16 sps:$4 sm:$0xff]   ;;  %v2362_v49 = vld [vmem:[%s2602_s18 + $0xcc] ss:$16 sps:$4 sm:$0xff]   ;;  %v2355_v50 = vld [vmem:[%s2602_s18 + $0x80] ss:$16 sps:$4 sm:$0xff]  }
  0x1c   : > { %v2359_v51 = vld [vmem:[%s2602_s18 + $0xa4] ss:$16 sps:$4 sm:$0xff]   ;;  %v2364_v52 = vld [vmem:[%s2602_s18 + $0xc8] ss:$16 sps:$4 sm:$0xff]   ;;  %v2368_v53 = vld [vmem:[%s2602_s18 + $0xec] ss:$16 sps:$4 sm:$0xff]  }
  0x1d   : > { %1322 = vmatpush1.bf16.msra.mxu0 %v2303_v8  ;;  %1611 = vmatpush1.bf16.msra.mxu1 %v2312_v11  ;;  %v2361_v54 = vld [vmem:[%s2602_s18 + $0xa0] ss:$16 sps:$4 sm:$0xff]   ;;  %v2365_v55 = vld [vmem:[%s2602_s18 + $0xc4] ss:$16 sps:$4 sm:$0xff]   ;;  %v2370_v56 = vld [vmem:[%s2602_s18 + $0xe8] ss:$16 sps:$4 sm:$0xff]  }
  0x1e   : > { %1323 = vmatprep.subr.bf16.mxu0 %v2515_v1  ;;  %1612 = vmatprep.subr.bf16.mxu1 %v2515_v1  ;;  %v2374_v57 = vld [vmem:[%s2602_s18 + $0x10c] ss:$16 sps:$4 sm:$0xff]   ;;  %v2367_v58 = vld [vmem:[%s2602_s18 + $0xc0] ss:$16 sps:$4 sm:$0xff]   ;;  %v2371_v59 = vld [vmem:[%s2602_s18 + $0xe4] ss:$16 sps:$4 sm:$0xff]  }
  0x1f   : > { %v2376_v60 = vld [vmem:[%s2602_s18 + $0x108] ss:$16 sps:$4 sm:$0xff]   ;;  %v2380_v61 = vld [vmem:[%s2602_s18 + $0x12c] ss:$16 sps:$4 sm:$0xff]   ;;  %v2373_v62 = vld [vmem:[%s2602_s18 + $0xe0] ss:$16 sps:$4 sm:$0xff]  }
  0x20   : > { %v2377_v63 = vld [vmem:[%s2602_s18 + $0x104] ss:$16 sps:$4 sm:$0xff]   ;;  %v2382_v0 = vld [vmem:[%s2602_s18 + $0x128] ss:$16 sps:$4 sm:$0xff]   ;;  %v2379_v2 = vld [vmem:[%s2602_s18 + $0x100] ss:$16 sps:$4 sm:$0xff]  }
  0x21   : > { %1324 = vmatpush1.bf16.msra.mxu0 %v2305_v10  ;;  %1613 = vmatpush1.bf16.msra.mxu1 %v2314_v13  ;;  %v2383_v3 = vld [vmem:[%s2602_s18 + $0x124] ss:$16 sps:$4 sm:$0xff]   ;;  %v2388_v4 = vld [vmem:[%s2602_s18 + $0x148] ss:$16 sps:$4 sm:$0xff]   ;;  %v2392_v5 = vld [vmem:[%s2602_s18 + $0x16c] ss:$16 sps:$4 sm:$0xff]  }
  0x22   : > { %1325 = vmatprep.subr.bf16.mxu0 %v2515_v1  ;;  %1614 = vmatprep.subr.bf16.mxu1 %v2515_v1  ;;  %v2385_v6 = vld [vmem:[%s2602_s18 + $0x120] ss:$16 sps:$4 sm:$0xff]   ;;  %v2389_v7 = vld [vmem:[%s2602_s18 + $0x144] ss:$16 sps:$4 sm:$0xff]   ;;  %v2394_v8 = vld [vmem:[%s2602_s18 + $0x168] ss:$16 sps:$4 sm:$0xff]  }
  0x23   : > { %v2398_v9 = vld [vmem:[%s2602_s18 + $0x18c] ss:$16 sps:$4 sm:$0xff]   ;;  %v2391_v10 = vld [vmem:[%s2602_s18 + $0x140] ss:$16 sps:$4 sm:$0xff]   ;;  %v2395_v11 = vld [vmem:[%s2602_s18 + $0x164] ss:$16 sps:$4 sm:$0xff]  }
  0x24   : > { %v2404_v13 = vld [vmem:[%s2602_s18 + $0x1ac] ss:$16 sps:$4 sm:$0xff]   ;;  %v2406_v16 = vld [vmem:[%s2602_s18 + $0x1a8] ss:$16 sps:$4 sm:$0xff]  }
  0x25   : > { %1326 = vmatpush1.bf16.msra.mxu0 %v2307_v12  ;;  %1615 = vmatpush1.bf16.msra.mxu1 %v2316_v15  ;;  %v2400_v12 = vld [vmem:[%s2602_s18 + $0x188] ss:$16 sps:$4 sm:$0xff]   ;;  %v2401_v15 = vld [vmem:[%s2602_s18 + $0x184] ss:$16 sps:$4 sm:$0xff]   ;;  %v2410_v17 = vld [vmem:[%s2602_s18 + $0x1cc] ss:$16 sps:$4 sm:$0xff]  }
  0x26   : > { %1327 = vmatprep.subr.bf16.mxu0 %v2515_v1  ;;  %1616 = vmatprep.subr.bf16.mxu1 %v2515_v1 }
  0x29   : > { %1328 = vmatpush1.bf16.msra.mxu0 %v2309_v14  ;;  %1617 = vmatpush1.bf16.msra.mxu1 %v2318_v19  ;;  %v2397_v14 = vld [vmem:[%s2602_s18 + $0x160] ss:$16 sps:$4 sm:$0xff]   ;;  %v2407_v19 = vld [vmem:[%s2602_s18 + $0x1a4] ss:$16 sps:$4 sm:$0xff]  }
  0x2a   : > { %1329 = vmatprep.subr.bf16.mxu0 %v2515_v1  ;;  %1628 = vmatprep.subr.bf16.mxu1 %v2515_v1 }
  0x2d   : > { %1330 = vmatpush2.bf16.msra.mxu0 %v2311_v18  ;;  %1629 = vmatpush2.bf16.msra.mxu1 %v2320_v21  ;;  %v2403_v18 = vld [vmem:[%s2602_s18 + $0x180] ss:$16 sps:$4 sm:$0xff]   ;;  %v2416_v21 = vld [vmem:[%s2602_s18 + $0x1ec] ss:$16 sps:$4 sm:$0xff]  }
  0x2e   : > { %1331 = vmatprep.subr.bf16.mxu0 %v2515_v1  ;;  %1630 = vmatprep.subr.bf16.mxu1 %v2515_v1 }
  0x31   : > { %1332 = vmatpush2.bf16.msra.mxu0 %v2313_v20  ;;  %1631 = vmatpush2.bf16.msra.mxu1 %v2322_v23  ;;  %v2412_v20 = vld [vmem:[%s2602_s18 + $0x1c8] ss:$16 sps:$4 sm:$0xff]   ;;  %v2413_v23 = vld [vmem:[%s2602_s18 + $0x1c4] ss:$16 sps:$4 sm:$0xff]  }
  0x32   : > { %1333 = vmatprep.subr.bf16.mxu0 %v2515_v1  ;;  %1632 = vmatprep.subr.bf16.mxu1 %v2515_v1 }
  0x35   : > { %1334 = vmatpush2.bf16.msra.mxu0 %v2315_v22  ;;  %1633 = vmatpush2.bf16.msra.mxu1 %v2324_v25  ;;  %v2409_v22 = vld [vmem:[%s2602_s18 + $0x1a0] ss:$16 sps:$4 sm:$0xff]   ;;  %v2422_v25 = vld [vmem:[%s2602_s18 + $0x20c] ss:$16 sps:$4 sm:$0xff]  }
  0x36   : > { %1335 = vmatprep.subr.bf16.mxu0 %v2515_v1 }
  0x38   : > { %1635 = vmatmul.mubr.bf16.vlgmr.msra.gmra.mxu1 %v2325_v27  ;;  %v2419_v27 = vld [vmem:[%s2602_s18 + $0x1e4] ss:$16 sps:$4 sm:$0xff]  }
  0x39   : > { %1336 = vmatpush2.bf16.msra.mxu0 %v2317_v24  ;;  %2256 = vmatprep.mubr.msk.bf16.mxu1 %vm1216_vm0, %v2332_v28  ;;  %v2418_v24 = vld [vmem:[%s2602_s18 + $0x1e8] ss:$16 sps:$4 sm:$0xff]  }
  0x3a   : > { %1337 = vmatprep.subr.bf16.mxu0 %v2515_v1  ;;  %v2424_v28 = vld [vmem:[%s2602_s18 + $0x208] ss:$16 sps:$4 sm:$0xff]  }
  0x3d   : > { %1338 = vmatpush2.bf16.msra.mxu0 %v2319_v26  ;;  %v2415_v26 = vld [vmem:[%s2602_s18 + $0x1c0] ss:$16 sps:$4 sm:$0xff]  }
  0x3e   : > { %1339 = vmatprep.subr.bf16.mxu0 %v2515_v1 }
  0x40   : > { %1643 = vmatmul.mubr.bf16.gmra.mxu1 %v2334_v31  ;;  %v2425_v31 = vld [vmem:[%s2602_s18 + $0x204] ss:$16 sps:$4 sm:$0xff]  }
  0x41   : > { %1340 = vmatpush2.bf16.msra.mxu0 %v2321_v29  ;;  %2257 = vmatprep.mubr.msk.bf16.mxu1 %vm1216_vm0, %v2338_v32  ;;  %v2428_v29 = vld [vmem:[%s2602_s18 + $0x22c] ss:$16 sps:$4 sm:$0xff]   ;;  %v2430_v32 = vld [vmem:[%s2602_s18 + $0x228] ss:$16 sps:$4 sm:$0xff]  }
  0x42   : > { %1341 = vmatprep.subr.bf16.mxu0 %v2515_v1 }
  0x45   : > { %1342 = vmatpush2.bf16.msra.mxu0 %v2323_v30  ;;  %v2421_v30 = vld [vmem:[%s2602_s18 + $0x1e0] ss:$16 sps:$4 sm:$0xff]  }
  0x46   : > { %1343 = vmatprep.subr.bf16.mxu0 %v2515_v1  ;;  %v2386_v1 = vld [vmem:[%s2602_s18 + $0x14c] ss:$16 sps:$4 sm:$0xff]  }
  0x48   : > { %1651 = vmatmul.mubr.bf16.gmra.mxu1 %v2340_v36  ;;  %v2436_v36 = vld [vmem:[%s2602_s18 + $0x248] ss:$16 sps:$4 sm:$0xff]  }
  0x49   : > { %1344 = vmatpush2.bf16.msra.mxu0 %v2328_v33  ;;  %2258 = vmatprep.mubr.msk.bf16.mxu1 %vm1216_vm0, %v2344_v37  ;;  %v2434_v33 = vld [vmem:[%s2602_s18 + $0x24c] ss:$16 sps:$4 sm:$0xff]  }
  0x4a   : > { %v2440_v37 = vld [vmem:[%s2602_s18 + $0x26c] ss:$16 sps:$4 sm:$0xff]  }
  0x4c   : > { %1346 = vmatmul.mubr.bf16.vlgmr.msra.gmra.mxu0 %v2329_v34  ;;  %v2427_v34 = vld [vmem:[%s2602_s18 + $0x200] ss:$16 sps:$4 sm:$0xff]  }
  0x4d   : > { %1353 = vmatprep.mubr.bf16.mxu0 %v2335_v35  ;;  %v2431_v35 = vld [vmem:[%s2602_s18 + $0x224] ss:$16 sps:$4 sm:$0xff]  }
  0x50   : > { %1659 = vmatmul.mubr.bf16.gmra.mxu1 %v2346_v40  ;;  %v2442_v40 = vld [vmem:[%s2602_s18 + $0x268] ss:$16 sps:$4 sm:$0xff]  }
  0x51   : > { %2259 = vmatprep.mubr.msk.bf16.mxu1 %vm1216_vm0, %v2350_v41  ;;  %v2446_v41 = vld [vmem:[%s2602_s18 + $0x28c] ss:$16 sps:$4 sm:$0xff]  }
  0x54   : > { %1354 = vmatmul.mubr.bf16.gmra.mxu0 %v2337_v38  ;;  %v2433_v38 = vld [vmem:[%s2602_s18 + $0x220] ss:$16 sps:$4 sm:$0xff]  }
  0x55   : > { %1361 = vmatprep.mubr.bf16.mxu0 %v2341_v39  ;;  %v2437_v39 = vld [vmem:[%s2602_s18 + $0x244] ss:$16 sps:$4 sm:$0xff]  }
  0x58   : > { %1667 = vmatmul.mubr.bf16.gmra.mxu1 %v2352_v44  ;;  %v2448_v44 = vld [vmem:[%s2602_s18 + $0x288] ss:$16 sps:$4 sm:$0xff]  }
  0x59   : > { %2260 = vmatprep.mubr.msk.bf16.mxu1 %vm1216_vm0, %v2356_v45  ;;  %v2452_v45 = vld [vmem:[%s2602_s18 + $0x2ac] ss:$16 sps:$4 sm:$0xff]  }
  0x5c   : > { %1362 = vmatmul.mubr.bf16.gmra.mxu0 %v2343_v42  ;;  %v2439_v42 = vld [vmem:[%s2602_s18 + $0x240] ss:$16 sps:$4 sm:$0xff]  }
  0x5d   : > { %1369 = vmatprep.mubr.bf16.mxu0 %v2347_v43  ;;  %v2443_v43 = vld [vmem:[%s2602_s18 + $0x264] ss:$16 sps:$4 sm:$0xff]  }
  0x60   : > { %1675 = vmatmul.mubr.bf16.gmra.mxu1 %v2358_v48  ;;  %v2454_v48 = vld [vmem:[%s2602_s18 + $0x2a8] ss:$16 sps:$4 sm:$0xff]  }
  0x61   : > { %2261 = vmatprep.mubr.msk.bf16.mxu1 %vm1216_vm0, %v2362_v49  ;;  %v2458_v49 = vld [vmem:[%s2602_s18 + $0x2cc] ss:$16 sps:$4 sm:$0xff]  }
  0x64   : > { %1370 = vmatmul.mubr.bf16.gmra.mxu0 %v2349_v46  ;;  %v2445_v46 = vld [vmem:[%s2602_s18 + $0x260] ss:$16 sps:$4 sm:$0xff]  }
  0x65   : > { %1377 = vmatprep.mubr.bf16.mxu0 %v2353_v47  ;;  %v2449_v47 = vld [vmem:[%s2602_s18 + $0x284] ss:$16 sps:$4 sm:$0xff]  }
  0x68   : > { %1683 = vmatmul.mubr.bf16.gmra.mxu1 %v2364_v52  ;;  %v2460_v52 = vld [vmem:[%s2602_s18 + $0x2c8] ss:$16 sps:$4 sm:$0xff]  }
  0x69   : > { %2262 = vmatprep.mubr.msk.bf16.mxu1 %vm1216_vm0, %v2368_v53  ;;  %v2464_v53 = vld [vmem:[%s2602_s18 + $0x2ec] ss:$16 sps:$4 sm:$0xff]  }
  0x6c   : > { %1378 = vmatmul.mubr.bf16.gmra.mxu0 %v2355_v50  ;;  %v2451_v50 = vld [vmem:[%s2602_s18 + $0x280] ss:$16 sps:$4 sm:$0xff]  }
  0x6d   : > { %1385 = vmatprep.mubr.bf16.mxu0 %v2359_v51  ;;  %v2455_v51 = vld [vmem:[%s2602_s18 + $0x2a4] ss:$16 sps:$4 sm:$0xff]  }
  0x70   : > { %1691 = vmatmul.mubr.bf16.gmra.mxu1 %v2370_v56  ;;  %v2466_v56 = vld [vmem:[%s2602_s18 + $0x2e8] ss:$16 sps:$4 sm:$0xff]  }
  0x71   : > { %2263 = vmatprep.mubr.msk.bf16.mxu1 %vm1216_vm0, %v2374_v57  ;;  %v2470_v57 = vld [vmem:[%s2602_s18 + $0x30c] ss:$16 sps:$4 sm:$0xff]  }
  0x74   : > { %1386 = vmatmul.mubr.bf16.gmra.mxu0 %v2361_v54  ;;  %v2457_v54 = vld [vmem:[%s2602_s18 + $0x2a0] ss:$16 sps:$4 sm:$0xff]  }
  0x75   : > { %1393 = vmatprep.mubr.bf16.mxu0 %v2365_v55  ;;  %v2461_v55 = vld [vmem:[%s2602_s18 + $0x2c4] ss:$16 sps:$4 sm:$0xff]  }
  0x78   : > { %1699 = vmatmul.mubr.bf16.gmra.mxu1 %v2376_v60  ;;  %v2472_v60 = vld [vmem:[%s2602_s18 + $0x308] ss:$16 sps:$4 sm:$0xff]  }
  0x79   : > { %2264 = vmatprep.mubr.msk.bf16.mxu1 %vm1216_vm0, %v2380_v61  ;;  %v2475_v61 = vld [vmem:[%s2602_s18 + $0x32c] ss:$16 sps:$4 sm:$0xff]  }
  0x7c   : > { %1394 = vmatmul.mubr.bf16.gmra.mxu0 %v2367_v58  ;;  %v2463_v58 = vld [vmem:[%s2602_s18 + $0x2c0] ss:$16 sps:$4 sm:$0xff]  }
  0x7d   : > { %1401 = vmatprep.mubr.bf16.mxu0 %v2371_v59  ;;  %v2467_v59 = vld [vmem:[%s2602_s18 + $0x2e4] ss:$16 sps:$4 sm:$0xff]  }
  0x80   : > { %1707 = vmatmul.mubr.bf16.gmra.mxu1 %v2382_v0  ;;  %v303_v0 = vld [vmem:[%s2602_s18 + $0x338] sm:$0xff] }
  0x81   : > { %2265 = vmatprep.mubr.msk.bf16.mxu1 %vm1216_vm0, %v2386_v1 }
  0x84   : > { %1402 = vmatmul.mubr.bf16.gmra.mxu0 %v2373_v62 }
  0x85   : > { %1409 = vmatprep.mubr.bf16.mxu0 %v2377_v63  ;;  %v301_v63 = vld [vmem:[%s2602_s18 + $0x328] sm:$0xff] }
  0x88   : > { %1715 = vmatmul.mubr.bf16.gmra.mxu1 %v2388_v4 }
  0x89   : > { %2266 = vmatprep.mubr.msk.bf16.mxu1 %vm1216_vm0, %v2392_v5  ;;  %v2202_v5 = vcombine.low %v301_v63, %v303_v0  ;;  %v386_v0 = vld [vmem:[%s2800_s27 + $0x20] sm:$0xff] }
  0x8c   : > { %1410 = vmatmul.mubr.bf16.gmra.mxu0 %v2379_v2  ;;  %v2469_v2 = vld [vmem:[%s2602_s18 + $0x2e0] ss:$16 sps:$4 sm:$0xff]  }
  0x8d   : > { %1417 = vmatprep.mubr.bf16.mxu0 %v2383_v3  ;;  %v2473_v3 = vld [vmem:[%s2602_s18 + $0x304] ss:$16 sps:$4 sm:$0xff]  }
  0x90   : > { %1723 = vmatmul.mubr.bf16.gmra.mxu1 %v2394_v8  ;;  %v296_v8 = vld [vmem:[%s2602_s18 + $0x300] sm:$0xff] }
  0x91   : > { %2267 = vmatprep.mubr.msk.bf16.mxu1 %vm1216_vm0, %v2398_v9  ;;  %v298_v9 = vld [vmem:[%s2602_s18 + $0x310] sm:$0xff] }
  0x94   : > { %1418 = vmatmul.mubr.bf16.gmra.mxu0 %v2385_v6  ;;  %v2479_v6 = vld [vmem:[%s2602_s18 + $0x34c] ss:$16 sps:$4 sm:$0xff]  }
  0x95   : > { %1425 = vmatprep.mubr.bf16.mxu0 %v2389_v7 }
  0x98   : > { %1731 = vmatmul.mubr.bf16.gmra.mxu1 %v2400_v12  ;;  %v307_v12 = vld [vmem:[%s2602_s18 + $0x358] sm:$0xff] }
  0x99   : > { %2268 = vmatprep.mubr.msk.bf16.mxu1 %vm1216_vm0, %v2404_v13 }
  0x9c   : > { %1426 = vmatmul.mubr.bf16.gmra.mxu0 %v2391_v10 }
  0x9d   : > { %1433 = vmatprep.mubr.bf16.mxu0 %v2395_v11  ;;  %v305_v11 = vld [vmem:[%s2602_s18 + $0x348] sm:$0xff] }
  0xa0   : > { %1739 = vmatmul.mubr.bf16.gmra.mxu1 %v2406_v16 }
  0xa1   : > { %2269 = vmatprep.mubr.msk.bf16.mxu1 %vm1216_vm0, %v2410_v17  ;;  %v2206_v17 = vcombine.low %v305_v11, %v307_v12  ;;  %v387_v11 = vld [vmem:[%s2800_s27 + $0x28] sm:$0xff] }
  0xa2   : > { %v317_v12 = vld [vmem:[%s2602_s18 + $0x3a8] sm:$0xff] }
  0xa4   : > { %1434 = vmatmul.mubr.bf16.gmra.mxu0 %v2397_v14  ;;  %v2196_v14 = vcombine.low %v296_v8, %v298_v9  ;;  %v310_v8 = vld [vmem:[%s2602_s18 + $0x370] sm:$0xff] }
  0xa5   : > { %1441 = vmatprep.mubr.bf16.mxu0 %v2401_v15  ;;  %v2477_v15 = vld [vmem:[%s2602_s18 + $0x324] ss:$16 sps:$4 sm:$0xff]  }
  0xa8   : > { %1747 = vmatmul.mubr.bf16.gmra.mxu1 %v2412_v20 }
  0xa9   : > { %2270 = vmatprep.mubr.msk.bf16.mxu1 %vm1216_vm0, %v2416_v21 }
  0xac   : > { %1442 = vmatmul.mubr.bf16.gmra.mxu0 %v2403_v18  ;;  %v382_v18 = vld [vmem:[%s2800_s27] sm:$0xff] }
  0xad   : > { %1449 = vmatprep.mubr.bf16.mxu0 %v2407_v19  ;;  %v2483_v19 = vld [vmem:[%s2602_s18 + $0x36c] ss:$16 sps:$4 sm:$0xff]  }
  0xb0   : > { %1755 = vmatmul.mubr.bf16.gmra.mxu1 %v2418_v24  ;;  %v302_v24 = vld [vmem:[%s2602_s18 + $0x330] sm:$0xff] }
  0xb1   : > { %2271 = vmatprep.mubr.msk.bf16.mxu1 %vm1216_vm0, %v2422_v25 }
  0xb4   : > { %1450 = vmatmul.mubr.bf16.gmra.mxu0 %v2409_v22 }
  0xb5   : > { %1457 = vmatprep.mubr.bf16.mxu0 %v2413_v23  ;;  %v300_v23 = vld [vmem:[%s2602_s18 + $0x320] sm:$0xff] }
  0xb8   : > { %1763 = vmatmul.mubr.bf16.gmra.mxu1 %v2424_v28  ;;  %v309_v28 = vld [vmem:[%s2602_s18 + $0x368] sm:$0xff] }
  0xb9   : > { %2272 = vmatprep.mubr.msk.bf16.mxu1 %vm1216_vm0, %v2428_v29  ;;  %v311_v29 = vld [vmem:[%s2602_s18 + $0x378] sm:$0xff] }
  0xbc   : > { %1458 = vmatmul.mubr.bf16.gmra.mxu0 %v2415_v26 }
  0xbd   : > { %1465 = vmatprep.mubr.bf16.mxu0 %v2419_v27  ;;  %v383_v27 = vld [vmem:[%s2800_s27 + $0x8] sm:$0xff] }
  0xc0   : > { %1771 = vmatmul.mubr.bf16.gmra.mxu1 %v2430_v32 }
  0xc1   : > { %2273 = vmatprep.mubr.msk.bf16.mxu1 %vm1216_vm0, %v2434_v33  ;;  %v2200_v33 = vcombine.low %v300_v23, %v302_v24  ;;  %v388_v24 = vld [vmem:[%s2800_s27 + $0x30] sm:$0xff] }
  0xc4   : > { %1466 = vmatmul.mubr.bf16.gmra.mxu0 %v2421_v30 }
  0xc5   : > { %1473 = vmatprep.mubr.bf16.mxu0 %v2425_v31 }
  0xc8   : > { %1779 = vmatmul.mubr.bf16.gmra.mxu1 %v2436_v36  ;;  %v2481_v36 = vld [vmem:[%s2602_s18 + $0x344] ss:$16 sps:$4 sm:$0xff]  }
  0xc9   : > { %2274 = vmatprep.mubr.msk.bf16.mxu1 %vm1216_vm0, %v2440_v37 }
  0xcc   : > { %1474 = vmatmul.mubr.bf16.gmra.mxu0 %v2427_v34 }
  0xcd   : > { %1481 = vmatprep.mubr.bf16.mxu0 %v2431_v35 }
  0xd0   : > { %1787 = vmatmul.mubr.bf16.gmra.mxu1 %v2442_v40  ;;  %v384_v40 = vld [vmem:[%s2800_s27 + $0x10] sm:$0xff] }
  0xd1   : > { %2275 = vmatprep.mubr.msk.bf16.mxu1 %vm1216_vm0, %v2446_v41  ;;  %v2487_v41 = vld [vmem:[%s2602_s18 + $0x38c] ss:$16 sps:$4 sm:$0xff]  }
  0xd4   : > { %1482 = vmatmul.mubr.bf16.gmra.mxu0 %v2433_v38  ;;  %v2210_v38 = vcombine.low %v309_v28, %v311_v29 }
  0xd5   : > { %1489 = vmatprep.mubr.bf16.mxu0 %v2437_v39 }
  0xd8   : > { %1795 = vmatmul.mubr.bf16.gmra.mxu1 %v2448_v44 }
  0xd9   : > { %2276 = vmatprep.mubr.msk.bf16.mxu1 %vm1216_vm0, %v2452_v45 }
  0xdc   : > { %1490 = vmatmul.mubr.bf16.gmra.mxu0 %v2439_v42 }
  0xdd   : > { %1497 = vmatprep.mubr.bf16.mxu0 %v2443_v43 }
  0xe0   : > { %1803 = vmatmul.mubr.bf16.gmra.mxu1 %v2454_v48  ;;  %v306_v48 = vld [vmem:[%s2602_s18 + $0x350] sm:$0xff] }
  0xe1   : > { %2277 = vmatprep.mubr.msk.bf16.mxu1 %vm1216_vm0, %v2458_v49 }
  0xe4   : > { %1498 = vmatmul.mubr.bf16.gmra.mxu0 %v2445_v46 }
  0xe5   : > { %1505 = vmatprep.mubr.bf16.mxu0 %v2449_v47  ;;  %v304_v47 = vld [vmem:[%s2602_s18 + $0x340] sm:$0xff] }
  0xe8   : > { %1811 = vmatmul.mubr.bf16.gmra.mxu1 %v2460_v52  ;;  %v313_v52 = vld [vmem:[%s2602_s18 + $0x388] sm:$0xff] }
  0xe9   : > { %2278 = vmatprep.mubr.msk.bf16.mxu1 %vm1216_vm0, %v2464_v53  ;;  %v315_v53 = vld [vmem:[%s2602_s18 + $0x398] sm:$0xff] }
  0xec   : > { %1506 = vmatmul.mubr.bf16.gmra.mxu0 %v2451_v50 }
  0xed   : > { %1513 = vmatprep.mubr.bf16.mxu0 %v2455_v51  ;;  %v385_v51 = vld [vmem:[%s2800_s27 + $0x18] sm:$0xff] }
  0xf0   : > { %1819 = vmatmul.mubr.bf16.gmra.mxu1 %v2466_v56 }
  0xf1   : > { %2279 = vmatprep.mubr.msk.bf16.mxu1 %vm1216_vm0, %v2470_v57  ;;  %v2204_v57 = vcombine.low %v304_v47, %v306_v48  ;;  %v2502_v47 = vld [vmem:[%s2602_s18 + $0x3ec] ss:$16 sps:$4 sm:$0xff]  }
  0xf4   : > { %1514 = vmatmul.mubr.bf16.gmra.mxu0 %v2457_v54 }
  0xf5   : > { %1521 = vmatprep.mubr.bf16.mxu0 %v2461_v55 }
  0xf8   : > { %v1636_v62 = vpop.f32.mrf.mxu1  ;;  %1827 = vmatmul.mubr.bf16.gmra.mxu1 %v2472_v60  ;;  %v2485_v60 = vld [vmem:[%s2602_s18 + $0x364] ss:$16 sps:$4 sm:$0xff]  }
  0xf9   : > { %2280 = vmatprep.mubr.msk.bf16.mxu1 %vm1216_vm0, %v2475_v61 }
  0xfa   : > { %v1638_v1 = vpop.f32.mrf.mxu1 }
  0xfb   : > { %v2492_v1 = vld [vmem:[%s2602_s18 + $0x3ac] ss:$16 sps:$4 sm:$0xff]  }
  0xfc   : > { %1522 = vmatmul.mubr.bf16.gmra.mxu0 %v2463_v58  ;;  %v1639_v4 = vpop.f32.mrf.mxu1 }
  0xfd   : > { %1529 = vmatprep.mubr.bf16.mxu0 %v2467_v59 }
  0xfe   : > { %v1641_v7 = vpop.f32.mrf.mxu1 }
  0xff   : > { %v308_v7 = vld [vmem:[%s2602_s18 + $0x360] sm:$0xff] }
 0x100   : > { %v1644_v10 = vpop.f32.mrf.mxu1  ;;  %1835 = vmatmul.mubr.bf16.gmra.mxu1 %v2202_v5 }
 0x101   : > { %2281 = vmatprep.mubr.msk.bf16.mxu1 %vm1216_vm0, %v2479_v6 }
 0x102   : > { %v1646_v13 = vpop.f32.mrf.mxu1 }
 0x103   : > { %v319_v13 = vld [vmem:[%s2602_s18 + $0x3b8] sm:$0xff] }
 0x104   : > { %1530 = vmatmul.mubr.bf16.gmra.mxu0 %v2469_v2  ;;  %v2803_v16 = vpop.f32.mrf.mxu1 }
 0x105   : > { %1537 = vmatprep.mubr.bf16.mxu0 %v2473_v3 }
 0x106   : > { %v1649_v20 = vpop.f32.mrf.mxu1 }
 0x107   : > { %v2491_v20 = vld [vmem:[%s2602_s18 + $0x384] ss:$16 sps:$4 sm:$0xff]  }
 0x108   : > { %v2809_v25 = vpop.f32.mrf.mxu1  ;;  %1843 = vmatmul.mubr.bf16.gmra.mxu1 %v2206_v17  ;;  %v2208_v17 = vcombine.low %v308_v7, %v310_v8 }
 0x109   : > { %2282 = vmatprep.mubr.msk.bf16.mxu1 %vm1216_vm0, %v2483_v19 }
 0x10a   : > { %v1654_v31 = vpop.f32.mrf.mxu1 }
 0x10c   : > { %v1347_v21 = vpop.f32.mrf.mxu0  ;;  %1538 = vmatmul.mubr.bf16.gmra.mxu0 %v2196_v14  ;;  %v2823_v37 = vpop.f32.mrf.mxu1 }
 0x10d   : > { %v1348_v22 = vadd.f32 %v1347_v21, %v382_v18  ;;  %1545 = vmatprep.mubr.bf16.mxu0 %v2477_v15 }
 0x10e   : > { %v1349_v26 = vpop.f32.mrf.mxu0  ;;  %v1657_v43 = vpop.f32.mrf.mxu1 }
 0x10f   : > { %v1637_v30 = vadd.f32 %v1636_v62, %v1348_v22  ;;  %v2214_v62 = vcombine.low %v313_v52, %v315_v53  ;;  %v2218_v22 = vcombine.low %v317_v12, %v319_v13  ;;  %v2497_v26 = vld [vmem:[%s2602_s18 + $0x3cc] ss:$16 sps:$4 sm:$0xff]  }
 0x110   : > { %v1350_v32 = vpop.f32.mrf.mxu0  ;;  %v2831_v49 = vpop.f32.mrf.mxu1  ;;  %1851 = vmatmul.mubr.bf16.gmra.mxu1 %v2210_v38  ;;  %v393_v12 = vld [vmem:[%s2800_s27 + $0x58] sm:$0xff] }
 0x111   : > { %v1891_v34 = vmax.f32 %v1637_v30, 0.0  ;;  %v1351_v35 = vadd.f32 %v1350_v32, %v383_v27  ;;  %2283 = vmatprep.mubr.msk.bf16.mxu1 %vm1216_vm0, %v2487_v41 }
 0x112   : > { %v1352_v39 = vpop.f32.mrf.mxu0  ;;  %v1662_v55 = vpop.f32.mrf.mxu1 }
 0x113   : > { %1956 = vst.msk [vmem:[%s2820_s30] sm:$0xff] %vm1955_vm1, %v1891_v34  ;;  %v1640_v42 = vadd.f32 %v1639_v4, %v1351_v35  ;;  %v321_v34 = vld [vmem:[%s2602_s18 + $0x3c8] sm:$0xff]  ;;  %v323_v35 = vld [vmem:[%s2602_s18 + $0x3d8] sm:$0xff]  ;;  %v2489_v39 = vld [vmem:[%s2602_s18 + $0x380] ss:$16 sps:$4 sm:$0xff]  }
 0x114   : > { %v1355_v44 = vpop.f32.mrf.mxu0  ;;  %1546 = vmatmul.mubr.bf16.gmra.mxu0 %v2200_v33  ;;  %v2840_v61 = vpop.f32.mrf.mxu1  ;;  %v389_v33 = vld [vmem:[%s2800_s27 + $0x38] sm:$0xff]  ;;  %v391_v55 = vld [vmem:[%s2800_s27 + $0x48] sm:$0xff] }
 0x115   : > { %v1892_v45 = vmax.f32 %v1640_v42, 0.0  ;;  %v1356_v46 = vadd.f32 %v1355_v44, %v384_v40  ;;  %1553 = vmatprep.mubr.bf16.mxu0 %v2481_v36  ;;  %v2496_v42 = vld [vmem:[%s2602_s18 + $0x3a4] ss:$16 sps:$4 sm:$0xff]   ;;  %v2222_v44 = vcombine.low %v321_v34, %v323_v35  ;;  %v2504_v34 = vld [vmem:[%s2602_s18 + $0x3e0] ss:$16 sps:$4 sm:$0xff]  }
 0x116   : > { %v1357_v50 = vpop.f32.mrf.mxu0  ;;  %v1665_v3 = vpop.f32.mrf.mxu1 }
 0x117   : > { %1957 = vst.msk [vmem:[%s2820_s30 + $0x8] sm:$0xff] %vm1955_vm1, %v1892_v45  ;;  %v1645_v54 = vadd.f32 %v1644_v10, %v1356_v46  ;;  %v390_v46 = vld [vmem:[%s2800_s27 + $0x40] sm:$0xff] }
 0x118   : > { %v1358_v56 = vpop.f32.mrf.mxu0  ;;  %v2849_v9 = vpop.f32.mrf.mxu1  ;;  %1859 = vmatmul.mubr.bf16.gmra.mxu1 %v2214_v62 }
 0x119   : > { %v1893_v58 = vmax.f32 %v1645_v54, 0.0  ;;  %v1359_v59 = vadd.f32 %v1358_v56, %v385_v51  ;;  %2284 = vmatprep.mubr.msk.bf16.mxu1 %vm1216_vm0, %v2492_v1  ;;  %v325_v56 = vld [vmem:[%s2602_s18 + $0x3e8] sm:$0xff] }
 0x11a   : > { %v1360_v63 = vpop.f32.mrf.mxu0  ;;  %v1670_v15 = vpop.f32.mrf.mxu1 }
 0x11b   : > { %1958 = vst.msk [vmem:[%s2820_s30 + $0x10] sm:$0xff] %vm1955_vm1, %v1893_v58  ;;  %v1648_v2 = vadd.f32 %v2803_v16, %v1359_v59 }
 0x11c   : > { %v1363_v4 = vpop.f32.mrf.mxu0  ;;  %1554 = vmatmul.mubr.bf16.gmra.mxu0 %v2204_v57  ;;  %v1671_v21 = vpop.f32.mrf.mxu1  ;;  %v327_v57 = vld [vmem:[%s2602_s18 + $0x3f8] sm:$0xff] }
 0x11d   : > { %v1894_v5 = vmax.f32 %v1648_v2, 0.0  ;;  %v1364_v6 = vadd.f32 %v1363_v4, %v386_v0  ;;  %1561 = vmatprep.mubr.bf16.mxu0 %v2485_v60  ;;  %v2501_v0 = vld [vmem:[%s2602_s18 + $0x3c4] ss:$16 sps:$4 sm:$0xff]   ;;  %v2226_v2 = vcombine.low %v325_v56, %v327_v57 }
 0x11e   : > { %v1365_v10 = vpop.f32.mrf.mxu0  ;;  %v392_v4 = vld [vmem:[%s2800_s27 + $0x50] sm:$0xff] }
 0x11f   : > { %1959 = vst.msk [vmem:[%s2820_s30 + $0x18] sm:$0xff] %vm1955_vm1, %v1894_v5  ;;  %v1653_v14 = vadd.f32 %v2809_v25, %v1364_v6  ;;  %v1673_v25 = vpop.f32.mrf.mxu1 }
 0x120   : > { %v1366_v16 = vpop.f32.mrf.mxu0  ;;  %1867 = vmatmul.mubr.bf16.gmra.mxu1 %v2218_v22  ;;  %v394_v22 = vld [vmem:[%s2800_s27 + $0x60] sm:$0xff] }
 0x121   : > { %v1895_v18 = vmax.f32 %v1653_v14, 0.0  ;;  %v1367_v19 = vadd.f32 %v1366_v16, %v387_v11  ;;  %v1676_v31 = vpop.f32.mrf.mxu1  ;;  %2285 = vmatprep.mubr.msk.bf16.mxu1 %vm1216_vm0, %v2497_v26  ;;  %v2499_v16 = vld [vmem:[%s2602_s18 + $0x3c0] ss:$16 sps:$4 sm:$0xff]  }
 0x122   : > { %v1368_v23 = vpop.f32.mrf.mxu0 }
 0x123   : > { %1960 = vst.msk [vmem:[%s2820_s30 + $0x20] sm:$0xff] %vm1955_vm1, %v1895_v18  ;;  %v1656_v27 = vadd.f32 %v2823_v37, %v1367_v19  ;;  %v1678_v37 = vpop.f32.mrf.mxu1  ;;  %v2506_v19 = vld [vmem:[%s2602_s18 + $0x3e4] ss:$16 sps:$4 sm:$0xff]  }
 0x124   : > { %v1371_v28 = vpop.f32.mrf.mxu0  ;;  %1562 = vmatmul.mubr.bf16.gmra.mxu0 %v2208_v17 }
 0x125   : > { %v1896_v29 = vmax.f32 %v1656_v27, 0.0  ;;  %v1372_v30 = vadd.f32 %v1371_v28, %v388_v24  ;;  %1569 = vmatprep.mubr.bf16.mxu0 %v2491_v20  ;;  %v1679_v43 = vpop.f32.mrf.mxu1 }
 0x126   : > { %v1373_v32 = vpop.f32.mrf.mxu0 }
 0x127   : > { %1961 = vst.msk [vmem:[%s2820_s30 + $0x28] sm:$0xff] %vm1955_vm1, %v1896_v29  ;;  %v1661_v36 = vadd.f32 %v2831_v49, %v1372_v30  ;;  %v1681_v49 = vpop.f32.mrf.mxu1  ;;  %v395_v30 = vld [vmem:[%s2800_s27 + $0x68] sm:$0xff] }
 0x128   : > { %v1374_v38 = vpop.f32.mrf.mxu0  ;;  %1875 = vmatmul.mubr.bf16.gmra.mxu1 %v2222_v44 }
 0x129   : > { %v1897_v40 = vmax.f32 %v1661_v36, 0.0  ;;  %v1375_v41 = vadd.f32 %v1374_v38, %v389_v33  ;;  %v1684_v53 = vpop.f32.mrf.mxu1  ;;  %2286 = vmatprep.mubr.msk.bf16.mxu1 %vm1216_vm0, %v2502_v47  ;;  %v397_v47 = vld [vmem:[%s2800_s27 + $0x78] sm:$0xff] }
 0x12a   : > { %v1376_v45 = vpop.f32.mrf.mxu0 }
 0x12b   : > { %1962 = vst.msk [vmem:[%s2820_s30 + $0x30] sm:$0xff] %vm1955_vm1, %v1897_v40  ;;  %v1664_v48 = vadd.f32 %v2840_v61, %v1375_v41  ;;  %v1686_v59 = vpop.f32.mrf.mxu1  ;;  %v2494_v61 = vld [vmem:[%s2602_s18 + $0x3a0] ss:$16 sps:$4 sm:$0xff]  }
 0x12c   : > { %v1379_v50 = vpop.f32.mrf.mxu0  ;;  %1570 = vmatmul.mubr.bf16.gmra.mxu0 %v2489_v39  ;;  %v396_v39 = vld [vmem:[%s2800_s27 + $0x70] sm:$0xff] }
 0x12d   : > { %v1898_v51 = vmax.f32 %v1664_v48, 0.0  ;;  %v1380_v52 = vadd.f32 %v1379_v50, %v390_v46  ;;  %1577 = vmatprep.mubr.bf16.mxu0 %v2496_v42  ;;  %v1687_v1 = vpop.f32.mrf.mxu1 }
 0x12e   : > { %v1381_v54 = vpop.f32.mrf.mxu0 }
 0x12f   : > { %1963 = vst.msk [vmem:[%s2820_s30 + $0x38] sm:$0xff] %vm1955_vm1, %v1898_v51  ;;  %v1669_v58 = vadd.f32 %v2849_v9, %v1380_v52  ;;  %v1689_v6 = vpop.f32.mrf.mxu1 }
 0x130   : > { %v1382_v60 = vpop.f32.mrf.mxu0  ;;  %1883 = vmatmul.mubr.bf16.gmra.mxu1 %v2226_v2 }
 0x131   : > { %v1899_v62 = vmax.f32 %v1669_v58, 0.0  ;;  %v1383_v63 = vadd.f32 %v1382_v60, %v391_v55  ;;  %v1692_v10 = vpop.f32.mrf.mxu1  ;;  %v398_v55 = vld [vmem:[%s2800_s27 + $0x80] sm:$0xff] }
 0x132   : > { %v1384_v3 = vpop.f32.mrf.mxu0 }
 0x133   : > { %1964 = vst.msk [vmem:[%s2820_s30 + $0x40] sm:$0xff] %vm1955_vm1, %v1899_v62  ;;  %v1672_v5 = vadd.f32 %v1671_v21, %v1383_v63  ;;  %v1694_v14 = vpop.f32.mrf.mxu1  ;;  %v399_v63 = vld [vmem:[%s2800_s27 + $0x88] sm:$0xff] }
 0x134   : > { %v1387_v7 = vpop.f32.mrf.mxu0  ;;  %1578 = vmatmul.mubr.bf16.gmra.mxu0 %v2494_v61 }
 0x135   : > { %v1900_v8 = vmax.f32 %v1672_v5, 0.0  ;;  %v1388_v9 = vadd.f32 %v1387_v7, %v392_v4  ;;  %1585 = vmatprep.mubr.bf16.mxu0 %v2501_v0  ;;  %v1695_v20 = vpop.f32.mrf.mxu1  ;;  %v400_v7 = vld [vmem:[%s2800_s27 + $0x90] sm:$0xff] }
 0x136   : > { %v1389_v11 = vpop.f32.mrf.mxu0 }
 0x137   : > { %1965 = vst.msk [vmem:[%s2820_s30 + $0x48] sm:$0xff] %vm1955_vm1, %v1900_v8  ;;  %v1677_v13 = vadd.f32 %v1676_v31, %v1388_v9  ;;  %v1697_v24 = vpop.f32.mrf.mxu1 }
 0x138   : > { %v1390_v15 = vpop.f32.mrf.mxu0 }
 0x139   : > { %v1901_v17 = vmax.f32 %v1677_v13, 0.0  ;;  %v1391_v18 = vadd.f32 %v1390_v15, %v393_v12  ;;  %v1700_v28 = vpop.f32.mrf.mxu1  ;;  %v401_v15 = vld [vmem:[%s2800_s27 + $0x98] sm:$0xff] }
 0x13a   : > { %v1392_v21 = vpop.f32.mrf.mxu0 }
 0x13b   : > { %1966 = vst.msk [vmem:[%s2820_s30 + $0x50] sm:$0xff] %vm1955_vm1, %v1901_v17  ;;  %v1680_v23 = vadd.f32 %v1679_v43, %v1391_v18  ;;  %v1702_v32 = vpop.f32.mrf.mxu1 }
 0x13c   : > { %v1395_v26 = vpop.f32.mrf.mxu0  ;;  %1586 = vmatmul.mubr.bf16.gmra.mxu0 %v2499_v16 }
 0x13d   : > { %v1902_v27 = vmax.f32 %v1680_v23, 0.0  ;;  %v1396_v25 = vadd.f32 %v1395_v26, %v394_v22  ;;  %1593 = vmatprep.mubr.bf16.mxu0 %v2506_v19  ;;  %v1703_v37 = vpop.f32.mrf.mxu1  ;;  %v402_v23 = vld [vmem:[%s2800_s27 + $0xa0] sm:$0xff] }
 0x13e   : > { %v1397_v29 = vpop.f32.mrf.mxu0 }
 0x13f   : > { %1967 = vst.msk [vmem:[%s2820_s30 + $0x58] sm:$0xff] %vm1955_vm1, %v1902_v27  ;;  %v1685_v31 = vadd.f32 %v1684_v53, %v1396_v25  ;;  %v1705_v41 = vpop.f32.mrf.mxu1 }
 0x140   : > { %v1398_v33 = vpop.f32.mrf.mxu0 }
 0x141   : > { %v1903_v35 = vmax.f32 %v1685_v31, 0.0  ;;  %v1399_v36 = vadd.f32 %v1398_v33, %v395_v30  ;;  %v1708_v45 = vpop.f32.mrf.mxu1  ;;  %v403_v31 = vld [vmem:[%s2800_s27 + $0xa8] sm:$0xff] }
 0x142   : > { %v1400_v38 = vpop.f32.mrf.mxu0 }
 0x143   : > { %1968 = vst.msk [vmem:[%s2820_s30 + $0x60] sm:$0xff] %vm1955_vm1, %v1903_v35  ;;  %v1688_v40 = vadd.f32 %v1687_v1, %v1399_v36  ;;  %v1710_v49 = vpop.f32.mrf.mxu1 }
 0x144   : > { %v1403_v42 = vpop.f32.mrf.mxu0  ;;  %1594 = vmatmul.mubr.bf16.gmra.mxu0 %v2504_v34 }
 0x145   : > { %v1904_v43 = vmax.f32 %v1688_v40, 0.0  ;;  %v1404_v44 = vadd.f32 %v1403_v42, %v396_v39  ;;  %v1711_v53 = vpop.f32.mrf.mxu1  ;;  %v404_v39 = vld [vmem:[%s2800_s27 + $0xb0] sm:$0xff] }
 0x146   : > { %v1405_v46 = vpop.f32.mrf.mxu0 }
 0x147   : > { %1969 = vst.msk [vmem:[%s2820_s30 + $0x68] sm:$0xff] %vm1955_vm1, %v1904_v43  ;;  %v1693_v48 = vadd.f32 %v1692_v10, %v1404_v44  ;;  %v1713_v57 = vpop.f32.mrf.mxu1 }
 0x148   : > { %v1406_v50 = vpop.f32.mrf.mxu0 }
 0x149   : > { %v1905_v51 = vmax.f32 %v1693_v48, 0.0  ;;  %v1407_v52 = vadd.f32 %v1406_v50, %v397_v47  ;;  %v1716_v61 = vpop.f32.mrf.mxu1  ;;  %v405_v47 = vld [vmem:[%s2800_s27 + $0xb8] sm:$0xff] }
 0x14a   : > { %v1408_v54 = vpop.f32.mrf.mxu0 }
 0x14b   : > { %1970 = vst.msk [vmem:[%s2820_s30 + $0x70] sm:$0xff] %vm1955_vm1, %v1905_v51  ;;  %v1696_v56 = vadd.f32 %v1695_v20, %v1407_v52  ;;  %v1718_v1 = vpop.f32.mrf.mxu1 }
 0x14c   : > { %v1411_v58 = vpop.f32.mrf.mxu0 }
 0x14d   : > { %v1906_v59 = vmax.f32 %v1696_v56, 0.0  ;;  %v1412_v60 = vadd.f32 %v1411_v58, %v398_v55  ;;  %v1719_v5 = vpop.f32.mrf.mxu1  ;;  %v406_v55 = vld [vmem:[%s2800_s27 + $0xc0] sm:$0xff] }
 0x14e   : > { %v1413_v62 = vpop.f32.mrf.mxu0 }
 0x14f   : > { %1971 = vst.msk [vmem:[%s2820_s30 + $0x78] sm:$0xff] %vm1955_vm1, %v1906_v59  ;;  %v1701_v0 = vadd.f32 %v1700_v28, %v1412_v60  ;;  %v1721_v9 = vpop.f32.mrf.mxu1 }
 0x150   : > { %v1414_v2 = vpop.f32.mrf.mxu0 }
 0x151   : > { %v1907_v3 = vmax.f32 %v1701_v0, 0.0  ;;  %v1415_v4 = vadd.f32 %v1414_v2, %v399_v63  ;;  %v1724_v13 = vpop.f32.mrf.mxu1  ;;  %v407_v63 = vld [vmem:[%s2800_s27 + $0xc8] sm:$0xff] }
 0x152   : > { %v1416_v6 = vpop.f32.mrf.mxu0 }
 0x153   : > { %1972 = vst.msk [vmem:[%s2820_s30 + $0x80] sm:$0xff] %vm1955_vm1, %v1907_v3  ;;  %v1704_v8 = vadd.f32 %v1703_v37, %v1415_v4  ;;  %v1726_v17 = vpop.f32.mrf.mxu1 }
 0x154   : > { %v1419_v10 = vpop.f32.mrf.mxu0 }
 0x155   : > { %v1908_v11 = vmax.f32 %v1704_v8, 0.0  ;;  %v1420_v12 = vadd.f32 %v1419_v10, %v400_v7  ;;  %v1727_v21 = vpop.f32.mrf.mxu1  ;;  %v408_v7 = vld [vmem:[%s2800_s27 + $0xd0] sm:$0xff] }
 0x156   : > { %v1421_v14 = vpop.f32.mrf.mxu0 }
 0x157   : > { %1973 = vst.msk [vmem:[%s2820_s30 + $0x88] sm:$0xff] %vm1955_vm1, %v1908_v11  ;;  %v1709_v16 = vadd.f32 %v1708_v45, %v1420_v12  ;;  %v1729_v26 = vpop.f32.mrf.mxu1 }
 0x158   : > { %v1422_v18 = vpop.f32.mrf.mxu0 }
 0x159   : > { %v1909_v19 = vmax.f32 %v1709_v16, 0.0  ;;  %v1423_v20 = vadd.f32 %v1422_v18, %v401_v15  ;;  %v1732_v29 = vpop.f32.mrf.mxu1  ;;  %v409_v15 = vld [vmem:[%s2800_s27 + $0xd8] sm:$0xff] }
 0x15a   : > { %v1424_v22 = vpop.f32.mrf.mxu0 }
 0x15b   : > { %1974 = vst.msk [vmem:[%s2820_s30 + $0x90] sm:$0xff] %vm1955_vm1, %v1909_v19  ;;  %v1712_v24 = vadd.f32 %v1711_v53, %v1423_v20  ;;  %v1734_v33 = vpop.f32.mrf.mxu1 }
 0x15c   : > { %v1427_v27 = vpop.f32.mrf.mxu0 }
 0x15d   : > { %v1910_v25 = vmax.f32 %v1712_v24, 0.0  ;;  %v1428_v28 = vadd.f32 %v1427_v27, %v402_v23  ;;  %v1735_v37 = vpop.f32.mrf.mxu1  ;;  %v410_v23 = vld [vmem:[%s2800_s27 + $0xe0] sm:$0xff] }
 0x15e   : > { %v1429_v30 = vpop.f32.mrf.mxu0 }
 0x15f   : > { %1975 = vst.msk [vmem:[%s2820_s30 + $0x98] sm:$0xff] %vm1955_vm1, %v1910_v25  ;;  %v1717_v32 = vadd.f32 %v1716_v61, %v1428_v28  ;;  %v1737_v41 = vpop.f32.mrf.mxu1 }
 0x160   : > { %v1430_v34 = vpop.f32.mrf.mxu0 }
 0x161   : > { %v1911_v35 = vmax.f32 %v1717_v32, 0.0  ;;  %v1431_v36 = vadd.f32 %v1430_v34, %v403_v31  ;;  %v1740_v45 = vpop.f32.mrf.mxu1  ;;  %v411_v31 = vld [vmem:[%s2800_s27 + $0xe8] sm:$0xff] }
 0x162   : > { %v1432_v38 = vpop.f32.mrf.mxu0 }
 0x163   : > { %1976 = vst.msk [vmem:[%s2820_s30 + $0xa0] sm:$0xff] %vm1955_vm1, %v1911_v35  ;;  %v1720_v40 = vadd.f32 %v1719_v5, %v1431_v36  ;;  %v1742_v49 = vpop.f32.mrf.mxu1 }
 0x164   : > { %v1435_v42 = vpop.f32.mrf.mxu0 }
 0x165   : > { %v1912_v43 = vmax.f32 %v1720_v40, 0.0  ;;  %v1436_v44 = vadd.f32 %v1435_v42, %v404_v39  ;;  %v1743_v53 = vpop.f32.mrf.mxu1  ;;  %v412_v39 = vld [vmem:[%s2800_s27 + $0xf0] sm:$0xff] }
 0x166   : > { %v1437_v46 = vpop.f32.mrf.mxu0 }
 0x167   : > { %1977 = vst.msk [vmem:[%s2820_s30 + $0xa8] sm:$0xff] %vm1955_vm1, %v1912_v43  ;;  %v1725_v48 = vadd.f32 %v1724_v13, %v1436_v44  ;;  %v1745_v57 = vpop.f32.mrf.mxu1 }
 0x168   : > { %v1438_v50 = vpop.f32.mrf.mxu0 }
 0x169   : > { %v1913_v51 = vmax.f32 %v1725_v48, 0.0  ;;  %v1439_v52 = vadd.f32 %v1438_v50, %v405_v47  ;;  %v1748_v61 = vpop.f32.mrf.mxu1  ;;  %v413_v47 = vld [vmem:[%s2800_s27 + $0xf8] sm:$0xff] }
 0x16a   : > { %v1440_v54 = vpop.f32.mrf.mxu0 }
 0x16b   : > { %1978 = vst.msk [vmem:[%s2820_s30 + $0xb0] sm:$0xff] %vm1955_vm1, %v1913_v51  ;;  %v1728_v56 = vadd.f32 %v1727_v21, %v1439_v52  ;;  %v1750_v1 = vpop.f32.mrf.mxu1 }
 0x16c   : > { %v1443_v58 = vpop.f32.mrf.mxu0 }
 0x16d   : > { %v1914_v59 = vmax.f32 %v1728_v56, 0.0  ;;  %v1444_v60 = vadd.f32 %v1443_v58, %v406_v55  ;;  %v1751_v5 = vpop.f32.mrf.mxu1  ;;  %v414_v55 = vld [vmem:[%s2800_s27 + $0x100] sm:$0xff] }
 0x16e   : > { %v1445_v62 = vpop.f32.mrf.mxu0 }
 0x16f   : > { %1979 = vst.msk [vmem:[%s2820_s30 + $0xb8] sm:$0xff] %vm1955_vm1, %v1914_v59  ;;  %v1733_v0 = vadd.f32 %v1732_v29, %v1444_v60  ;;  %v1753_v9 = vpop.f32.mrf.mxu1 }
 0x170   : > { %v1446_v2 = vpop.f32.mrf.mxu0 }
 0x171   : > { %v1915_v3 = vmax.f32 %v1733_v0, 0.0  ;;  %v1447_v4 = vadd.f32 %v1446_v2, %v407_v63  ;;  %v1756_v13 = vpop.f32.mrf.mxu1  ;;  %v415_v63 = vld [vmem:[%s2800_s27 + $0x108] sm:$0xff] }
 0x172   : > { %v1448_v6 = vpop.f32.mrf.mxu0 }
 0x173   : > { %1980 = vst.msk [vmem:[%s2820_s30 + $0xc0] sm:$0xff] %vm1955_vm1, %v1915_v3  ;;  %v1736_v8 = vadd.f32 %v1735_v37, %v1447_v4  ;;  %v1758_v17 = vpop.f32.mrf.mxu1 }
 0x174   : > { %v1451_v10 = vpop.f32.mrf.mxu0 }
 0x175   : > { %v1916_v11 = vmax.f32 %v1736_v8, 0.0  ;;  %v1452_v12 = vadd.f32 %v1451_v10, %v408_v7  ;;  %v1759_v21 = vpop.f32.mrf.mxu1  ;;  %v416_v7 = vld [vmem:[%s2800_s27 + $0x110] sm:$0xff] }
 0x176   : > { %v1453_v14 = vpop.f32.mrf.mxu0 }
 0x177   : > { %1981 = vst.msk [vmem:[%s2820_s30 + $0xc8] sm:$0xff] %vm1955_vm1, %v1916_v11  ;;  %v1741_v16 = vadd.f32 %v1740_v45, %v1452_v12  ;;  %v1761_v26 = vpop.f32.mrf.mxu1 }
 0x178   : > { %v1454_v18 = vpop.f32.mrf.mxu0 }
 0x179   : > { %v1917_v19 = vmax.f32 %v1741_v16, 0.0  ;;  %v1455_v20 = vadd.f32 %v1454_v18, %v409_v15  ;;  %v1764_v29 = vpop.f32.mrf.mxu1  ;;  %v417_v15 = vld [vmem:[%s2800_s27 + $0x118] sm:$0xff] }
 0x17a   : > { %v1456_v22 = vpop.f32.mrf.mxu0 }
 0x17b   : > { %1982 = vst.msk [vmem:[%s2820_s30 + $0xd0] sm:$0xff] %vm1955_vm1, %v1917_v19  ;;  %v1744_v24 = vadd.f32 %v1743_v53, %v1455_v20  ;;  %v1766_v33 = vpop.f32.mrf.mxu1 }
 0x17c   : > { %v1459_v27 = vpop.f32.mrf.mxu0 }
 0x17d   : > { %v1918_v25 = vmax.f32 %v1744_v24, 0.0  ;;  %v1460_v28 = vadd.f32 %v1459_v27, %v410_v23  ;;  %v1767_v37 = vpop.f32.mrf.mxu1  ;;  %v418_v23 = vld [vmem:[%s2800_s27 + $0x120] sm:$0xff] }
 0x17e   : > { %v1461_v30 = vpop.f32.mrf.mxu0 }
 0x17f   : > { %1983 = vst.msk [vmem:[%s2820_s30 + $0xd8] sm:$0xff] %vm1955_vm1, %v1918_v25  ;;  %v1749_v32 = vadd.f32 %v1748_v61, %v1460_v28  ;;  %v1769_v41 = vpop.f32.mrf.mxu1 }
 0x180   : > { %v1462_v34 = vpop.f32.mrf.mxu0 }
 0x181   : > { %v1919_v35 = vmax.f32 %v1749_v32, 0.0  ;;  %v1463_v36 = vadd.f32 %v1462_v34, %v411_v31  ;;  %v1772_v45 = vpop.f32.mrf.mxu1  ;;  %v419_v31 = vld [vmem:[%s2800_s27 + $0x128] sm:$0xff] }
 0x182   : > { %v1464_v38 = vpop.f32.mrf.mxu0 }
 0x183   : > { %1984 = vst.msk [vmem:[%s2820_s30 + $0xe0] sm:$0xff] %vm1955_vm1, %v1919_v35  ;;  %v1752_v40 = vadd.f32 %v1751_v5, %v1463_v36  ;;  %v1774_v49 = vpop.f32.mrf.mxu1 }
 0x184   : > { %v1467_v42 = vpop.f32.mrf.mxu0 }
 0x185   : > { %v1920_v43 = vmax.f32 %v1752_v40, 0.0  ;;  %v1468_v44 = vadd.f32 %v1467_v42, %v412_v39  ;;  %v1775_v53 = vpop.f32.mrf.mxu1  ;;  %v420_v39 = vld [vmem:[%s2800_s27 + $0x130] sm:$0xff] }
 0x186   : > { %v1469_v46 = vpop.f32.mrf.mxu0 }
 0x187   : > { %1985 = vst.msk [vmem:[%s2820_s30 + $0xe8] sm:$0xff] %vm1955_vm1, %v1920_v43  ;;  %v1757_v48 = vadd.f32 %v1756_v13, %v1468_v44  ;;  %v1777_v57 = vpop.f32.mrf.mxu1 }
 0x188   : > { %v1470_v50 = vpop.f32.mrf.mxu0 }
 0x189   : > { %v1921_v51 = vmax.f32 %v1757_v48, 0.0  ;;  %v1471_v52 = vadd.f32 %v1470_v50, %v413_v47  ;;  %v1780_v61 = vpop.f32.mrf.mxu1  ;;  %v421_v47 = vld [vmem:[%s2800_s27 + $0x138] sm:$0xff] }
 0x18a   : > { %v1472_v54 = vpop.f32.mrf.mxu0 }
 0x18b   : > { %1986 = vst.msk [vmem:[%s2820_s30 + $0xf0] sm:$0xff] %vm1955_vm1, %v1921_v51  ;;  %v1760_v56 = vadd.f32 %v1759_v21, %v1471_v52  ;;  %v1782_v1 = vpop.f32.mrf.mxu1 }
 0x18c   : > { %v1475_v58 = vpop.f32.mrf.mxu0 }
 0x18d   : > { %v1922_v59 = vmax.f32 %v1760_v56, 0.0  ;;  %v1476_v60 = vadd.f32 %v1475_v58, %v414_v55  ;;  %v1783_v5 = vpop.f32.mrf.mxu1  ;;  %v422_v55 = vld [vmem:[%s2800_s27 + $0x140] sm:$0xff] }
 0x18e   : > { %v1477_v62 = vpop.f32.mrf.mxu0 }
 0x18f   : > { %1987 = vst.msk [vmem:[%s2820_s30 + $0xf8] sm:$0xff] %vm1955_vm1, %v1922_v59  ;;  %v1765_v0 = vadd.f32 %v1764_v29, %v1476_v60  ;;  %v1785_v9 = vpop.f32.mrf.mxu1 }
 0x190   : > { %v1478_v2 = vpop.f32.mrf.mxu0 }
 0x191   : > { %v1923_v3 = vmax.f32 %v1765_v0, 0.0  ;;  %v1479_v4 = vadd.f32 %v1478_v2, %v415_v63  ;;  %v1788_v13 = vpop.f32.mrf.mxu1  ;;  %v423_v63 = vld [vmem:[%s2800_s27 + $0x148] sm:$0xff] }
 0x192   : > { %v1480_v6 = vpop.f32.mrf.mxu0 }
 0x193   : > { %1988 = vst.msk [vmem:[%s2820_s30 + $0x100] sm:$0xff] %vm1955_vm1, %v1923_v3  ;;  %v1768_v8 = vadd.f32 %v1767_v37, %v1479_v4  ;;  %v1790_v17 = vpop.f32.mrf.mxu1 }
 0x194   : > { %v1483_v10 = vpop.f32.mrf.mxu0 }
 0x195   : > { %v1924_v11 = vmax.f32 %v1768_v8, 0.0  ;;  %v1484_v12 = vadd.f32 %v1483_v10, %v416_v7  ;;  %v1791_v21 = vpop.f32.mrf.mxu1  ;;  %v424_v7 = vld [vmem:[%s2800_s27 + $0x150] sm:$0xff] }
 0x196   : > { %v1485_v14 = vpop.f32.mrf.mxu0 }
 0x197   : > { %1989 = vst.msk [vmem:[%s2820_s30 + $0x108] sm:$0xff] %vm1955_vm1, %v1924_v11  ;;  %v1773_v16 = vadd.f32 %v1772_v45, %v1484_v12  ;;  %v1793_v26 = vpop.f32.mrf.mxu1 }
 0x198   : > { %v1486_v18 = vpop.f32.mrf.mxu0 }
 0x199   : > { %v1925_v19 = vmax.f32 %v1773_v16, 0.0  ;;  %v1487_v20 = vadd.f32 %v1486_v18, %v417_v15  ;;  %v1796_v29 = vpop.f32.mrf.mxu1  ;;  %v425_v15 = vld [vmem:[%s2800_s27 + $0x158] sm:$0xff] }
 0x19a   : > { %v1488_v22 = vpop.f32.mrf.mxu0 }
 0x19b   : > { %1990 = vst.msk [vmem:[%s2820_s30 + $0x110] sm:$0xff] %vm1955_vm1, %v1925_v19  ;;  %v1776_v24 = vadd.f32 %v1775_v53, %v1487_v20  ;;  %v1798_v33 = vpop.f32.mrf.mxu1 }
 0x19c   : > { %v1491_v27 = vpop.f32.mrf.mxu0 }
 0x19d   : > { %v1926_v25 = vmax.f32 %v1776_v24, 0.0  ;;  %v1492_v28 = vadd.f32 %v1491_v27, %v418_v23  ;;  %v1799_v37 = vpop.f32.mrf.mxu1  ;;  %v426_v23 = vld [vmem:[%s2800_s27 + $0x160] sm:$0xff] }
 0x19e   : > { %v1493_v30 = vpop.f32.mrf.mxu0 }
 0x19f   : > { %1991 = vst.msk [vmem:[%s2820_s30 + $0x118] sm:$0xff] %vm1955_vm1, %v1926_v25  ;;  %v1781_v32 = vadd.f32 %v1780_v61, %v1492_v28  ;;  %v1801_v41 = vpop.f32.mrf.mxu1 }
 0x1a0   : > { %v1494_v34 = vpop.f32.mrf.mxu0 }
 0x1a1   : > { %v1927_v35 = vmax.f32 %v1781_v32, 0.0  ;;  %v1495_v36 = vadd.f32 %v1494_v34, %v419_v31  ;;  %v1804_v45 = vpop.f32.mrf.mxu1  ;;  %v427_v31 = vld [vmem:[%s2800_s27 + $0x168] sm:$0xff] }
 0x1a2   : > { %v1496_v38 = vpop.f32.mrf.mxu0 }
 0x1a3   : > { %1992 = vst.msk [vmem:[%s2820_s30 + $0x120] sm:$0xff] %vm1955_vm1, %v1927_v35  ;;  %v1784_v40 = vadd.f32 %v1783_v5, %v1495_v36  ;;  %v1806_v49 = vpop.f32.mrf.mxu1 }
 0x1a4   : > { %v1499_v42 = vpop.f32.mrf.mxu0 }
 0x1a5   : > { %v1928_v43 = vmax.f32 %v1784_v40, 0.0  ;;  %v1500_v44 = vadd.f32 %v1499_v42, %v420_v39  ;;  %v1807_v53 = vpop.f32.mrf.mxu1  ;;  %v428_v39 = vld [vmem:[%s2800_s27 + $0x170] sm:$0xff] }
 0x1a6   : > { %v1501_v46 = vpop.f32.mrf.mxu0 }
 0x1a7   : > { %1993 = vst.msk [vmem:[%s2820_s30 + $0x128] sm:$0xff] %vm1955_vm1, %v1928_v43  ;;  %v1789_v48 = vadd.f32 %v1788_v13, %v1500_v44  ;;  %v1809_v57 = vpop.f32.mrf.mxu1 }
 0x1a8   : > { %v1502_v50 = vpop.f32.mrf.mxu0 }
 0x1a9   : > { %v1929_v51 = vmax.f32 %v1789_v48, 0.0  ;;  %v1503_v52 = vadd.f32 %v1502_v50, %v421_v47  ;;  %v1812_v61 = vpop.f32.mrf.mxu1  ;;  %v429_v47 = vld [vmem:[%s2800_s27 + $0x178] sm:$0xff] }
 0x1aa   : > { %v1504_v54 = vpop.f32.mrf.mxu0 }
 0x1ab   : > { %1994 = vst.msk [vmem:[%s2820_s30 + $0x130] sm:$0xff] %vm1955_vm1, %v1929_v51  ;;  %v1792_v56 = vadd.f32 %v1791_v21, %v1503_v52  ;;  %v1814_v1 = vpop.f32.mrf.mxu1 }
 0x1ac   : > { %v1507_v58 = vpop.f32.mrf.mxu0 }
 0x1ad   : > { %v1930_v59 = vmax.f32 %v1792_v56, 0.0  ;;  %v1508_v60 = vadd.f32 %v1507_v58, %v422_v55  ;;  %v1815_v5 = vpop.f32.mrf.mxu1  ;;  %v430_v55 = vld [vmem:[%s2800_s27 + $0x180] sm:$0xff] }
 0x1ae   : > { %v1509_v62 = vpop.f32.mrf.mxu0 }
 0x1af   : > { %1995 = vst.msk [vmem:[%s2820_s30 + $0x138] sm:$0xff] %vm1955_vm1, %v1930_v59  ;;  %v1797_v0 = vadd.f32 %v1796_v29, %v1508_v60  ;;  %v1817_v9 = vpop.f32.mrf.mxu1 }
 0x1b0   : > { %v1510_v2 = vpop.f32.mrf.mxu0 }
 0x1b1   : > { %v1931_v3 = vmax.f32 %v1797_v0, 0.0  ;;  %v1511_v4 = vadd.f32 %v1510_v2, %v423_v63  ;;  %v1820_v13 = vpop.f32.mrf.mxu1  ;;  %v431_v63 = vld [vmem:[%s2800_s27 + $0x188] sm:$0xff] }
 0x1b2   : > { %v1512_v6 = vpop.f32.mrf.mxu0 }
 0x1b3   : > { %1996 = vst.msk [vmem:[%s2820_s30 + $0x140] sm:$0xff] %vm1955_vm1, %v1931_v3  ;;  %v1800_v8 = vadd.f32 %v1799_v37, %v1511_v4  ;;  %v1822_v17 = vpop.f32.mrf.mxu1 }
 0x1b4   : > { %v1515_v10 = vpop.f32.mrf.mxu0 }
 0x1b5   : > { %v1932_v11 = vmax.f32 %v1800_v8, 0.0  ;;  %v1516_v12 = vadd.f32 %v1515_v10, %v424_v7  ;;  %v1823_v21 = vpop.f32.mrf.mxu1  ;;  %v432_v7 = vld [vmem:[%s2800_s27 + $0x190] sm:$0xff] }
 0x1b6   : > { %v1517_v14 = vpop.f32.mrf.mxu0 }
 0x1b7   : > { %1997 = vst.msk [vmem:[%s2820_s30 + $0x148] sm:$0xff] %vm1955_vm1, %v1932_v11  ;;  %v1805_v16 = vadd.f32 %v1804_v45, %v1516_v12  ;;  %v1825_v26 = vpop.f32.mrf.mxu1 }
 0x1b8   : > { %v1518_v18 = vpop.f32.mrf.mxu0 }
 0x1b9   : > { %v1933_v19 = vmax.f32 %v1805_v16, 0.0  ;;  %v1519_v20 = vadd.f32 %v1518_v18, %v425_v15  ;;  %v1828_v29 = vpop.f32.mrf.mxu1  ;;  %v433_v15 = vld [vmem:[%s2800_s27 + $0x198] sm:$0xff] }
 0x1ba   : > { %v1520_v22 = vpop.f32.mrf.mxu0 }
 0x1bb   : > { %1998 = vst.msk [vmem:[%s2820_s30 + $0x150] sm:$0xff] %vm1955_vm1, %v1933_v19  ;;  %v1808_v24 = vadd.f32 %v1807_v53, %v1519_v20  ;;  %v1830_v33 = vpop.f32.mrf.mxu1 }
 0x1bc   : > { %v1523_v27 = vpop.f32.mrf.mxu0 }
 0x1bd   : > { %v1934_v25 = vmax.f32 %v1808_v24, 0.0  ;;  %v1524_v28 = vadd.f32 %v1523_v27, %v426_v23  ;;  %v1831_v37 = vpop.f32.mrf.mxu1  ;;  %v434_v23 = vld [vmem:[%s2800_s27 + $0x1a0] sm:$0xff] }
 0x1be   : > { %v1525_v30 = vpop.f32.mrf.mxu0 }
 0x1bf   : > { %1999 = vst.msk [vmem:[%s2820_s30 + $0x158] sm:$0xff] %vm1955_vm1, %v1934_v25  ;;  %v1813_v32 = vadd.f32 %v1812_v61, %v1524_v28  ;;  %v1833_v41 = vpop.f32.mrf.mxu1 }
 0x1c0   : > { %v1526_v34 = vpop.f32.mrf.mxu0 }
 0x1c1   : > { %v1935_v35 = vmax.f32 %v1813_v32, 0.0  ;;  %v1527_v36 = vadd.f32 %v1526_v34, %v427_v31  ;;  %v1836_v45 = vpop.f32.mrf.mxu1  ;;  %v435_v31 = vld [vmem:[%s2800_s27 + $0x1a8] sm:$0xff] }
 0x1c2   : > { %v1528_v38 = vpop.f32.mrf.mxu0 }
 0x1c3   : > { %2000 = vst.msk [vmem:[%s2820_s30 + $0x160] sm:$0xff] %vm1955_vm1, %v1935_v35  ;;  %v1816_v40 = vadd.f32 %v1815_v5, %v1527_v36  ;;  %v1838_v49 = vpop.f32.mrf.mxu1 }
 0x1c4   : > { %v1531_v42 = vpop.f32.mrf.mxu0 }
 0x1c5   : > { %v1936_v43 = vmax.f32 %v1816_v40, 0.0  ;;  %v1532_v44 = vadd.f32 %v1531_v42, %v428_v39  ;;  %v1839_v53 = vpop.f32.mrf.mxu1  ;;  %v436_v39 = vld [vmem:[%s2800_s27 + $0x1b0] sm:$0xff] }
 0x1c6   : > { %v1533_v46 = vpop.f32.mrf.mxu0 }
 0x1c7   : > { %2001 = vst.msk [vmem:[%s2820_s30 + $0x168] sm:$0xff] %vm1955_vm1, %v1936_v43  ;;  %v1821_v48 = vadd.f32 %v1820_v13, %v1532_v44  ;;  %v1841_v57 = vpop.f32.mrf.mxu1 }
 0x1c8   : > { %v1534_v50 = vpop.f32.mrf.mxu0 }
 0x1c9   : > { %v1937_v51 = vmax.f32 %v1821_v48, 0.0  ;;  %v1535_v52 = vadd.f32 %v1534_v50, %v429_v47  ;;  %v1844_v61 = vpop.f32.mrf.mxu1  ;;  %v437_v47 = vld [vmem:[%s2800_s27 + $0x1b8] sm:$0xff] }
 0x1ca   : > { %v1536_v54 = vpop.f32.mrf.mxu0 }
 0x1cb   : > { %2002 = vst.msk [vmem:[%s2820_s30 + $0x170] sm:$0xff] %vm1955_vm1, %v1937_v51  ;;  %v1824_v56 = vadd.f32 %v1823_v21, %v1535_v52  ;;  %v1846_v1 = vpop.f32.mrf.mxu1 }
 0x1cc   : > { %v1539_v58 = vpop.f32.mrf.mxu0 }
 0x1cd   : > { %v1938_v59 = vmax.f32 %v1824_v56, 0.0  ;;  %v1540_v60 = vadd.f32 %v1539_v58, %v430_v55  ;;  %v1847_v5 = vpop.f32.mrf.mxu1  ;;  %v438_v55 = vld [vmem:[%s2800_s27 + $0x1c0] sm:$0xff] }
 0x1ce   : > { %v1541_v62 = vpop.f32.mrf.mxu0 }
 0x1cf   : > { %2003 = vst.msk [vmem:[%s2820_s30 + $0x178] sm:$0xff] %vm1955_vm1, %v1938_v59  ;;  %v1829_v0 = vadd.f32 %v1828_v29, %v1540_v60  ;;  %v1849_v9 = vpop.f32.mrf.mxu1 }
 0x1d0   : > { %v1542_v2 = vpop.f32.mrf.mxu0 }
 0x1d1   : > { %v1939_v3 = vmax.f32 %v1829_v0, 0.0  ;;  %v1543_v4 = vadd.f32 %v1542_v2, %v431_v63  ;;  %v1852_v13 = vpop.f32.mrf.mxu1  ;;  %v439_v63 = vld [vmem:[%s2800_s27 + $0x1c8] sm:$0xff] }
 0x1d2   : > { %v1544_v6 = vpop.f32.mrf.mxu0 }
 0x1d3   : > { %2004 = vst.msk [vmem:[%s2820_s30 + $0x180] sm:$0xff] %vm1955_vm1, %v1939_v3  ;;  %v1832_v8 = vadd.f32 %v1831_v37, %v1543_v4  ;;  %v1854_v17 = vpop.f32.mrf.mxu1 }
 0x1d4   : > { %v1547_v10 = vpop.f32.mrf.mxu0 }
 0x1d5   : > { %v1940_v11 = vmax.f32 %v1832_v8, 0.0  ;;  %v1548_v12 = vadd.f32 %v1547_v10, %v432_v7  ;;  %v1855_v21 = vpop.f32.mrf.mxu1  ;;  %v440_v7 = vld [vmem:[%s2800_s27 + $0x1d0] sm:$0xff] }
 0x1d6   : > { %v1549_v14 = vpop.f32.mrf.mxu0 }
 0x1d7   : > { %2005 = vst.msk [vmem:[%s2820_s30 + $0x188] sm:$0xff] %vm1955_vm1, %v1940_v11  ;;  %v1837_v16 = vadd.f32 %v1836_v45, %v1548_v12  ;;  %v1857_v26 = vpop.f32.mrf.mxu1 }
 0x1d8   : > { %v1550_v18 = vpop.f32.mrf.mxu0 }
 0x1d9   : > { %v1941_v19 = vmax.f32 %v1837_v16, 0.0  ;;  %v1551_v20 = vadd.f32 %v1550_v18, %v433_v15  ;;  %v1860_v29 = vpop.f32.mrf.mxu1  ;;  %v441_v15 = vld [vmem:[%s2800_s27 + $0x1d8] sm:$0xff] }
 0x1da   : > { %v1552_v22 = vpop.f32.mrf.mxu0 }
 0x1db   : > { %2006 = vst.msk [vmem:[%s2820_s30 + $0x190] sm:$0xff] %vm1955_vm1, %v1941_v19  ;;  %v1840_v24 = vadd.f32 %v1839_v53, %v1551_v20  ;;  %v1862_v33 = vpop.f32.mrf.mxu1 }
 0x1dc   : > { %v1555_v27 = vpop.f32.mrf.mxu0 }
 0x1dd   : > { %v1942_v25 = vmax.f32 %v1840_v24, 0.0  ;;  %v1556_v28 = vadd.f32 %v1555_v27, %v434_v23  ;;  %v1863_v37 = vpop.f32.mrf.mxu1  ;;  %v442_v23 = vld [vmem:[%s2800_s27 + $0x1e0] sm:$0xff] }
 0x1de   : > { %v1557_v30 = vpop.f32.mrf.mxu0 }
 0x1df   : > { %2007 = vst.msk [vmem:[%s2820_s30 + $0x198] sm:$0xff] %vm1955_vm1, %v1942_v25  ;;  %v1845_v32 = vadd.f32 %v1844_v61, %v1556_v28  ;;  %v1865_v41 = vpop.f32.mrf.mxu1  ;;  %v443_v30 = vld [vmem:[%s2800_s27 + $0x1e8] sm:$0xff] }
 0x1e0   : > { %v1558_v34 = vpop.f32.mrf.mxu0 }
 0x1e1   : > { %v1943_v35 = vmax.f32 %v1845_v32, 0.0  ;;  %v1559_v36 = vadd.f32 %v1558_v34, %v435_v31  ;;  %v1868_v45 = vpop.f32.mrf.mxu1 }
 0x1e2   : > { %v1560_v38 = vpop.f32.mrf.mxu0 }
 0x1e3   : > { %2008 = vst.msk [vmem:[%s2820_s30 + $0x1a0] sm:$0xff] %vm1955_vm1, %v1943_v35  ;;  %v1848_v40 = vadd.f32 %v1847_v5, %v1559_v36  ;;  %v1870_v49 = vpop.f32.mrf.mxu1  ;;  %v444_v36 = vld [vmem:[%s2800_s27 + $0x1f0] sm:$0xff] }
 0x1e4   : > { %v1563_v42 = vpop.f32.mrf.mxu0 }
 0x1e5   : > { %v1944_v43 = vmax.f32 %v1848_v40, 0.0  ;;  %v1564_v44 = vadd.f32 %v1563_v42, %v436_v39  ;;  %v1871_v53 = vpop.f32.mrf.mxu1  ;;  %v445_v42 = vld [vmem:[%s2800_s27 + $0x1f8] sm:$0xff] }
 0x1e6   : > { %v1565_v46 = vpop.f32.mrf.mxu0 }
 0x1e7   : > { %2009 = vst.msk [vmem:[%s2820_s30 + $0x1a8] sm:$0xff] %vm1955_vm1, %v1944_v43  ;;  %v1853_v48 = vadd.f32 %v1852_v13, %v1564_v44  ;;  %v1873_v57 = vpop.f32.mrf.mxu1 }
 0x1e8   : > { %v1566_v50 = vpop.f32.mrf.mxu0 }
 0x1e9   : > { %v1945_v51 = vmax.f32 %v1853_v48, 0.0  ;;  %v1567_v52 = vadd.f32 %v1566_v50, %v437_v47  ;;  %v1876_v61 = vpop.f32.mrf.mxu1 }
 0x1ea   : > { %v1568_v54 = vpop.f32.mrf.mxu0 }
 0x1eb   : > { %2010 = vst.msk [vmem:[%s2820_s30 + $0x1b0] sm:$0xff] %vm1955_vm1, %v1945_v51  ;;  %v1856_v56 = vadd.f32 %v1855_v21, %v1567_v52  ;;  %v1878_v1 = vpop.f32.mrf.mxu1 }
 0x1ec   : > { %v1571_v58 = vpop.f32.mrf.mxu0 }
 0x1ed   : > { %v1946_v59 = vmax.f32 %v1856_v56, 0.0  ;;  %v1572_v60 = vadd.f32 %v1571_v58, %v438_v55  ;;  %v1879_v5 = vpop.f32.mrf.mxu1 }
 0x1ee   : > { %v1573_v62 = vpop.f32.mrf.mxu0 }
 0x1ef   : > { %2011 = vst.msk [vmem:[%s2820_s30 + $0x1b8] sm:$0xff] %vm1955_vm1, %v1946_v59  ;;  %v1861_v0 = vadd.f32 %v1860_v29, %v1572_v60  ;;  %v1881_v9 = vpop.f32.mrf.mxu1 }
 0x1f0   : > { %v1574_v2 = vpop.f32.mrf.mxu0 }
 0x1f1   : > { %v1947_v3 = vmax.f32 %v1861_v0, 0.0  ;;  %v1575_v4 = vadd.f32 %v1574_v2, %v439_v63  ;;  %v1884_v13 = vpop.f32.mrf.mxu1 }
 0x1f2   : > { %v1576_v6 = vpop.f32.mrf.mxu0 }
 0x1f3   : > { %2012 = vst.msk [vmem:[%s2820_s30 + $0x1c0] sm:$0xff] %vm1955_vm1, %v1947_v3  ;;  %v1864_v8 = vadd.f32 %v1863_v37, %v1575_v4  ;;  %v1886_v17 = vpop.f32.mrf.mxu1 }
 0x1f4   : > { %v1579_v10 = vpop.f32.mrf.mxu0 }
 0x1f5   : > { %v1948_v11 = vmax.f32 %v1864_v8, 0.0  ;;  %v1580_v12 = vadd.f32 %v1579_v10, %v440_v7  ;;  %v1887_v21 = vpop.f32.mrf.mxu1 }
 0x1f6   : > { %v1581_v14 = vpop.f32.mrf.mxu0 }
 0x1f7   : > { %2013 = vst.msk [vmem:[%s2820_s30 + $0x1c8] sm:$0xff] %vm1955_vm1, %v1948_v11  ;;  %v1869_v16 = vadd.f32 %v1868_v45, %v1580_v12  ;;  %v1889_v26 = vpop.f32.mrf.mxu1 }
 0x1f8   : > { %v1582_v18 = vpop.f32.mrf.mxu0 }
 0x1f9   : > { %v1949_v19 = vmax.f32 %v1869_v16, 0.0  ;;  %v1583_v20 = vadd.f32 %v1582_v18, %v441_v15 }
 0x1fa   : > { %v1584_v22 = vpop.f32.mrf.mxu0 }
 0x1fb   : > { %2014 = vst.msk [vmem:[%s2820_s30 + $0x1d0] sm:$0xff] %vm1955_vm1, %v1949_v19  ;;  %v1872_v24 = vadd.f32 %v1871_v53, %v1583_v20 }
 0x1fc   : > { %v1587_v27 = vpop.f32.mrf.mxu0 }
 0x1fd   : > { %v1950_v25 = vmax.f32 %v1872_v24, 0.0  ;;  %v1588_v28 = vadd.f32 %v1587_v27, %v442_v23 }
 0x1fe   : > { %v1589_v29 = vpop.f32.mrf.mxu0 }
 0x1ff   : > { %2015 = vst.msk [vmem:[%s2820_s30 + $0x1d8] sm:$0xff] %vm1955_vm1, %v1950_v25  ;;  %v1877_v31 = vadd.f32 %v1876_v61, %v1588_v28 }
 0x200   : > { %v1590_v32 = vpop.f32.mrf.mxu0 }
 0x201   : > { %v1951_v33 = vmax.f32 %v1877_v31, 0.0  ;;  %v1591_v34 = vadd.f32 %v1590_v32, %v443_v30 }
 0x202   : > { %v1592_v35 = vpop.f32.mrf.mxu0 }
 0x203   : > { %2016 = vst.msk [vmem:[%s2820_s30 + $0x1e0] sm:$0xff] %vm1955_vm1, %v1951_v33  ;;  %v1880_v37 = vadd.f32 %v1879_v5, %v1591_v34 }
 0x204   : > { %v1595_v38 = vpop.f32.mrf.mxu0 }
 0x205   : > { %v1952_v39 = vmax.f32 %v1880_v37, 0.0  ;;  %v1596_v40 = vadd.f32 %v1595_v38, %v444_v36 }
 0x206   : > { %v1597_v41 = vpop.f32.mrf.mxu0 }
 0x207   : > { %2017 = vst.msk [vmem:[%s2820_s30 + $0x1e8] sm:$0xff] %vm1955_vm1, %v1952_v39  ;;  %v1885_v43 = vadd.f32 %v1884_v13, %v1596_v40 }
 0x208   : > { %v1598_v44 = vpop.f32.mrf.mxu0 }
 0x209   : > { %v1953_v45 = vmax.f32 %v1885_v43, 0.0  ;;  %v1599_v46 = vadd.f32 %v1598_v44, %v445_v42 }
 0x20a   : > { %v1600_v47 = vpop.f32.mrf.mxu0 }
 0x20b   : > { %2018 = vst.msk [vmem:[%s2820_s30 + $0x1f0] sm:$0xff] %vm1955_vm1, %v1953_v45  ;;  %v1888_v48 = vadd.f32 %v1887_v21, %v1599_v46 }
 0x20d   : > { %v1954_v49 = vmax.f32 %v1888_v48, 0.0 }
 0x20f   : > { %2019 = vst.msk [vmem:[%s2820_s30 + $0x1f8] sm:$0xff] %vm1955_vm1, %v1954_v49 }
 0x210 PF: > { %s13_s12 = sadd.s32 1, %s2513_s12  }
 0x211   : > { %p10_p4 = scmp.ge.s32.totalorder %s13_s12, 4  }
 0x213   :  { %12 = sbr.rel (!%p10_p4) target bundleno = 1 (0x1), region = 65 }

// kernel: forward.23
= control target key start
LH: loop header
LB: loop body
LE: loop exit
PB: predicated region body
PF: predicated region fallthrough
CT: control target
= control target key end

     0   :  { %v875_v0 = vmov 0   ;;  %vm412_vm0 = vcmask 392192   ;;  %vm647_vm1 = vcmask 261120   ;;  %s1151_s1 = inlined_call_operand.vmem [shape: bf16[432,32], index: 1, kind: input, shape index: {}]   ;;  %s1152_s0 = inlined_call_operand.vmem [shape: bf16[128,432], index: 0, kind: input, shape index: {}]   ;;  %s1153_s2 = inlined_call_operand.vmem [shape: f32[128,32], index: 2, kind: output, shape index: {}]  }
   0x1   :  { %534 = vmatprep.subr.bf16.mxu1 %v875_v0  ;;  %v800_v1 = vld [vmem:[%s1151_s1 + $0xb8] sm:$0xff]   ;;  %v803_v4 = vld [vmem:[%s1151_s1 + $0xb0] sm:$0xff]   ;;  %v806_v7 = vld [vmem:[%s1151_s1 + $0xa8] sm:$0xff]  }
   0x2   :  { %v801_v2 = vld [vmem:[%s1151_s1 + $0x78] sm:$0xff]   ;;  %535 = vmatpush1.bf16.msra.mxu1 %v800_v1  ;;  %v804_v5 = vld [vmem:[%s1151_s1 + $0x70] sm:$0xff]   ;;  %v807_v8 = vld [vmem:[%s1151_s1 + $0x68] sm:$0xff]  }
   0x3   :  { %v802_v3 = vld [vmem:[%s1151_s1 + $0x38] sm:$0xff]   ;;  %735 = vmatprep.subr.bf16.mxu0 %v801_v2  ;;  %536 = vmatprep.subr.bf16.mxu1 %v875_v0  ;;  %v805_v6 = vld [vmem:[%s1151_s1 + $0x30] sm:$0xff]   ;;  %v808_v9 = vld [vmem:[%s1151_s1 + $0x28] sm:$0xff]  }
   0x4   :  { %736 = vmatpush3.bf16.msra.mxu0 %v802_v3  ;;  %v809_v10 = vld [vmem:[%s1151_s1 + $0xa0] sm:$0xff]   ;;  %v813_v13 = vld [vmem:[%s1151_s1 + $0x58] sm:$0xff]   ;;  %v816_v16 = vld [vmem:[%s1151_s1 + $0x50] sm:$0xff]  }
   0x5   :  { %737 = vmatprep.subr.bf16.mxu0 %v804_v5  ;;  %v810_v11 = vld [vmem:[%s1151_s1 + $0x60] sm:$0xff]   ;;  %v812_v14 = vld [vmem:[%s1151_s1 + $0x98] sm:$0xff]   ;;  %v815_v17 = vld [vmem:[%s1151_s1 + $0x90] sm:$0xff]  }
   0x6   :  { %537 = vmatpush1.bf16.msra.mxu1 %v803_v4  ;;  %v811_v12 = vld [vmem:[%s1151_s1 + $0x20] sm:$0xff]   ;;  %v814_v15 = vld [vmem:[%s1151_s1 + $0x18] sm:$0xff]   ;;  %v817_v18 = vld [vmem:[%s1151_s1 + $0x10] sm:$0xff]  }
   0x7   :  { %538 = vmatprep.subr.bf16.mxu1 %v875_v0  ;;  %v819_v19 = vld [vmem:[%s1151_s1 + $0x48] sm:$0xff]   ;;  %v822_v22 = vld [vmem:[%s1151_s1 + $0x40] sm:$0xff]   ;;  %v827_v26 = vld [vmem:[%s1151_s1 + $0xd0] sm:$0xff]  }
   0x8   :  { %738 = vmatpush3.bf16.msra.mxu0 %v805_v6  ;;  %v818_v20 = vld [vmem:[%s1151_s1 + $0x88] sm:$0xff]   ;;  %v826_v23 = vld [vmem:[%s1152_s0 + $0x4] ss:$16 sps:$4 sm:$0xff]   ;;  %v824_v28 = vld [vmem:[%s1152_s0] ss:$16 sps:$4 sm:$0xff]  }
   0x9   :  { %739 = vmatprep.subr.bf16.mxu0 %v807_v8  ;;  %v820_v21 = vld [vmem:[%s1151_s1 + $0x8] sm:$0xff]   ;;  %v821_v24 = vld [vmem:[%s1151_s1 + $0x80] sm:$0xff]   ;;  %469 = vmatprep.mubr.bf16.mxu0 %v826_v23 }
   0xa   :  { %539 = vmatpush1.bf16.msra.mxu1 %v806_v7  ;;  %v823_v25 = vld [vmem:[%s1151_s1] sm:$0xff]   ;;  %v835_v27 = vld [vmem:[%s1152_s0 + $0xc] ss:$16 sps:$4 sm:$0xff]   ;;  %v833_v34 = vld [vmem:[%s1152_s0 + $0x8] ss:$16 sps:$4 sm:$0xff]  }
   0xb   :  { %540 = vmatprep.subr.bf16.mxu1 %v875_v0  ;;  %v829_v29 = vld [vmem:[%s1152_s0 + $0x24] ss:$16 sps:$4 sm:$0xff]   ;;  %727 = vmatprep.mubr.msk.bf16.mxu1 %vm412_vm0, %v835_v27  ;;  %v828_v30 = vld [vmem:[%s1151_s1 + $0xc8] sm:$0xff]   ;;  %v832_v32 = vld [vmem:[%s1152_s0 + $0x20] ss:$16 sps:$4 sm:$0xff]  }
   0xc   :  { %740 = vmatpush3.bf16.msra.mxu0 %v808_v9  ;;  %v831_v31 = vld [vmem:[%s1151_s1 + $0xc0] sm:$0xff]   ;;  %v839_v35 = vld [vmem:[%s1152_s0 + $0x2c] ss:$16 sps:$4 sm:$0xff]   ;;  %v841_v38 = vld [vmem:[%s1152_s0 + $0x28] ss:$16 sps:$4 sm:$0xff]  }
   0xd   :  { %741 = vmatprep.subr.bf16.mxu0 %v810_v11  ;;  %v836_v33 = vld [vmem:[%s1152_s0 + $0x44] ss:$16 sps:$4 sm:$0xff]   ;;  %v838_v36 = vld [vmem:[%s1152_s0 + $0x40] ss:$16 sps:$4 sm:$0xff]   ;;  %v845_v39 = vld [vmem:[%s1152_s0 + $0x4c] ss:$16 sps:$4 sm:$0xff]  }
   0xe   :  { %541 = vmatpush1.bf16.msra.mxu1 %v809_v10  ;;  %v842_v37 = vld [vmem:[%s1152_s0 + $0x64] ss:$16 sps:$4 sm:$0xff]   ;;  %v844_v40 = vld [vmem:[%s1152_s0 + $0x60] ss:$16 sps:$4 sm:$0xff]   ;;  %v847_v42 = vld [vmem:[%s1152_s0 + $0x48] ss:$16 sps:$4 sm:$0xff]  }
   0xf   :  { %542 = vmatprep.subr.bf16.mxu1 %v875_v0  ;;  %v848_v41 = vld [vmem:[%s1152_s0 + $0x84] ss:$16 sps:$4 sm:$0xff]   ;;  %v851_v43 = vld [vmem:[%s1152_s0 + $0x6c] ss:$16 sps:$4 sm:$0xff]   ;;  %v850_v44 = vld [vmem:[%s1152_s0 + $0x80] ss:$16 sps:$4 sm:$0xff]  }
  0x10   :  { %742 = vmatpush3.bf16.msra.mxu0 %v811_v12  ;;  %v854_v45 = vld [vmem:[%s1152_s0 + $0xa4] ss:$16 sps:$4 sm:$0xff]   ;;  %v853_v46 = vld [vmem:[%s1152_s0 + $0x68] ss:$16 sps:$4 sm:$0xff]   ;;  %v857_v47 = vld [vmem:[%s1152_s0 + $0x8c] ss:$16 sps:$4 sm:$0xff]  }
  0x11   :  { %743 = vmatprep.subr.bf16.mxu0 %v813_v13  ;;  %v856_v48 = vld [vmem:[%s1152_s0 + $0xa0] ss:$16 sps:$4 sm:$0xff]   ;;  %v860_v49 = vld [vmem:[%s1152_s0 + $0xc4] ss:$16 sps:$4 sm:$0xff]   ;;  %v859_v50 = vld [vmem:[%s1152_s0 + $0x88] ss:$16 sps:$4 sm:$0xff]  }
  0x12   :  { %543 = vmatpush1.bf16.msra.mxu1 %v812_v14  ;;  %v863_v51 = vld [vmem:[%s1152_s0 + $0xac] ss:$16 sps:$4 sm:$0xff]   ;;  %v862_v52 = vld [vmem:[%s1152_s0 + $0xc0] ss:$16 sps:$4 sm:$0xff]   ;;  %v866_v53 = vld [vmem:[%s1152_s0 + $0xe4] ss:$16 sps:$4 sm:$0xff]  }
  0x13   :  { %544 = vmatprep.subr.bf16.mxu1 %v875_v0  ;;  %v865_v54 = vld [vmem:[%s1152_s0 + $0xa8] ss:$16 sps:$4 sm:$0xff]   ;;  %v869_v55 = vld [vmem:[%s1152_s0 + $0xcc] ss:$16 sps:$4 sm:$0xff]   ;;  %v868_v56 = vld [vmem:[%s1152_s0 + $0xe0] ss:$16 sps:$4 sm:$0xff]  }
  0x14   :  { %744 = vmatpush3.bf16.msra.mxu0 %v814_v15  ;;  %v871_v57 = vld [vmem:[%s1152_s0 + $0xc8] ss:$16 sps:$4 sm:$0xff]   ;;  %v872_v58 = vld [vmem:[%s1152_s0 + $0xec] ss:$16 sps:$4 sm:$0xff]  }
  0x15   :  { %745 = vmatprep.subr.bf16.mxu0 %v816_v16  ;;  %v874_v59 = vld [vmem:[%s1152_s0 + $0xe8] ss:$16 sps:$4 sm:$0xff]  }
  0x16   :  { %545 = vmatpush1.bf16.msra.mxu1 %v815_v17 }
  0x17   :  { %546 = vmatprep.subr.bf16.mxu1 %v875_v0 }
  0x18   :  { %746 = vmatpush3.bf16.msra.mxu0 %v817_v18 }
  0x19   :  { %747 = vmatprep.subr.bf16.mxu0 %v819_v19 }
  0x1a   :  { %547 = vmatpush1.bf16.msra.mxu1 %v818_v20 }
  0x1b   :  { %548 = vmatprep.subr.bf16.mxu1 %v875_v0 }
  0x1c   :  { %748 = vmatpush3.bf16.msra.mxu0 %v820_v21 }
  0x1d   :  { %749 = vmatprep.subr.bf16.mxu0 %v822_v22 }
  0x1e   :  { %549 = vmatpush1.bf16.msra.mxu1 %v821_v24 }
  0x1f   :  { %560 = vmatprep.subr.bf16.mxu1 %v875_v0 }
  0x20   :  { %750 = vmatpush3.bf16.msra.mxu0 %v823_v25 }
  0x22   :  { %561 = vmatpush2.bf16.msra.mxu1 %v827_v26 }
  0x23   :  { %470 = vmatmul.mubr.bf16.vlgmr.msra.gmra.mxu0 %v824_v28  ;;  %562 = vmatprep.subr.bf16.mxu1 %v875_v0 }
  0x24   :  { %477 = vmatprep.mubr.bf16.mxu0 %v829_v29 }
  0x26   :  { %563 = vmatpush2.bf16.msra.mxu1 %v828_v30 }
  0x27   :  { %564 = vmatprep.subr.bf16.mxu1 %v875_v0 }
  0x2a   :  { %565 = vmatpush2.bf16.msra.mxu1 %v831_v31 }
  0x2b   :  { %478 = vmatmul.mubr.bf16.gmra.mxu0 %v832_v32 }
  0x2c   :  { %485 = vmatprep.mubr.bf16.mxu0 %v836_v33 }
  0x2d   :  { %567 = vmatmul.mubr.bf16.vlgmr.msra.gmra.mxu1 %v833_v34 }
  0x2e   :  { %728 = vmatprep.mubr.msk.bf16.mxu1 %vm412_vm0, %v839_v35 }
  0x33   :  { %486 = vmatmul.mubr.bf16.gmra.mxu0 %v838_v36 }
  0x34   :  { %493 = vmatprep.mubr.bf16.mxu0 %v842_v37 }
  0x35   :  { %575 = vmatmul.mubr.bf16.gmra.mxu1 %v841_v38 }
  0x36   :  { %729 = vmatprep.mubr.msk.bf16.mxu1 %vm412_vm0, %v845_v39 }
  0x3b   :  { %494 = vmatmul.mubr.bf16.gmra.mxu0 %v844_v40 }
  0x3c   :  { %501 = vmatprep.mubr.bf16.mxu0 %v848_v41 }
  0x3d   :  { %583 = vmatmul.mubr.bf16.gmra.mxu1 %v847_v42 }
  0x3e   :  { %730 = vmatprep.mubr.msk.bf16.mxu1 %vm412_vm0, %v851_v43 }
  0x43   :  { %502 = vmatmul.mubr.bf16.gmra.mxu0 %v850_v44 }
  0x44   :  { %509 = vmatprep.mubr.bf16.mxu0 %v854_v45 }
  0x45   :  { %591 = vmatmul.mubr.bf16.gmra.mxu1 %v853_v46 }
  0x46   :  { %731 = vmatprep.mubr.msk.bf16.mxu1 %vm412_vm0, %v857_v47 }
  0x4b   :  { %510 = vmatmul.mubr.bf16.gmra.mxu0 %v856_v48 }
  0x4c   :  { %517 = vmatprep.mubr.bf16.mxu0 %v860_v49 }
  0x4d   :  { %599 = vmatmul.mubr.bf16.gmra.mxu1 %v859_v50 }
  0x4e   :  { %732 = vmatprep.mubr.msk.bf16.mxu1 %vm412_vm0, %v863_v51 }
  0x53   :  { %518 = vmatmul.mubr.bf16.gmra.mxu0 %v862_v52 }
  0x54   :  { %525 = vmatprep.mubr.bf16.mxu0 %v866_v53 }
  0x55   :  { %607 = vmatmul.mubr.bf16.gmra.mxu1 %v865_v54 }
  0x56   :  { %733 = vmatprep.mubr.msk.bf16.mxu1 %vm412_vm0, %v869_v55 }
  0x5b   :  { %526 = vmatmul.mubr.bf16.gmra.mxu0 %v868_v56 }
  0x5d   :  { %615 = vmatmul.mubr.bf16.gmra.mxu1 %v871_v57 }
  0x5e   :  { %734 = vmatprep.mubr.msk.bf16.mxu1 %vm412_vm0, %v872_v58 }
  0x65   :  { %623 = vmatmul.mubr.bf16.gmra.mxu1 %v874_v59 }
  0xe3   :  { %v751_v60 = vpop.f32.mrf.mxu0 }
  0xe5   :  { %v752_v61 = vpop.f32.mrf.mxu0 }
  0xe6   :  { %v753_v1 = vadd.f32 %v752_v61, %v751_v60 }
  0xe7   :  { %v754_v62 = vpop.f32.mrf.mxu0 }
  0xe9   :  { %v755_v63 = vpop.f32.mrf.mxu0 }
  0xea   :  { %v756_v7 = vadd.f32 %v755_v63, %v754_v62 }
  0xeb   :  { %v757_v0 = vpop.f32.mrf.mxu0 }
  0xed   :  { %v758_v2 = vpop.f32.mrf.mxu0  ;;  %v568_v3 = vpop.f32.mrf.mxu1 }
  0xee   :  { %v569_v4 = vadd.f32 %v753_v1, %v568_v3  ;;  %v759_v14 = vadd.f32 %v758_v2, %v757_v0 }
  0xef   :  { %v760_v5 = vpop.f32.mrf.mxu0  ;;  %v570_v6 = vpop.f32.mrf.mxu1 }
  0xf0   :  { %v631_v8 = vmax.f32 %v569_v4, 0.0 }
  0xf1   :  { %v761_v9 = vpop.f32.mrf.mxu0  ;;  %v571_v10 = vpop.f32.mrf.mxu1 }
  0xf2   :  { %648 = vst.msk [vmem:[%s1153_s2] sm:$0xff] %vm647_vm1, %v631_v8  ;;  %v572_v11 = vadd.f32 %v756_v7, %v571_v10  ;;  %v762_v21 = vadd.f32 %v761_v9, %v760_v5 }
  0xf3   :  { %v763_v12 = vpop.f32.mrf.mxu0  ;;  %v573_v13 = vpop.f32.mrf.mxu1 }
  0xf4   :  { %v632_v15 = vmax.f32 %v572_v11, 0.0 }
  0xf5   :  { %v764_v16 = vpop.f32.mrf.mxu0  ;;  %v576_v17 = vpop.f32.mrf.mxu1 }
  0xf6   :  { %649 = vst.msk [vmem:[%s1153_s2 + $0x8] sm:$0xff] %vm647_vm1, %v632_v15  ;;  %v577_v18 = vadd.f32 %v759_v14, %v576_v17  ;;  %v765_v28 = vadd.f32 %v764_v16, %v763_v12 }
  0xf7   :  { %v766_v19 = vpop.f32.mrf.mxu0  ;;  %v578_v20 = vpop.f32.mrf.mxu1 }
  0xf8   :  { %v633_v22 = vmax.f32 %v577_v18, 0.0 }
  0xf9   :  { %v767_v23 = vpop.f32.mrf.mxu0  ;;  %v579_v24 = vpop.f32.mrf.mxu1 }
  0xfa   :  { %650 = vst.msk [vmem:[%s1153_s2 + $0x10] sm:$0xff] %vm647_vm1, %v633_v22  ;;  %v580_v25 = vadd.f32 %v762_v21, %v579_v24  ;;  %v768_v35 = vadd.f32 %v767_v23, %v766_v19 }
  0xfb   :  { %v769_v26 = vpop.f32.mrf.mxu0  ;;  %v581_v27 = vpop.f32.mrf.mxu1 }
  0xfc   :  { %v634_v29 = vmax.f32 %v580_v25, 0.0 }
  0xfd   :  { %v770_v30 = vpop.f32.mrf.mxu0  ;;  %v584_v31 = vpop.f32.mrf.mxu1 }
  0xfe   :  { %651 = vst.msk [vmem:[%s1153_s2 + $0x18] sm:$0xff] %vm647_vm1, %v634_v29  ;;  %v585_v32 = vadd.f32 %v765_v28, %v584_v31  ;;  %v771_v42 = vadd.f32 %v770_v30, %v769_v26 }
  0xff   :  { %v772_v33 = vpop.f32.mrf.mxu0  ;;  %v586_v34 = vpop.f32.mrf.mxu1 }
 0x100   :  { %v635_v36 = vmax.f32 %v585_v32, 0.0 }
 0x101   :  { %v773_v37 = vpop.f32.mrf.mxu0  ;;  %v587_v38 = vpop.f32.mrf.mxu1 }
 0x102   :  { %652 = vst.msk [vmem:[%s1153_s2 + $0x20] sm:$0xff] %vm647_vm1, %v635_v36  ;;  %v588_v39 = vadd.f32 %v768_v35, %v587_v38  ;;  %v774_v49 = vadd.f32 %v773_v37, %v772_v33 }
 0x103   :  { %v775_v40 = vpop.f32.mrf.mxu0  ;;  %v589_v41 = vpop.f32.mrf.mxu1 }
 0x104   :  { %v636_v43 = vmax.f32 %v588_v39, 0.0 }
 0x105   :  { %v776_v44 = vpop.f32.mrf.mxu0  ;;  %v592_v45 = vpop.f32.mrf.mxu1 }
 0x106   :  { %653 = vst.msk [vmem:[%s1153_s2 + $0x28] sm:$0xff] %vm647_vm1, %v636_v43  ;;  %v593_v46 = vadd.f32 %v771_v42, %v592_v45  ;;  %v777_v56 = vadd.f32 %v776_v44, %v775_v40 }
 0x107   :  { %v778_v47 = vpop.f32.mrf.mxu0  ;;  %v594_v48 = vpop.f32.mrf.mxu1 }
 0x108   :  { %v637_v50 = vmax.f32 %v593_v46, 0.0 }
 0x109   :  { %v779_v51 = vpop.f32.mrf.mxu0  ;;  %v595_v52 = vpop.f32.mrf.mxu1 }
 0x10a   :  { %654 = vst.msk [vmem:[%s1153_s2 + $0x30] sm:$0xff] %vm647_vm1, %v637_v50  ;;  %v596_v53 = vadd.f32 %v774_v49, %v595_v52  ;;  %v780_v63 = vadd.f32 %v779_v51, %v778_v47 }
 0x10b   :  { %v781_v54 = vpop.f32.mrf.mxu0  ;;  %v597_v55 = vpop.f32.mrf.mxu1 }
 0x10c   :  { %v638_v57 = vmax.f32 %v596_v53, 0.0 }
 0x10d   :  { %v782_v58 = vpop.f32.mrf.mxu0  ;;  %v600_v59 = vpop.f32.mrf.mxu1 }
 0x10e   :  { %655 = vst.msk [vmem:[%s1153_s2 + $0x38] sm:$0xff] %vm647_vm1, %v638_v57  ;;  %v601_v60 = vadd.f32 %v777_v56, %v600_v59  ;;  %v783_v6 = vadd.f32 %v782_v58, %v781_v54 }
 0x10f   :  { %v784_v61 = vpop.f32.mrf.mxu0  ;;  %v602_v62 = vpop.f32.mrf.mxu1 }
 0x110   :  { %v639_v0 = vmax.f32 %v601_v60, 0.0 }
 0x111   :  { %v785_v1 = vpop.f32.mrf.mxu0  ;;  %v603_v2 = vpop.f32.mrf.mxu1 }
 0x112   :  { %656 = vst.msk [vmem:[%s1153_s2 + $0x40] sm:$0xff] %vm647_vm1, %v639_v0  ;;  %v604_v3 = vadd.f32 %v780_v63, %v603_v2  ;;  %v786_v13 = vadd.f32 %v785_v1, %v784_v61 }
 0x113   :  { %v787_v4 = vpop.f32.mrf.mxu0  ;;  %v605_v5 = vpop.f32.mrf.mxu1 }
 0x114   :  { %v640_v7 = vmax.f32 %v604_v3, 0.0 }
 0x115   :  { %v788_v8 = vpop.f32.mrf.mxu0  ;;  %v608_v9 = vpop.f32.mrf.mxu1 }
 0x116   :  { %657 = vst.msk [vmem:[%s1153_s2 + $0x48] sm:$0xff] %vm647_vm1, %v640_v7  ;;  %v609_v10 = vadd.f32 %v783_v6, %v608_v9  ;;  %v789_v20 = vadd.f32 %v788_v8, %v787_v4 }
 0x117   :  { %v790_v11 = vpop.f32.mrf.mxu0  ;;  %v610_v12 = vpop.f32.mrf.mxu1 }
 0x118   :  { %v641_v14 = vmax.f32 %v609_v10, 0.0 }
 0x119   :  { %v791_v15 = vpop.f32.mrf.mxu0  ;;  %v611_v16 = vpop.f32.mrf.mxu1 }
 0x11a   :  { %658 = vst.msk [vmem:[%s1153_s2 + $0x50] sm:$0xff] %vm647_vm1, %v641_v14  ;;  %v612_v17 = vadd.f32 %v786_v13, %v611_v16  ;;  %v792_v26 = vadd.f32 %v791_v15, %v790_v11 }
 0x11b   :  { %v793_v18 = vpop.f32.mrf.mxu0  ;;  %v613_v19 = vpop.f32.mrf.mxu1 }
 0x11c   :  { %v642_v21 = vmax.f32 %v612_v17, 0.0 }
 0x11d   :  { %v794_v22 = vpop.f32.mrf.mxu0  ;;  %v616_v23 = vpop.f32.mrf.mxu1 }
 0x11e   :  { %659 = vst.msk [vmem:[%s1153_s2 + $0x58] sm:$0xff] %vm647_vm1, %v642_v21  ;;  %v617_v24 = vadd.f32 %v789_v20, %v616_v23  ;;  %v795_v32 = vadd.f32 %v794_v22, %v793_v18 }
 0x11f   :  { %v618_v25 = vpop.f32.mrf.mxu1  ;;  %v796_v28 = vpop.f32.mrf.mxu0 }
 0x120   :  { %v643_v27 = vmax.f32 %v617_v24, 0.0 }
 0x121   :  { %v619_v29 = vpop.f32.mrf.mxu1  ;;  %v797_v34 = vpop.f32.mrf.mxu0 }
 0x122   :  { %660 = vst.msk [vmem:[%s1153_s2 + $0x60] sm:$0xff] %vm647_vm1, %v643_v27  ;;  %v620_v30 = vadd.f32 %v792_v26, %v619_v29  ;;  %v798_v38 = vadd.f32 %v797_v34, %v796_v28 }
 0x123   :  { %v621_v31 = vpop.f32.mrf.mxu1 }
 0x124   :  { %v644_v33 = vmax.f32 %v620_v30, 0.0 }
 0x125   :  { %v624_v35 = vpop.f32.mrf.mxu1 }
 0x126   :  { %661 = vst.msk [vmem:[%s1153_s2 + $0x68] sm:$0xff] %vm647_vm1, %v644_v33  ;;  %v625_v36 = vadd.f32 %v795_v32, %v624_v35 }
 0x127   :  { %v626_v37 = vpop.f32.mrf.mxu1 }
 0x128   :  { %v645_v39 = vmax.f32 %v625_v36, 0.0 }
 0x129   :  { %v627_v40 = vpop.f32.mrf.mxu1 }
 0x12a   :  { %662 = vst.msk [vmem:[%s1153_s2 + $0x70] sm:$0xff] %vm647_vm1, %v645_v39  ;;  %v628_v41 = vadd.f32 %v798_v38, %v627_v40 }
 0x12b   :  { %v629_v42 = vpop.f32.mrf.mxu1 }
 0x12c   :  { %v646_v43 = vmax.f32 %v628_v41, 0.0 }
 0x12e   :  { %663 = vst.msk [vmem:[%s1153_s2 + $0x78] sm:$0xff] %vm647_vm1, %v646_v43 }

// kernel: forward.22
= control target key start
LH: loop header
LB: loop body
LE: loop exit
PB: predicated region body
PF: predicated region fallthrough
CT: control target
= control target key end

     0   :  { %vm76_vm0 = vcmask 130048   ;;  %vm198_vm1 = vcmask 261120   ;;  %s388_s1 = inlined_call_operand.vmem [shape: bf16[16,32], index: 1, kind: input, shape index: {}]   ;;  %s389_s0 = inlined_call_operand.vmem [shape: bf16[128,16], index: 0, kind: input, shape index: {}]   ;;  %s390_s2 = inlined_call_operand.vmem [shape: f32[128,32], index: 2, kind: output, shape index: {}]  }
   0x1   :  { %v265_v0 = vld [vmem:[%s388_s1] sm:$0xff]   ;;  %v268_v3 = vld [vmem:[%s389_s0 + $0x8] sm:$0xff]   ;;  %v270_v5 = vld [vmem:[%s389_s0 + $0x10] sm:$0xff]  }
   0x2   :  { %v266_v1 = vld [vmem:[%s389_s0] sm:$0xff]   ;;  %245 = vmatprep.subr.bf16.mxu0 %v265_v0  ;;  %263 = vmatprep.subr.bf16.mxu1 %v265_v0  ;;  %v269_v4 = vld [vmem:[%s389_s0 + $0x28] sm:$0xff]   ;;  %v271_v6 = vld [vmem:[%s389_s0 + $0x30] sm:$0xff]  }
   0x3   :  { %v267_v2 = vld [vmem:[%s389_s0 + $0x20] sm:$0xff]   ;;  %246 = vmatpush3.bf16.msra.mxu0 %v265_v0  ;;  %264 = vmatpush3.bf16.msra.mxu1 %v265_v0  ;;  %v272_v7 = vld [vmem:[%s389_s0 + $0x18] sm:$0xff]  }
   0x4   :  { %247 = vmatprep.mubr.msk.bf16.mxu0 %vm76_vm0, %v266_v1  ;;  %255 = vmatprep.mubr.msk.bf16.mxu1 %vm76_vm0, %v267_v2  ;;  %v273_v8 = vld [vmem:[%s389_s0 + $0x38] sm:$0xff]  }
   0x6   :  { %248 = vmatmul.mubr.msk.bf16.vlgmr.msra.gmra.mxu0 %vm76_vm0, %v268_v3  ;;  %256 = vmatmul.mubr.msk.bf16.vlgmr.msra.gmra.mxu1 %vm76_vm0, %v269_v4 }
   0x7   :  { %251 = vmatprep.mubr.msk.bf16.mxu0 %vm76_vm0, %v270_v5  ;;  %259 = vmatprep.mubr.msk.bf16.mxu1 %vm76_vm0, %v271_v6 }
   0xe   :  { %252 = vmatmul.mubr.msk.bf16.gmra.mxu0 %vm76_vm0, %v272_v7  ;;  %260 = vmatmul.mubr.msk.bf16.gmra.mxu1 %vm76_vm0, %v273_v8 }
  0xc6   :  { %v249_v9 = vpop.f32.mrf.mxu0  ;;  %v257_v10 = vpop.f32.mrf.mxu1 }
  0xc7   :  { %201 = vst.msk [vmem:[%s390_s2 + $0x10] sm:$0xff] %vm198_vm1, %v249_v9  ;;  %209 = vst.msk [vmem:[%s390_s2 + $0x50] sm:$0xff] %vm198_vm1, %v257_v10 }
  0xc8   :  { %v135_v11 = vpop.f32.mrf.mxu0  ;;  %v167_v12 = vpop.f32.mrf.mxu1 }
  0xc9   :  { %199 = vst.msk [vmem:[%s390_s2] sm:$0xff] %vm198_vm1, %v135_v11  ;;  %207 = vst.msk [vmem:[%s390_s2 + $0x40] sm:$0xff] %vm198_vm1, %v167_v12 }
  0xca   :  { %v250_v13 = vpop.f32.mrf.mxu0  ;;  %v258_v14 = vpop.f32.mrf.mxu1 }
  0xcb   :  { %202 = vst.msk [vmem:[%s390_s2 + $0x18] sm:$0xff] %vm198_vm1, %v250_v13  ;;  %210 = vst.msk [vmem:[%s390_s2 + $0x58] sm:$0xff] %vm198_vm1, %v258_v14 }
  0xcc   :  { %v138_v15 = vpop.f32.mrf.mxu0  ;;  %v170_v16 = vpop.f32.mrf.mxu1 }
  0xcd   :  { %200 = vst.msk [vmem:[%s390_s2 + $0x8] sm:$0xff] %vm198_vm1, %v138_v15  ;;  %208 = vst.msk [vmem:[%s390_s2 + $0x48] sm:$0xff] %vm198_vm1, %v170_v16 }
  0xce   :  { %v253_v17 = vpop.f32.mrf.mxu0  ;;  %v261_v18 = vpop.f32.mrf.mxu1 }
  0xcf   :  { %205 = vst.msk [vmem:[%s390_s2 + $0x30] sm:$0xff] %vm198_vm1, %v253_v17  ;;  %213 = vst.msk [vmem:[%s390_s2 + $0x70] sm:$0xff] %vm198_vm1, %v261_v18 }
  0xd0   :  { %v151_v19 = vpop.f32.mrf.mxu0  ;;  %v183_v20 = vpop.f32.mrf.mxu1 }
  0xd1   :  { %203 = vst.msk [vmem:[%s390_s2 + $0x20] sm:$0xff] %vm198_vm1, %v151_v19  ;;  %211 = vst.msk [vmem:[%s390_s2 + $0x60] sm:$0xff] %vm198_vm1, %v183_v20 }
  0xd2   :  { %v254_v21 = vpop.f32.mrf.mxu0  ;;  %v262_v22 = vpop.f32.mrf.mxu1 }
  0xd3   :  { %206 = vst.msk [vmem:[%s390_s2 + $0x38] sm:$0xff] %vm198_vm1, %v254_v21  ;;  %214 = vst.msk [vmem:[%s390_s2 + $0x78] sm:$0xff] %vm198_vm1, %v262_v22 }
  0xd4   :  { %v154_v23 = vpop.f32.mrf.mxu0  ;;  %v186_v24 = vpop.f32.mrf.mxu1 }
  0xd5   :  { %204 = vst.msk [vmem:[%s390_s2 + $0x28] sm:$0xff] %vm198_vm1, %v154_v23  ;;  %212 = vst.msk [vmem:[%s390_s2 + $0x68] sm:$0xff] %vm198_vm1, %v186_v24 }

// kernel: forward.24
= control target key start
LH: loop header
LB: loop body
LE: loop exit
PB: predicated region body
PF: predicated region fallthrough
CT: control target
= control target key end

     0   :  { %vm807_vm0 = vcmask 785408   ;;  %vm1236_vm1 = vcmask 261120   ;;  %s2393_s1 = inlined_call_operand.vmem [shape: bf16[864,32], index: 1, kind: input, shape index: {}]   ;;  %s2394_s0 = inlined_call_operand.vmem [shape: bf16[128,864], index: 0, kind: input, shape index: {}]   ;;  %s2395_s2 = inlined_call_operand.vmem [shape: f32[128,32], index: 2, kind: input, shape index: {}]   ;;  %s2396_s3 = inlined_call_operand.vmem [shape: f32[128,32], index: 3, kind: output, shape index: {}]  }
   0x1   :  { %v1609_v0 = vld [vmem:[%s2393_s1 + $0x78] sm:$0xff]   ;;  %v1613_v4 = vld [vmem:[%s2393_s1 + $0x70] sm:$0xff]   ;;  %v1617_v8 = vld [vmem:[%s2393_s1 + $0x68] sm:$0xff]  }
   0x2   :  { %v1610_v1 = vld [vmem:[%s2393_s1 + $0x38] sm:$0xff]   ;;  %1375 = vmatprep.subr.bf16.mxu0 %v1609_v0  ;;  %v1614_v5 = vld [vmem:[%s2393_s1 + $0x30] sm:$0xff]   ;;  %v1618_v9 = vld [vmem:[%s2393_s1 + $0x28] sm:$0xff]  }
   0x3   :  { %v1611_v2 = vld [vmem:[%s2393_s1 + $0xf8] sm:$0xff]   ;;  %1376 = vmatpush3.bf16.msra.mxu0 %v1610_v1  ;;  %v1615_v6 = vld [vmem:[%s2393_s1 + $0xf0] sm:$0xff]   ;;  %v1619_v10 = vld [vmem:[%s2393_s1 + $0xe8] sm:$0xff]  }
   0x4   :  { %v1612_v3 = vld [vmem:[%s2393_s1 + $0xb8] sm:$0xff]   ;;  %1439 = vmatprep.subr.bf16.mxu1 %v1611_v2  ;;  %1377 = vmatprep.subr.bf16.mxu0 %v1613_v4  ;;  %v1616_v7 = vld [vmem:[%s2393_s1 + $0xb0] sm:$0xff]   ;;  %v1620_v11 = vld [vmem:[%s2393_s1 + $0xa8] sm:$0xff]  }
   0x5   :  { %1440 = vmatpush3.bf16.msra.mxu1 %v1612_v3  ;;  %v1621_v12 = vld [vmem:[%s2393_s1 + $0x60] sm:$0xff]   ;;  %v1625_v16 = vld [vmem:[%s2393_s1 + $0x58] sm:$0xff]   ;;  %v1629_v20 = vld [vmem:[%s2393_s1 + $0x50] sm:$0xff]  }
   0x6   :  { %1441 = vmatprep.subr.bf16.mxu1 %v1615_v6  ;;  %v1622_v13 = vld [vmem:[%s2393_s1 + $0x20] sm:$0xff]   ;;  %v1626_v17 = vld [vmem:[%s2393_s1 + $0x18] sm:$0xff]   ;;  %v1630_v21 = vld [vmem:[%s2393_s1 + $0x10] sm:$0xff]  }
   0x7   :  { %1378 = vmatpush3.bf16.msra.mxu0 %v1614_v5  ;;  %v1623_v14 = vld [vmem:[%s2393_s1 + $0xe0] sm:$0xff]   ;;  %v1627_v18 = vld [vmem:[%s2393_s1 + $0xd8] sm:$0xff]   ;;  %v1631_v22 = vld [vmem:[%s2393_s1 + $0xd0] sm:$0xff]  }
   0x8   :  { %1379 = vmatprep.subr.bf16.mxu0 %v1617_v8  ;;  %v1624_v15 = vld [vmem:[%s2393_s1 + $0xa0] sm:$0xff]   ;;  %v1628_v19 = vld [vmem:[%s2393_s1 + $0x98] sm:$0xff]   ;;  %v1632_v23 = vld [vmem:[%s2393_s1 + $0x90] sm:$0xff]  }
   0x9   :  { %1442 = vmatpush3.bf16.msra.mxu1 %v1616_v7  ;;  %v1633_v24 = vld [vmem:[%s2393_s1 + $0x48] sm:$0xff]   ;;  %v1637_v28 = vld [vmem:[%s2393_s1 + $0x40] sm:$0xff]   ;;  %v1644_v34 = vld [vmem:[%s2393_s1 + $0x178] sm:$0xff]  }
   0xa   :  { %1443 = vmatprep.subr.bf16.mxu1 %v1619_v10  ;;  %v1634_v25 = vld [vmem:[%s2393_s1 + $0x8] sm:$0xff]   ;;  %v1638_v29 = vld [vmem:[%s2393_s1] sm:$0xff]   ;;  %v1648_v37 = vld [vmem:[%s2393_s1 + $0x138] sm:$0xff]  }
   0xb   :  { %1380 = vmatpush3.bf16.msra.mxu0 %v1618_v9  ;;  %v1635_v26 = vld [vmem:[%s2393_s1 + $0xc8] sm:$0xff]   ;;  %v1639_v30 = vld [vmem:[%s2393_s1 + $0xc0] sm:$0xff]   ;;  %v1649_v38 = vld [vmem:[%s2394_s0 + $0x3c] ss:$28 sps:$4 sm:$0xff]  }
   0xc   :  { %1381 = vmatprep.subr.bf16.mxu0 %v1621_v12  ;;  %v1636_v27 = vld [vmem:[%s2393_s1 + $0x88] sm:$0xff]   ;;  %v1640_v31 = vld [vmem:[%s2394_s0] ss:$28 sps:$4 sm:$0xff]   ;;  %v1651_v39 = vld [vmem:[%s2394_s0 + $0x38] ss:$28 sps:$4 sm:$0xff]  }
   0xd   :  { %1444 = vmatpush3.bf16.msra.mxu1 %v1620_v11  ;;  %v1642_v32 = vld [vmem:[%s2394_s0 + $0x4] ss:$28 sps:$4 sm:$0xff]   ;;  %v1647_v36 = vld [vmem:[%s2394_s0 + $0xc] ss:$28 sps:$4 sm:$0xff]   ;;  %v1652_v40 = vld [vmem:[%s2393_s1 + $0x170] sm:$0xff]  }
   0xe   :  { %1445 = vmatprep.subr.bf16.mxu1 %v1623_v14  ;;  %v1643_v33 = vld [vmem:[%s2393_s1 + $0x80] sm:$0xff]   ;;  %864 = vmatprep.mubr.bf16.mxu0 %v1642_v32  ;;  %v1655_v42 = vld [vmem:[%s2393_s1 + $0x130] sm:$0xff]   ;;  %v1660_v45 = vld [vmem:[%s2393_s1 + $0x168] sm:$0xff]  }
   0xf   :  { %1382 = vmatpush3.bf16.msra.mxu0 %v1622_v13  ;;  %v1645_v35 = vld [vmem:[%s2394_s0 + $0x8] ss:$28 sps:$4 sm:$0xff]   ;;  %961 = vmatprep.mubr.bf16.mxu1 %v1647_v36  ;;  %v1656_v43 = vld [vmem:[%s2394_s0 + $0x40] ss:$28 sps:$4 sm:$0xff]   ;;  %v1657_v44 = vld [vmem:[%s2394_s0 + $0x74] ss:$28 sps:$4 sm:$0xff]  }
  0x10   :  { %1383 = vmatprep.subr.bf16.mxu0 %v1625_v16  ;;  %v1653_v41 = vld [vmem:[%s2394_s0 + $0x44] ss:$28 sps:$4 sm:$0xff]   ;;  %v1661_v46 = vld [vmem:[%s2394_s0 + $0x7c] ss:$28 sps:$4 sm:$0xff]   ;;  %v1663_v47 = vld [vmem:[%s2393_s1 + $0x128] sm:$0xff]  }
  0x11   :  { %1446 = vmatpush3.bf16.msra.mxu1 %v1624_v15  ;;  %v1659_v48 = vld [vmem:[%s2394_s0 + $0x70] ss:$28 sps:$4 sm:$0xff]   ;;  %v1668_v50 = vld [vmem:[%s2393_s1 + $0x160] sm:$0xff]   ;;  %v1664_v51 = vld [vmem:[%s2394_s0 + $0x78] ss:$28 sps:$4 sm:$0xff]  }
  0x12   :  { %1447 = vmatprep.subr.bf16.mxu1 %v1627_v18  ;;  %v1665_v49 = vld [vmem:[%s2394_s0 + $0xac] ss:$28 sps:$4 sm:$0xff]   ;;  %v1671_v52 = vld [vmem:[%s2393_s1 + $0x120] sm:$0xff]   ;;  %v1669_v53 = vld [vmem:[%s2394_s0 + $0xb4] ss:$28 sps:$4 sm:$0xff]  }
  0x13   :  { %1384 = vmatpush3.bf16.msra.mxu0 %v1626_v17  ;;  %v1676_v54 = vld [vmem:[%s2393_s1 + $0x158] sm:$0xff]   ;;  %v1667_v55 = vld [vmem:[%s2394_s0 + $0xa8] ss:$28 sps:$4 sm:$0xff]   ;;  %v1672_v59 = vld [vmem:[%s2394_s0 + $0xb0] ss:$28 sps:$4 sm:$0xff]  }
  0x14   :  { %1385 = vmatprep.subr.bf16.mxu0 %v1629_v20  ;;  %v1679_v56 = vld [vmem:[%s2393_s1 + $0x118] sm:$0xff]   ;;  %v1673_v57 = vld [vmem:[%s2394_s0 + $0xe4] ss:$28 sps:$4 sm:$0xff]   ;;  %v1681_v58 = vld [vmem:[%s2393_s1 + $0x1a8] sm:$0xff]  }
  0x15   :  { %1448 = vmatpush3.bf16.msra.mxu1 %v1628_v19  ;;  %v1685_v60 = vld [vmem:[%s2393_s1 + $0x150] sm:$0xff]   ;;  %v1677_v61 = vld [vmem:[%s2394_s0 + $0xec] ss:$28 sps:$4 sm:$0xff]   ;;  %v1675_v63 = vld [vmem:[%s2394_s0 + $0xe0] ss:$28 sps:$4 sm:$0xff]  }
  0x16   :  { %1449 = vmatprep.subr.bf16.mxu1 %v1631_v22  ;;  %v1688_v62 = vld [vmem:[%s2393_s1 + $0x110] sm:$0xff]   ;;  %v1692_v0 = vld [vmem:[%s2393_s1 + $0x1a0] sm:$0xff]   ;;  %v1682_v1 = vld [vmem:[%s2394_s0 + $0x11c] ss:$28 sps:$4 sm:$0xff]  }
  0x17   :  { %1386 = vmatpush3.bf16.msra.mxu0 %v1630_v21  ;;  %v1694_v2 = vld [vmem:[%s2393_s1 + $0x148] sm:$0xff]   ;;  %v1686_v4 = vld [vmem:[%s2394_s0 + $0x124] ss:$28 sps:$4 sm:$0xff]   ;;  %v1699_v6 = vld [vmem:[%s2393_s1 + $0x198] sm:$0xff]  }
  0x18   :  { %1387 = vmatprep.subr.bf16.mxu0 %v1633_v24  ;;  %v1680_v3 = vld [vmem:[%s2394_s0 + $0xe8] ss:$28 sps:$4 sm:$0xff]   ;;  %v1684_v7 = vld [vmem:[%s2394_s0 + $0x118] ss:$28 sps:$4 sm:$0xff]   ;;  %v1689_v12 = vld [vmem:[%s2394_s0 + $0x120] ss:$28 sps:$4 sm:$0xff]  }
  0x19   :  { %1450 = vmatpush3.bf16.msra.mxu1 %v1632_v23  ;;  %v1697_v5 = vld [vmem:[%s2393_s1 + $0x108] sm:$0xff]   ;;  %v1703_v8 = vld [vmem:[%s2393_s1 + $0x140] sm:$0xff]   ;;  %v1704_v9 = vld [vmem:[%s2393_s1 + $0x190] sm:$0xff]  }
  0x1a   :  { %1451 = vmatprep.subr.bf16.mxu1 %v1635_v26  ;;  %v1690_v10 = vld [vmem:[%s2394_s0 + $0x154] ss:$28 sps:$4 sm:$0xff]   ;;  %v1707_v11 = vld [vmem:[%s2393_s1 + $0x100] sm:$0xff]   ;;  %v1709_v13 = vld [vmem:[%s2393_s1 + $0x188] sm:$0xff]  }
  0x1b   :  { %1388 = vmatpush3.bf16.msra.mxu0 %v1634_v25  ;;  %v1695_v14 = vld [vmem:[%s2394_s0 + $0x15c] ss:$28 sps:$4 sm:$0xff]   ;;  %v1713_v15 = vld [vmem:[%s2393_s1 + $0x180] sm:$0xff]   ;;  %v1693_v16 = vld [vmem:[%s2394_s0 + $0x150] ss:$28 sps:$4 sm:$0xff]  }
  0x1c   :  { %1389 = vmatprep.subr.bf16.mxu0 %v1637_v28  ;;  %v1700_v17 = vld [vmem:[%s2394_s0 + $0x18c] ss:$28 sps:$4 sm:$0xff]   ;;  %v1698_v18 = vld [vmem:[%s2394_s0 + $0x158] ss:$28 sps:$4 sm:$0xff]   ;;  %v1721_v32 = vld [vmem:[%s2394_s0 + $0x80] ss:$28 sps:$4 sm:$0xff]  }
  0x1d   :  { %1452 = vmatpush3.bf16.msra.mxu1 %v1636_v27  ;;  %v1705_v19 = vld [vmem:[%s2394_s0 + $0x194] ss:$28 sps:$4 sm:$0xff]   ;;  %v1702_v20 = vld [vmem:[%s2394_s0 + $0x188] ss:$28 sps:$4 sm:$0xff]  }
  0x1e   :  { %1453 = vmatprep.subr.bf16.mxu1 %v1639_v30  ;;  %v1712_v21 = vld [vmem:[%s2394_s0 + $0x14] ss:$28 sps:$4 sm:$0xff]   ;;  %v1716_v25 = vld [vmem:[%s2394_s0 + $0x4c] ss:$28 sps:$4 sm:$0xff]   ;;  %v1723_v30 = vld [vmem:[%s2394_s0 + $0xc0] ss:$28 sps:$4 sm:$0xff]  }
  0x1f   :  { %1390 = vmatpush3.bf16.msra.mxu0 %v1638_v29  ;;  %v1708_v22 = vld [vmem:[%s2394_s0 + $0x190] ss:$28 sps:$4 sm:$0xff]   ;;  %v1714_v23 = vld [vmem:[%s2394_s0 + $0x18] ss:$28 sps:$4 sm:$0xff]   ;;  %v1722_v27 = vld [vmem:[%s2394_s0 + $0x88] ss:$28 sps:$4 sm:$0xff]  }
  0x20   :  { %1503 = vmatprep.subr.bf16.mxu0 %v1644_v34  ;;  %v1710_v24 = vld [vmem:[%s2394_s0 + $0x10] ss:$28 sps:$4 sm:$0xff]   ;;  %v1718_v28 = vld [vmem:[%s2394_s0 + $0x48] ss:$28 sps:$4 sm:$0xff]   ;;  %v1726_v36 = vld [vmem:[%s2394_s0 + $0xb8] ss:$28 sps:$4 sm:$0xff]  }
  0x21   :  { %1454 = vmatpush3.bf16.msra.mxu1 %v1643_v33  ;;  %v1715_v26 = vld [vmem:[%s2394_s0 + $0x50] ss:$28 sps:$4 sm:$0xff]   ;;  %v1719_v29 = vld [vmem:[%s2394_s0 + $0x84] ss:$28 sps:$4 sm:$0xff]   ;;  %v1724_v33 = vld [vmem:[%s2394_s0 + $0xbc] ss:$28 sps:$4 sm:$0xff]  }
  0x22   :  { %865 = vmatmul.mubr.bf16.vlgmr.msra.gmra.mxu0 %v1640_v31  ;;  %1581 = vmatprep.subr.bf16.mxu1 %v1681_v58  ;;  %v1730_v31 = vld [vmem:[%s2394_s0 + $0xf8] ss:$28 sps:$4 sm:$0xff]   ;;  %v1731_v34 = vld [vmem:[%s2394_s0 + $0x130] ss:$28 sps:$4 sm:$0xff]  }
  0x23   :  { %1504 = vmatpush3.bf16.msra.mxu0 %v1648_v37  ;;  %872 = vmatprep.mubr.bf16.mxu0 %v1649_v38  ;;  %v1727_v37 = vld [vmem:[%s2394_s0 + $0xf4] ss:$28 sps:$4 sm:$0xff]   ;;  %v1739_v38 = vld [vmem:[%s2394_s0 + $0x1a0] ss:$28 sps:$4 sm:$0xff]  }
  0x24   :  { %962 = vmatmul.mubr.bf16.vlgmr.msra.gmra.mxu1 %v1645_v35  ;;  %1505 = vmatprep.subr.bf16.mxu0 %v1652_v40  ;;  %v1738_v35 = vld [vmem:[%s2394_s0 + $0x168] ss:$28 sps:$4 sm:$0xff]  }
  0x25   :  { %969 = vmatprep.mubr.bf16.mxu1 %v1653_v41  ;;  %1582 = vmatpush3.bf16.msra.mxu1 %v1681_v58  ;;  %v1732_v40 = vld [vmem:[%s2394_s0 + $0x12c] ss:$28 sps:$4 sm:$0xff]  }
  0x26   :  { %1583 = vmatprep.subr.bf16.mxu1 %v1692_v0  ;;  %v1734_v41 = vld [vmem:[%s2394_s0 + $0x128] ss:$28 sps:$4 sm:$0xff]  }
  0x27   :  { %1506 = vmatpush3.bf16.msra.mxu0 %v1655_v42  ;;  %v1735_v42 = vld [vmem:[%s2394_s0 + $0x164] ss:$28 sps:$4 sm:$0xff]  }
  0x28   :  { %1507 = vmatprep.subr.bf16.mxu0 %v1660_v45  ;;  %v1742_v45 = vld [vmem:[%s2394_s0 + $0x198] ss:$28 sps:$4 sm:$0xff]  }
  0x29   :  { %1584 = vmatpush3.bf16.msra.mxu1 %v1692_v0 }
  0x2a   :  { %873 = vmatmul.mubr.bf16.gmra.mxu0 %v1651_v39  ;;  %1585 = vmatprep.subr.bf16.mxu1 %v1699_v6  ;;  %v1729_v39 = vld [vmem:[%s2394_s0 + $0xf0] ss:$28 sps:$4 sm:$0xff]  }
  0x2b   :  { %880 = vmatprep.mubr.bf16.mxu0 %v1657_v44  ;;  %1508 = vmatpush3.bf16.msra.mxu0 %v1663_v47  ;;  %v1740_v44 = vld [vmem:[%s2394_s0 + $0x19c] ss:$28 sps:$4 sm:$0xff]  }
  0x2c   :  { %970 = vmatmul.mubr.bf16.gmra.mxu1 %v1656_v43  ;;  %1509 = vmatprep.subr.bf16.mxu0 %v1668_v50  ;;  %v1737_v43 = vld [vmem:[%s2394_s0 + $0x160] ss:$28 sps:$4 sm:$0xff]  }
  0x2d   :  { %977 = vmatprep.mubr.bf16.mxu1 %v1661_v46  ;;  %1586 = vmatpush3.bf16.msra.mxu1 %v1699_v6 }
  0x2e   :  { %1587 = vmatprep.subr.bf16.mxu1 %v1704_v9 }
  0x2f   :  { %1510 = vmatpush3.bf16.msra.mxu0 %v1671_v52 }
  0x30   :  { %1511 = vmatprep.subr.bf16.mxu0 %v1676_v54 }
  0x31   :  { %1588 = vmatpush3.bf16.msra.mxu1 %v1704_v9 }
  0x32   :  { %881 = vmatmul.mubr.bf16.gmra.mxu0 %v1659_v48  ;;  %1589 = vmatprep.subr.bf16.mxu1 %v1709_v13 }
  0x33   :  { %888 = vmatprep.mubr.bf16.mxu0 %v1665_v49  ;;  %1512 = vmatpush3.bf16.msra.mxu0 %v1679_v56 }
  0x34   :  { %978 = vmatmul.mubr.bf16.gmra.mxu1 %v1664_v51  ;;  %1513 = vmatprep.subr.bf16.mxu0 %v1685_v60 }
  0x35   :  { %985 = vmatprep.mubr.bf16.mxu1 %v1669_v53  ;;  %1590 = vmatpush3.bf16.msra.mxu1 %v1709_v13 }
  0x36   :  { %1591 = vmatprep.subr.bf16.mxu1 %v1713_v15 }
  0x37   :  { %1514 = vmatpush3.bf16.msra.mxu0 %v1688_v62 }
  0x38   :  { %1515 = vmatprep.subr.bf16.mxu0 %v1694_v2 }
  0x39   :  { %1592 = vmatpush3.bf16.msra.mxu1 %v1713_v15 }
  0x3a   :  { %889 = vmatmul.mubr.bf16.gmra.mxu0 %v1667_v55 }
  0x3b   :  { %896 = vmatprep.mubr.bf16.mxu0 %v1673_v57  ;;  %1516 = vmatpush3.bf16.msra.mxu0 %v1697_v5 }
  0x3c   :  { %986 = vmatmul.mubr.bf16.gmra.mxu1 %v1672_v59  ;;  %1517 = vmatprep.subr.bf16.mxu0 %v1703_v8 }
  0x3d   :  { %993 = vmatprep.mubr.bf16.mxu1 %v1677_v61 }
  0x3f   :  { %1518 = vmatpush3.bf16.msra.mxu0 %v1707_v11 }
  0x42   :  { %897 = vmatmul.mubr.bf16.gmra.mxu0 %v1675_v63 }
  0x43   :  { %904 = vmatprep.mubr.bf16.mxu0 %v1682_v1 }
  0x44   :  { %994 = vmatmul.mubr.bf16.gmra.mxu1 %v1680_v3 }
  0x45   :  { %1001 = vmatprep.mubr.bf16.mxu1 %v1686_v4 }
  0x4a   :  { %905 = vmatmul.mubr.bf16.gmra.mxu0 %v1684_v7 }
  0x4b   :  { %912 = vmatprep.mubr.bf16.mxu0 %v1690_v10 }
  0x4c   :  { %1002 = vmatmul.mubr.bf16.gmra.mxu1 %v1689_v12 }
  0x4d   :  { %1009 = vmatprep.mubr.bf16.mxu1 %v1695_v14 }
  0x52   :  { %913 = vmatmul.mubr.bf16.gmra.mxu0 %v1693_v16 }
  0x53   :  { %920 = vmatprep.mubr.bf16.mxu0 %v1700_v17 }
  0x54   :  { %1010 = vmatmul.mubr.bf16.gmra.mxu1 %v1698_v18 }
  0x55   :  { %1017 = vmatprep.mubr.bf16.mxu1 %v1705_v19 }
  0x5a   :  { %921 = vmatmul.mubr.bf16.gmra.mxu0 %v1702_v20 }
  0x5b   :  { %1058 = vmatprep.mubr.bf16.mxu0 %v1712_v21 }
  0x5c   :  { %1018 = vmatmul.mubr.bf16.gmra.mxu1 %v1708_v22 }
  0x5d   :  { %1593 = vmatprep.mubr.msk.bf16.mxu1 %vm807_vm0, %v1714_v23 }
  0x62   :  { %1059 = vmatmul.mubr.bf16.vlgmr.msra.gmra.mxu0 %v1710_v24 }
  0x63   :  { %1066 = vmatprep.mubr.bf16.mxu0 %v1716_v25 }
  0x64   :  { %1594 = vmatmul.mubr.msk.bf16.vlgmr.msra.gmra.mxu1 %vm807_vm0, %v1715_v26 }
  0x65   :  { %1597 = vmatprep.mubr.msk.bf16.mxu1 %vm807_vm0, %v1722_v27 }
  0x6a   :  { %1067 = vmatmul.mubr.bf16.gmra.mxu0 %v1718_v28 }
  0x6b   :  { %1074 = vmatprep.mubr.bf16.mxu0 %v1719_v29 }
  0x6c   :  { %1598 = vmatmul.mubr.msk.bf16.gmra.mxu1 %vm807_vm0, %v1723_v30 }
  0x6d   :  { %1601 = vmatprep.mubr.msk.bf16.mxu1 %vm807_vm0, %v1730_v31 }
  0x72   :  { %1075 = vmatmul.mubr.bf16.gmra.mxu0 %v1721_v32 }
  0x73   :  { %1082 = vmatprep.mubr.bf16.mxu0 %v1724_v33 }
  0x74   :  { %1602 = vmatmul.mubr.msk.bf16.gmra.mxu1 %vm807_vm0, %v1731_v34 }
  0x75   :  { %1605 = vmatprep.mubr.msk.bf16.mxu1 %vm807_vm0, %v1738_v35 }
  0x7a   :  { %1083 = vmatmul.mubr.bf16.gmra.mxu0 %v1726_v36 }
  0x7b   :  { %1090 = vmatprep.mubr.bf16.mxu0 %v1727_v37 }
  0x7c   :  { %1606 = vmatmul.mubr.msk.bf16.gmra.mxu1 %vm807_vm0, %v1739_v38 }
  0x82   :  { %1091 = vmatmul.mubr.bf16.gmra.mxu0 %v1729_v39 }
  0x83   :  { %1098 = vmatprep.mubr.bf16.mxu0 %v1732_v40 }
  0x8a   :  { %1099 = vmatmul.mubr.bf16.gmra.mxu0 %v1734_v41 }
  0x8b   :  { %1106 = vmatprep.mubr.bf16.mxu0 %v1735_v42  ;;  %v187_v42 = vld [vmem:[%s2395_s2] sm:$0xff] }
  0x92   :  { %1107 = vmatmul.mubr.bf16.gmra.mxu0 %v1737_v43 }
  0x93   :  { %1114 = vmatprep.mubr.bf16.mxu0 %v1740_v44 }
  0x9a   :  { %1115 = vmatmul.mubr.bf16.gmra.mxu0 %v1742_v45 }
  0xe2   :  { %v1391_v46 = vpop.f32.mrf.mxu0 }
  0xe4   :  { %v1392_v47 = vpop.f32.mrf.mxu0  ;;  %v2101_v48 = vpop.f32.mrf.mxu1 }
  0xe5   :  { %v1393_v40 = vadd.f32 %v1392_v47, %v1391_v46  ;;  %v188_v46 = vld [vmem:[%s2395_s2 + $0x8] sm:$0xff] }
  0xe6   :  { %v2103_v49 = vpop.f32.mrf.mxu0  ;;  %v1456_v50 = vpop.f32.mrf.mxu1 }
  0xe8   :  { %v1395_v51 = vpop.f32.mrf.mxu0  ;;  %v2105_v52 = vpop.f32.mrf.mxu1 }
  0xea   :  { %v2107_v53 = vpop.f32.mrf.mxu0  ;;  %v2109_v54 = vpop.f32.mrf.mxu1 }
  0xec   :  { %v2111_v55 = vpop.f32.mrf.mxu0  ;;  %v2113_v56 = vpop.f32.mrf.mxu1 }
  0xee   :  { %v2115_v57 = vpop.f32.mrf.mxu0  ;;  %v2117_v58 = vpop.f32.mrf.mxu1 }
  0xf0   :  { %v2119_v59 = vpop.f32.mrf.mxu0  ;;  %v2121_v60 = vpop.f32.mrf.mxu1 }
  0xf2   :  { %v2123_v61 = vpop.f32.mrf.mxu0  ;;  %v2125_v62 = vpop.f32.mrf.mxu1 }
  0xf4   :  { %v2127_v63 = vpop.f32.mrf.mxu0  ;;  %v2129_v0 = vpop.f32.mrf.mxu1 }
  0xf6   :  { %v2131_v1 = vpop.f32.mrf.mxu0  ;;  %v2133_v2 = vpop.f32.mrf.mxu1 }
  0xf8   :  { %v2135_v3 = vpop.f32.mrf.mxu0  ;;  %v2137_v4 = vpop.f32.mrf.mxu1 }
  0xfa   :  { %v2139_v5 = vpop.f32.mrf.mxu0  ;;  %v2141_v6 = vpop.f32.mrf.mxu1 }
  0xfc   :  { %v2143_v7 = vpop.f32.mrf.mxu0  ;;  %v2145_v8 = vpop.f32.mrf.mxu1 }
  0xfe   :  { %v2147_v9 = vpop.f32.mrf.mxu0  ;;  %v2149_v10 = vpop.f32.mrf.mxu1 }
 0x100   :  { %v2151_v11 = vpop.f32.mrf.mxu0  ;;  %v2153_v12 = vpop.f32.mrf.mxu1 }
 0x102   :  { %v2155_v13 = vpop.f32.mrf.mxu0  ;;  %v2157_v14 = vpop.f32.mrf.mxu1 }
 0x104   :  { %v2159_v15 = vpop.f32.mrf.mxu0  ;;  %v2161_v16 = vpop.f32.mrf.mxu1 }
 0x106   :  { %v2163_v17 = vpop.f32.mrf.mxu0  ;;  %v2165_v18 = vpop.f32.mrf.mxu1 }
 0x108   :  { %v2167_v19 = vpop.f32.mrf.mxu0  ;;  %v2169_v20 = vpop.f32.mrf.mxu1 }
 0x10a   :  { %v2171_v21 = vpop.f32.mrf.mxu0  ;;  %v2173_v22 = vpop.f32.mrf.mxu1 }
 0x10c   :  { %v2175_v23 = vpop.f32.mrf.mxu0  ;;  %v2177_v24 = vpop.f32.mrf.mxu1 }
 0x10e   :  { %v2179_v25 = vpop.f32.mrf.mxu0  ;;  %v2181_v26 = vpop.f32.mrf.mxu1 }
 0x110   :  { %v2183_v27 = vpop.f32.mrf.mxu0  ;;  %v2185_v28 = vpop.f32.mrf.mxu1 }
 0x112   :  { %v2187_v29 = vpop.f32.mrf.mxu0  ;;  %v2189_v30 = vpop.f32.mrf.mxu1 }
 0x114   :  { %v2191_v31 = vpop.f32.mrf.mxu0  ;;  %v2193_v32 = vpop.f32.mrf.mxu1 }
 0x116   :  { %v2195_v33 = vpop.f32.mrf.mxu0  ;;  %v2197_v34 = vpop.f32.mrf.mxu1 }
 0x117   :  { %2397 = vst [vmem:[#allocation2_spill] sm:$0xff] %v2195_v33 }
 0x118   :  { %v2199_v35 = vpop.f32.mrf.mxu0  ;;  %v2201_v36 = vpop.f32.mrf.mxu1 }
 0x119   :  { %2398 = vst [vmem:[#allocation3_spill] sm:$0xff] %v2199_v35  ;;  %2399 = vst [vmem:[#allocation4_spill] sm:$0xff] %v2201_v36  ;;  %v867_v36 = vadd.f32 %v1393_v40, %v187_v42 }
 0x11a   :  { %v2203_v37 = vpop.f32.mrf.mxu0  ;;  %v2205_v38 = vpop.f32.mrf.mxu1 }
 0x11b   :  { %2400 = vst [vmem:[#allocation5_spill] sm:$0xff] %v2203_v37  ;;  %2401 = vst [vmem:[#allocation6_spill] sm:$0xff] %v2205_v38  ;;  %v1457_v37 = vadd.f32 %v1456_v50, %v2101_v48  ;;  %v1396_v38 = vadd.f32 %v1395_v51, %v2103_v49  ;;  %v1460_v48 = vadd.f32 %v2109_v54, %v2105_v52  ;;  %v189_v49 = vld [vmem:[%s2395_s2 + $0x10] sm:$0xff] }
 0x11c   :  { %v2207_v39 = vpop.f32.mrf.mxu0  ;;  %v2209_v41 = vpop.f32.mrf.mxu1 }
 0x11d   :  { %2402 = vst [vmem:[#allocation7_spill] sm:$0xff] %v2207_v39  ;;  %2403 = vst [vmem:[#allocation8_spill] sm:$0xff] %v2209_v41  ;;  %v964_v39 = vadd.f32 %v1457_v37, %v867_v36  ;;  %v1402_v36 = vadd.f32 %v2119_v59, %v2115_v57  ;;  %v1466_v57 = vadd.f32 %v2125_v62, %v2121_v60  ;;  %v191_v59 = vld [vmem:[%s2395_s2 + $0x20] sm:$0xff] }
 0x11e   :  { %v2214_v43 = vpop.f32.mrf.mxu0  ;;  %v2216_v44 = vpop.f32.mrf.mxu1 }
 0x11f   :  { %2404 = vst [vmem:[#allocation9_spill] sm:$0xff] %v2214_v43  ;;  %2405 = vst [vmem:[#allocation10_spill] sm:$0xff] %v2216_v44  ;;  %v1399_v43 = vadd.f32 %v2111_v55, %v2107_v53 }
 0x120   :  { %v2218_v45 = vpop.f32.mrf.mxu0  ;;  %v2222_v35 = vpop.f32.mrf.mxu1 }
 0x121   :  { %2406 = vst [vmem:[#allocation11_spill] sm:$0xff] %v2218_v45  ;;  %2407 = vst [vmem:[#allocation12_spill] sm:$0xff] %v2222_v35  ;;  %v870_v45 = vadd.f32 %v1396_v38, %v188_v46  ;;  %v875_v33 = vadd.f32 %v1399_v43, %v189_v49  ;;  %v190_v38 = vld [vmem:[%s2395_s2 + $0x18] sm:$0xff] }
 0x122   :  { %v1519_v47 = vpop.f32.mrf.mxu0  ;;  %v2227_v41 = vpop.f32.mrf.mxu1 }
 0x123   :  { %2408 = vst [vmem:[#allocation13_spill] sm:$0xff] %v2227_v41  ;;  %v1463_v41 = vadd.f32 %v2117_v58, %v2113_v56  ;;  %v967_v55 = vadd.f32 %v1460_v48, %v870_v45  ;;  %v1405_v56 = vadd.f32 %v2127_v63, %v2123_v61  ;;  %v878_v45 = vadd.f32 %v1402_v36, %v190_v38 }
 0x124   :  { %v1520_v44 = vpop.f32.mrf.mxu0  ;;  %v1595_v51 = vpop.f32.mrf.mxu1  ;;  %v1411_v38 = vadd.f32 %v2143_v7, %v2139_v5 }
 0x125   :  { %v1521_v50 = vadd.f32 %v1520_v44, %v1519_v47  ;;  %v972_v47 = vadd.f32 %v1463_v41, %v875_v33  ;;  %v883_v63 = vadd.f32 %v1405_v56, %v191_v59  ;;  %v975_v62 = vadd.f32 %v1466_v57, %v878_v45  ;;  %v194_v59 = vld [vmem:[%s2395_s2 + $0x38] sm:$0xff] }
 0x126   :  { %v1522_v40 = vpop.f32.mrf.mxu0  ;;  %v1157_v35 = vpop.f32.mrf.mxu1  ;;  %v1414_v45 = vadd.f32 %v2151_v11, %v2147_v9 }
 0x127   :  { %v1061_v42 = vadd.f32 %v1521_v50, %v964_v39  ;;  %v1469_v50 = vadd.f32 %v2133_v2, %v2129_v0 }
 0x128   :  { %v1523_v53 = vpop.f32.mrf.mxu0  ;;  %v1596_v54 = vpop.f32.mrf.mxu1  ;;  %v894_v11 = vadd.f32 %v1414_v45, %v194_v59  ;;  %v199_v59 = vld [vmem:[%s2395_s2 + $0x60] sm:$0xff] }
 0x129   :  { %v1524_v37 = vadd.f32 %v1523_v53, %v1522_v40  ;;  %v1158_v52 = vadd.f32 %v1157_v35, %v1061_v42  ;;  %v1408_v40 = vadd.f32 %v2135_v3, %v2131_v1  ;;  %v980_v2 = vadd.f32 %v1469_v50, %v883_v63  ;;  %v195_v63 = vld [vmem:[%s2395_s2 + $0x40] sm:$0xff] }
 0x12a   :  { %v1525_v44 = vpop.f32.mrf.mxu0  ;;  %v1160_v43 = vpop.f32.mrf.mxu1 }
 0x12b   :  { %v1220_v39 = vmax.f32 %v1158_v52, 0.0  ;;  %v1064_v46 = vadd.f32 %v1524_v37, %v967_v55  ;;  %v192_v55 = vld [vmem:[%s2395_s2 + $0x28] sm:$0xff] }
 0x12c   :  { %v1526_v58 = vpop.f32.mrf.mxu0  ;;  %v1599_v41 = vpop.f32.mrf.mxu1  ;;  %v886_v3 = vadd.f32 %v1408_v40, %v192_v55  ;;  %v1420_v55 = vadd.f32 %v2167_v19, %v2163_v17 }
 0x12d   :  { %1237 = vst.msk [vmem:[%s2396_s3] sm:$0xff] %vm1236_vm1, %v1220_v39  ;;  %v1527_v35 = vadd.f32 %v1526_v58, %v1525_v44  ;;  %v1161_v48 = vadd.f32 %v1160_v43, %v1064_v46  ;;  %v193_v44 = vld [vmem:[%s2395_s2 + $0x30] sm:$0xff]  ;;  %v1475_v58 = vadd.f32 %v2149_v10, %v2145_v8 }
 0x12e   :  { %v1528_v33 = vpop.f32.mrf.mxu0  ;;  %v1173_v37 = vpop.f32.mrf.mxu1  ;;  %v891_v7 = vadd.f32 %v1411_v38, %v193_v44 }
 0x12f   :  { %v1069_v49 = vadd.f32 %v1527_v35, %v972_v47  ;;  %v1221_v61 = vmax.f32 %v1161_v48, 0.0 }
 0x130   :  { %v1529_v60 = vpop.f32.mrf.mxu0  ;;  %v1600_v47 = vpop.f32.mrf.mxu1  ;;  %v988_v10 = vadd.f32 %v1475_v58, %v891_v7  ;;  %v198_v58 = vld [vmem:[%s2395_s2 + $0x58] sm:$0xff] }
 0x131   :  { %v1166_v42 = vadd.f32 %v1595_v51, %v1069_v49  ;;  %1238 = vst.msk [vmem:[%s2396_s3 + $0x8] sm:$0xff] %vm1236_vm1, %v1221_v61  ;;  %v1530_v53 = vadd.f32 %v1529_v60, %v1528_v33  ;;  %v1472_v51 = vadd.f32 %v2141_v6, %v2137_v4  ;;  %v1417_v49 = vadd.f32 %v2159_v15, %v2155_v13 }
 0x132   :  { %v1531_v36 = vpop.f32.mrf.mxu0  ;;  %v1176_v48 = vpop.f32.mrf.mxu1  ;;  %v1478_v61 = vadd.f32 %v2157_v14, %v2153_v12 }
 0x133   :  { %v1222_v52 = vmax.f32 %v1166_v42, 0.0  ;;  %v1072_v0 = vadd.f32 %v1530_v53, %v975_v62  ;;  %v983_v6 = vadd.f32 %v1472_v51, %v886_v3  ;;  %v899_v15 = vadd.f32 %v1417_v49, %v195_v63  ;;  %v197_v3 = vld [vmem:[%s2395_s2 + $0x50] sm:$0xff] }
 0x134   :  { %v1532_v1 = vpop.f32.mrf.mxu0  ;;  %v1603_v40 = vpop.f32.mrf.mxu1  ;;  %v1481_v53 = vadd.f32 %v2165_v18, %v2161_v16  ;;  %v991_v14 = vadd.f32 %v1478_v61, %v894_v11  ;;  %v1493_v49 = vadd.f32 %v2197_v34, %v2193_v32  ;;  %v2410_v11 = vld [vmem:[#allocation3_spill] sm:$0xff] }
 0x135   :  { %1239 = vst.msk [vmem:[%s2396_s3 + $0x10] sm:$0xff] %vm1236_vm1, %v1222_v52  ;;  %v1169_v39 = vadd.f32 %v1596_v54, %v1072_v0  ;;  %v1533_v46 = vadd.f32 %v1532_v1, %v1531_v36  ;;  %v196_v52 = vld [vmem:[%s2395_s2 + $0x48] sm:$0xff]  ;;  %v1423_v1 = vadd.f32 %v2175_v23, %v2171_v21 }
 0x136   :  { %v1534_v43 = vpop.f32.mrf.mxu0  ;;  %v996_v18 = vadd.f32 %v1481_v53, %v899_v15  ;;  %v902_v19 = vadd.f32 %v1420_v55, %v196_v52  ;;  %v2411_v15 = vld [vmem:[#allocation5_spill] sm:$0xff]  ;;  %v2412_v53 = vld [vmem:[#allocation7_spill] sm:$0xff]  ;;  %v2413_v55 = vld [vmem:[#allocation4_spill] sm:$0xff] }
 0x137   :  { %v1223_v56 = vmax.f32 %v1169_v39, 0.0  ;;  %v1077_v5 = vadd.f32 %v1533_v46, %v980_v2  ;;  %v1189_v2 = vpop.f32.mrf.mxu1  ;;  %v907_v23 = vadd.f32 %v1423_v1, %v197_v3  ;;  %v201_v52 = vld [vmem:[%s2395_s2 + $0x70] sm:$0xff] }
 0x138   :  { %v1535_v4 = vpop.f32.mrf.mxu0 }
 0x139   :  { %1240 = vst.msk [vmem:[%s2396_s3 + $0x18] sm:$0xff] %vm1236_vm1, %v1223_v56  ;;  %v1536_v54 = vadd.f32 %v1535_v4, %v1534_v43  ;;  %v1174_v57 = vadd.f32 %v1173_v37, %v1077_v5  ;;  %v1604_v46 = vpop.f32.mrf.mxu1  ;;  %v1487_v56 = vadd.f32 %v2181_v26, %v2177_v24  ;;  %v1426_v5 = vadd.f32 %v2183_v27, %v2179_v25 }
 0x13a   :  { %v1537_v35 = vpop.f32.mrf.mxu0 }
 0x13b   :  { %v1224_v33 = vmax.f32 %v1174_v57, 0.0  ;;  %v1080_v8 = vadd.f32 %v1536_v54, %v983_v6  ;;  %v1192_v6 = vpop.f32.mrf.mxu1  ;;  %v1004_v26 = vadd.f32 %v1487_v56, %v907_v23  ;;  %v1429_v54 = vadd.f32 %v2191_v31, %v2187_v29  ;;  %v202_v56 = vld [vmem:[%s2395_s2 + $0x78] sm:$0xff] }
 0x13c   :  { %v1538_v9 = vpop.f32.mrf.mxu0  ;;  %v910_v27 = vadd.f32 %v1426_v5, %v198_v58  ;;  %v1490_v57 = vadd.f32 %v2189_v30, %v2185_v28 }
 0x13d   :  { %1241 = vst.msk [vmem:[%s2396_s3 + $0x20] sm:$0xff] %vm1236_vm1, %v1224_v33  ;;  %v1539_v50 = vadd.f32 %v1538_v9, %v1537_v35  ;;  %v1177_v60 = vadd.f32 %v1176_v48, %v1080_v8  ;;  %v1607_v8 = vpop.f32.mrf.mxu1  ;;  %v915_v31 = vadd.f32 %v1429_v54, %v199_v59  ;;  %v2409_v9 = vld [vmem:[#allocation2_spill] sm:$0xff] }
 0x13e   :  { %v1540_v62 = vpop.f32.mrf.mxu0  ;;  %v1007_v30 = vadd.f32 %v1490_v57, %v910_v27  ;;  %v1432_v61 = vadd.f32 %v2410_v11, %v2409_v9 }
 0x13f   :  { %v1085_v42 = vadd.f32 %v1539_v50, %v988_v10  ;;  %v1225_v13 = vmax.f32 %v1177_v60, 0.0  ;;  %v200_v60 = vld [vmem:[%s2395_s2 + $0x68] sm:$0xff]  ;;  %v1012_v34 = vadd.f32 %v1493_v49, %v915_v31 }
 0x140   :  { %v1541_v12 = vpop.f32.mrf.mxu0 }
 0x141   :  { %v1182_v36 = vadd.f32 %v1599_v41, %v1085_v42  ;;  %1242 = vst.msk [vmem:[%s2396_s3 + $0x28] sm:$0xff] %vm1236_vm1, %v1225_v13  ;;  %v1542_v37 = vadd.f32 %v1541_v12, %v1540_v62  ;;  %v1484_v41 = vadd.f32 %v2173_v22, %v2169_v20  ;;  %v1205_v42 = vpop.f32.mrf.mxu1  ;;  %v1435_v12 = vadd.f32 %v2412_v53, %v2411_v15 }
 0x142   :  { %v1543_v0 = vpop.f32.mrf.mxu0 }
 0x143   :  { %v1226_v38 = vmax.f32 %v1182_v36, 0.0  ;;  %v1088_v16 = vadd.f32 %v1542_v37, %v991_v14  ;;  %v999_v22 = vadd.f32 %v1484_v41, %v902_v19  ;;  %v2414_v36 = vld [vmem:[#allocation6_spill] sm:$0xff]  ;;  %v2415_v19 = vld [vmem:[#allocation8_spill] sm:$0xff] }
 0x144   :  { %v1544_v17 = vpop.f32.mrf.mxu0  ;;  %v1496_v37 = vadd.f32 %v2414_v36, %v2413_v55  ;;  %v2416_v41 = vld [vmem:[#allocation10_spill] sm:$0xff] }
 0x145   :  { %1243 = vst.msk [vmem:[%s2396_s3 + $0x30] sm:$0xff] %vm1236_vm1, %v1226_v38  ;;  %v1185_v51 = vadd.f32 %v1600_v47, %v1088_v16  ;;  %v1545_v44 = vadd.f32 %v1544_v17, %v1543_v0  ;;  %v1608_v16 = vpop.f32.mrf.mxu1  ;;  %v923_v17 = vadd.f32 %v1435_v12, %v201_v52  ;;  %v1499_v3 = vadd.f32 %v2416_v41, %v2415_v19 }
 0x146   :  { %v1546_v39 = vpop.f32.mrf.mxu0 }
 0x147   :  { %v1227_v43 = vmax.f32 %v1185_v51, 0.0  ;;  %v1093_v21 = vadd.f32 %v1545_v44, %v996_v18 }
 0x148   :  { %v1547_v20 = vpop.f32.mrf.mxu0 }
 0x149   :  { %1244 = vst.msk [vmem:[%s2396_s3 + $0x38] sm:$0xff] %vm1236_vm1, %v1227_v43  ;;  %v1548_v47 = vadd.f32 %v1547_v20, %v1546_v39  ;;  %v1190_v7 = vadd.f32 %v1189_v2, %v1093_v21  ;;  %v2417_v39 = vld [vmem:[#allocation9_spill] sm:$0xff]  ;;  %v2418_v43 = vld [vmem:[#allocation11_spill] sm:$0xff] }
 0x14a   :  { %v1549_v4 = vpop.f32.mrf.mxu0  ;;  %v1438_v21 = vadd.f32 %v2418_v43, %v2417_v39 }
 0x14b   :  { %v1228_v45 = vmax.f32 %v1190_v7, 0.0  ;;  %v1096_v24 = vadd.f32 %v1548_v47, %v999_v22  ;;  %v1208_v22 = vpop.f32.mrf.mxu1  ;;  %v1020_v7 = vadd.f32 %v1499_v3, %v923_v17 }
 0x14c   :  { %v1550_v25 = vpop.f32.mrf.mxu0 }
 0x14d   :  { %1245 = vst.msk [vmem:[%s2396_s3 + $0x40] sm:$0xff] %vm1236_vm1, %v1228_v45  ;;  %v1551_v35 = vadd.f32 %v1550_v25, %v1549_v4  ;;  %v1193_v48 = vadd.f32 %v1192_v6, %v1096_v24  ;;  %v926_v4 = vadd.f32 %v1438_v21, %v202_v56  ;;  %v2419_v6 = vld [vmem:[#allocation12_spill] sm:$0xff]  ;;  %v2420_v45 = vld [vmem:[#allocation13_spill] sm:$0xff] }
 0x14e   :  { %v1552_v33 = vpop.f32.mrf.mxu0  ;;  %v1502_v24 = vadd.f32 %v2420_v45, %v2419_v6 }
 0x14f   :  { %v1101_v10 = vadd.f32 %v1551_v35, %v1004_v26  ;;  %v1229_v29 = vmax.f32 %v1193_v48, 0.0 }
 0x150   :  { %v1553_v28 = vpop.f32.mrf.mxu0  ;;  %v1023_v35 = vadd.f32 %v1502_v24, %v926_v4 }
 0x151   :  { %v1198_v63 = vadd.f32 %v1603_v40, %v1101_v10  ;;  %1246 = vst.msk [vmem:[%s2396_s3 + $0x48] sm:$0xff] %vm1236_vm1, %v1229_v29  ;;  %v1554_v50 = vadd.f32 %v1553_v28, %v1552_v33  ;;  %v918_v40 = vadd.f32 %v1432_v61, %v200_v60 }
 0x152   :  { %v1555_v62 = vpop.f32.mrf.mxu0 }
 0x153   :  { %v1230_v13 = vmax.f32 %v1198_v63, 0.0  ;;  %v1104_v32 = vadd.f32 %v1554_v50, %v1007_v30  ;;  %v1015_v44 = vadd.f32 %v1496_v37, %v918_v40 }
 0x154   :  { %v1556_v14 = vpop.f32.mrf.mxu0 }
 0x155   :  { %1247 = vst.msk [vmem:[%s2396_s3 + $0x50] sm:$0xff] %vm1236_vm1, %v1230_v13  ;;  %v1201_v0 = vadd.f32 %v1604_v46, %v1104_v32  ;;  %v1557_v2 = vadd.f32 %v1556_v14, %v1555_v62 }
 0x156   :  { %v1558_v38 = vpop.f32.mrf.mxu0 }
 0x157   :  { %v1231_v18 = vmax.f32 %v1201_v0, 0.0  ;;  %v1109_v1 = vadd.f32 %v1557_v2, %v1012_v34 }
 0x158   :  { %v1559_v51 = vpop.f32.mrf.mxu0 }
 0x159   :  { %1248 = vst.msk [vmem:[%s2396_s3 + $0x58] sm:$0xff] %vm1236_vm1, %v1231_v18  ;;  %v1560_v46 = vadd.f32 %v1559_v51, %v1558_v38  ;;  %v1206_v23 = vadd.f32 %v1205_v42, %v1109_v1 }
 0x15a   :  { %v1561_v20 = vpop.f32.mrf.mxu0 }
 0x15b   :  { %v1232_v5 = vmax.f32 %v1206_v23, 0.0  ;;  %v1112_v47 = vadd.f32 %v1560_v46, %v1015_v44 }
 0x15c   :  { %v1562_v58 = vpop.f32.mrf.mxu0 }
 0x15d   :  { %1249 = vst.msk [vmem:[%s2396_s3 + $0x60] sm:$0xff] %vm1236_vm1, %v1232_v5  ;;  %v1563_v26 = vadd.f32 %v1562_v58, %v1561_v20  ;;  %v1209_v54 = vadd.f32 %v1208_v22, %v1112_v47 }
 0x15e   :  { %v1564_v25 = vpop.f32.mrf.mxu0 }
 0x15f   :  { %v1117_v27 = vadd.f32 %v1563_v26, %v1020_v7  ;;  %v1233_v57 = vmax.f32 %v1209_v54, 0.0 }
 0x160   :  { %v1565_v59 = vpop.f32.mrf.mxu0 }
 0x161   :  { %v1214_v48 = vadd.f32 %v1607_v8, %v1117_v27  ;;  %1250 = vst.msk [vmem:[%s2396_s3 + $0x68] sm:$0xff] %vm1236_vm1, %v1233_v57  ;;  %v1566_v33 = vadd.f32 %v1565_v59, %v1564_v25 }
 0x163   :  { %v1234_v10 = vmax.f32 %v1214_v48, 0.0  ;;  %v1120_v29 = vadd.f32 %v1566_v33, %v1023_v35 }
 0x165   :  { %1251 = vst.msk [vmem:[%s2396_s3 + $0x70] sm:$0xff] %vm1236_vm1, %v1234_v10  ;;  %v1217_v31 = vadd.f32 %v1608_v16, %v1120_v29 }
 0x167   :  { %v1235_v49 = vmax.f32 %v1217_v31, 0.0 }
 0x169   :  { %1252 = vst.msk [vmem:[%s2396_s3 + $0x78] sm:$0xff] %vm1236_vm1, %v1235_v49 }

// kernel: forward.26
= control target key start
LH: loop header
LB: loop body
LE: loop exit
PB: predicated region body
PF: predicated region fallthrough
CT: control target
= control target key end

     0   :  { %vm530_vm0 = vcmask 785408   ;;  %vm737_vm1 = vcmask 261120   ;;  %s1233_s1 = inlined_call_operand.vmem [shape: bf16[864,32], index: 1, kind: input, shape index: {}]   ;;  %s1234_s0 = inlined_call_operand.vmem [shape: bf16[32,864], index: 0, kind: input, shape index: {}]   ;;  %s1235_s2 = inlined_call_operand.vmem [shape: f32[32,32], index: 2, kind: output, shape index: {}]  }
   0x1   :  { %v924_v0 = vld [vmem:[%s1233_s1 + $0x78] sm:$0xff]   ;;  %v928_v4 = vld [vmem:[%s1233_s1 + $0x70] sm:$0xff]   ;;  %v932_v8 = vld [vmem:[%s1233_s1 + $0x68] sm:$0xff]  }
   0x2   :  { %v925_v1 = vld [vmem:[%s1233_s1 + $0xf8] sm:$0xff]   ;;  %816 = vmatprep.subr.bf16.mxu0 %v924_v0  ;;  %v929_v5 = vld [vmem:[%s1233_s1 + $0xf0] sm:$0xff]   ;;  %v933_v9 = vld [vmem:[%s1233_s1 + $0xe8] sm:$0xff]  }
   0x3   :  { %v926_v2 = vld [vmem:[%s1233_s1 + $0x38] sm:$0xff]   ;;  %844 = vmatprep.subr.bf16.mxu1 %v925_v1  ;;  %v930_v6 = vld [vmem:[%s1233_s1 + $0x30] sm:$0xff]   ;;  %v934_v10 = vld [vmem:[%s1233_s1 + $0x28] sm:$0xff]  }
   0x4   :  { %v927_v3 = vld [vmem:[%s1233_s1 + $0xb8] sm:$0xff]   ;;  %817 = vmatpush3.bf16.msra.mxu0 %v926_v2  ;;  %v931_v7 = vld [vmem:[%s1233_s1 + $0xb0] sm:$0xff]   ;;  %v935_v11 = vld [vmem:[%s1233_s1 + $0xa8] sm:$0xff]  }
   0x5   :  { %845 = vmatpush3.bf16.msra.mxu1 %v927_v3  ;;  %818 = vmatprep.subr.bf16.mxu0 %v928_v4  ;;  %v936_v12 = vld [vmem:[%s1233_s1 + $0x60] sm:$0xff]   ;;  %v940_v16 = vld [vmem:[%s1233_s1 + $0x58] sm:$0xff]   ;;  %v944_v20 = vld [vmem:[%s1233_s1 + $0x50] sm:$0xff]  }
   0x6   :  { %846 = vmatprep.subr.bf16.mxu1 %v929_v5  ;;  %v937_v13 = vld [vmem:[%s1233_s1 + $0xe0] sm:$0xff]   ;;  %v941_v17 = vld [vmem:[%s1233_s1 + $0xd8] sm:$0xff]   ;;  %v945_v21 = vld [vmem:[%s1233_s1 + $0xd0] sm:$0xff]  }
   0x7   :  { %v938_v14 = vld [vmem:[%s1233_s1 + $0x20] sm:$0xff]   ;;  %v942_v18 = vld [vmem:[%s1233_s1 + $0x18] sm:$0xff]   ;;  %v946_v22 = vld [vmem:[%s1233_s1 + $0x10] sm:$0xff]  }
   0x8   :  { %819 = vmatpush3.bf16.msra.mxu0 %v930_v6  ;;  %v939_v15 = vld [vmem:[%s1233_s1 + $0xa0] sm:$0xff]   ;;  %v943_v19 = vld [vmem:[%s1233_s1 + $0x98] sm:$0xff]   ;;  %v947_v23 = vld [vmem:[%s1233_s1 + $0x90] sm:$0xff]  }
   0x9   :  { %847 = vmatpush3.bf16.msra.mxu1 %v931_v7  ;;  %820 = vmatprep.subr.bf16.mxu0 %v932_v8  ;;  %v948_v24 = vld [vmem:[%s1233_s1 + $0x48] sm:$0xff]   ;;  %v952_v28 = vld [vmem:[%s1233_s1 + $0x40] sm:$0xff]   ;;  %v962_v36 = vld [vmem:[%s1233_s1 + $0x178] sm:$0xff]  }
   0xa   :  { %848 = vmatprep.subr.bf16.mxu1 %v933_v9  ;;  %v949_v25 = vld [vmem:[%s1233_s1 + $0xc8] sm:$0xff]   ;;  %v953_v29 = vld [vmem:[%s1233_s1 + $0xc0] sm:$0xff]   ;;  %v963_v37 = vld [vmem:[%s1233_s1 + $0x138] sm:$0xff]  }
   0xb   :  { %v950_v26 = vld [vmem:[%s1233_s1 + $0x8] sm:$0xff]   ;;  %v954_v30 = vld [vmem:[%s1233_s1] sm:$0xff]   ;;  %v964_v38 = vld [vmem:[%s1233_s1 + $0x170] sm:$0xff]  }
   0xc   :  { %821 = vmatpush3.bf16.msra.mxu0 %v934_v10  ;;  %v951_v27 = vld [vmem:[%s1233_s1 + $0x88] sm:$0xff]   ;;  %v955_v31 = vld [vmem:[%s1233_s1 + $0x80] sm:$0xff]   ;;  %v965_v39 = vld [vmem:[%s1233_s1 + $0x130] sm:$0xff]  }
   0xd   :  { %849 = vmatpush3.bf16.msra.mxu1 %v935_v11  ;;  %822 = vmatprep.subr.bf16.mxu0 %v936_v12  ;;  %v956_v32 = vld [vmem:[%s1234_s0] ss:$28 sps:$4 sm:$0xff]   ;;  %v959_v34 = vld [vmem:[%s1234_s0 + $0x8] ss:$28 sps:$4 sm:$0xff]   ;;  %v978_v50 = vld [vmem:[%s1234_s0 + $0x38] ss:$28 sps:$4 sm:$0xff]  }
   0xe   :  { %850 = vmatprep.subr.bf16.mxu1 %v937_v13  ;;  %v958_v33 = vld [vmem:[%s1234_s0 + $0x4] ss:$28 sps:$4 sm:$0xff]   ;;  %v961_v35 = vld [vmem:[%s1234_s0 + $0xc] ss:$28 sps:$4 sm:$0xff]   ;;  %v971_v45 = vld [vmem:[%s1233_s1 + $0x158] sm:$0xff]  }
   0xf   :  { %569 = vmatprep.mubr.bf16.mxu0 %v958_v33  ;;  %618 = vmatprep.mubr.bf16.mxu1 %v961_v35  ;;  %v966_v40 = vld [vmem:[%s1233_s1 + $0x168] sm:$0xff]   ;;  %v968_v43 = vld [vmem:[%s1233_s1 + $0x160] sm:$0xff]   ;;  %v973_v47 = vld [vmem:[%s1234_s0 + $0x3c] ss:$28 sps:$4 sm:$0xff]  }
  0x10   :  { %823 = vmatpush3.bf16.msra.mxu0 %v938_v14  ;;  %v967_v41 = vld [vmem:[%s1233_s1 + $0x128] sm:$0xff]   ;;  %v970_v44 = vld [vmem:[%s1233_s1 + $0x120] sm:$0xff]   ;;  %v977_v49 = vld [vmem:[%s1233_s1 + $0x118] sm:$0xff]  }
  0x11   :  { %851 = vmatpush3.bf16.msra.mxu1 %v939_v15  ;;  %824 = vmatprep.subr.bf16.mxu0 %v940_v16  ;;  %v969_v42 = vld [vmem:[%s1233_s1 + $0x1a8] sm:$0xff]   ;;  %v972_v46 = vld [vmem:[%s1233_s1 + $0x1a0] sm:$0xff]   ;;  %v980_v52 = vld [vmem:[%s1233_s1 + $0x150] sm:$0xff]  }
  0x12   :  { %852 = vmatprep.subr.bf16.mxu1 %v941_v17  ;;  %v975_v48 = vld [vmem:[%s1234_s0 + $0x44] ss:$28 sps:$4 sm:$0xff]   ;;  %v981_v53 = vld [vmem:[%s1233_s1 + $0x198] sm:$0xff]   ;;  %v982_v54 = vld [vmem:[%s1233_s1 + $0x110] sm:$0xff]  }
  0x13   :  { %v979_v51 = vld [vmem:[%s1234_s0 + $0x40] ss:$28 sps:$4 sm:$0xff]   ;;  %v984_v55 = vld [vmem:[%s1233_s1 + $0x190] sm:$0xff]   ;;  %v983_v56 = vld [vmem:[%s1233_s1 + $0x148] sm:$0xff]  }
  0x14   :  { %825 = vmatpush3.bf16.msra.mxu0 %v942_v18  ;;  %v987_v57 = vld [vmem:[%s1233_s1 + $0x188] sm:$0xff]   ;;  %v986_v59 = vld [vmem:[%s1233_s1 + $0x140] sm:$0xff]   ;;  %v991_v60 = vld [vmem:[%s1234_s0 + $0x14] ss:$28 sps:$4 sm:$0xff]  }
  0x15   :  { %853 = vmatpush3.bf16.msra.mxu1 %v943_v19  ;;  %826 = vmatprep.subr.bf16.mxu0 %v944_v20  ;;  %v985_v58 = vld [vmem:[%s1233_s1 + $0x108] sm:$0xff]   ;;  %v992_v61 = vld [vmem:[%s1233_s1 + $0x180] sm:$0xff]   ;;  %v993_v62 = vld [vmem:[%s1234_s0 + $0x18] ss:$28 sps:$4 sm:$0xff]  }
  0x16   :  { %854 = vmatprep.subr.bf16.mxu1 %v945_v21  ;;  %v988_v63 = vld [vmem:[%s1233_s1 + $0x100] sm:$0xff]   ;;  %v989_v0 = vld [vmem:[%s1234_s0 + $0x10] ss:$28 sps:$4 sm:$0xff]  }
  0x17   :  { %v994_v1 = vld [vmem:[%s1234_s0 + $0x50] ss:$28 sps:$4 sm:$0xff]   ;;  %v997_v3 = vld [vmem:[%s1234_s0 + $0x48] ss:$28 sps:$4 sm:$0xff]  }
  0x18   :  { %827 = vmatpush3.bf16.msra.mxu0 %v946_v22  ;;  %v995_v2 = vld [vmem:[%s1234_s0 + $0x4c] ss:$28 sps:$4 sm:$0xff]  }
  0x19   :  { %855 = vmatpush3.bf16.msra.mxu1 %v947_v23  ;;  %828 = vmatprep.subr.bf16.mxu0 %v948_v24 }
  0x1a   :  { %856 = vmatprep.subr.bf16.mxu1 %v949_v25 }
  0x1c   :  { %829 = vmatpush3.bf16.msra.mxu0 %v950_v26 }
  0x1d   :  { %857 = vmatpush3.bf16.msra.mxu1 %v951_v27  ;;  %830 = vmatprep.subr.bf16.mxu0 %v952_v28 }
  0x1e   :  { %858 = vmatprep.subr.bf16.mxu1 %v953_v29 }
  0x20   :  { %831 = vmatpush3.bf16.msra.mxu0 %v954_v30 }
  0x21   :  { %859 = vmatpush3.bf16.msra.mxu1 %v955_v31  ;;  %872 = vmatprep.subr.bf16.mxu0 %v962_v36 }
  0x22   :  { %908 = vmatprep.subr.bf16.mxu1 %v969_v42 }
  0x23   :  { %570 = vmatmul.mubr.bf16.vlgmr.msra.gmra.mxu0 %v956_v32 }
  0x24   :  { %619 = vmatmul.mubr.bf16.vlgmr.msra.gmra.mxu1 %v959_v34  ;;  %873 = vmatpush3.bf16.msra.mxu0 %v963_v37 }
  0x25   :  { %874 = vmatprep.subr.bf16.mxu0 %v964_v38  ;;  %909 = vmatpush3.bf16.msra.mxu1 %v969_v42 }
  0x26   :  { %910 = vmatprep.subr.bf16.mxu1 %v972_v46  ;;  %577 = vmatprep.mubr.bf16.mxu0 %v973_v47 }
  0x27   :  { %626 = vmatprep.mubr.bf16.mxu1 %v975_v48 }
  0x28   :  { %875 = vmatpush3.bf16.msra.mxu0 %v965_v39 }
  0x29   :  { %876 = vmatprep.subr.bf16.mxu0 %v966_v40  ;;  %911 = vmatpush3.bf16.msra.mxu1 %v972_v46 }
  0x2a   :  { %912 = vmatprep.subr.bf16.mxu1 %v981_v53 }
  0x2b   :  { %578 = vmatmul.mubr.bf16.gmra.mxu0 %v978_v50 }
  0x2c   :  { %877 = vmatpush3.bf16.msra.mxu0 %v967_v41  ;;  %627 = vmatmul.mubr.bf16.gmra.mxu1 %v979_v51 }
  0x2d   :  { %878 = vmatprep.subr.bf16.mxu0 %v968_v43  ;;  %913 = vmatpush3.bf16.msra.mxu1 %v981_v53 }
  0x2e   :  { %914 = vmatprep.subr.bf16.mxu1 %v984_v55  ;;  %667 = vmatprep.mubr.bf16.mxu0 %v991_v60 }
  0x2f   :  { %920 = vmatprep.mubr.msk.bf16.mxu1 %vm530_vm0, %v993_v62 }
  0x30   :  { %879 = vmatpush3.bf16.msra.mxu0 %v970_v44 }
  0x31   :  { %880 = vmatprep.subr.bf16.mxu0 %v971_v45  ;;  %915 = vmatpush3.bf16.msra.mxu1 %v984_v55 }
  0x32   :  { %916 = vmatprep.subr.bf16.mxu1 %v987_v57 }
  0x34   :  { %881 = vmatpush3.bf16.msra.mxu0 %v977_v49 }
  0x35   :  { %882 = vmatprep.subr.bf16.mxu0 %v980_v52  ;;  %917 = vmatpush3.bf16.msra.mxu1 %v987_v57 }
  0x36   :  { %918 = vmatprep.subr.bf16.mxu1 %v992_v61 }
  0x38   :  { %883 = vmatpush3.bf16.msra.mxu0 %v982_v54 }
  0x39   :  { %884 = vmatprep.subr.bf16.mxu0 %v983_v56  ;;  %919 = vmatpush3.bf16.msra.mxu1 %v992_v61 }
  0x3c   :  { %885 = vmatpush3.bf16.msra.mxu0 %v985_v58  ;;  %921 = vmatmul.mubr.msk.bf16.vlgmr.msra.gmra.mxu1 %vm530_vm0, %v994_v1 }
  0x3d   :  { %886 = vmatprep.subr.bf16.mxu0 %v986_v59 }
  0x40   :  { %887 = vmatpush3.bf16.msra.mxu0 %v988_v63 }
  0x43   :  { %668 = vmatmul.mubr.bf16.vlgmr.msra.gmra.mxu0 %v989_v0 }
  0x44   :  { %675 = vmatprep.mubr.bf16.mxu0 %v995_v2 }
  0x4b   :  { %676 = vmatmul.mubr.bf16.gmra.mxu0 %v997_v3 }
  0xe3   :  { %v832_v4 = vpop.f32.mrf.mxu0 }
  0xe4   :  { %v860_v5 = vpop.f32.mrf.mxu1 }
  0xe5   :  { %v833_v6 = vpop.f32.mrf.mxu0 }
  0xe6   :  { %v861_v7 = vpop.f32.mrf.mxu1  ;;  %v834_v20 = vadd.f32 %v833_v6, %v832_v4 }
  0xe7   :  { %v835_v8 = vpop.f32.mrf.mxu0  ;;  %v862_v21 = vadd.f32 %v861_v7, %v860_v5 }
  0xe8   :  { %v863_v9 = vpop.f32.mrf.mxu1 }
  0xe9   :  { %v836_v10 = vpop.f32.mrf.mxu0  ;;  %v621_v26 = vadd.f32 %v862_v21, %v834_v20 }
  0xea   :  { %v864_v11 = vpop.f32.mrf.mxu1  ;;  %v837_v27 = vadd.f32 %v836_v10, %v835_v8 }
  0xeb   :  { %v838_v12 = vpop.f32.mrf.mxu0  ;;  %v865_v28 = vadd.f32 %v864_v11, %v863_v9 }
  0xec   :  { %v866_v13 = vpop.f32.mrf.mxu1 }
  0xed   :  { %v839_v14 = vpop.f32.mrf.mxu0  ;;  %v624_v36 = vadd.f32 %v865_v28, %v837_v27 }
  0xee   :  { %v867_v15 = vpop.f32.mrf.mxu1  ;;  %v840_v33 = vadd.f32 %v839_v14, %v838_v12 }
  0xef   :  { %v841_v16 = vpop.f32.mrf.mxu0  ;;  %v868_v34 = vadd.f32 %v867_v15, %v866_v13 }
  0xf0   :  { %v869_v17 = vpop.f32.mrf.mxu1 }
  0xf1   :  { %v842_v18 = vpop.f32.mrf.mxu0  ;;  %v629_v43 = vadd.f32 %v868_v34, %v840_v33 }
  0xf2   :  { %v870_v19 = vpop.f32.mrf.mxu1  ;;  %v843_v45 = vadd.f32 %v842_v18, %v841_v16 }
  0xf3   :  { %v871_v46 = vadd.f32 %v870_v19, %v869_v17 }
  0xf5   :  { %v632_v53 = vadd.f32 %v871_v46, %v843_v45 }
  0xfc   :  { %v922_v23 = vpop.f32.mrf.mxu1 }
  0xfe   :  { %v718_v25 = vpop.f32.mrf.mxu1 }
 0x100   :  { %v923_v31 = vpop.f32.mrf.mxu1 }
 0x102   :  { %v721_v40 = vpop.f32.mrf.mxu1 }
 0x103   :  { %v888_v22 = vpop.f32.mrf.mxu0 }
 0x105   :  { %v889_v24 = vpop.f32.mrf.mxu0 }
 0x106   :  { %v890_v29 = vadd.f32 %v889_v24, %v888_v22 }
 0x107   :  { %v891_v30 = vpop.f32.mrf.mxu0 }
 0x108   :  { %v670_v32 = vadd.f32 %v890_v29, %v621_v26 }
 0x109   :  { %v892_v35 = vpop.f32.mrf.mxu0 }
 0x10a   :  { %v893_v37 = vadd.f32 %v892_v35, %v891_v30  ;;  %v719_v38 = vadd.f32 %v718_v25, %v670_v32 }
 0x10b   :  { %v894_v39 = vpop.f32.mrf.mxu0 }
 0x10c   :  { %v733_v41 = vmax.f32 %v719_v38, 0.0  ;;  %v673_v42 = vadd.f32 %v893_v37, %v624_v36 }
 0x10d   :  { %v895_v44 = vpop.f32.mrf.mxu0 }
 0x10e   :  { %738 = vst.msk [vmem:[%s1235_s2] sm:$0xff] %vm737_vm1, %v733_v41  ;;  %v896_v47 = vadd.f32 %v895_v44, %v894_v39  ;;  %v722_v48 = vadd.f32 %v721_v40, %v673_v42 }
 0x10f   :  { %v897_v49 = vpop.f32.mrf.mxu0 }
 0x110   :  { %v678_v50 = vadd.f32 %v896_v47, %v629_v43  ;;  %v734_v51 = vmax.f32 %v722_v48, 0.0 }
 0x111   :  { %v898_v52 = vpop.f32.mrf.mxu0 }
 0x112   :  { %v727_v54 = vadd.f32 %v922_v23, %v678_v50  ;;  %739 = vst.msk [vmem:[%s1235_s2 + $0x8] sm:$0xff] %vm737_vm1, %v734_v51  ;;  %v899_v55 = vadd.f32 %v898_v52, %v897_v49 }
 0x114   :  { %v735_v56 = vmax.f32 %v727_v54, 0.0  ;;  %v681_v57 = vadd.f32 %v899_v55, %v632_v53 }
 0x116   :  { %740 = vst.msk [vmem:[%s1235_s2 + $0x10] sm:$0xff] %vm737_vm1, %v735_v56  ;;  %v730_v58 = vadd.f32 %v923_v31, %v681_v57 }
 0x118   :  { %v736_v59 = vmax.f32 %v730_v58, 0.0 }
 0x11a   :  { %741 = vst.msk [vmem:[%s1235_s2 + $0x18] sm:$0xff] %vm737_vm1, %v736_v59 }

// kernel: forward.25
= control target key start
LH: loop header
LB: loop body
LE: loop exit
PB: predicated region body
PF: predicated region fallthrough
CT: control target
= control target key end

     0   :  { %vm42_vm0 = vcmask 261120   ;;  %s173_s1 = inlined_call_operand.vmem [shape: bf16[32,32], index: 1, kind: input, shape index: {}]   ;;  %s174_s0 = inlined_call_operand.vmem [shape: bf16[32,32], index: 0, kind: input, shape index: {}]   ;;  %s175_s2 = inlined_call_operand.vmem [shape: f32[32,32], index: 2, kind: output, shape index: {}]  }
   0x1   :  { %v124_v0 = vld [vmem:[%s173_s1 + $0x8] sm:$0xff]   ;;  %v125_v1 = vld [vmem:[%s173_s1] sm:$0xff]  }
   0x2   :  { %116 = vmatprep.subr.bf16.mxu0 %v124_v0  ;;  %v126_v2 = vld [vmem:[%s174_s0] sm:$0xff]   ;;  %v127_v3 = vld [vmem:[%s174_s0 + $0x8] sm:$0xff]  }
   0x3   :  { %117 = vmatpush3.bf16.msra.mxu0 %v124_v0  ;;  %120 = vmatprep.mubr.msk.bf16.mxu0 %vm42_vm0, %v126_v2 }
   0x4   :  { %118 = vmatprep.subr.bf16.mxu0 %v125_v1 }
   0x7   :  { %119 = vmatpush3.bf16.msra.mxu0 %v125_v1 }
   0xa   :  { %121 = vmatmul.mubr.msk.bf16.vlgmr.msra.gmra.mxu0 %vm42_vm0, %v127_v3 }
  0xca   :  { %v122_v4 = vpop.f32.mrf.mxu0 }
  0xcb   :  { %100 = vst.msk [vmem:[%s175_s2 + $0x10] sm:$0xff] %vm42_vm0, %v122_v4 }
  0xcc   :  { %v83_v5 = vpop.f32.mrf.mxu0 }
  0xcd   :  { %98 = vst.msk [vmem:[%s175_s2] sm:$0xff] %vm42_vm0, %v83_v5 }
  0xce   :  { %v123_v6 = vpop.f32.mrf.mxu0 }
  0xcf   :  { %101 = vst.msk [vmem:[%s175_s2 + $0x18] sm:$0xff] %vm42_vm0, %v123_v6 }
  0xd0   :  { %v86_v7 = vpop.f32.mrf.mxu0 }
  0xd1   :  { %99 = vst.msk [vmem:[%s175_s2 + $0x8] sm:$0xff] %vm42_vm0, %v86_v7 }

// kernel: forward.27
= control target key start
LH: loop header
LB: loop body
LE: loop exit
PB: predicated region body
PF: predicated region fallthrough
CT: control target
= control target key end

     0   :  { %vm537_vm0 = vcmask 785408   ;;  %vm744_vm1 = vcmask 261120   ;;  %s1257_s1 = inlined_call_operand.vmem [shape: bf16[864,32], index: 1, kind: input, shape index: {}]   ;;  %s1258_s0 = inlined_call_operand.vmem [shape: bf16[32,864], index: 0, kind: input, shape index: {}]   ;;  %s1259_s2 = inlined_call_operand.vmem [shape: f32[32,32], index: 2, kind: input, shape index: {}]   ;;  %s1260_s3 = inlined_call_operand.vmem [shape: f32[32,32], index: 3, kind: output, shape index: {}]  }
   0x1   :  { %v931_v0 = vld [vmem:[%s1257_s1 + $0x78] sm:$0xff]   ;;  %v935_v4 = vld [vmem:[%s1257_s1 + $0x70] sm:$0xff]   ;;  %v939_v8 = vld [vmem:[%s1257_s1 + $0x68] sm:$0xff]  }
   0x2   :  { %v932_v1 = vld [vmem:[%s1257_s1 + $0x38] sm:$0xff]   ;;  %823 = vmatprep.subr.bf16.mxu0 %v931_v0  ;;  %v936_v5 = vld [vmem:[%s1257_s1 + $0x30] sm:$0xff]   ;;  %v940_v9 = vld [vmem:[%s1257_s1 + $0x28] sm:$0xff]  }
   0x3   :  { %v933_v2 = vld [vmem:[%s1257_s1 + $0xf8] sm:$0xff]   ;;  %824 = vmatpush3.bf16.msra.mxu0 %v932_v1  ;;  %v937_v6 = vld [vmem:[%s1257_s1 + $0xf0] sm:$0xff]   ;;  %v941_v10 = vld [vmem:[%s1257_s1 + $0xe8] sm:$0xff]  }
   0x4   :  { %v934_v3 = vld [vmem:[%s1257_s1 + $0xb8] sm:$0xff]   ;;  %851 = vmatprep.subr.bf16.mxu1 %v933_v2  ;;  %825 = vmatprep.subr.bf16.mxu0 %v935_v4  ;;  %v938_v7 = vld [vmem:[%s1257_s1 + $0xb0] sm:$0xff]   ;;  %v942_v11 = vld [vmem:[%s1257_s1 + $0xa8] sm:$0xff]  }
   0x5   :  { %852 = vmatpush3.bf16.msra.mxu1 %v934_v3  ;;  %v943_v12 = vld [vmem:[%s1257_s1 + $0x60] sm:$0xff]   ;;  %v947_v16 = vld [vmem:[%s1257_s1 + $0x58] sm:$0xff]   ;;  %v951_v20 = vld [vmem:[%s1257_s1 + $0x50] sm:$0xff]  }
   0x6   :  { %853 = vmatprep.subr.bf16.mxu1 %v937_v6  ;;  %v944_v13 = vld [vmem:[%s1257_s1 + $0x20] sm:$0xff]   ;;  %v948_v17 = vld [vmem:[%s1257_s1 + $0x18] sm:$0xff]   ;;  %v952_v21 = vld [vmem:[%s1257_s1 + $0x10] sm:$0xff]  }
   0x7   :  { %826 = vmatpush3.bf16.msra.mxu0 %v936_v5  ;;  %v945_v14 = vld [vmem:[%s1257_s1 + $0xe0] sm:$0xff]   ;;  %v949_v18 = vld [vmem:[%s1257_s1 + $0xd8] sm:$0xff]   ;;  %v953_v22 = vld [vmem:[%s1257_s1 + $0xd0] sm:$0xff]  }
   0x8   :  { %827 = vmatprep.subr.bf16.mxu0 %v939_v8  ;;  %v946_v15 = vld [vmem:[%s1257_s1 + $0xa0] sm:$0xff]   ;;  %v950_v19 = vld [vmem:[%s1257_s1 + $0x98] sm:$0xff]   ;;  %v954_v23 = vld [vmem:[%s1257_s1 + $0x90] sm:$0xff]  }
   0x9   :  { %854 = vmatpush3.bf16.msra.mxu1 %v938_v7  ;;  %v955_v24 = vld [vmem:[%s1257_s1 + $0x48] sm:$0xff]   ;;  %v959_v28 = vld [vmem:[%s1257_s1 + $0x40] sm:$0xff]   ;;  %v966_v34 = vld [vmem:[%s1257_s1 + $0x178] sm:$0xff]  }
   0xa   :  { %855 = vmatprep.subr.bf16.mxu1 %v941_v10  ;;  %v956_v25 = vld [vmem:[%s1257_s1 + $0x8] sm:$0xff]   ;;  %v960_v29 = vld [vmem:[%s1257_s1] sm:$0xff]   ;;  %v970_v37 = vld [vmem:[%s1257_s1 + $0x138] sm:$0xff]  }
   0xb   :  { %828 = vmatpush3.bf16.msra.mxu0 %v940_v9  ;;  %v957_v26 = vld [vmem:[%s1257_s1 + $0xc8] sm:$0xff]   ;;  %v961_v30 = vld [vmem:[%s1257_s1 + $0xc0] sm:$0xff]   ;;  %v971_v38 = vld [vmem:[%s1257_s1 + $0x170] sm:$0xff]  }
   0xc   :  { %829 = vmatprep.subr.bf16.mxu0 %v943_v12  ;;  %v958_v27 = vld [vmem:[%s1257_s1 + $0x88] sm:$0xff]   ;;  %v962_v31 = vld [vmem:[%s1258_s0] ss:$28 sps:$4 sm:$0xff]   ;;  %v972_v39 = vld [vmem:[%s1257_s1 + $0x130] sm:$0xff]  }
   0xd   :  { %856 = vmatpush3.bf16.msra.mxu1 %v942_v11  ;;  %v964_v32 = vld [vmem:[%s1258_s0 + $0x4] ss:$28 sps:$4 sm:$0xff]   ;;  %v969_v36 = vld [vmem:[%s1258_s0 + $0xc] ss:$28 sps:$4 sm:$0xff]   ;;  %v980_v46 = vld [vmem:[%s1258_s0 + $0x3c] ss:$28 sps:$4 sm:$0xff]  }
   0xe   :  { %857 = vmatprep.subr.bf16.mxu1 %v945_v14  ;;  %v965_v33 = vld [vmem:[%s1257_s1 + $0x80] sm:$0xff]   ;;  %576 = vmatprep.mubr.bf16.mxu0 %v964_v32  ;;  %v973_v40 = vld [vmem:[%s1257_s1 + $0x168] sm:$0xff]   ;;  %v978_v47 = vld [vmem:[%s1257_s1 + $0x158] sm:$0xff]  }
   0xf   :  { %830 = vmatpush3.bf16.msra.mxu0 %v944_v13  ;;  %v967_v35 = vld [vmem:[%s1258_s0 + $0x8] ss:$28 sps:$4 sm:$0xff]   ;;  %625 = vmatprep.mubr.bf16.mxu1 %v969_v36  ;;  %v983_v48 = vld [vmem:[%s1258_s0 + $0x38] ss:$28 sps:$4 sm:$0xff]   ;;  %v986_v51 = vld [vmem:[%s1258_s0 + $0x40] ss:$28 sps:$4 sm:$0xff]  }
  0x10   :  { %831 = vmatprep.subr.bf16.mxu0 %v947_v16  ;;  %v974_v41 = vld [vmem:[%s1257_s1 + $0x128] sm:$0xff]   ;;  %v975_v43 = vld [vmem:[%s1257_s1 + $0x160] sm:$0xff]   ;;  %v982_v49 = vld [vmem:[%s1257_s1 + $0x118] sm:$0xff]  }
  0x11   :  { %858 = vmatpush3.bf16.msra.mxu1 %v946_v15  ;;  %v976_v42 = vld [vmem:[%s1257_s1 + $0x1a8] sm:$0xff]   ;;  %v977_v44 = vld [vmem:[%s1257_s1 + $0x120] sm:$0xff]   ;;  %v987_v52 = vld [vmem:[%s1257_s1 + $0x150] sm:$0xff]  }
  0x12   :  { %859 = vmatprep.subr.bf16.mxu1 %v949_v18  ;;  %v979_v45 = vld [vmem:[%s1257_s1 + $0x1a0] sm:$0xff]   ;;  %v988_v53 = vld [vmem:[%s1257_s1 + $0x198] sm:$0xff]   ;;  %v989_v54 = vld [vmem:[%s1257_s1 + $0x110] sm:$0xff]  }
  0x13   :  { %832 = vmatpush3.bf16.msra.mxu0 %v948_v17  ;;  %v984_v50 = vld [vmem:[%s1258_s0 + $0x44] ss:$28 sps:$4 sm:$0xff]   ;;  %v991_v55 = vld [vmem:[%s1257_s1 + $0x190] sm:$0xff]   ;;  %v990_v56 = vld [vmem:[%s1257_s1 + $0x148] sm:$0xff]  }
  0x14   :  { %833 = vmatprep.subr.bf16.mxu0 %v951_v20  ;;  %v994_v57 = vld [vmem:[%s1257_s1 + $0x188] sm:$0xff]   ;;  %v993_v59 = vld [vmem:[%s1257_s1 + $0x140] sm:$0xff]   ;;  %v998_v60 = vld [vmem:[%s1258_s0 + $0x14] ss:$28 sps:$4 sm:$0xff]  }
  0x15   :  { %860 = vmatpush3.bf16.msra.mxu1 %v950_v19  ;;  %v992_v58 = vld [vmem:[%s1257_s1 + $0x108] sm:$0xff]   ;;  %v999_v61 = vld [vmem:[%s1257_s1 + $0x180] sm:$0xff]   ;;  %v1000_v62 = vld [vmem:[%s1258_s0 + $0x18] ss:$28 sps:$4 sm:$0xff]  }
  0x16   :  { %861 = vmatprep.subr.bf16.mxu1 %v953_v22  ;;  %v995_v63 = vld [vmem:[%s1257_s1 + $0x100] sm:$0xff]   ;;  %v996_v0 = vld [vmem:[%s1258_s0 + $0x10] ss:$28 sps:$4 sm:$0xff]  }
  0x17   :  { %834 = vmatpush3.bf16.msra.mxu0 %v952_v21  ;;  %v1001_v1 = vld [vmem:[%s1258_s0 + $0x50] ss:$28 sps:$4 sm:$0xff]   ;;  %v1004_v3 = vld [vmem:[%s1258_s0 + $0x48] ss:$28 sps:$4 sm:$0xff]  }
  0x18   :  { %835 = vmatprep.subr.bf16.mxu0 %v955_v24  ;;  %v1002_v2 = vld [vmem:[%s1258_s0 + $0x4c] ss:$28 sps:$4 sm:$0xff]   ;;  %v139_v19 = vld [vmem:[%s1259_s2] sm:$0xff] }
  0x19   :  { %862 = vmatpush3.bf16.msra.mxu1 %v954_v23 }
  0x1a   :  { %863 = vmatprep.subr.bf16.mxu1 %v957_v26 }
  0x1b   :  { %836 = vmatpush3.bf16.msra.mxu0 %v956_v25  ;;  %v140_v25 = vld [vmem:[%s1259_s2 + $0x8] sm:$0xff] }
  0x1c   :  { %837 = vmatprep.subr.bf16.mxu0 %v959_v28 }
  0x1d   :  { %864 = vmatpush3.bf16.msra.mxu1 %v958_v27 }
  0x1e   :  { %865 = vmatprep.subr.bf16.mxu1 %v961_v30 }
  0x1f   :  { %838 = vmatpush3.bf16.msra.mxu0 %v960_v29 }
  0x20   :  { %879 = vmatprep.subr.bf16.mxu0 %v966_v34  ;;  %v141_v34 = vld [vmem:[%s1259_s2 + $0x10] sm:$0xff] }
  0x21   :  { %866 = vmatpush3.bf16.msra.mxu1 %v965_v33 }
  0x22   :  { %577 = vmatmul.mubr.bf16.vlgmr.msra.gmra.mxu0 %v962_v31  ;;  %915 = vmatprep.subr.bf16.mxu1 %v976_v42 }
  0x23   :  { %880 = vmatpush3.bf16.msra.mxu0 %v970_v37  ;;  %584 = vmatprep.mubr.bf16.mxu0 %v980_v46  ;;  %v142_v46 = vld [vmem:[%s1259_s2 + $0x18] sm:$0xff] }
  0x24   :  { %626 = vmatmul.mubr.bf16.vlgmr.msra.gmra.mxu1 %v967_v35  ;;  %881 = vmatprep.subr.bf16.mxu0 %v971_v38 }
  0x25   :  { %916 = vmatpush3.bf16.msra.mxu1 %v976_v42  ;;  %633 = vmatprep.mubr.bf16.mxu1 %v984_v50 }
  0x26   :  { %917 = vmatprep.subr.bf16.mxu1 %v979_v45 }
  0x27   :  { %882 = vmatpush3.bf16.msra.mxu0 %v972_v39 }
  0x28   :  { %883 = vmatprep.subr.bf16.mxu0 %v973_v40 }
  0x29   :  { %918 = vmatpush3.bf16.msra.mxu1 %v979_v45 }
  0x2a   :  { %585 = vmatmul.mubr.bf16.gmra.mxu0 %v983_v48  ;;  %919 = vmatprep.subr.bf16.mxu1 %v988_v53 }
  0x2b   :  { %884 = vmatpush3.bf16.msra.mxu0 %v974_v41  ;;  %674 = vmatprep.mubr.bf16.mxu0 %v998_v60 }
  0x2c   :  { %885 = vmatprep.subr.bf16.mxu0 %v975_v43  ;;  %634 = vmatmul.mubr.bf16.gmra.mxu1 %v986_v51 }
  0x2d   :  { %920 = vmatpush3.bf16.msra.mxu1 %v988_v53  ;;  %927 = vmatprep.mubr.msk.bf16.mxu1 %vm537_vm0, %v1000_v62 }
  0x2e   :  { %921 = vmatprep.subr.bf16.mxu1 %v991_v55 }
  0x2f   :  { %886 = vmatpush3.bf16.msra.mxu0 %v977_v44 }
  0x30   :  { %887 = vmatprep.subr.bf16.mxu0 %v978_v47 }
  0x31   :  { %922 = vmatpush3.bf16.msra.mxu1 %v991_v55 }
  0x32   :  { %923 = vmatprep.subr.bf16.mxu1 %v994_v57 }
  0x33   :  { %888 = vmatpush3.bf16.msra.mxu0 %v982_v49 }
  0x34   :  { %889 = vmatprep.subr.bf16.mxu0 %v987_v52 }
  0x35   :  { %924 = vmatpush3.bf16.msra.mxu1 %v994_v57 }
  0x36   :  { %925 = vmatprep.subr.bf16.mxu1 %v999_v61 }
  0x37   :  { %890 = vmatpush3.bf16.msra.mxu0 %v989_v54 }
  0x38   :  { %891 = vmatprep.subr.bf16.mxu0 %v990_v56 }
  0x39   :  { %926 = vmatpush3.bf16.msra.mxu1 %v999_v61 }
  0x3b   :  { %892 = vmatpush3.bf16.msra.mxu0 %v992_v58 }
  0x3c   :  { %893 = vmatprep.subr.bf16.mxu0 %v993_v59  ;;  %928 = vmatmul.mubr.msk.bf16.vlgmr.msra.gmra.mxu1 %vm537_vm0, %v1001_v1 }
  0x3f   :  { %894 = vmatpush3.bf16.msra.mxu0 %v995_v63 }
  0x42   :  { %675 = vmatmul.mubr.bf16.vlgmr.msra.gmra.mxu0 %v996_v0 }
  0x43   :  { %682 = vmatprep.mubr.bf16.mxu0 %v1002_v2 }
  0x4a   :  { %683 = vmatmul.mubr.bf16.gmra.mxu0 %v1004_v3 }
  0xe2   :  { %v839_v4 = vpop.f32.mrf.mxu0 }
  0xe4   :  { %v867_v5 = vpop.f32.mrf.mxu1  ;;  %v840_v6 = vpop.f32.mrf.mxu0 }
  0xe5   :  { %v841_v18 = vadd.f32 %v840_v6, %v839_v4 }
  0xe6   :  { %v868_v7 = vpop.f32.mrf.mxu1  ;;  %v842_v8 = vpop.f32.mrf.mxu0 }
  0xe7   :  { %v579_v22 = vadd.f32 %v841_v18, %v139_v19  ;;  %v869_v23 = vadd.f32 %v868_v7, %v867_v5 }
  0xe8   :  { %v870_v9 = vpop.f32.mrf.mxu1  ;;  %v843_v10 = vpop.f32.mrf.mxu0 }
  0xe9   :  { %v844_v24 = vadd.f32 %v843_v10, %v842_v8  ;;  %v628_v31 = vadd.f32 %v869_v23, %v579_v22 }
  0xea   :  { %v871_v11 = vpop.f32.mrf.mxu1  ;;  %v845_v12 = vpop.f32.mrf.mxu0 }
  0xeb   :  { %v582_v32 = vadd.f32 %v844_v24, %v140_v25  ;;  %v872_v33 = vadd.f32 %v871_v11, %v870_v9 }
  0xec   :  { %v873_v13 = vpop.f32.mrf.mxu1  ;;  %v846_v14 = vpop.f32.mrf.mxu0 }
  0xed   :  { %v847_v28 = vadd.f32 %v846_v14, %v845_v12  ;;  %v631_v42 = vadd.f32 %v872_v33, %v582_v32 }
  0xee   :  { %v874_v15 = vpop.f32.mrf.mxu1  ;;  %v848_v16 = vpop.f32.mrf.mxu0 }
  0xef   :  { %v587_v39 = vadd.f32 %v847_v28, %v141_v34  ;;  %v875_v40 = vadd.f32 %v874_v15, %v873_v13 }
  0xf0   :  { %v876_v17 = vpop.f32.mrf.mxu1  ;;  %v849_v20 = vpop.f32.mrf.mxu0 }
  0xf1   :  { %v850_v43 = vadd.f32 %v849_v20, %v848_v16  ;;  %v636_v51 = vadd.f32 %v875_v40, %v587_v39 }
  0xf2   :  { %v877_v21 = vpop.f32.mrf.mxu1 }
  0xf3   :  { %v590_v53 = vadd.f32 %v850_v43, %v142_v46  ;;  %v878_v54 = vadd.f32 %v877_v21, %v876_v17 }
  0xf5   :  { %v639_v61 = vadd.f32 %v878_v54, %v590_v53 }
  0xfc   :  { %v929_v27 = vpop.f32.mrf.mxu1 }
  0xfe   :  { %v725_v30 = vpop.f32.mrf.mxu1 }
 0x100   :  { %v930_v37 = vpop.f32.mrf.mxu1 }
 0x102   :  { %v895_v26 = vpop.f32.mrf.mxu0  ;;  %v728_v48 = vpop.f32.mrf.mxu1 }
 0x104   :  { %v896_v29 = vpop.f32.mrf.mxu0 }
 0x105   :  { %v897_v35 = vadd.f32 %v896_v29, %v895_v26 }
 0x106   :  { %v898_v36 = vpop.f32.mrf.mxu0 }
 0x107   :  { %v677_v38 = vadd.f32 %v897_v35, %v628_v31 }
 0x108   :  { %v899_v41 = vpop.f32.mrf.mxu0 }
 0x109   :  { %v900_v44 = vadd.f32 %v899_v41, %v898_v36  ;;  %v726_v45 = vadd.f32 %v725_v30, %v677_v38 }
 0x10a   :  { %v901_v47 = vpop.f32.mrf.mxu0 }
 0x10b   :  { %v740_v49 = vmax.f32 %v726_v45, 0.0  ;;  %v680_v50 = vadd.f32 %v900_v44, %v631_v42 }
 0x10c   :  { %v902_v52 = vpop.f32.mrf.mxu0 }
 0x10d   :  { %745 = vst.msk [vmem:[%s1260_s3] sm:$0xff] %vm744_vm1, %v740_v49  ;;  %v903_v55 = vadd.f32 %v902_v52, %v901_v47  ;;  %v729_v56 = vadd.f32 %v728_v48, %v680_v50 }
 0x10e   :  { %v904_v57 = vpop.f32.mrf.mxu0 }
 0x10f   :  { %v685_v58 = vadd.f32 %v903_v55, %v636_v51  ;;  %v741_v59 = vmax.f32 %v729_v56, 0.0 }
 0x110   :  { %v905_v60 = vpop.f32.mrf.mxu0 }
 0x111   :  { %v734_v62 = vadd.f32 %v929_v27, %v685_v58  ;;  %746 = vst.msk [vmem:[%s1260_s3 + $0x8] sm:$0xff] %vm744_vm1, %v741_v59  ;;  %v906_v63 = vadd.f32 %v905_v60, %v904_v57 }
 0x113   :  { %v742_v0 = vmax.f32 %v734_v62, 0.0  ;;  %v688_v1 = vadd.f32 %v906_v63, %v639_v61 }
 0x115   :  { %747 = vst.msk [vmem:[%s1260_s3 + $0x10] sm:$0xff] %vm744_vm1, %v742_v0  ;;  %v737_v2 = vadd.f32 %v930_v37, %v688_v1 }
 0x117   :  { %v743_v3 = vmax.f32 %v737_v2, 0.0 }
 0x119   :  { %748 = vst.msk [vmem:[%s1260_s3 + $0x18] sm:$0xff] %vm744_vm1, %v743_v3 }

// kernel: forward.29
= control target key start
LH: loop header
LB: loop body
LE: loop exit
PB: predicated region body
PF: predicated region fallthrough
CT: control target
= control target key end

     0   :  { %vm538_vm0 = vcmask 785408   ;;  %s1291_s0 = inlined_call_operand.vmem [shape: bf16[32,864], index: 0, kind: input, shape index: {}]   ;;  %s1292_s1 = inlined_call_operand.vmem [shape: bf16[864,32], index: 1, kind: input, shape index: {}]   ;;  %s1293_s2 = inlined_call_operand.vmem [shape: f32[32,32], index: 2, kind: input, shape index: {}]   ;;  %s1294_s3 = inlined_call_operand.hbm [shape: f32[32,32], index: 3, kind: output, shape index: {}]  }
   0x1   :  { %v947_v0 = vld [vmem:[%s1292_s1 + $0x78] sm:$0xff]   ;;  %v951_v4 = vld [vmem:[%s1292_s1 + $0x70] sm:$0xff]   ;;  %v955_v8 = vld [vmem:[%s1292_s1 + $0x68] sm:$0xff]  }
   0x2   :  { %v948_v1 = vld [vmem:[%s1292_s1 + $0x38] sm:$0xff]   ;;  %836 = vmatprep.subr.bf16.mxu0 %v947_v0  ;;  %v952_v5 = vld [vmem:[%s1292_s1 + $0x30] sm:$0xff]   ;;  %v956_v9 = vld [vmem:[%s1292_s1 + $0x28] sm:$0xff]  }
   0x3   :  { %v949_v2 = vld [vmem:[%s1292_s1 + $0xf8] sm:$0xff]   ;;  %837 = vmatpush3.bf16.msra.mxu0 %v948_v1  ;;  %v953_v6 = vld [vmem:[%s1292_s1 + $0xf0] sm:$0xff]   ;;  %v957_v10 = vld [vmem:[%s1292_s1 + $0xe8] sm:$0xff]  }
   0x4   :  { %v950_v3 = vld [vmem:[%s1292_s1 + $0xb8] sm:$0xff]   ;;  %864 = vmatprep.subr.bf16.mxu1 %v949_v2  ;;  %838 = vmatprep.subr.bf16.mxu0 %v951_v4  ;;  %v954_v7 = vld [vmem:[%s1292_s1 + $0xb0] sm:$0xff]   ;;  %v958_v11 = vld [vmem:[%s1292_s1 + $0xa8] sm:$0xff]  }
   0x5   :  { %865 = vmatpush3.bf16.msra.mxu1 %v950_v3  ;;  %v959_v12 = vld [vmem:[%s1292_s1 + $0x60] sm:$0xff]   ;;  %v963_v16 = vld [vmem:[%s1292_s1 + $0x58] sm:$0xff]   ;;  %v967_v20 = vld [vmem:[%s1292_s1 + $0x50] sm:$0xff]  }
   0x6   :  { %866 = vmatprep.subr.bf16.mxu1 %v953_v6  ;;  %v960_v13 = vld [vmem:[%s1292_s1 + $0x20] sm:$0xff]   ;;  %v964_v17 = vld [vmem:[%s1292_s1 + $0x18] sm:$0xff]   ;;  %v968_v21 = vld [vmem:[%s1292_s1 + $0x10] sm:$0xff]  }
   0x7   :  { %839 = vmatpush3.bf16.msra.mxu0 %v952_v5  ;;  %v961_v14 = vld [vmem:[%s1292_s1 + $0xe0] sm:$0xff]   ;;  %v965_v18 = vld [vmem:[%s1292_s1 + $0xd8] sm:$0xff]   ;;  %v969_v22 = vld [vmem:[%s1292_s1 + $0xd0] sm:$0xff]  }
   0x8   :  { %840 = vmatprep.subr.bf16.mxu0 %v955_v8  ;;  %v962_v15 = vld [vmem:[%s1292_s1 + $0xa0] sm:$0xff]   ;;  %v966_v19 = vld [vmem:[%s1292_s1 + $0x98] sm:$0xff]   ;;  %v970_v23 = vld [vmem:[%s1292_s1 + $0x90] sm:$0xff]  }
   0x9   :  { %867 = vmatpush3.bf16.msra.mxu1 %v954_v7  ;;  %v971_v24 = vld [vmem:[%s1292_s1 + $0x48] sm:$0xff]   ;;  %v975_v28 = vld [vmem:[%s1292_s1 + $0x40] sm:$0xff]   ;;  %v982_v34 = vld [vmem:[%s1292_s1 + $0x178] sm:$0xff]  }
   0xa   :  { %868 = vmatprep.subr.bf16.mxu1 %v957_v10  ;;  %v972_v25 = vld [vmem:[%s1292_s1 + $0x8] sm:$0xff]   ;;  %v976_v29 = vld [vmem:[%s1292_s1] sm:$0xff]   ;;  %v986_v37 = vld [vmem:[%s1292_s1 + $0x138] sm:$0xff]  }
   0xb   :  { %841 = vmatpush3.bf16.msra.mxu0 %v956_v9  ;;  %v973_v26 = vld [vmem:[%s1292_s1 + $0xc8] sm:$0xff]   ;;  %v977_v30 = vld [vmem:[%s1292_s1 + $0xc0] sm:$0xff]   ;;  %v987_v38 = vld [vmem:[%s1292_s1 + $0x170] sm:$0xff]  }
   0xc   :  { %842 = vmatprep.subr.bf16.mxu0 %v959_v12  ;;  %v974_v27 = vld [vmem:[%s1292_s1 + $0x88] sm:$0xff]   ;;  %v978_v31 = vld [vmem:[%s1291_s0] ss:$28 sps:$4 sm:$0xff]   ;;  %v988_v39 = vld [vmem:[%s1292_s1 + $0x130] sm:$0xff]  }
   0xd   :  { %869 = vmatpush3.bf16.msra.mxu1 %v958_v11  ;;  %v980_v32 = vld [vmem:[%s1291_s0 + $0x4] ss:$28 sps:$4 sm:$0xff]   ;;  %v985_v36 = vld [vmem:[%s1291_s0 + $0xc] ss:$28 sps:$4 sm:$0xff]   ;;  %v996_v46 = vld [vmem:[%s1291_s0 + $0x3c] ss:$28 sps:$4 sm:$0xff]  }
   0xe   :  { %870 = vmatprep.subr.bf16.mxu1 %v961_v14  ;;  %v981_v33 = vld [vmem:[%s1292_s1 + $0x80] sm:$0xff]   ;;  %577 = vmatprep.mubr.bf16.mxu0 %v980_v32  ;;  %v989_v40 = vld [vmem:[%s1292_s1 + $0x168] sm:$0xff]   ;;  %v994_v47 = vld [vmem:[%s1292_s1 + $0x158] sm:$0xff]  }
   0xf   :  { %843 = vmatpush3.bf16.msra.mxu0 %v960_v13  ;;  %v983_v35 = vld [vmem:[%s1291_s0 + $0x8] ss:$28 sps:$4 sm:$0xff]   ;;  %626 = vmatprep.mubr.bf16.mxu1 %v985_v36  ;;  %v999_v48 = vld [vmem:[%s1291_s0 + $0x38] ss:$28 sps:$4 sm:$0xff]   ;;  %v1002_v51 = vld [vmem:[%s1291_s0 + $0x40] ss:$28 sps:$4 sm:$0xff]  }
  0x10   :  { %844 = vmatprep.subr.bf16.mxu0 %v963_v16  ;;  %v990_v41 = vld [vmem:[%s1292_s1 + $0x128] sm:$0xff]   ;;  %v991_v43 = vld [vmem:[%s1292_s1 + $0x160] sm:$0xff]   ;;  %v998_v49 = vld [vmem:[%s1292_s1 + $0x118] sm:$0xff]  }
  0x11   :  { %871 = vmatpush3.bf16.msra.mxu1 %v962_v15  ;;  %v992_v42 = vld [vmem:[%s1292_s1 + $0x1a8] sm:$0xff]   ;;  %v993_v44 = vld [vmem:[%s1292_s1 + $0x120] sm:$0xff]   ;;  %v1003_v52 = vld [vmem:[%s1292_s1 + $0x150] sm:$0xff]  }
  0x12   :  { %872 = vmatprep.subr.bf16.mxu1 %v965_v18  ;;  %v995_v45 = vld [vmem:[%s1292_s1 + $0x1a0] sm:$0xff]   ;;  %v1004_v53 = vld [vmem:[%s1292_s1 + $0x198] sm:$0xff]   ;;  %v1005_v54 = vld [vmem:[%s1292_s1 + $0x110] sm:$0xff]  }
  0x13   :  { %845 = vmatpush3.bf16.msra.mxu0 %v964_v17  ;;  %v1000_v50 = vld [vmem:[%s1291_s0 + $0x44] ss:$28 sps:$4 sm:$0xff]   ;;  %v1007_v55 = vld [vmem:[%s1292_s1 + $0x190] sm:$0xff]   ;;  %v1006_v56 = vld [vmem:[%s1292_s1 + $0x148] sm:$0xff]  }
  0x14   :  { %846 = vmatprep.subr.bf16.mxu0 %v967_v20  ;;  %v1010_v57 = vld [vmem:[%s1292_s1 + $0x188] sm:$0xff]   ;;  %v1009_v59 = vld [vmem:[%s1292_s1 + $0x140] sm:$0xff]   ;;  %v1014_v60 = vld [vmem:[%s1291_s0 + $0x14] ss:$28 sps:$4 sm:$0xff]  }
  0x15   :  { %873 = vmatpush3.bf16.msra.mxu1 %v966_v19  ;;  %v1008_v58 = vld [vmem:[%s1292_s1 + $0x108] sm:$0xff]   ;;  %v1015_v61 = vld [vmem:[%s1292_s1 + $0x180] sm:$0xff]   ;;  %v1016_v62 = vld [vmem:[%s1291_s0 + $0x18] ss:$28 sps:$4 sm:$0xff]  }
  0x16   :  { %874 = vmatprep.subr.bf16.mxu1 %v969_v22  ;;  %v1011_v63 = vld [vmem:[%s1292_s1 + $0x100] sm:$0xff]  }
  0x17   :  { %847 = vmatpush3.bf16.msra.mxu0 %v968_v21 }
  0x18   :  { %848 = vmatprep.subr.bf16.mxu0 %v971_v24 }
  0x19   :  { %875 = vmatpush3.bf16.msra.mxu1 %v970_v23 }
  0x1a   :  { %876 = vmatprep.subr.bf16.mxu1 %v973_v26 }
  0x1b   :  { %849 = vmatpush3.bf16.msra.mxu0 %v972_v25 }
  0x1c   :  { %850 = vmatprep.subr.bf16.mxu0 %v975_v28 }
  0x1d   :  { %877 = vmatpush3.bf16.msra.mxu1 %v974_v27 }
  0x1e   :  { %878 = vmatprep.subr.bf16.mxu1 %v977_v30 }
  0x1f   :  { %851 = vmatpush3.bf16.msra.mxu0 %v976_v29 }
  0x20   :  { %892 = vmatprep.subr.bf16.mxu0 %v982_v34 }
  0x21   :  { %879 = vmatpush3.bf16.msra.mxu1 %v981_v33 }
  0x22   :  { %578 = vmatmul.mubr.bf16.vlgmr.msra.gmra.mxu0 %v978_v31  ;;  %928 = vmatprep.subr.bf16.mxu1 %v992_v42 }
  0x23   :  { %893 = vmatpush3.bf16.msra.mxu0 %v986_v37  ;;  %585 = vmatprep.mubr.bf16.mxu0 %v996_v46 }
  0x24   :  { %627 = vmatmul.mubr.bf16.vlgmr.msra.gmra.mxu1 %v983_v35  ;;  %894 = vmatprep.subr.bf16.mxu0 %v987_v38 }
  0x25   :  { %929 = vmatpush3.bf16.msra.mxu1 %v992_v42  ;;  %634 = vmatprep.mubr.bf16.mxu1 %v1000_v50 }
  0x26   :  { %930 = vmatprep.subr.bf16.mxu1 %v995_v45 }
  0x27   :  { %895 = vmatpush3.bf16.msra.mxu0 %v988_v39 }
  0x28   :  { %896 = vmatprep.subr.bf16.mxu0 %v989_v40 }
  0x29   :  { %931 = vmatpush3.bf16.msra.mxu1 %v995_v45 }
  0x2a   :  { %586 = vmatmul.mubr.bf16.gmra.mxu0 %v999_v48  ;;  %932 = vmatprep.subr.bf16.mxu1 %v1004_v53 }
  0x2b   :  { %897 = vmatpush3.bf16.msra.mxu0 %v990_v41  ;;  %675 = vmatprep.mubr.bf16.mxu0 %v1014_v60 }
  0x2c   :  { %898 = vmatprep.subr.bf16.mxu0 %v991_v43  ;;  %635 = vmatmul.mubr.bf16.gmra.mxu1 %v1002_v51 }
  0x2d   :  { %933 = vmatpush3.bf16.msra.mxu1 %v1004_v53  ;;  %940 = vmatprep.mubr.msk.bf16.mxu1 %vm538_vm0, %v1016_v62 }
  0x2e   :  { %934 = vmatprep.subr.bf16.mxu1 %v1007_v55 }
  0x2f   :  { %899 = vmatpush3.bf16.msra.mxu0 %v993_v44 }
  0x30   :  { %900 = vmatprep.subr.bf16.mxu0 %v994_v47 }
  0x31   :  { %935 = vmatpush3.bf16.msra.mxu1 %v1007_v55 }
  0x32   :  { %936 = vmatprep.subr.bf16.mxu1 %v1010_v57 }
  0x33   :  { %901 = vmatpush3.bf16.msra.mxu0 %v998_v49 }
  0x34   :  { %902 = vmatprep.subr.bf16.mxu0 %v1003_v52 }
  0x35   :  { %937 = vmatpush3.bf16.msra.mxu1 %v1010_v57 }
  0x36   :  { %938 = vmatprep.subr.bf16.mxu1 %v1015_v61 }
  0x37   :  { %903 = vmatpush3.bf16.msra.mxu0 %v1005_v54 }
  0x38   :  { %904 = vmatprep.subr.bf16.mxu0 %v1006_v56 }
  0x3b   :  { %905 = vmatpush3.bf16.msra.mxu0 %v1008_v58 }
  0x3c   :  { %906 = vmatprep.subr.bf16.mxu0 %v1009_v59 }
  0x3d   :  { %8 = vsyncpa [#allocation3], 0  ;;  %v1012_v0 = vld [vmem:[%s1291_s0 + $0x10] ss:$28 sps:$4 sm:$0xff]   ;;  %939 = vmatpush3.bf16.msra.mxu1 %v1015_v61  ;;  %v1020_v3 = vld [vmem:[%s1291_s0 + $0x48] ss:$28 sps:$4 sm:$0xff]  }
  0x3e   :  { %v1017_v1 = vld [vmem:[%s1291_s0 + $0x50] ss:$28 sps:$4 sm:$0xff]   ;;  %v140_v19 = vld [vmem:[%s1293_s2] sm:$0xff]  ;;  %v143_v46 = vld [vmem:[%s1293_s2 + $0x18] sm:$0xff]  ;;  %vm745_vm1 = vcmask 261120  }
  0x3f   :  { %907 = vmatpush3.bf16.msra.mxu0 %v1011_v63  ;;  %v1018_v2 = vld [vmem:[%s1291_s0 + $0x4c] ss:$28 sps:$4 sm:$0xff]   ;;  %v142_v34 = vld [vmem:[%s1293_s2 + $0x10] sm:$0xff] }
  0x40   :  { %941 = vmatmul.mubr.msk.bf16.vlgmr.msra.gmra.mxu1 %vm538_vm0, %v1017_v1  ;;  %v141_v25 = vld [vmem:[%s1293_s2 + $0x8] sm:$0xff]  ;;  %s1043_s2 = smov [#allocation2]  }
  0x41   :  { %s755_s19 = sshll.u32 %s1043_s2, 4  ;;  %s756_s19 = int_to_ptr.vmem [resolvable:$true] %s755_s19 }
  0x42   :  { %676 = vmatmul.mubr.bf16.vlgmr.msra.gmra.mxu0 %v1012_v0  ;;  %s1021_s20 = scalar_lea.vmem %s756_s19, 512  ;;  %p1026_p1 = scmp.lt.s32.totalorder %s756_s19, %s756_s19 }
  0x43   :  { %683 = vmatprep.mubr.bf16.mxu0 %v1018_v2  ;;  %p1022_p0 = scmp.ne.s32.totalorder %s756_s19, %s1021_s20  ;;  %p1027_p2 = scmp.lt.s32.totalorder %s1021_s20, %s1021_s20 }
  0x45   :  { %p1028_p3 = por %p1027_p2, %p1026_p1 }
  0x47   :  { %p1029_p4 = pnand %p1028_p3, %p1022_p0 }
  0x4a   :  { %684 = vmatmul.mubr.bf16.gmra.mxu0 %v1020_v3 }
  0xe2   :  { %v852_v4 = vpop.f32.mrf.mxu0 }
  0xe4   :  { %v880_v5 = vpop.f32.mrf.mxu1  ;;  %v853_v6 = vpop.f32.mrf.mxu0 }
  0xe5   :  { %v854_v18 = vadd.f32 %v853_v6, %v852_v4 }
  0xe6   :  { %v881_v7 = vpop.f32.mrf.mxu1  ;;  %v855_v8 = vpop.f32.mrf.mxu0 }
  0xe7   :  { %v580_v22 = vadd.f32 %v854_v18, %v140_v19  ;;  %v882_v23 = vadd.f32 %v881_v7, %v880_v5 }
  0xe8   :  { %v883_v9 = vpop.f32.mrf.mxu1  ;;  %v856_v10 = vpop.f32.mrf.mxu0 }
  0xe9   :  { %v857_v24 = vadd.f32 %v856_v10, %v855_v8  ;;  %v629_v31 = vadd.f32 %v882_v23, %v580_v22 }
  0xea   :  { %v884_v11 = vpop.f32.mrf.mxu1  ;;  %v858_v12 = vpop.f32.mrf.mxu0 }
  0xeb   :  { %v583_v32 = vadd.f32 %v857_v24, %v141_v25  ;;  %v885_v33 = vadd.f32 %v884_v11, %v883_v9 }
  0xec   :  { %v886_v13 = vpop.f32.mrf.mxu1  ;;  %v859_v14 = vpop.f32.mrf.mxu0 }
  0xed   :  { %v860_v28 = vadd.f32 %v859_v14, %v858_v12  ;;  %v632_v42 = vadd.f32 %v885_v33, %v583_v32 }
  0xee   :  { %v887_v15 = vpop.f32.mrf.mxu1  ;;  %v861_v16 = vpop.f32.mrf.mxu0 }
  0xef   :  { %v588_v39 = vadd.f32 %v860_v28, %v142_v34  ;;  %v888_v40 = vadd.f32 %v887_v15, %v886_v13 }
  0xf0   :  { %v889_v17 = vpop.f32.mrf.mxu1  ;;  %v862_v20 = vpop.f32.mrf.mxu0 }
  0xf1   :  { %v863_v43 = vadd.f32 %v862_v20, %v861_v16  ;;  %v637_v51 = vadd.f32 %v888_v40, %v588_v39 }
  0xf2   :  { %v890_v21 = vpop.f32.mrf.mxu1 }
  0xf3   :  { %v591_v53 = vadd.f32 %v863_v43, %v143_v46  ;;  %v891_v54 = vadd.f32 %v890_v21, %v889_v17 }
  0xf5   :  { %v640_v61 = vadd.f32 %v891_v54, %v591_v53 }
 0x100   :  { %v942_v27 = vpop.f32.mrf.mxu1 }
 0x102   :  { %v908_v26 = vpop.f32.mrf.mxu0  ;;  %v726_v30 = vpop.f32.mrf.mxu1 }
 0x104   :  { %v909_v29 = vpop.f32.mrf.mxu0  ;;  %v943_v37 = vpop.f32.mrf.mxu1 }
 0x105   :  { %v910_v35 = vadd.f32 %v909_v29, %v908_v26 }
 0x106   :  { %v911_v36 = vpop.f32.mrf.mxu0  ;;  %v729_v48 = vpop.f32.mrf.mxu1 }
 0x107   :  { %v678_v38 = vadd.f32 %v910_v35, %v629_v31 }
 0x108   :  { %v912_v41 = vpop.f32.mrf.mxu0 }
 0x109   :  { %v913_v44 = vadd.f32 %v912_v41, %v911_v36  ;;  %v727_v45 = vadd.f32 %v726_v30, %v678_v38 }
 0x10a   :  { %v914_v47 = vpop.f32.mrf.mxu0 }
 0x10b   :  { %v741_v49 = vmax.f32 %v727_v45, 0.0  ;;  %v681_v50 = vadd.f32 %v913_v44, %v632_v42 }
 0x10c   :  { %v915_v52 = vpop.f32.mrf.mxu0 }
 0x10d   :  { %746 = vst.msk [vmem:[#allocation2] sm:$0xff] %vm745_vm1, %v741_v49  ;;  %v916_v55 = vadd.f32 %v915_v52, %v914_v47  ;;  %v730_v56 = vadd.f32 %v729_v48, %v681_v50 }
 0x10e   :  { %v917_v57 = vpop.f32.mrf.mxu0 }
 0x10f   :  { %v686_v58 = vadd.f32 %v916_v55, %v637_v51  ;;  %v742_v59 = vmax.f32 %v730_v56, 0.0 }
 0x110   :  { %v918_v60 = vpop.f32.mrf.mxu0 }
 0x111   :  { %v735_v62 = vadd.f32 %v942_v27, %v686_v58  ;;  %747 = vst.msk [vmem:[#allocation2 + $0x8] sm:$0xff] %vm745_vm1, %v742_v59  ;;  %v919_v63 = vadd.f32 %v918_v60, %v917_v57 }
 0x113   :  { %v743_v0 = vmax.f32 %v735_v62, 0.0  ;;  %v689_v1 = vadd.f32 %v919_v63, %v640_v61 }
 0x115   :  { %748 = vst.msk [vmem:[#allocation2 + $0x10] sm:$0xff] %vm745_vm1, %v743_v0  ;;  %v738_v2 = vadd.f32 %v943_v37, %v689_v1 }
 0x117   :  { %v744_v3 = vmax.f32 %v738_v2, 0.0 }
 0x119   :  { %749 = vst.msk [vmem:[#allocation2 + $0x18] sm:$0xff] %vm745_vm1, %v744_v3 }
 0x11a   :  { %1032 = shalt.err (!%p1029_p4)
}
 0x11b   :  { %s1044_s21 = smov 128   ;;  %s1045_s22 = smov 8  }
 0x11c   :  { %761 = dma.vmem_to_hbm [thread:$0]  %s756_s19, 512, %s1294_s3, [#allocation3], %s1044_s21, %s1044_s21, %s1045_s22  }
 0x11d   :  { %1041 = dma.done.wait [#allocation3], 512  }
 0x11e   :  { %1042 = vsyncadd [#allocation3], 4294966784 }
 0x11f   :  { %765 = vsyncpa [#allocation3], 1 }

</bundles_post_ra>
